<compile_context>
chip_gen: v6e
topology: v6e:2x2x1
jax: 0.10.0
libtpu: 0.0.40
codegen_flags: <defaults>
</compile_context>

<pallas_src>
import functools

import numpy as np

import jax
import jax.numpy as jnp
from jax.experimental import pallas as pl
from jax.experimental.pallas import tpu as pltpu


# ----------------------------------------------------------------------------
# Static architecture config (scaled-down AlexNet).  Stride / pad live HERE as
# static Python ints, NOT inside the params pytree.
# ----------------------------------------------------------------------------

# (KH, KW, Cin, Cout, stride, pad)
_CONV_CFG = [
    (3, 3, 3, 16, 2, 1),
    (5, 5, 16, 24, 1, 2),
    (3, 3, 24, 32, 1, 1),
    (3, 3, 32, 32, 1, 1),
    (3, 3, 32, 32, 1, 1),
]
# features = Conv, MaxPool, Conv, MaxPool, Conv, Conv, Conv, MaxPool  (ReLU fused per conv)
_FEATURE_PLAN = ("conv", "pool", "conv", "pool", "conv", "conv", "conv", "pool")
_POOL_K, _POOL_S = 3, 2

# TODO(synk): the original forward hard-codes feats.view(-1, 4096); here the flatten
# width matches the scaled-down features output for a 64x64 input: 32*3*3 = 288.
_FLATTEN_DIM = 32 * 3 * 3
_HIDDEN = 128
_NUM_CLASSES = 10
_LINEAR_CFG = [(_FLATTEN_DIM, _HIDDEN), (_HIDDEN, _HIDDEN), (_HIDDEN, _NUM_CLASSES)]


# ----------------------------------------------------------------------------
# Numpy constant builders (0/1 selection / lowering matrices, built at trace time)
# ----------------------------------------------------------------------------

def _conv_row_sel(n, h_in, oh, kh, stride, pad):
    """R[i, n*OH+oh, n*H+y] = 1  iff  y == stride*oh + i - pad  and  0 <= y < H.
    Out-of-range rows stay all-zero, which is exactly zero padding for a sum."""
    r = np.zeros((kh, n * oh, n * h_in), np.float32)
    for i in range(kh):
        for nn in range(n):
            for o in range(oh):
                y = stride * o + i - pad
                if 0 <= y < h_in:
                    r[i, nn * oh + o, nn * h_in + y] = 1.0
    return r


def _conv_col_band(w_in, ow, kw, stride, pad):
    """Band structure of the block-Toeplitz lowered weight: for input col w and output
    col ow, tap index j = w - stride*ow + pad (valid iff 0 <= j < KW)."""
    w_idx = np.arange(w_in)[:, None]
    ow_idx = np.arange(ow)[None, :]
    j = w_idx - stride * ow_idx + pad
    valid = ((j >= 0) & (j < kw)).astype(np.float32)
    return np.clip(j, 0, kw - 1).astype(np.int32), valid


def _pool_consts(n, h_in, w_in, c):
    """T[j] (lane selection) and S[i] (row selection) so that
    pool(Y) = max_i S_i @ (max_j Y @ T_j) for MaxPool2d(3, stride=2), floor mode."""
    ohp = (h_in - _POOL_K) // _POOL_S + 1
    owp = (w_in - _POOL_K) // _POOL_S + 1
    t = np.zeros((_POOL_K, w_in * c, owp * c), np.float32)
    s = np.zeros((_POOL_K, n * ohp, n * h_in), np.float32)
    for j in range(_POOL_K):
        for pw in range(owp):
            src_w = _POOL_S * pw + j
            if src_w < w_in:
                for cc in range(c):
                    t[j, src_w * c + cc, pw * c + cc] = 1.0
    for i in range(_POOL_K):
        for nn in range(n):
            for ph in range(ohp):
                src_h = _POOL_S * ph + i
                if src_h < h_in:
                    s[i, nn * ohp + ph, nn * h_in + src_h] = 1.0
    return t, s, ohp, owp


def _flatten_consts(n, h_f, w_f, c):
    """F = sum_h (Sel_h @ P) @ G_h maps the (N*Hf, Wf*C) slab to the PyTorch NCHW
    channel-major flatten order feats[n, c*Hf*Wf + h*Wf + w]."""
    sel = np.zeros((h_f, n, n * h_f), np.float32)
    g = np.zeros((h_f, w_f * c, c * h_f * w_f), np.float32)
    for hh in range(h_f):
        for nn in range(n):
            sel[hh, nn, nn * h_f + hh] = 1.0
        for ww in range(w_f):
            for cc in range(c):
                g[hh, ww * c + cc, cc * h_f * w_f + hh * w_f + ww] = 1.0
    return sel, g


def _lower_conv_weight(w_hwio, j_idx, valid):
    """(KH, KW, Cin, Cout) -> block-Toeplitz (KH, Win*Cin, OW*Cout), param-side glue only."""
    kh, kw, cin, cout = w_hwio.shape
    w_in, ow = j_idx.shape
    wc = w_hwio[:, j_idx, :, :]                               # (KH, Win, OW, Cin, Cout)
    wc = wc * valid[None, :, :, None, None]
    return jnp.transpose(wc, (0, 1, 3, 2, 4)).reshape(kh, w_in * cin, ow * cout)


def _slab_to_nchw(slab, n, h, w, c):
    return jnp.transpose(slab.reshape(n, h, w, c), (0, 3, 1, 2))


# ----------------------------------------------------------------------------
# Pallas kernels
# ----------------------------------------------------------------------------

def _features_kernel(*refs, num_inputs, capture):
    """Entire feature extractor (+ flatten) in one kernel.  Only 2-D matmuls, adds and
    maxes on lane-dense (N*H, W*C) slabs; everything stays in VMEM/vregs."""
    in_refs = refs[:num_inputs]
    out_refs = refs[num_inputs:]
    it = iter(in_refs)

    x = next(it)[...]                                   # input image slab (N*H, W*Cin)
    captured = []

    for op in _FEATURE_PLAN:
        if op == "conv":
            w_ref, r_ref, b_ref = next(it), next(it), next(it)
            acc = None
            for i in range(w_ref.shape[0]):              # KH taps, statically unrolled
                xi = jnp.dot(r_ref[i], x, preferred_element_type=jnp.float32)
                zi = jnp.dot(xi, w_ref[i], preferred_element_type=jnp.float32)
                acc = zi if acc is None else acc + zi
            y = acc + b_ref[...]                          # bias (1, OW*Cout) broadcast
            captured.append(y)                            # pre-ReLU conv output
            x = jnp.maximum(y, 0.0)                       # fused ReLU
        else:  # "pool"
            t_ref, s_ref = next(it), next(it)
            u = None
            for j in range(t_ref.shape[0]):               # width taps
                uj = jnp.dot(x, t_ref[j], preferred_element_type=jnp.float32)
                u = uj if u is None else jnp.maximum(u, uj)
            v = None
            for i in range(s_ref.shape[0]):               # height taps
                vi = jnp.dot(s_ref[i], u, preferred_element_type=jnp.float32)
                v = vi if v is None else jnp.maximum(v, vi)
            x = v
            captured.append(v)

    sel_ref, g_ref = next(it), next(it)                    # PyTorch NCHW flatten
    f = None
    for hh in range(sel_ref.shape[0]):
        fh = jnp.dot(jnp.dot(sel_ref[hh], x, preferred_element_type=jnp.float32),
                     g_ref[hh], preferred_element_type=jnp.float32)
        f = fh if f is None else f + fh
    out_refs[0][...] = f

    if capture:
        for ref, val in zip(out_refs[1:], captured):
            ref[...] = val


def _classifier_kernel(x_ref, w1_ref, b1_ref, w2_ref, b2_ref, w3_ref, b3_ref,
                       *out_refs, capture):
    # Whole classifier in one kernel; weights (~200 KB f32) stay VMEM resident.
    h1 = jnp.dot(x_ref[...], w1_ref[...], preferred_element_type=jnp.float32) + b1_ref[...]
    a1 = jnp.maximum(h1, 0.0)
    h2 = jnp.dot(a1, w2_ref[...], preferred_element_type=jnp.float32) + b2_ref[...]
    a2 = jnp.maximum(h2, 0.0)
    h3 = jnp.dot(a2, w3_ref[...], preferred_element_type=jnp.float32) + b3_ref[...]
    out_refs[0][...] = h3
    if capture:
        out_refs[1][...] = h1                              # pre-ReLU Linear outputs
        out_refs[2][...] = h2


# ----------------------------------------------------------------------------
# Wrappers
# ----------------------------------------------------------------------------

def _run_features(params, x_nchw, capture):
    n, cin, h, w = x_nchw.shape
    # NCHW -> lane-dense (N*H, W*Cin) slab (only plain-JAX glue on the raw input).
    x2d = jnp.transpose(x_nchw, (0, 2, 3, 1)).reshape(n * h, w * cin)

    args = [x2d]
    cap_shapes = []                     # (n, h, w, c) of every captured slab, plan order
    cur_h, cur_w, cur_c = h, w, cin
    conv_idx = 0
    for op in _FEATURE_PLAN:
        if op == "conv":
            kh, kw, ci, co, s, p = _CONV_CFG[conv_idx]
            oh = (cur_h + 2 * p - kh) // s + 1
            ow = (cur_w + 2 * p - kw) // s + 1
            j_idx, valid = _conv_col_band(cur_w, ow, kw, s, p)
            wcat = _lower_conv_weight(params["convs"][conv_idx]["w"], j_idx, valid)
            r_sel = jnp.asarray(_conv_row_sel(n, cur_h, oh, kh, s, p))
            brow = jnp.tile(params["convs"][conv_idx]["b"], ow)[None, :]
            args += [wcat, r_sel, brow]
            cur_h, cur_w, cur_c = oh, ow, co
            conv_idx += 1
        else:
            t, s_sel, ohp, owp = _pool_consts(n, cur_h, cur_w, cur_c)
            args += [jnp.asarray(t), jnp.asarray(s_sel)]
            cur_h, cur_w = ohp, owp
        cap_shapes.append((n, cur_h, cur_w, cur_c))

    sel, g = _flatten_consts(n, cur_h, cur_w, cur_c)
    args += [jnp.asarray(sel), jnp.asarray(g)]

    feat_dim = cur_c * cur_h * cur_w
    out_shapes = [jax.ShapeDtypeStruct((n, feat_dim), jnp.float32)]
    if capture:
        out_shapes += [jax.ShapeDtypeStruct((nn * hh, ww * cc), jnp.float32)
                       for (nn, hh, ww, cc) in cap_shapes]

    outs = pl.pallas_call(
        functools.partial(_features_kernel, num_inputs=len(args), capture=capture),
        out_shape=tuple(out_shapes),
        compiler_params=pltpu.CompilerParams(vmem_limit_bytes=40 * 1024 * 1024),
    )(*args)

    feats = outs[0]
    if not capture:
        return feats, None
    nchw = [_slab_to_nchw(slab, *meta) for slab, meta in zip(outs[1:], cap_shapes)]
    y1, p1, y2, p2, y3, y4, y5, _p3 = nchw                 # plan order
    conv_pre = [x_nchw, p1, p2, jnp.maximum(y3, 0.0), jnp.maximum(y4, 0.0)]
    conv_post = [y1, y2, y3, y4, y5]
    return feats, (conv_pre, conv_post)


def _run_classifier(params, feats, capture):
    lin = params["linears"]
    n = feats.shape[0]
    args = [feats]
    for layer in lin:
        args += [layer["w"], layer["b"][None, :]]
    out_shapes = [jax.ShapeDtypeStruct((n, lin[2]["w"].shape[1]), jnp.float32)]
    if capture:
        out_shapes += [jax.ShapeDtypeStruct((n, lin[0]["w"].shape[1]), jnp.float32),
                       jax.ShapeDtypeStruct((n, lin[1]["w"].shape[1]), jnp.float32)]
    return pl.pallas_call(
        functools.partial(_classifier_kernel, capture=capture),
        out_shape=tuple(out_shapes),
    )(*args)


# ----------------------------------------------------------------------------
# Params + forward (mirrors alexNetGetter.forward)
# ----------------------------------------------------------------------------

def init_params(key):
    params = {"convs": [], "linears": []}
    keys = jax.random.split(key, len(_CONV_CFG) + len(_LINEAR_CFG))
    ki = 0
    for (kh, kw, cin, cout, _s, _p) in _CONV_CFG:
        fan_in = kh * kw * cin
        w = jax.random.normal(keys[ki], (kh, kw, cin, cout), jnp.float32) * (2.0 / fan_in) ** 0.5
        params["convs"].append({"w": w, "b": jnp.zeros((cout,), jnp.float32)})
        ki += 1
    for (fin, fout) in _LINEAR_CFG:
        # alexNetGetter.init_weights: classifier Linear -> normal(0, 0.01), bias = 0
        w = jax.random.normal(keys[ki], (fin, fout), jnp.float32) * 0.01
        params["linears"].append({"w": w, "b": jnp.zeros((fout,), jnp.float32)})
        ki += 1
    return params


def alexnet_getter_forward(params, x_nchw, alpha, ganin=False,
                           keep_feature=False, keep_classifier=False):
    """Returns (class_pred, domain_pred, activations_classifier, activations_features)."""
    activations_features = {}
    activations_classifier = {}
    domain_pred = None

    feats, caps = _run_features(params, x_nchw, capture=keep_feature)
    if keep_feature:
        conv_pre, conv_post = caps
        for pre, post in zip(conv_pre, conv_post):
            # NOTE: original code never increments `count`, so every conv overwrites the
            # same key; replicated faithfully (stored in NCHW like PyTorch).
            activations_features["Conv2d_1"] = [pre, post]

    if ganin:
        # TODO(synk): DANN branch (ReverseLayerF + domain_classifier) only exists when
        # ganin_da=True at construction; not instantiated here (default ganin_da=False).
        # `alpha` is only consumed by that branch.
        pass

    # classifier: Dropout, Linear, ReLU, Dropout, Linear, ReLU, Linear
    # TODO(synk): nn.Dropout in training mode has RNG-dependent masking; modelled as
    # eval-mode identity here (so dropout layers are no-ops).
    cls_out = _run_classifier(params, feats, capture=keep_classifier)
    class_pred = cls_out[0]
    if keep_classifier:
        h1, h2 = cls_out[1], cls_out[2]
        pairs = [(feats, h1), (jnp.maximum(h1, 0.0), h2), (jnp.maximum(h2, 0.0), class_pred)]
        for pre, post in pairs:
            # Same `count` quirk as the original: every Linear overwrites 'Linear_1'.
            activations_classifier["Linear_1"] = [pre, post]

    return class_pred, domain_pred, activations_classifier, activations_features


if __name__ == "__main__":
    key = jax.random.PRNGKey(0)
    pkey, xkey = jax.random.split(key)
    params = init_params(pkey)

    x = jax.random.normal(xkey, (2, 3, 64, 64), jnp.float32)  # NCHW like PyTorch
    alpha = jnp.float32(0.5)

    fwd = jax.jit(alexnet_getter_forward,
                  static_argnames=("ganin", "keep_feature", "keep_classifier"))
    class_pred, domain_pred, act_c, act_f = fwd(params, x, alpha)
    jax.block_until_ready(class_pred)

    assert class_pred.shape == (2, _NUM_CLASSES)
    assert domain_pred is None and act_c == {} and act_f == {}
    print("KERNEL_OK")
</pallas_src>

<mosaic_0001>
module attributes {stable_mosaic.version = 11 : i64} {
  func.func @_features_kernel(%arg0: memref<128x192xf32, #tpu.memory_space<vmem>>, %arg1: memref<3x192x512xf32, #tpu.memory_space<vmem>>, %arg2: memref<3x64x128xf32, #tpu.memory_space<vmem>>, %arg3: memref<1x512xf32, #tpu.memory_space<vmem>>, %arg4: memref<3x512x240xf32, #tpu.memory_space<vmem>>, %arg5: memref<3x30x64xf32, #tpu.memory_space<vmem>>, %arg6: memref<5x240x360xf32, #tpu.memory_space<vmem>>, %arg7: memref<5x30x30xf32, #tpu.memory_space<vmem>>, %arg8: memref<1x360xf32, #tpu.memory_space<vmem>>, %arg9: memref<3x360x168xf32, #tpu.memory_space<vmem>>, %arg10: memref<3x14x30xf32, #tpu.memory_space<vmem>>, %arg11: memref<3x168x224xf32, #tpu.memory_space<vmem>>, %arg12: memref<3x14x14xf32, #tpu.memory_space<vmem>>, %arg13: memref<1x224xf32, #tpu.memory_space<vmem>>, %arg14: memref<3x224x224xf32, #tpu.memory_space<vmem>>, %arg15: memref<3x14x14xf32, #tpu.memory_space<vmem>>, %arg16: memref<1x224xf32, #tpu.memory_space<vmem>>, %arg17: memref<3x224x224xf32, #tpu.memory_space<vmem>>, %arg18: memref<3x14x14xf32, #tpu.memory_space<vmem>>, %arg19: memref<1x224xf32, #tpu.memory_space<vmem>>, %arg20: memref<3x224x96xf32, #tpu.memory_space<vmem>>, %arg21: memref<3x6x14xf32, #tpu.memory_space<vmem>>, %arg22: memref<3x2x6xf32, #tpu.memory_space<vmem>>, %arg23: memref<3x96x288xf32, #tpu.memory_space<vmem>>, %arg24: memref<2x288xf32, #tpu.memory_space<vmem>>) attributes {dimension_semantics = [], scalar_prefetch = 0 : i64, scratch_operands = 0 : i64, tpu.core_type = #tpu.core_type<tc>} {
    %c0 = arith.constant 0 : index
    %c0_0 = arith.constant 0 : index
    %0 = vector.load %arg0[%c0, %c0_0] : memref<128x192xf32, #tpu.memory_space<vmem>>, vector<128x192xf32>
    %c0_1 = arith.constant 0 : index
    %c0_2 = arith.constant 0 : index
    %c0_3 = arith.constant 0 : index
    %1 = vector.load %arg2[%c0_1, %c0_2, %c0_3] : memref<3x64x128xf32, #tpu.memory_space<vmem>>, vector<1x64x128xf32>
    %2 = vector.shape_cast %1 : vector<1x64x128xf32> to vector<64x128xf32>
    %cst = arith.constant dense<0.000000e+00> : vector<64x192xf32>
    %3 = tpu.matmul %2, %0, %cst {dimension_numbers = #tpu.dot_dimension_numbers<[1], [0], [0], [1], [0, 0, 1, 1], [], []>} : vector<64x128xf32>, vector<128x192xf32>, vector<64x192xf32> -> vector<64x192xf32>
    %c0_4 = arith.constant 0 : index
    %c0_5 = arith.constant 0 : index
    %c0_6 = arith.constant 0 : index
    %4 = vector.load %arg1[%c0_4, %c0_5, %c0_6] : memref<3x192x512xf32, #tpu.memory_space<vmem>>, vector<1x192x512xf32>
    %5 = vector.shape_cast %4 : vector<1x192x512xf32> to vector<192x512xf32>
    %cst_7 = arith.constant dense<0.000000e+00> : vector<64x512xf32>
    %6 = tpu.matmul %3, %5, %cst_7 {dimension_numbers = #tpu.dot_dimension_numbers<[1], [0], [0], [1], [0, 0, 1, 1], [], []>} : vector<64x192xf32>, vector<192x512xf32>, vector<64x512xf32> -> vector<64x512xf32>
    %c1 = arith.constant 1 : index
    %c0_8 = arith.constant 0 : index
    %c0_9 = arith.constant 0 : index
    %7 = vector.load %arg2[%c1, %c0_8, %c0_9] : memref<3x64x128xf32, #tpu.memory_space<vmem>>, vector<1x64x128xf32>
    %8 = vector.shape_cast %7 : vector<1x64x128xf32> to vector<64x128xf32>
    %cst_10 = arith.constant dense<0.000000e+00> : vector<64x192xf32>
    %9 = tpu.matmul %8, %0, %cst_10 {dimension_numbers = #tpu.dot_dimension_numbers<[1], [0], [0], [1], [0, 0, 1, 1], [], []>} : vector<64x128xf32>, vector<128x192xf32>, vector<64x192xf32> -> vector<64x192xf32>
    %c1_11 = arith.constant 1 : index
    %c0_12 = arith.constant 0 : index
    %c0_13 = arith.constant 0 : index
    %10 = vector.load %arg1[%c1_11, %c0_12, %c0_13] : memref<3x192x512xf32, #tpu.memory_space<vmem>>, vector<1x192x512xf32>
    %11 = vector.shape_cast %10 : vector<1x192x512xf32> to vector<192x512xf32>
    %cst_14 = arith.constant dense<0.000000e+00> : vector<64x512xf32>
    %12 = tpu.matmul %9, %11, %cst_14 {dimension_numbers = #tpu.dot_dimension_numbers<[1], [0], [0], [1], [0, 0, 1, 1], [], []>} : vector<64x192xf32>, vector<192x512xf32>, vector<64x512xf32> -> vector<64x512xf32>
    %13 = arith.addf %6, %12 : vector<64x512xf32>
    %c2 = arith.constant 2 : index
    %c0_15 = arith.constant 0 : index
    %c0_16 = arith.constant 0 : index
    %14 = vector.load %arg2[%c2, %c0_15, %c0_16] : memref<3x64x128xf32, #tpu.memory_space<vmem>>, vector<1x64x128xf32>
    %15 = vector.shape_cast %14 : vector<1x64x128xf32> to vector<64x128xf32>
    %cst_17 = arith.constant dense<0.000000e+00> : vector<64x192xf32>
    %16 = tpu.matmul %15, %0, %cst_17 {dimension_numbers = #tpu.dot_dimension_numbers<[1], [0], [0], [1], [0, 0, 1, 1], [], []>} : vector<64x128xf32>, vector<128x192xf32>, vector<64x192xf32> -> vector<64x192xf32>
    %c2_18 = arith.constant 2 : index
    %c0_19 = arith.constant 0 : index
    %c0_20 = arith.constant 0 : index
    %17 = vector.load %arg1[%c2_18, %c0_19, %c0_20] : memref<3x192x512xf32, #tpu.memory_space<vmem>>, vector<1x192x512xf32>
    %18 = vector.shape_cast %17 : vector<1x192x512xf32> to vector<192x512xf32>
    %cst_21 = arith.constant dense<0.000000e+00> : vector<64x512xf32>
    %19 = tpu.matmul %16, %18, %cst_21 {dimension_numbers = #tpu.dot_dimension_numbers<[1], [0], [0], [1], [0, 0, 1, 1], [], []>} : vector<64x192xf32>, vector<192x512xf32>, vector<64x512xf32> -> vector<64x512xf32>
    %20 = arith.addf %13, %19 : vector<64x512xf32>
    %c0_22 = arith.constant 0 : index
    %c0_23 = arith.constant 0 : index
    %21 = vector.load %arg3[%c0_22, %c0_23] : memref<1x512xf32, #tpu.memory_space<vmem>>, vector<1x512xf32>
    %22 = vector.broadcast %21 : vector<1x512xf32> to vector<64x512xf32>
    %23 = arith.addf %20, %22 : vector<64x512xf32>
    %cst_24 = arith.constant 0.000000e+00 : f32
    %24 = vector.broadcast %cst_24 : f32 to vector<64x512xf32>
    %25 = arith.maximumf %23, %24 : vector<64x512xf32>
    %c0_25 = arith.constant 0 : index
    %c0_26 = arith.constant 0 : index
    %c0_27 = arith.constant 0 : index
    %26 = vector.load %arg4[%c0_25, %c0_26, %c0_27] : memref<3x512x240xf32, #tpu.memory_space<vmem>>, vector<1x512x240xf32>
    %27 = vector.shape_cast %26 : vector<1x512x240xf32> to vector<512x240xf32>
    %cst_28 = arith.constant dense<0.000000e+00> : vector<64x240xf32>
    %28 = tpu.matmul %25, %27, %cst_28 {dimension_numbers = #tpu.dot_dimension_numbers<[1], [0], [0], [1], [0, 0, 1, 1], [], []>} : vector<64x512xf32>, vector<512x240xf32>, vector<64x240xf32> -> vector<64x240xf32>
    %c1_29 = arith.constant 1 : index
    %c0_30 = arith.constant 0 : index
    %c0_31 = arith.constant 0 : index
    %29 = vector.load %arg4[%c1_29, %c0_30, %c0_31] : memref<3x512x240xf32, #tpu.memory_space<vmem>>, vector<1x512x240xf32>
    %30 = vector.shape_cast %29 : vector<1x512x240xf32> to vector<512x240xf32>
    %cst_32 = arith.constant dense<0.000000e+00> : vector<64x240xf32>
    %31 = tpu.matmul %25, %30, %cst_32 {dimension_numbers = #tpu.dot_dimension_numbers<[1], [0], [0], [1], [0, 0, 1, 1], [], []>} : vector<64x512xf32>, vector<512x240xf32>, vector<64x240xf32> -> vector<64x240xf32>
    %32 = arith.maximumf %28, %31 : vector<64x240xf32>
    %c2_33 = arith.constant 2 : index
    %c0_34 = arith.constant 0 : index
    %c0_35 = arith.constant 0 : index
    %33 = vector.load %arg4[%c2_33, %c0_34, %c0_35] : memref<3x512x240xf32, #tpu.memory_space<vmem>>, vector<1x512x240xf32>
    %34 = vector.shape_cast %33 : vector<1x512x240xf32> to vector<512x240xf32>
    %cst_36 = arith.constant dense<0.000000e+00> : vector<64x240xf32>
    %35 = tpu.matmul %25, %34, %cst_36 {dimension_numbers = #tpu.dot_dimension_numbers<[1], [0], [0], [1], [0, 0, 1, 1], [], []>} : vector<64x512xf32>, vector<512x240xf32>, vector<64x240xf32> -> vector<64x240xf32>
    %36 = arith.maximumf %32, %35 : vector<64x240xf32>
    %c0_37 = arith.constant 0 : index
    %c0_38 = arith.constant 0 : index
    %c0_39 = arith.constant 0 : index
    %37 = vector.load %arg5[%c0_37, %c0_38, %c0_39] : memref<3x30x64xf32, #tpu.memory_space<vmem>>, vector<1x30x64xf32>
    %38 = vector.shape_cast %37 : vector<1x30x64xf32> to vector<30x64xf32>
    %cst_40 = arith.constant dense<0.000000e+00> : vector<30x240xf32>
    %39 = tpu.matmul %38, %36, %cst_40 {dimension_numbers = #tpu.dot_dimension_numbers<[1], [0], [0], [1], [0, 0, 1, 1], [], []>} : vector<30x64xf32>, vector<64x240xf32>, vector<30x240xf32> -> vector<30x240xf32>
    %c1_41 = arith.constant 1 : index
    %c0_42 = arith.constant 0 : index
    %c0_43 = arith.constant 0 : index
    %40 = vector.load %arg5[%c1_41, %c0_42, %c0_43] : memref<3x30x64xf32, #tpu.memory_space<vmem>>, vector<1x30x64xf32>
    %41 = vector.shape_cast %40 : vector<1x30x64xf32> to vector<30x64xf32>
    %cst_44 = arith.constant dense<0.000000e+00> : vector<30x240xf32>
    %42 = tpu.matmul %41, %36, %cst_44 {dimension_numbers = #tpu.dot_dimension_numbers<[1], [0], [0], [1], [0, 0, 1, 1], [], []>} : vector<30x64xf32>, vector<64x240xf32>, vector<30x240xf32> -> vector<30x240xf32>
    %43 = arith.maximumf %39, %42 : vector<30x240xf32>
    %c2_45 = arith.constant 2 : index
    %c0_46 = arith.constant 0 : index
    %c0_47 = arith.constant 0 : index
    %44 = vector.load %arg5[%c2_45, %c0_46, %c0_47] : memref<3x30x64xf32, #tpu.memory_space<vmem>>, vector<1x30x64xf32>
    %45 = vector.shape_cast %44 : vector<1x30x64xf32> to vector<30x64xf32>
    %cst_48 = arith.constant dense<0.000000e+00> : vector<30x240xf32>
    %46 = tpu.matmul %45, %36, %cst_48 {dimension_numbers = #tpu.dot_dimension_numbers<[1], [0], [0], [1], [0, 0, 1, 1], [], []>} : vector<30x64xf32>, vector<64x240xf32>, vector<30x240xf32> -> vector<30x240xf32>
    %47 = arith.maximumf %43, %46 : vector<30x240xf32>
    %c0_49 = arith.constant 0 : index
    %c0_50 = arith.constant 0 : index
    %c0_51 = arith.constant 0 : index
    %48 = vector.load %arg7[%c0_49, %c0_50, %c0_51] : memref<5x30x30xf32, #tpu.memory_space<vmem>>, vector<1x30x30xf32>
    %49 = vector.shape_cast %48 : vector<1x30x30xf32> to vector<30x30xf32>
    %cst_52 = arith.constant dense<0.000000e+00> : vector<30x240xf32>
    %50 = tpu.matmul %49, %47, %cst_52 {dimension_numbers = #tpu.dot_dimension_numbers<[1], [0], [0], [1], [0, 0, 1, 1], [], []>} : vector<30x30xf32>, vector<30x240xf32>, vector<30x240xf32> -> vector<30x240xf32>
    %c0_53 = arith.constant 0 : index
    %c0_54 = arith.constant 0 : index
    %c0_55 = arith.constant 0 : index
    %51 = vector.load %arg6[%c0_53, %c0_54, %c0_55] : memref<5x240x360xf32, #tpu.memory_space<vmem>>, vector<1x240x360xf32>
    %52 = vector.shape_cast %51 : vector<1x240x360xf32> to vector<240x360xf32>
    %cst_56 = arith.constant dense<0.000000e+00> : vector<30x360xf32>
    %53 = tpu.matmul %50, %52, %cst_56 {dimension_numbers = #tpu.dot_dimension_numbers<[1], [0], [0], [1], [0, 0, 1, 1], [], []>} : vector<30x240xf32>, vector<240x360xf32>, vector<30x360xf32> -> vector<30x360xf32>
    %c1_57 = arith.constant 1 : index
    %c0_58 = arith.constant 0 : index
    %c0_59 = arith.constant 0 : index
    %54 = vector.load %arg7[%c1_57, %c0_58, %c0_59] : memref<5x30x30xf32, #tpu.memory_space<vmem>>, vector<1x30x30xf32>
    %55 = vector.shape_cast %54 : vector<1x30x30xf32> to vector<30x30xf32>
    %cst_60 = arith.constant dense<0.000000e+00> : vector<30x240xf32>
    %56 = tpu.matmul %55, %47, %cst_60 {dimension_numbers = #tpu.dot_dimension_numbers<[1], [0], [0], [1], [0, 0, 1, 1], [], []>} : vector<30x30xf32>, vector<30x240xf32>, vector<30x240xf32> -> vector<30x240xf32>
    %c1_61 = arith.constant 1 : index
    %c0_62 = arith.constant 0 : index
    %c0_63 = arith.constant 0 : index
    %57 = vector.load %arg6[%c1_61, %c0_62, %c0_63] : memref<5x240x360xf32, #tpu.memory_space<vmem>>, vector<1x240x360xf32>
    %58 = vector.shape_cast %57 : vector<1x240x360xf32> to vector<240x360xf32>
    %cst_64 = arith.constant dense<0.000000e+00> : vector<30x360xf32>
    %59 = tpu.matmul %56, %58, %cst_64 {dimension_numbers = #tpu.dot_dimension_numbers<[1], [0], [0], [1], [0, 0, 1, 1], [], []>} : vector<30x240xf32>, vector<240x360xf32>, vector<30x360xf32> -> vector<30x360xf32>
    %60 = arith.addf %53, %59 : vector<30x360xf32>
    %c2_65 = arith.constant 2 : index
    %c0_66 = arith.constant 0 : index
    %c0_67 = arith.constant 0 : index
    %61 = vector.load %arg7[%c2_65, %c0_66, %c0_67] : memref<5x30x30xf32, #tpu.memory_space<vmem>>, vector<1x30x30xf32>
    %62 = vector.shape_cast %61 : vector<1x30x30xf32> to vector<30x30xf32>
    %cst_68 = arith.constant dense<0.000000e+00> : vector<30x240xf32>
    %63 = tpu.matmul %62, %47, %cst_68 {dimension_numbers = #tpu.dot_dimension_numbers<[1], [0], [0], [1], [0, 0, 1, 1], [], []>} : vector<30x30xf32>, vector<30x240xf32>, vector<30x240xf32> -> vector<30x240xf32>
    %c2_69 = arith.constant 2 : index
    %c0_70 = arith.constant 0 : index
    %c0_71 = arith.constant 0 : index
    %64 = vector.load %arg6[%c2_69, %c0_70, %c0_71] : memref<5x240x360xf32, #tpu.memory_space<vmem>>, vector<1x240x360xf32>
    %65 = vector.shape_cast %64 : vector<1x240x360xf32> to vector<240x360xf32>
    %cst_72 = arith.constant dense<0.000000e+00> : vector<30x360xf32>
    %66 = tpu.matmul %63, %65, %cst_72 {dimension_numbers = #tpu.dot_dimension_numbers<[1], [0], [0], [1], [0, 0, 1, 1], [], []>} : vector<30x240xf32>, vector<240x360xf32>, vector<30x360xf32> -> vector<30x360xf32>
    %67 = arith.addf %60, %66 : vector<30x360xf32>
    %c3 = arith.constant 3 : index
    %c0_73 = arith.constant 0 : index
    %c0_74 = arith.constant 0 : index
    %68 = vector.load %arg7[%c3, %c0_73, %c0_74] : memref<5x30x30xf32, #tpu.memory_space<vmem>>, vector<1x30x30xf32>
    %69 = vector.shape_cast %68 : vector<1x30x30xf32> to vector<30x30xf32>
    %cst_75 = arith.constant dense<0.000000e+00> : vector<30x240xf32>
    %70 = tpu.matmul %69, %47, %cst_75 {dimension_numbers = #tpu.dot_dimension_numbers<[1], [0], [0], [1], [0, 0, 1, 1], [], []>} : vector<30x30xf32>, vector<30x240xf32>, vector<30x240xf32> -> vector<30x240xf32>
    %c3_76 = arith.constant 3 : index
    %c0_77 = arith.constant 0 : index
    %c0_78 = arith.constant 0 : index
    %71 = vector.load %arg6[%c3_76, %c0_77, %c0_78] : memref<5x240x360xf32, #tpu.memory_space<vmem>>, vector<1x240x360xf32>
    %72 = vector.shape_cast %71 : vector<1x240x360xf32> to vector<240x360xf32>
    %cst_79 = arith.constant dense<0.000000e+00> : vector<30x360xf32>
    %73 = tpu.matmul %70, %72, %cst_79 {dimension_numbers = #tpu.dot_dimension_numbers<[1], [0], [0], [1], [0, 0, 1, 1], [], []>} : vector<30x240xf32>, vector<240x360xf32>, vector<30x360xf32> -> vector<30x360xf32>
    %74 = arith.addf %67, %73 : vector<30x360xf32>
    %c4 = arith.constant 4 : index
    %c0_80 = arith.constant 0 : index
    %c0_81 = arith.constant 0 : index
    %75 = vector.load %arg7[%c4, %c0_80, %c0_81] : memref<5x30x30xf32, #tpu.memory_space<vmem>>, vector<1x30x30xf32>
    %76 = vector.shape_cast %75 : vector<1x30x30xf32> to vector<30x30xf32>
    %cst_82 = arith.constant dense<0.000000e+00> : vector<30x240xf32>
    %77 = tpu.matmul %76, %47, %cst_82 {dimension_numbers = #tpu.dot_dimension_numbers<[1], [0], [0], [1], [0, 0, 1, 1], [], []>} : vector<30x30xf32>, vector<30x240xf32>, vector<30x240xf32> -> vector<30x240xf32>
    %c4_83 = arith.constant 4 : index
    %c0_84 = arith.constant 0 : index
    %c0_85 = arith.constant 0 : index
    %78 = vector.load %arg6[%c4_83, %c0_84, %c0_85] : memref<5x240x360xf32, #tpu.memory_space<vmem>>, vector<1x240x360xf32>
    %79 = vector.shape_cast %78 : vector<1x240x360xf32> to vector<240x360xf32>
    %cst_86 = arith.constant dense<0.000000e+00> : vector<30x360xf32>
    %80 = tpu.matmul %77, %79, %cst_86 {dimension_numbers = #tpu.dot_dimension_numbers<[1], [0], [0], [1], [0, 0, 1, 1], [], []>} : vector<30x240xf32>, vector<240x360xf32>, vector<30x360xf32> -> vector<30x360xf32>
    %81 = arith.addf %74, %80 : vector<30x360xf32>
    %c0_87 = arith.constant 0 : index
    %c0_88 = arith.constant 0 : index
    %82 = vector.load %arg8[%c0_87, %c0_88] : memref<1x360xf32, #tpu.memory_space<vmem>>, vector<1x360xf32>
    %83 = vector.broadcast %82 : vector<1x360xf32> to vector<30x360xf32>
    %84 = arith.addf %81, %83 : vector<30x360xf32>
    %cst_89 = arith.constant 0.000000e+00 : f32
    %85 = vector.broadcast %cst_89 : f32 to vector<30x360xf32>
    %86 = arith.maximumf %84, %85 : vector<30x360xf32>
    %c0_90 = arith.constant 0 : index
    %c0_91 = arith.constant 0 : index
    %c0_92 = arith.constant 0 : index
    %87 = vector.load %arg9[%c0_90, %c0_91, %c0_92] : memref<3x360x168xf32, #tpu.memory_space<vmem>>, vector<1x360x168xf32>
    %88 = vector.shape_cast %87 : vector<1x360x168xf32> to vector<360x168xf32>
    %cst_93 = arith.constant dense<0.000000e+00> : vector<30x168xf32>
    %89 = tpu.matmul %86, %88, %cst_93 {dimension_numbers = #tpu.dot_dimension_numbers<[1], [0], [0], [1], [0, 0, 1, 1], [], []>} : vector<30x360xf32>, vector<360x168xf32>, vector<30x168xf32> -> vector<30x168xf32>
    %c1_94 = arith.constant 1 : index
    %c0_95 = arith.constant 0 : index
    %c0_96 = arith.constant 0 : index
    %90 = vector.load %arg9[%c1_94, %c0_95, %c0_96] : memref<3x360x168xf32, #tpu.memory_space<vmem>>, vector<1x360x168xf32>
    %91 = vector.shape_cast %90 : vector<1x360x168xf32> to vector<360x168xf32>
    %cst_97 = arith.constant dense<0.000000e+00> : vector<30x168xf32>
    %92 = tpu.matmul %86, %91, %cst_97 {dimension_numbers = #tpu.dot_dimension_numbers<[1], [0], [0], [1], [0, 0, 1, 1], [], []>} : vector<30x360xf32>, vector<360x168xf32>, vector<30x168xf32> -> vector<30x168xf32>
    %93 = arith.maximumf %89, %92 : vector<30x168xf32>
    %c2_98 = arith.constant 2 : index
    %c0_99 = arith.constant 0 : index
    %c0_100 = arith.constant 0 : index
    %94 = vector.load %arg9[%c2_98, %c0_99, %c0_100] : memref<3x360x168xf32, #tpu.memory_space<vmem>>, vector<1x360x168xf32>
    %95 = vector.shape_cast %94 : vector<1x360x168xf32> to vector<360x168xf32>
    %cst_101 = arith.constant dense<0.000000e+00> : vector<30x168xf32>
    %96 = tpu.matmul %86, %95, %cst_101 {dimension_numbers = #tpu.dot_dimension_numbers<[1], [0], [0], [1], [0, 0, 1, 1], [], []>} : vector<30x360xf32>, vector<360x168xf32>, vector<30x168xf32> -> vector<30x168xf32>
    %97 = arith.maximumf %93, %96 : vector<30x168xf32>
    %c0_102 = arith.constant 0 : index
    %c0_103 = arith.constant 0 : index
    %c0_104 = arith.constant 0 : index
    %98 = vector.load %arg10[%c0_102, %c0_103, %c0_104] : memref<3x14x30xf32, #tpu.memory_space<vmem>>, vector<1x14x30xf32>
    %99 = vector.shape_cast %98 : vector<1x14x30xf32> to vector<14x30xf32>
    %cst_105 = arith.constant dense<0.000000e+00> : vector<14x168xf32>
    %100 = tpu.matmul %99, %97, %cst_105 {dimension_numbers = #tpu.dot_dimension_numbers<[1], [0], [0], [1], [0, 0, 1, 1], [], []>} : vector<14x30xf32>, vector<30x168xf32>, vector<14x168xf32> -> vector<14x168xf32>
    %c1_106 = arith.constant 1 : index
    %c0_107 = arith.constant 0 : index
    %c0_108 = arith.constant 0 : index
    %101 = vector.load %arg10[%c1_106, %c0_107, %c0_108] : memref<3x14x30xf32, #tpu.memory_space<vmem>>, vector<1x14x30xf32>
    %102 = vector.shape_cast %101 : vector<1x14x30xf32> to vector<14x30xf32>
    %cst_109 = arith.constant dense<0.000000e+00> : vector<14x168xf32>
    %103 = tpu.matmul %102, %97, %cst_109 {dimension_numbers = #tpu.dot_dimension_numbers<[1], [0], [0], [1], [0, 0, 1, 1], [], []>} : vector<14x30xf32>, vector<30x168xf32>, vector<14x168xf32> -> vector<14x168xf32>
    %104 = arith.maximumf %100, %103 : vector<14x168xf32>
    %c2_110 = arith.constant 2 : index
    %c0_111 = arith.constant 0 : index
    %c0_112 = arith.constant 0 : index
    %105 = vector.load %arg10[%c2_110, %c0_111, %c0_112] : memref<3x14x30xf32, #tpu.memory_space<vmem>>, vector<1x14x30xf32>
    %106 = vector.shape_cast %105 : vector<1x14x30xf32> to vector<14x30xf32>
    %cst_113 = arith.constant dense<0.000000e+00> : vector<14x168xf32>
    %107 = tpu.matmul %106, %97, %cst_113 {dimension_numbers = #tpu.dot_dimension_numbers<[1], [0], [0], [1], [0, 0, 1, 1], [], []>} : vector<14x30xf32>, vector<30x168xf32>, vector<14x168xf32> -> vector<14x168xf32>
    %108 = arith.maximumf %104, %107 : vector<14x168xf32>
    %c0_114 = arith.constant 0 : index
    %c0_115 = arith.constant 0 : index
    %c0_116 = arith.constant 0 : index
    %109 = vector.load %arg12[%c0_114, %c0_115, %c0_116] : memref<3x14x14xf32, #tpu.memory_space<vmem>>, vector<1x14x14xf32>
    %110 = vector.shape_cast %109 : vector<1x14x14xf32> to vector<14x14xf32>
    %cst_117 = arith.constant dense<0.000000e+00> : vector<14x168xf32>
    %111 = tpu.matmul %110, %108, %cst_117 {dimension_numbers = #tpu.dot_dimension_numbers<[1], [0], [0], [1], [0, 0, 1, 1], [], []>} : vector<14x14xf32>, vector<14x168xf32>, vector<14x168xf32> -> vector<14x168xf32>
    %c0_118 = arith.constant 0 : index
    %c0_119 = arith.constant 0 : index
    %c0_120 = arith.constant 0 : index
    %112 = vector.load %arg11[%c0_118, %c0_119, %c0_120] : memref<3x168x224xf32, #tpu.memory_space<vmem>>, vector<1x168x224xf32>
    %113 = vector.shape_cast %112 : vector<1x168x224xf32> to vector<168x224xf32>
    %cst_121 = arith.constant dense<0.000000e+00> : vector<14x224xf32>
    %114 = tpu.matmul %111, %113, %cst_121 {dimension_numbers = #tpu.dot_dimension_numbers<[1], [0], [0], [1], [0, 0, 1, 1], [], []>} : vector<14x168xf32>, vector<168x224xf32>, vector<14x224xf32> -> vector<14x224xf32>
    %c1_122 = arith.constant 1 : index
    %c0_123 = arith.constant 0 : index
    %c0_124 = arith.constant 0 : index
    %115 = vector.load %arg12[%c1_122, %c0_123, %c0_124] : memref<3x14x14xf32, #tpu.memory_space<vmem>>, vector<1x14x14xf32>
    %116 = vector.shape_cast %115 : vector<1x14x14xf32> to vector<14x14xf32>
    %cst_125 = arith.constant dense<0.000000e+00> : vector<14x168xf32>
    %117 = tpu.matmul %116, %108, %cst_125 {dimension_numbers = #tpu.dot_dimension_numbers<[1], [0], [0], [1], [0, 0, 1, 1], [], []>} : vector<14x14xf32>, vector<14x168xf32>, vector<14x168xf32> -> vector<14x168xf32>
    %c1_126 = arith.constant 1 : index
    %c0_127 = arith.constant 0 : index
    %c0_128 = arith.constant 0 : index
    %118 = vector.load %arg11[%c1_126, %c0_127, %c0_128] : memref<3x168x224xf32, #tpu.memory_space<vmem>>, vector<1x168x224xf32>
    %119 = vector.shape_cast %118 : vector<1x168x224xf32> to vector<168x224xf32>
    %cst_129 = arith.constant dense<0.000000e+00> : vector<14x224xf32>
    %120 = tpu.matmul %117, %119, %cst_129 {dimension_numbers = #tpu.dot_dimension_numbers<[1], [0], [0], [1], [0, 0, 1, 1], [], []>} : vector<14x168xf32>, vector<168x224xf32>, vector<14x224xf32> -> vector<14x224xf32>
    %121 = arith.addf %114, %120 : vector<14x224xf32>
    %c2_130 = arith.constant 2 : index
    %c0_131 = arith.constant 0 : index
    %c0_132 = arith.constant 0 : index
    %122 = vector.load %arg12[%c2_130, %c0_131, %c0_132] : memref<3x14x14xf32, #tpu.memory_space<vmem>>, vector<1x14x14xf32>
    %123 = vector.shape_cast %122 : vector<1x14x14xf32> to vector<14x14xf32>
    %cst_133 = arith.constant dense<0.000000e+00> : vector<14x168xf32>
    %124 = tpu.matmul %123, %108, %cst_133 {dimension_numbers = #tpu.dot_dimension_numbers<[1], [0], [0], [1], [0, 0, 1, 1], [], []>} : vector<14x14xf32>, vector<14x168xf32>, vector<14x168xf32> -> vector<14x168xf32>
    %c2_134 = arith.constant 2 : index
    %c0_135 = arith.constant 0 : index
    %c0_136 = arith.constant 0 : index
    %125 = vector.load %arg11[%c2_134, %c0_135, %c0_136] : memref<3x168x224xf32, #tpu.memory_space<vmem>>, vector<1x168x224xf32>
    %126 = vector.shape_cast %125 : vector<1x168x224xf32> to vector<168x224xf32>
    %cst_137 = arith.constant dense<0.000000e+00> : vector<14x224xf32>
    %127 = tpu.matmul %124, %126, %cst_137 {dimension_numbers = #tpu.dot_dimension_numbers<[1], [0], [0], [1], [0, 0, 1, 1], [], []>} : vector<14x168xf32>, vector<168x224xf32>, vector<14x224xf32> -> vector<14x224xf32>
    %128 = arith.addf %121, %127 : vector<14x224xf32>
    %c0_138 = arith.constant 0 : index
    %c0_139 = arith.constant 0 : index
    %129 = vector.load %arg13[%c0_138, %c0_139] : memref<1x224xf32, #tpu.memory_space<vmem>>, vector<1x224xf32>
    %130 = vector.broadcast %129 : vector<1x224xf32> to vector<14x224xf32>
    %131 = arith.addf %128, %130 : vector<14x224xf32>
    %cst_140 = arith.constant 0.000000e+00 : f32
    %132 = vector.broadcast %cst_140 : f32 to vector<14x224xf32>
    %133 = arith.maximumf %131, %132 : vector<14x224xf32>
    %c0_141 = arith.constant 0 : index
    %c0_142 = arith.constant 0 : index
    %c0_143 = arith.constant 0 : index
    %134 = vector.load %arg15[%c0_141, %c0_142, %c0_143] : memref<3x14x14xf32, #tpu.memory_space<vmem>>, vector<1x14x14xf32>
    %135 = vector.shape_cast %134 : vector<1x14x14xf32> to vector<14x14xf32>
    %cst_144 = arith.constant dense<0.000000e+00> : vector<14x224xf32>
    %136 = tpu.matmul %135, %133, %cst_144 {dimension_numbers = #tpu.dot_dimension_numbers<[1], [0], [0], [1], [0, 0, 1, 1], [], []>} : vector<14x14xf32>, vector<14x224xf32>, vector<14x224xf32> -> vector<14x224xf32>
    %c0_145 = arith.constant 0 : index
    %c0_146 = arith.constant 0 : index
    %c0_147 = arith.constant 0 : index
    %137 = vector.load %arg14[%c0_145, %c0_146, %c0_147] : memref<3x224x224xf32, #tpu.memory_space<vmem>>, vector<1x224x224xf32>
    %138 = vector.shape_cast %137 : vector<1x224x224xf32> to vector<224x224xf32>
    %cst_148 = arith.constant dense<0.000000e+00> : vector<14x224xf32>
    %139 = tpu.matmul %136, %138, %cst_148 {dimension_numbers = #tpu.dot_dimension_numbers<[1], [0], [0], [1], [0, 0, 1, 1], [], []>} : vector<14x224xf32>, vector<224x224xf32>, vector<14x224xf32> -> vector<14x224xf32>
    %c1_149 = arith.constant 1 : index
    %c0_150 = arith.constant 0 : index
    %c0_151 = arith.constant 0 : index
    %140 = vector.load %arg15[%c1_149, %c0_150, %c0_151] : memref<3x14x14xf32, #tpu.memory_space<vmem>>, vector<1x14x14xf32>
    %141 = vector.shape_cast %140 : vector<1x14x14xf32> to vector<14x14xf32>
    %cst_152 = arith.constant dense<0.000000e+00> : vector<14x224xf32>
    %142 = tpu.matmul %141, %133, %cst_152 {dimension_numbers = #tpu.dot_dimension_numbers<[1], [0], [0], [1], [0, 0, 1, 1], [], []>} : vector<14x14xf32>, vector<14x224xf32>, vector<14x224xf32> -> vector<14x224xf32>
    %c1_153 = arith.constant 1 : index
    %c0_154 = arith.constant 0 : index
    %c0_155 = arith.constant 0 : index
    %143 = vector.load %arg14[%c1_153, %c0_154, %c0_155] : memref<3x224x224xf32, #tpu.memory_space<vmem>>, vector<1x224x224xf32>
    %144 = vector.shape_cast %143 : vector<1x224x224xf32> to vector<224x224xf32>
    %cst_156 = arith.constant dense<0.000000e+00> : vector<14x224xf32>
    %145 = tpu.matmul %142, %144, %cst_156 {dimension_numbers = #tpu.dot_dimension_numbers<[1], [0], [0], [1], [0, 0, 1, 1], [], []>} : vector<14x224xf32>, vector<224x224xf32>, vector<14x224xf32> -> vector<14x224xf32>
    %146 = arith.addf %139, %145 : vector<14x224xf32>
    %c2_157 = arith.constant 2 : index
    %c0_158 = arith.constant 0 : index
    %c0_159 = arith.constant 0 : index
    %147 = vector.load %arg15[%c2_157, %c0_158, %c0_159] : memref<3x14x14xf32, #tpu.memory_space<vmem>>, vector<1x14x14xf32>
    %148 = vector.shape_cast %147 : vector<1x14x14xf32> to vector<14x14xf32>
    %cst_160 = arith.constant dense<0.000000e+00> : vector<14x224xf32>
    %149 = tpu.matmul %148, %133, %cst_160 {dimension_numbers = #tpu.dot_dimension_numbers<[1], [0], [0], [1], [0, 0, 1, 1], [], []>} : vector<14x14xf32>, vector<14x224xf32>, vector<14x224xf32> -> vector<14x224xf32>
    %c2_161 = arith.constant 2 : index
    %c0_162 = arith.constant 0 : index
    %c0_163 = arith.constant 0 : index
    %150 = vector.load %arg14[%c2_161, %c0_162, %c0_163] : memref<3x224x224xf32, #tpu.memory_space<vmem>>, vector<1x224x224xf32>
    %151 = vector.shape_cast %150 : vector<1x224x224xf32> to vector<224x224xf32>
    %cst_164 = arith.constant dense<0.000000e+00> : vector<14x224xf32>
    %152 = tpu.matmul %149, %151, %cst_164 {dimension_numbers = #tpu.dot_dimension_numbers<[1], [0], [0], [1], [0, 0, 1, 1], [], []>} : vector<14x224xf32>, vector<224x224xf32>, vector<14x224xf32> -> vector<14x224xf32>
    %153 = arith.addf %146, %152 : vector<14x224xf32>
    %c0_165 = arith.constant 0 : index
    %c0_166 = arith.constant 0 : index
    %154 = vector.load %arg16[%c0_165, %c0_166] : memref<1x224xf32, #tpu.memory_space<vmem>>, vector<1x224xf32>
    %155 = vector.broadcast %154 : vector<1x224xf32> to vector<14x224xf32>
    %156 = arith.addf %153, %155 : vector<14x224xf32>
    %cst_167 = arith.constant 0.000000e+00 : f32
    %157 = vector.broadcast %cst_167 : f32 to vector<14x224xf32>
    %158 = arith.maximumf %156, %157 : vector<14x224xf32>
    %c0_168 = arith.constant 0 : index
    %c0_169 = arith.constant 0 : index
    %c0_170 = arith.constant 0 : index
    %159 = vector.load %arg18[%c0_168, %c0_169, %c0_170] : memref<3x14x14xf32, #tpu.memory_space<vmem>>, vector<1x14x14xf32>
    %160 = vector.shape_cast %159 : vector<1x14x14xf32> to vector<14x14xf32>
    %cst_171 = arith.constant dense<0.000000e+00> : vector<14x224xf32>
    %161 = tpu.matmul %160, %158, %cst_171 {dimension_numbers = #tpu.dot_dimension_numbers<[1], [0], [0], [1], [0, 0, 1, 1], [], []>} : vector<14x14xf32>, vector<14x224xf32>, vector<14x224xf32> -> vector<14x224xf32>
    %c0_172 = arith.constant 0 : index
    %c0_173 = arith.constant 0 : index
    %c0_174 = arith.constant 0 : index
    %162 = vector.load %arg17[%c0_172, %c0_173, %c0_174] : memref<3x224x224xf32, #tpu.memory_space<vmem>>, vector<1x224x224xf32>
    %163 = vector.shape_cast %162 : vector<1x224x224xf32> to vector<224x224xf32>
    %cst_175 = arith.constant dense<0.000000e+00> : vector<14x224xf32>
    %164 = tpu.matmul %161, %163, %cst_175 {dimension_numbers = #tpu.dot_dimension_numbers<[1], [0], [0], [1], [0, 0, 1, 1], [], []>} : vector<14x224xf32>, vector<224x224xf32>, vector<14x224xf32> -> vector<14x224xf32>
    %c1_176 = arith.constant 1 : index
    %c0_177 = arith.constant 0 : index
    %c0_178 = arith.constant 0 : index
    %165 = vector.load %arg18[%c1_176, %c0_177, %c0_178] : memref<3x14x14xf32, #tpu.memory_space<vmem>>, vector<1x14x14xf32>
    %166 = vector.shape_cast %165 : vector<1x14x14xf32> to vector<14x14xf32>
    %cst_179 = arith.constant dense<0.000000e+00> : vector<14x224xf32>
    %167 = tpu.matmul %166, %158, %cst_179 {dimension_numbers = #tpu.dot_dimension_numbers<[1], [0], [0], [1], [0, 0, 1, 1], [], []>} : vector<14x14xf32>, vector<14x224xf32>, vector<14x224xf32> -> vector<14x224xf32>
    %c1_180 = arith.constant 1 : index
    %c0_181 = arith.constant 0 : index
    %c0_182 = arith.constant 0 : index
    %168 = vector.load %arg17[%c1_180, %c0_181, %c0_182] : memref<3x224x224xf32, #tpu.memory_space<vmem>>, vector<1x224x224xf32>
    %169 = vector.shape_cast %168 : vector<1x224x224xf32> to vector<224x224xf32>
    %cst_183 = arith.constant dense<0.000000e+00> : vector<14x224xf32>
    %170 = tpu.matmul %167, %169, %cst_183 {dimension_numbers = #tpu.dot_dimension_numbers<[1], [0], [0], [1], [0, 0, 1, 1], [], []>} : vector<14x224xf32>, vector<224x224xf32>, vector<14x224xf32> -> vector<14x224xf32>
    %171 = arith.addf %164, %170 : vector<14x224xf32>
    %c2_184 = arith.constant 2 : index
    %c0_185 = arith.constant 0 : index
    %c0_186 = arith.constant 0 : index
    %172 = vector.load %arg18[%c2_184, %c0_185, %c0_186] : memref<3x14x14xf32, #tpu.memory_space<vmem>>, vector<1x14x14xf32>
    %173 = vector.shape_cast %172 : vector<1x14x14xf32> to vector<14x14xf32>
    %cst_187 = arith.constant dense<0.000000e+00> : vector<14x224xf32>
    %174 = tpu.matmul %173, %158, %cst_187 {dimension_numbers = #tpu.dot_dimension_numbers<[1], [0], [0], [1], [0, 0, 1, 1], [], []>} : vector<14x14xf32>, vector<14x224xf32>, vector<14x224xf32> -> vector<14x224xf32>
    %c2_188 = arith.constant 2 : index
    %c0_189 = arith.constant 0 : index
    %c0_190 = arith.constant 0 : index
    %175 = vector.load %arg17[%c2_188, %c0_189, %c0_190] : memref<3x224x224xf32, #tpu.memory_space<vmem>>, vector<1x224x224xf32>
    %176 = vector.shape_cast %175 : vector<1x224x224xf32> to vector<224x224xf32>
    %cst_191 = arith.constant dense<0.000000e+00> : vector<14x224xf32>
    %177 = tpu.matmul %174, %176, %cst_191 {dimension_numbers = #tpu.dot_dimension_numbers<[1], [0], [0], [1], [0, 0, 1, 1], [], []>} : vector<14x224xf32>, vector<224x224xf32>, vector<14x224xf32> -> vector<14x224xf32>
    %178 = arith.addf %171, %177 : vector<14x224xf32>
    %c0_192 = arith.constant 0 : index
    %c0_193 = arith.constant 0 : index
    %179 = vector.load %arg19[%c0_192, %c0_193] : memref<1x224xf32, #tpu.memory_space<vmem>>, vector<1x224xf32>
    %180 = vector.broadcast %179 : vector<1x224xf32> to vector<14x224xf32>
    %181 = arith.addf %178, %180 : vector<14x224xf32>
    %cst_194 = arith.constant 0.000000e+00 : f32
    %182 = vector.broadcast %cst_194 : f32 to vector<14x224xf32>
    %183 = arith.maximumf %181, %182 : vector<14x224xf32>
    %c0_195 = arith.constant 0 : index
    %c0_196 = arith.constant 0 : index
    %c0_197 = arith.constant 0 : index
    %184 = vector.load %arg20[%c0_195, %c0_196, %c0_197] : memref<3x224x96xf32, #tpu.memory_space<vmem>>, vector<1x224x96xf32>
    %185 = vector.shape_cast %184 : vector<1x224x96xf32> to vector<224x96xf32>
    %cst_198 = arith.constant dense<0.000000e+00> : vector<14x96xf32>
    %186 = tpu.matmul %183, %185, %cst_198 {dimension_numbers = #tpu.dot_dimension_numbers<[1], [0], [0], [1], [0, 0, 1, 1], [], []>} : vector<14x224xf32>, vector<224x96xf32>, vector<14x96xf32> -> vector<14x96xf32>
    %c1_199 = arith.constant 1 : index
    %c0_200 = arith.constant 0 : index
    %c0_201 = arith.constant 0 : index
    %187 = vector.load %arg20[%c1_199, %c0_200, %c0_201] : memref<3x224x96xf32, #tpu.memory_space<vmem>>, vector<1x224x96xf32>
    %188 = vector.shape_cast %187 : vector<1x224x96xf32> to vector<224x96xf32>
    %cst_202 = arith.constant dense<0.000000e+00> : vector<14x96xf32>
    %189 = tpu.matmul %183, %188, %cst_202 {dimension_numbers = #tpu.dot_dimension_numbers<[1], [0], [0], [1], [0, 0, 1, 1], [], []>} : vector<14x224xf32>, vector<224x96xf32>, vector<14x96xf32> -> vector<14x96xf32>
    %190 = arith.maximumf %186, %189 : vector<14x96xf32>
    %c2_203 = arith.constant 2 : index
    %c0_204 = arith.constant 0 : index
    %c0_205 = arith.constant 0 : index
    %191 = vector.load %arg20[%c2_203, %c0_204, %c0_205] : memref<3x224x96xf32, #tpu.memory_space<vmem>>, vector<1x224x96xf32>
    %192 = vector.shape_cast %191 : vector<1x224x96xf32> to vector<224x96xf32>
    %cst_206 = arith.constant dense<0.000000e+00> : vector<14x96xf32>
    %193 = tpu.matmul %183, %192, %cst_206 {dimension_numbers = #tpu.dot_dimension_numbers<[1], [0], [0], [1], [0, 0, 1, 1], [], []>} : vector<14x224xf32>, vector<224x96xf32>, vector<14x96xf32> -> vector<14x96xf32>
    %194 = arith.maximumf %190, %193 : vector<14x96xf32>
    %c0_207 = arith.constant 0 : index
    %c0_208 = arith.constant 0 : index
    %c0_209 = arith.constant 0 : index
    %195 = vector.load %arg21[%c0_207, %c0_208, %c0_209] : memref<3x6x14xf32, #tpu.memory_space<vmem>>, vector<1x6x14xf32>
    %196 = vector.shape_cast %195 : vector<1x6x14xf32> to vector<6x14xf32>
    %cst_210 = arith.constant dense<0.000000e+00> : vector<6x96xf32>
    %197 = tpu.matmul %196, %194, %cst_210 {dimension_numbers = #tpu.dot_dimension_numbers<[1], [0], [0], [1], [0, 0, 1, 1], [], []>} : vector<6x14xf32>, vector<14x96xf32>, vector<6x96xf32> -> vector<6x96xf32>
    %c1_211 = arith.constant 1 : index
    %c0_212 = arith.constant 0 : index
    %c0_213 = arith.constant 0 : index
    %198 = vector.load %arg21[%c1_211, %c0_212, %c0_213] : memref<3x6x14xf32, #tpu.memory_space<vmem>>, vector<1x6x14xf32>
    %199 = vector.shape_cast %198 : vector<1x6x14xf32> to vector<6x14xf32>
    %cst_214 = arith.constant dense<0.000000e+00> : vector<6x96xf32>
    %200 = tpu.matmul %199, %194, %cst_214 {dimension_numbers = #tpu.dot_dimension_numbers<[1], [0], [0], [1], [0, 0, 1, 1], [], []>} : vector<6x14xf32>, vector<14x96xf32>, vector<6x96xf32> -> vector<6x96xf32>
    %201 = arith.maximumf %197, %200 : vector<6x96xf32>
    %c2_215 = arith.constant 2 : index
    %c0_216 = arith.constant 0 : index
    %c0_217 = arith.constant 0 : index
    %202 = vector.load %arg21[%c2_215, %c0_216, %c0_217] : memref<3x6x14xf32, #tpu.memory_space<vmem>>, vector<1x6x14xf32>
    %203 = vector.shape_cast %202 : vector<1x6x14xf32> to vector<6x14xf32>
    %cst_218 = arith.constant dense<0.000000e+00> : vector<6x96xf32>
    %204 = tpu.matmul %203, %194, %cst_218 {dimension_numbers = #tpu.dot_dimension_numbers<[1], [0], [0], [1], [0, 0, 1, 1], [], []>} : vector<6x14xf32>, vector<14x96xf32>, vector<6x96xf32> -> vector<6x96xf32>
    %205 = arith.maximumf %201, %204 : vector<6x96xf32>
    %c0_219 = arith.constant 0 : index
    %c0_220 = arith.constant 0 : index
    %c0_221 = arith.constant 0 : index
    %206 = vector.load %arg22[%c0_219, %c0_220, %c0_221] : memref<3x2x6xf32, #tpu.memory_space<vmem>>, vector<1x2x6xf32>
    %207 = vector.shape_cast %206 : vector<1x2x6xf32> to vector<2x6xf32>
    %cst_222 = arith.constant dense<0.000000e+00> : vector<2x96xf32>
    %208 = tpu.matmul %207, %205, %cst_222 {dimension_numbers = #tpu.dot_dimension_numbers<[1], [0], [0], [1], [0, 0, 1, 1], [], []>} : vector<2x6xf32>, vector<6x96xf32>, vector<2x96xf32> -> vector<2x96xf32>
    %c0_223 = arith.constant 0 : index
    %c0_224 = arith.constant 0 : index
    %c0_225 = arith.constant 0 : index
    %209 = vector.load %arg23[%c0_223, %c0_224, %c0_225] : memref<3x96x288xf32, #tpu.memory_space<vmem>>, vector<1x96x288xf32>
    %210 = vector.shape_cast %209 : vector<1x96x288xf32> to vector<96x288xf32>
    %cst_226 = arith.constant dense<0.000000e+00> : vector<2x288xf32>
    %211 = tpu.matmul %208, %210, %cst_226 {dimension_numbers = #tpu.dot_dimension_numbers<[1], [0], [0], [1], [0, 0, 1, 1], [], []>} : vector<2x96xf32>, vector<96x288xf32>, vector<2x288xf32> -> vector<2x288xf32>
    %c1_227 = arith.constant 1 : index
    %c0_228 = arith.constant 0 : index
    %c0_229 = arith.constant 0 : index
    %212 = vector.load %arg22[%c1_227, %c0_228, %c0_229] : memref<3x2x6xf32, #tpu.memory_space<vmem>>, vector<1x2x6xf32>
    %213 = vector.shape_cast %212 : vector<1x2x6xf32> to vector<2x6xf32>
    %cst_230 = arith.constant dense<0.000000e+00> : vector<2x96xf32>
    %214 = tpu.matmul %213, %205, %cst_230 {dimension_numbers = #tpu.dot_dimension_numbers<[1], [0], [0], [1], [0, 0, 1, 1], [], []>} : vector<2x6xf32>, vector<6x96xf32>, vector<2x96xf32> -> vector<2x96xf32>
    %c1_231 = arith.constant 1 : index
    %c0_232 = arith.constant 0 : index
    %c0_233 = arith.constant 0 : index
    %215 = vector.load %arg23[%c1_231, %c0_232, %c0_233] : memref<3x96x288xf32, #tpu.memory_space<vmem>>, vector<1x96x288xf32>
    %216 = vector.shape_cast %215 : vector<1x96x288xf32> to vector<96x288xf32>
    %cst_234 = arith.constant dense<0.000000e+00> : vector<2x288xf32>
    %217 = tpu.matmul %214, %216, %cst_234 {dimension_numbers = #tpu.dot_dimension_numbers<[1], [0], [0], [1], [0, 0, 1, 1], [], []>} : vector<2x96xf32>, vector<96x288xf32>, vector<2x288xf32> -> vector<2x288xf32>
    %218 = arith.addf %211, %217 : vector<2x288xf32>
    %c2_235 = arith.constant 2 : index
    %c0_236 = arith.constant 0 : index
    %c0_237 = arith.constant 0 : index
    %219 = vector.load %arg22[%c2_235, %c0_236, %c0_237] : memref<3x2x6xf32, #tpu.memory_space<vmem>>, vector<1x2x6xf32>
    %220 = vector.shape_cast %219 : vector<1x2x6xf32> to vector<2x6xf32>
    %cst_238 = arith.constant dense<0.000000e+00> : vector<2x96xf32>
    %221 = tpu.matmul %220, %205, %cst_238 {dimension_numbers = #tpu.dot_dimension_numbers<[1], [0], [0], [1], [0, 0, 1, 1], [], []>} : vector<2x6xf32>, vector<6x96xf32>, vector<2x96xf32> -> vector<2x96xf32>
    %c2_239 = arith.constant 2 : index
    %c0_240 = arith.constant 0 : index
    %c0_241 = arith.constant 0 : index
    %222 = vector.load %arg23[%c2_239, %c0_240, %c0_241] : memref<3x96x288xf32, #tpu.memory_space<vmem>>, vector<1x96x288xf32>
    %223 = vector.shape_cast %222 : vector<1x96x288xf32> to vector<96x288xf32>
    %cst_242 = arith.constant dense<0.000000e+00> : vector<2x288xf32>
    %224 = tpu.matmul %221, %223, %cst_242 {dimension_numbers = #tpu.dot_dimension_numbers<[1], [0], [0], [1], [0, 0, 1, 1], [], []>} : vector<2x96xf32>, vector<96x288xf32>, vector<2x288xf32> -> vector<2x288xf32>
    %225 = arith.addf %218, %224 : vector<2x288xf32>
    %c0_243 = arith.constant 0 : index
    %c0_244 = arith.constant 0 : index
    %226 = vector.load %arg24[%c0_243, %c0_244] : memref<2x288xf32, #tpu.memory_space<vmem>>, vector<2x288xf32>
    tpu.vector_store %arg24[%c0_243, %c0_244], %225 {strides = array<i32>} : memref<2x288xf32, #tpu.memory_space<vmem>>, vector<2x288xf32>,
    return
  }
}

module attributes {stable_mosaic.version = 11 : i64} {
  func.func @_classifier_kernel(%arg0: memref<2x288xf32, #tpu.memory_space<vmem>>, %arg1: memref<288x128xf32, #tpu.memory_space<vmem>>, %arg2: memref<1x128xf32, #tpu.memory_space<vmem>>, %arg3: memref<128x128xf32, #tpu.memory_space<vmem>>, %arg4: memref<1x128xf32, #tpu.memory_space<vmem>>, %arg5: memref<128x10xf32, #tpu.memory_space<vmem>>, %arg6: memref<1x10xf32, #tpu.memory_space<vmem>>, %arg7: memref<2x10xf32, #tpu.memory_space<vmem>>) attributes {dimension_semantics = [], scalar_prefetch = 0 : i64, scratch_operands = 0 : i64, tpu.core_type = #tpu.core_type<tc>} {
    %c0 = arith.constant 0 : index
    %c0_0 = arith.constant 0 : index
    %0 = vector.load %arg0[%c0, %c0_0] : memref<2x288xf32, #tpu.memory_space<vmem>>, vector<2x288xf32>
    %c0_1 = arith.constant 0 : index
    %c0_2 = arith.constant 0 : index
    %1 = vector.load %arg1[%c0_1, %c0_2] : memref<288x128xf32, #tpu.memory_space<vmem>>, vector<288x128xf32>
    %cst = arith.constant dense<0.000000e+00> : vector<2x128xf32>
    %2 = tpu.matmul %0, %1, %cst {dimension_numbers = #tpu.dot_dimension_numbers<[1], [0], [0], [1], [0, 0, 1, 1], [], []>} : vector<2x288xf32>, vector<288x128xf32>, vector<2x128xf32> -> vector<2x128xf32>
    %c0_3 = arith.constant 0 : index
    %c0_4 = arith.constant 0 : index
    %3 = vector.load %arg2[%c0_3, %c0_4] : memref<1x128xf32, #tpu.memory_space<vmem>>, vector<1x128xf32>
    %4 = vector.broadcast %3 : vector<1x128xf32> to vector<2x128xf32>
    %5 = arith.addf %2, %4 : vector<2x128xf32>
    %cst_5 = arith.constant 0.000000e+00 : f32
    %6 = vector.broadcast %cst_5 : f32 to vector<2x128xf32>
    %7 = arith.maximumf %5, %6 : vector<2x128xf32>
    %c0_6 = arith.constant 0 : index
    %c0_7 = arith.constant 0 : index
    %8 = vector.load %arg3[%c0_6, %c0_7] : memref<128x128xf32, #tpu.memory_space<vmem>>, vector<128x128xf32>
    %cst_8 = arith.constant dense<0.000000e+00> : vector<2x128xf32>
    %9 = tpu.matmul %7, %8, %cst_8 {dimension_numbers = #tpu.dot_dimension_numbers<[1], [0], [0], [1], [0, 0, 1, 1], [], []>} : vector<2x128xf32>, vector<128x128xf32>, vector<2x128xf32> -> vector<2x128xf32>
    %c0_9 = arith.constant 0 : index
    %c0_10 = arith.constant 0 : index
    %10 = vector.load %arg4[%c0_9, %c0_10] : memref<1x128xf32, #tpu.memory_space<vmem>>, vector<1x128xf32>
    %11 = vector.broadcast %10 : vector<1x128xf32> to vector<2x128xf32>
    %12 = arith.addf %9, %11 : vector<2x128xf32>
    %cst_11 = arith.constant 0.000000e+00 : f32
    %13 = vector.broadcast %cst_11 : f32 to vector<2x128xf32>
    %14 = arith.maximumf %12, %13 : vector<2x128xf32>
    %c0_12 = arith.constant 0 : index
    %c0_13 = arith.constant 0 : index
    %15 = vector.load %arg5[%c0_12, %c0_13] : memref<128x10xf32, #tpu.memory_space<vmem>>, vector<128x10xf32>
    %cst_14 = arith.constant dense<0.000000e+00> : vector<2x10xf32>
    %16 = tpu.matmul %14, %15, %cst_14 {dimension_numbers = #tpu.dot_dimension_numbers<[1], [0], [0], [1], [0, 0, 1, 1], [], []>} : vector<2x128xf32>, vector<128x10xf32>, vector<2x10xf32> -> vector<2x10xf32>
    %c0_15 = arith.constant 0 : index
    %c0_16 = arith.constant 0 : index
    %17 = vector.load %arg6[%c0_15, %c0_16] : memref<1x10xf32, #tpu.memory_space<vmem>>, vector<1x10xf32>
    %18 = vector.broadcast %17 : vector<1x10xf32> to vector<2x10xf32>
    %19 = arith.addf %16, %18 : vector<2x10xf32>
    %c0_17 = arith.constant 0 : index
    %c0_18 = arith.constant 0 : index
    %20 = vector.load %arg7[%c0_17, %c0_18] : memref<2x10xf32, #tpu.memory_space<vmem>>, vector<2x10xf32>
    tpu.vector_store %arg7[%c0_17, %c0_18], %19 {strides = array<i32>} : memref<2x10xf32, #tpu.memory_space<vmem>>, vector<2x10xf32>,
    return
  }
}

</mosaic_0001>

<bundles_post_ra>
// kernel: tile.28
= control target key start
LH: loop header
LB: loop body
LE: loop exit
PB: predicated region body
PF: predicated region fallthrough
CT: control target
= control target key end

     0   :  { %s40_s0 = inlined_call_operand.vmem [shape: f32[16], index: 0, kind: input, shape index: {}]   ;;  %s41_s1 = inlined_call_operand.vmem [shape: f32[32,16], index: 1, kind: output, shape index: {}]  }
   0x1   :  { %v4_v0 = vld [vmem:[%s40_s0] ss:$0 sm:$0xff] }
   0x2   :  { %5 = vst [vmem:[%s41_s1] sm:$0xff] %v4_v0  ;;  %12 = vst [vmem:[%s41_s1 + $0x8] sm:$0xff] %v4_v0 }
   0x3   :  { %13 = vst [vmem:[%s41_s1 + $0x10] sm:$0xff] %v4_v0  ;;  %14 = vst [vmem:[%s41_s1 + $0x18] sm:$0xff] %v4_v0 }

// kernel: tile.29
= control target key start
LH: loop header
LB: loop body
LE: loop exit
PB: predicated region body
PF: predicated region fallthrough
CT: control target
= control target key end

     0   :  { %s94_s8 = smov 112   ;;  %s95_s11 = smov 80   ;;  %vm3_vm0 = vcmask 130048   ;;  %vm9_vm1 = vcmask 1048448   ;;  %vm15_vm2 = vcmask 917248   ;;  %vm21_vm3 = vcmask 786048   ;;  %s147_s0 = inlined_call_operand.vmem [shape: f32[32,16], index: 0, kind: input, shape index: {}]   ;;  %s148_s1 = inlined_call_operand.vmem [shape: f32[1,512], index: 1, kind: output, shape index: {}]  }
   0x1   :  { %v77_v0 = vld [vmem:[%s147_s0 + $0x7] ss:$8 sm:$0xf]   ;;  %v79_v1 = vld [vmem:[%s147_s0 + $0x5] ss:$8 sm:$0xf]  }
   0x2   :  { %7 = vrot.lane.b32.xlu0 %v77_v0, %s94_s8  ;;  %19 = vrot.lane.b32.xlu1 %v79_v1, %s95_s11  ;;  %v78_v2 = vld [vmem:[%s147_s0 + $0x6] ss:$8 sm:$0xf]   ;;  %v80_v3 = vld [vmem:[%s147_s0 + $0x4] ss:$8 sm:$0xf]  }
   0x3   :  { %s96_s16 = smov 96   ;;  %v2_v4 = vld [vmem:[%s147_s0] ss:$8 sm:$0xf]   ;;  %s97_s19 = smov 64   ;;  %vm27_vm4 = vcmask 654848  }
   0x4   :  { %v81_v5 = vld [vmem:[%s147_s0 + $0x3] ss:$8 sm:$0xf]   ;;  %4 = vst.msk [vmem:[#allocation0] ss:$8 sm:$0xf] %vm3_vm0, %v2_v4  }
   0x5   :  { %v82_v6 = vld [vmem:[%s147_s0 + $0x2] ss:$8 sm:$0xf]   ;;  %s98_s24 = smov 48   ;;  %s99_s25 = smov 32   ;;  %vm33_vm5 = vcmask 523648  }
   0x6   :  { %13 = vrot.lane.b32.xlu0 %v78_v2, %s96_s16  ;;  %25 = vrot.lane.b32.xlu1 %v80_v3, %s97_s19  ;;  %v83_v7 = vld [vmem:[%s147_s0 + $0x1] ss:$8 sm:$0xf]   ;;  %s100_s0 = smov 16   ;;  %vm39_vm6 = vcmask 392448   ;;  %vm45_vm7 = vcmask 261248  }
   0xa   :  { %31 = vrot.lane.b32.xlu0 %v81_v5, %s98_s24  ;;  %37 = vrot.lane.b32.xlu1 %v82_v6, %s99_s25 }
   0xe   :  { %43 = vrot.lane.b32.xlu0 %v83_v7, %s100_s0 }
  0x74   :  { %v8_v8 = vpop.permute.xlu0 %7   ;;  %v20_v9 = vpop.permute.xlu1 %19  }
  0x75   :  { %10 = vst.msk [vmem:[#allocation0] ss:$8 sm:$0xf] %vm9_vm1, %v8_v8  }
  0x78   :  { %v14_v10 = vpop.permute.xlu0 %13   ;;  %v26_v11 = vpop.permute.xlu1 %25  }
  0x79   :  { %16 = vst.msk [vmem:[#allocation0] ss:$8 sm:$0xf] %vm15_vm2, %v14_v10  }
  0x7a   :  { %22 = vst.msk [vmem:[#allocation0] ss:$8 sm:$0xf] %vm21_vm3, %v20_v9  }
  0x7b   :  { %28 = vst.msk [vmem:[#allocation0] ss:$8 sm:$0xf] %vm27_vm4, %v26_v11  }
  0x7c   :  { %v32_v12 = vpop.permute.xlu0 %31   ;;  %v38_v13 = vpop.permute.xlu1 %37  }
  0x7d   :  { %34 = vst.msk [vmem:[#allocation0] ss:$8 sm:$0xf] %vm33_vm5, %v32_v12  }
  0x7e   :  { %40 = vst.msk [vmem:[#allocation0] ss:$8 sm:$0xf] %vm39_vm6, %v38_v13  }
  0x80   :  { %v44_v14 = vpop.permute.xlu0 %43  }
  0x81   :  { %46 = vst.msk [vmem:[#allocation0] ss:$8 sm:$0xf] %vm45_vm7, %v44_v14  }
  0x88   :  { %v51_v15 = vld [vmem:[#allocation0] sm:$0x1]  ;;  %v56_v16 = vld [vmem:[#allocation0 + $0x8] sm:$0x1]  ;;  %v62_v17 = vld [vmem:[#allocation0 + $0x10] sm:$0x1] }
  0x89   :  { %54 = vst [vmem:[%s148_s1] sm:$0x1] %v51_v15  ;;  %84 = vst [vmem:[%s148_s1 + $0x1] sm:$0x1] %v56_v16  ;;  %v69_v18 = vld [vmem:[#allocation0 + $0x18] sm:$0x1] }
  0x8a   :  { %85 = vst [vmem:[%s148_s1 + $0x2] sm:$0x1] %v62_v17  ;;  %86 = vst [vmem:[%s148_s1 + $0x3] sm:$0x1] %v69_v18 }

// kernel: tile.33
= control target key start
LH: loop header
LB: loop body
LE: loop exit
PB: predicated region body
PF: predicated region fallthrough
CT: control target
= control target key end

     0   :  { %s28_s0 = inlined_call_operand.vmem [shape: f32[24], index: 0, kind: input, shape index: {}]   ;;  %s29_s1 = inlined_call_operand.vmem [shape: f32[15,24], index: 1, kind: output, shape index: {}]  }
   0x1   :  { %v4_v0 = vld [vmem:[%s28_s0] ss:$0 sm:$0xff] }
   0x2   :  { %5 = vst [vmem:[%s29_s1] sm:$0xff] %v4_v0  ;;  %8 = vst [vmem:[%s29_s1 + $0x8] sm:$0xff] %v4_v0 }

// kernel: tile.34
= control target key start
LH: loop header
LB: loop body
LE: loop exit
PB: predicated region body
PF: predicated region fallthrough
CT: control target
= control target key end

     0   :  { %vm9_vm0 = vcmask 64512   ;;  %s166_s10 = smov 96   ;;  %vm13_vm1 = vcmask 130048   ;;  %s167_s19 = smov 120   ;;  %vm3_vm2 = vcmask 195584   ;;  %vm16_vm3 = vcmask 1048512   ;;  %s254_s0 = inlined_call_operand.vmem [shape: f32[15,24], index: 0, kind: input, shape index: {}]   ;;  %s255_s1 = inlined_call_operand.vmem [shape: f32[1,360], index: 1, kind: output, shape index: {}]  }
   0x1   :  { %v138_v0 = vld [vmem:[%s254_s0 + $0x4] sm:$0x1]   ;;  %v134_v1 = vld [vmem:[%s254_s0 + $0x5] sm:$0x1]   ;;  %v139_v3 = vld [vmem:[%s254_s0 + $0x9] sm:$0x1]  }
   0x2   :  { %34 = vrot.lane.b32.xlu1 %v138_v0, %s166_s10  ;;  %v135_v2 = vld [vmem:[%s254_s0 + $0x5] sm:$0x1]   ;;  %v136_v5 = vld [vmem:[%s254_s0 + $0xa] sm:$0x1]   ;;  %s168_s20 = smov 88   ;;  %s169_s23 = smov 112  }
   0x3   :  { %v10_v4 = vsel %vm9_vm0, %v135_v2, %v134_v1  ;;  %v137_v6 = vld [vmem:[%s254_s0 + $0xa] sm:$0x1]   ;;  %v141_v8 = vld [vmem:[%s254_s0 + $0x3] sm:$0x1]   ;;  %v140_v9 = vld [vmem:[%s254_s0 + $0xe] sm:$0x1]  }
   0x4   :  { %11 = vrot.lane.b32.xlu0 %v10_v4, %s167_s19  ;;  %v23_v7 = vsel %vm13_vm1, %v137_v6, %v136_v5  ;;  %v2_v10 = vld [vmem:[%s254_s0] sm:$0x1]   ;;  %s170_s28 = smov 72   ;;  %v143_v11 = vld [vmem:[%s254_s0 + $0xd] sm:$0x1]   ;;  %s171_s2 = smov 80  }
   0x5   :  { %4 = vst.msk [vmem:[#allocation0] sm:$0x1] %vm3_vm2, %v2_v10   ;;  %v142_v12 = vld [vmem:[%s254_s0 + $0x8] sm:$0x1]   ;;  %s172_s5 = smov 56   ;;  %s173_s8 = smov 64  }
   0x6   :  { %40 = vrot.lane.b32.xlu1 %v139_v3, %s168_s20  ;;  %v145_v13 = vld [vmem:[%s254_s0 + $0x7] sm:$0x1]   ;;  %v144_v14 = vld [vmem:[%s254_s0 + $0x2] sm:$0x1]   ;;  %s174_s11 = smov 40   ;;  %s175_s14 = smov 48  }
   0x7   :  { %v147_v15 = vld [vmem:[%s254_s0 + $0x1] sm:$0x1]   ;;  %v146_v16 = vld [vmem:[%s254_s0 + $0xc] sm:$0x1]   ;;  %s176_s17 = smov 24   ;;  %s177_s20 = smov 32  }
   0x8   :  { %24 = vrot.lane.b32.xlu0 %v23_v7, %s169_s23  ;;  %v149_v17 = vld [vmem:[%s254_s0 + $0xb] sm:$0x1]   ;;  %v148_v18 = vld [vmem:[%s254_s0 + $0x6] sm:$0x1]   ;;  %s178_s0 = smov 8   ;;  %s179_s23 = smov 16  }
   0x9   :  { %vm36_vm4 = vcmask 982784   ;;  %vm29_vm5 = vcmask 1048448   ;;  %vm42_vm6 = vcmask 917184   ;;  %vm56_vm7 = vcmask 785984  }
   0xa   :  { %54 = vrot.lane.b32.xlu1 %v141_v8, %s170_s28  ;;  %vm49_vm8 = vcmask 851584   ;;  %vm69_vm9 = vcmask 654784   ;;  %vm62_vm10 = vcmask 720384   ;;  %vm82_vm11 = vcmask 523584  }
   0xb   :  { %vm76_vm12 = vcmask 589184   ;;  %vm96_vm13 = vcmask 392384   ;;  %vm89_vm14 = vcmask 457984   ;;  %vm109_vm15 = vcmask 261184  }
   0xc   :  { %47 = vrot.lane.b32.xlu0 %v140_v9, %s171_s2 }
   0xe   :  { %67 = vrot.lane.b32.xlu1 %v143_v11, %s172_s5 }
  0x10   :  { %60 = vrot.lane.b32.xlu0 %v142_v12, %s173_s8 }
  0x12   :  { %80 = vrot.lane.b32.xlu1 %v145_v13, %s174_s11 }
  0x14   :  { %74 = vrot.lane.b32.xlu0 %v144_v14, %s175_s14 }
  0x16   :  { %94 = vrot.lane.b32.xlu1 %v147_v15, %s176_s17 }
  0x18   :  { %87 = vrot.lane.b32.xlu0 %v146_v16, %s177_s20 }
  0x1a   :  { %107 = vrot.lane.b32.xlu1 %v149_v17, %s178_s0 }
  0x1c   :  { %100 = vrot.lane.b32.xlu0 %v148_v18, %s179_s23 }
  0x74   :  { %v35_v19 = vpop.permute.xlu1 %34  }
  0x76   :  { %v12_v20 = vpop.permute.xlu0 %11  }
  0x77   :  { %15 = vst.msk [vmem:[#allocation0 + $0x8] sm:$0x1] %vm13_vm1, %v12_v20  }
  0x78   :  { %17 = vst.msk [vmem:[#allocation0] sm:$0x1] %vm16_vm3, %v12_v20   ;;  %v41_v21 = vpop.permute.xlu1 %40  }
  0x79   :  { %37 = vst.msk [vmem:[#allocation0] sm:$0x1] %vm36_vm4, %v35_v19  }
  0x7a   :  { %v25_v22 = vpop.permute.xlu0 %24  }
  0x7b   :  { %28 = vst.msk [vmem:[#allocation0 + $0x10] sm:$0x1] %vm9_vm0, %v25_v22   ;;  %vm102_vm0 = vcmask 326784  }
  0x7c   :  { %31 = vst.msk [vmem:[#allocation0 + $0x8] sm:$0x1] %vm29_vm5, %v25_v22   ;;  %v55_v23 = vpop.permute.xlu1 %54  }
  0x7d   :  { %44 = vst.msk [vmem:[#allocation0 + $0x8] sm:$0x1] %vm42_vm6, %v41_v21  }
  0x7e   :  { %57 = vst.msk [vmem:[#allocation0] sm:$0x1] %vm56_vm7, %v55_v23   ;;  %v48_v24 = vpop.permute.xlu0 %47  }
  0x7f   :  { %51 = vst.msk [vmem:[#allocation0 + $0x10] sm:$0x1] %vm49_vm8, %v48_v24  }
  0x80   :  { %v68_v25 = vpop.permute.xlu1 %67  }
  0x81   :  { %71 = vst.msk [vmem:[#allocation0 + $0x10] sm:$0x1] %vm69_vm9, %v68_v25  }
  0x82   :  { %v61_v26 = vpop.permute.xlu0 %60  }
  0x83   :  { %64 = vst.msk [vmem:[#allocation0 + $0x8] sm:$0x1] %vm62_vm10, %v61_v26  }
  0x84   :  { %v81_v27 = vpop.permute.xlu1 %80  }
  0x85   :  { %84 = vst.msk [vmem:[#allocation0 + $0x8] sm:$0x1] %vm82_vm11, %v81_v27  }
  0x86   :  { %v75_v28 = vpop.permute.xlu0 %74  }
  0x87   :  { %77 = vst.msk [vmem:[#allocation0] sm:$0x1] %vm76_vm12, %v75_v28  }
  0x88   :  { %v95_v29 = vpop.permute.xlu1 %94  }
  0x89   :  { %97 = vst.msk [vmem:[#allocation0] sm:$0x1] %vm96_vm13, %v95_v29  }
  0x8a   :  { %v88_v30 = vpop.permute.xlu0 %87  }
  0x8b   :  { %91 = vst.msk [vmem:[#allocation0 + $0x10] sm:$0x1] %vm89_vm14, %v88_v30  }
  0x8c   :  { %v108_v31 = vpop.permute.xlu1 %107  }
  0x8d   :  { %111 = vst.msk [vmem:[#allocation0 + $0x10] sm:$0x1] %vm109_vm15, %v108_v31  }
  0x8e   :  { %v101_v32 = vpop.permute.xlu0 %100  }
  0x8f   :  { %104 = vst.msk [vmem:[#allocation0 + $0x8] sm:$0x1] %vm102_vm0, %v101_v32  }
  0x90   :  { %v116_v33 = vld [vmem:[#allocation0] sm:$0x1] }
  0x91   :  { %119 = vst [vmem:[%s255_s1] sm:$0x1] %v116_v33 }
  0x94   :  { %v127_v34 = vld [vmem:[#allocation0 + $0x10] sm:$0x1] }
  0x95   :  { %151 = vst [vmem:[%s255_s1 + $0x2] sm:$0x1] %v127_v34 }
  0x96   :  { %v121_v35 = vld [vmem:[#allocation0 + $0x8] sm:$0x1] }
  0x97   :  { %150 = vst [vmem:[%s255_s1 + $0x1] sm:$0x1] %v121_v35 }

// kernel: tile.38
= control target key start
LH: loop header
LB: loop body
LE: loop exit
PB: predicated region body
PF: predicated region fallthrough
CT: control target
= control target key end

     0   :  { %s22_s0 = inlined_call_operand.vmem [shape: f32[32], index: 0, kind: input, shape index: {}]   ;;  %s23_s1 = inlined_call_operand.vmem [shape: f32[7,32], index: 1, kind: output, shape index: {}]  }
   0x1   :  { %v4_v0 = vld [vmem:[%s22_s0] ss:$0 sm:$0xff] }
   0x2   :  { %5 = vst [vmem:[%s23_s1] sm:$0xff] %v4_v0 }

// kernel: tile.39
= control target key start
LH: loop header
LB: loop body
LE: loop exit
PB: predicated region body
PF: predicated region fallthrough
CT: control target
= control target key end

     0   :  { %s13_s8 = smov 3  ;;  %s47_s9 = smov 96   ;;  %vm4_vm0 = vcmask 261120   ;;  %vm10_vm1 = vcmask 1048320   ;;  %vm17_vm2 = vcmask 785920   ;;  %vm24_vm3 = vcmask 523520   ;;  %s78_s0 = inlined_call_operand.vmem [shape: f32[7,32], index: 0, kind: input, shape index: {}]   ;;  %s79_s1 = inlined_call_operand.vmem [shape: f32[1,224], index: 1, kind: output, shape index: {}]  }
   0x1   :  { %v40_v0 = vld [vmem:[%s78_s0 + $0x3] sm:$0x1]   ;;  %s20_s10 = smov 3  ;;  %v41_v1 = vld [vmem:[%s78_s0 + $0x2] ss:$4 sm:%s13_s8]   ;;  %s2_s15 = smov 3 }
   0x2   :  { %8 = vrot.lane.b32.xlu0 %v40_v0, %s47_s9  ;;  %v42_v2 = vld [vmem:[%s78_s0 + $0x1] ss:$4 sm:%s20_s10]   ;;  %s48_s16 = smov 32  }
   0x3   :  { %22 = vrot.lane.b32.xlu1 %v42_v2, %s48_s16  ;;  %v3_v3 = vld [vmem:[%s78_s0] ss:$4 sm:%s2_s15]   ;;  %s49_s0 = smov 64  }
   0x4   :  { %5 = vst.msk [vmem:[#allocation0] ss:$8 sm:$0x3] %vm4_vm0, %v3_v3  }
   0x6   :  { %15 = vrot.lane.b32.xlu0 %v41_v1, %s49_s0 }
  0x74   :  { %v9_v4 = vpop.permute.xlu0 %8  }
  0x75   :  { %11 = vst.msk [vmem:[#allocation0] sm:$0x1] %vm10_vm1, %v9_v4   ;;  %v23_v5 = vpop.permute.xlu1 %22  }
  0x78   :  { %v16_v6 = vpop.permute.xlu0 %15  }
  0x79   :  { %18 = vst.msk [vmem:[#allocation0] ss:$8 sm:$0x3] %vm17_vm2, %v16_v6  }
  0x7a   :  { %25 = vst.msk [vmem:[#allocation0] ss:$8 sm:$0x3] %vm24_vm3, %v23_v5  }
  0x81   :  { %v30_v7 = vld [vmem:[#allocation0] sm:$0x1]  ;;  %v35_v8 = vld [vmem:[#allocation0 + $0x8] sm:$0x1] }
  0x82   :  { %33 = vst [vmem:[%s79_s1] sm:$0x1] %v30_v7  ;;  %43 = vst [vmem:[%s79_s1 + $0x1] sm:$0x1] %v35_v8 }

// kernel: alexnet_getter_forward.3
= control target key start
LH: loop header
LB: loop body
LE: loop exit
PB: predicated region body
PF: predicated region fallthrough
CT: control target
= control target key end

     0   :  { %v76_v3 = vlaneseq  ;;  %v623_v5 = vmov 0.0   ;;  %v624_v6 = vmov 1983009808   ;;  %vm625_vm0 = vmmov 0   ;;  %s933_s0 = inlined_call_operand.vmem [shape: f32[2,288], index: 0, kind: input, shape index: {}]   ;;  %s934_s1 = inlined_call_operand.vmem [shape: f32[288,128], index: 1, kind: input, shape index: {}]   ;;  %s935_s2 = inlined_call_operand.vmem [shape: f32[1,128], index: 2, kind: input, shape index: {}]   ;;  %s936_s3 = inlined_call_operand.vmem [shape: f32[128,128], index: 3, kind: input, shape index: {}]   ;;  %s937_s4 = inlined_call_operand.vmem [shape: f32[1,128], index: 4, kind: input, shape index: {}]   ;;  %s938_s5 = inlined_call_operand.vmem [shape: f32[128,10], index: 5, kind: input, shape index: {}]   ;;  %s939_s6 = inlined_call_operand.vmem [shape: f32[1,10], index: 6, kind: input, shape index: {}]   ;;  %s940_s7 = inlined_call_operand.hbm [shape: f32[2,10], index: 7, kind: output, shape index: {}]  }
   0x1   :  { %v59_v0 = vld [vmem:[%s934_s1 + $0xf8] sm:$0xff]  ;;  %v58_v2 = vld [vmem:[%s934_s1 + $0xf0] sm:$0xff]  ;;  %515 = vmatprep.subr.mxu1 %v623_v5  ;;  %v74_v7 = vunpack.c.l.s4 %v624_v6  ;;  %v57_v8 = vld [vmem:[%s934_s1 + $0xe8] sm:$0xff]  ;;  %523 = vmatprep.mubr.msk.f32.mxu1 %vm625_vm0, %v623_v5 }
   0x2   :  { %v43_v1 = vld [vmem:[%s934_s1 + $0x78] sm:$0xff]  ;;  %441 = vmatprep.subr.mxu0 %v59_v0  ;;  %v42_v4 = vld [vmem:[%s934_s1 + $0x70] sm:$0xff]  ;;  %v41_v9 = vld [vmem:[%s934_s1 + $0x68] sm:$0xff]  ;;  %v77_v12 = vshrl.u32 %v76_v3, 7 }
   0x3   :  { %442 = vmatpush3.msra.mxu0 %v43_v1  ;;  %v56_v10 = vld [vmem:[%s934_s1 + $0xe0] sm:$0xff]  ;;  %v75_v11 = vunpack.c.0.s8 %v74_v7  ;;  %v55_v14 = vld [vmem:[%s934_s1 + $0xd8] sm:$0xff]  ;;  %v54_v16 = vld [vmem:[%s934_s1 + $0xd0] sm:$0xff] }
   0x4   :  { %443 = vmatprep.subr.mxu0 %v58_v2  ;;  %v40_v13 = vld [vmem:[%s934_s1 + $0x60] sm:$0xff]  ;;  %v39_v15 = vld [vmem:[%s934_s1 + $0x58] sm:$0xff]  ;;  %v38_v18 = vld [vmem:[%s934_s1 + $0x50] sm:$0xff] }
   0x5   :  { %444 = vmatpush3.msra.mxu0 %v42_v4  ;;  %v78_v17 = vsub.s32 %v75_v11, %v77_v12  ;;  %v53_v19 = vld [vmem:[%s934_s1 + $0xc8] sm:$0xff]  ;;  %v63_v20 = vld [vmem:[%s934_s1 + $0x118] sm:$0xff]  ;;  %v27_v22 = vld [vmem:[%s933_s0] sm:$0x3f] }
   0x6   :  { %445 = vmatprep.subr.mxu0 %v57_v8  ;;  %v37_v21 = vld [vmem:[%s934_s1 + $0x48] sm:$0xff]  ;;  %516 = vmatpush3.msra.mxu1 %v63_v20  ;;  %v62_v23 = vld [vmem:[%s934_s1 + $0x110] sm:$0xff]  ;;  %v52_v24 = vld [vmem:[%s934_s1 + $0xc0] sm:$0xff]  ;;  %v72_v25 = vcombine.high %v27_v22, %v27_v22 }
   0x7   :  { %446 = vmatpush3.msra.mxu0 %v41_v9  ;;  %517 = vmatprep.subr.mxu1 %v623_v5  ;;  %v725_v26 = vrot.slane %v27_v22, %v78_v17  ;;  %v61_v27 = vld [vmem:[%s934_s1 + $0x108] sm:$0xff]  ;;  %v36_v28 = vld [vmem:[%s934_s1 + $0x40] sm:$0xff]  ;;  %v51_v29 = vld [vmem:[%s934_s1 + $0xb8] sm:$0xff] }
   0x8   :  { %447 = vmatprep.subr.mxu0 %v56_v10  ;;  %518 = vmatpush3.msra.mxu1 %v62_v23  ;;  %v35_v31 = vld [vmem:[%s934_s1 + $0x38] sm:$0xff]  ;;  %v86_v32 = vrot.slane %v72_v25, %v78_v17  ;;  %v60_v33 = vld [vmem:[%s934_s1 + $0x100] sm:$0xff] }
   0x9   :  { %448 = vmatpush3.msra.mxu0 %v40_v13  ;;  %v87_v30 = vcombine.high %v725_v26, %v725_v26  ;;  %519 = vmatprep.subr.mxu1 %v623_v5 }
   0xa   :  { %449 = vmatprep.subr.mxu0 %v55_v14  ;;  %520 = vmatpush3.msra.mxu1 %v61_v27 }
   0xb   :  { %450 = vmatpush3.msra.mxu0 %v39_v15 }
   0xc   :  { %451 = vmatprep.subr.mxu0 %v54_v16 }
   0xd   :  { %452 = vmatpush3.msra.mxu0 %v38_v18 }
   0xe   :  { %453 = vmatprep.subr.mxu0 %v53_v19 }
   0xf   :  { %454 = vmatpush3.msra.mxu0 %v37_v21 }
  0x10   :  { %455 = vmatprep.subr.mxu0 %v52_v24 }
  0x11   :  { %12 = vsyncpa [#allocation3], 0  ;;  %456 = vmatpush3.msra.mxu0 %v36_v28  ;;  %v50_v34 = vld [vmem:[%s934_s1 + $0xb0] sm:$0xff]  ;;  %157 = vmatprep.mubr.f32.mxu0 %v87_v30  ;;  %vm90_vm1 = vcmask 261120   ;;  %v49_v36 = vld [vmem:[%s934_s1 + $0xa8] sm:$0xff]  ;;  %s626_s19 = smov [#allocation2]  }
  0x12   :  { %457 = vmatprep.subr.mxu0 %v51_v29  ;;  %v34_v35 = vld [vmem:[%s934_s1 + $0x30] sm:$0xff]  ;;  %521 = vmatprep.subr.mxu1 %v623_v5  ;;  %v249_v37 = vld [vmem:[%s936_s3 + $0x78] sm:$0xff]  ;;  %v33_v38 = vld [vmem:[%s934_s1 + $0x28] sm:$0xff]  ;;  %s429_s20 = sshll.u32 %s626_s19, 4  ;;  %vm421_vm2 = vcmask 74752   ;;  %s430_s20 = int_to_ptr.vmem [resolvable:$true] %s429_s20 }
  0x13   :  { %458 = vmatpush3.msra.mxu0 %v35_v31  ;;  %522 = vmatpush3.msra.mxu1 %v60_v33  ;;  %v48_v39 = vld [vmem:[%s934_s1 + $0xa0] sm:$0xff]  ;;  %v248_v40 = vld [vmem:[%s936_s3 + $0x70] sm:$0xff]  ;;  %v47_v42 = vld [vmem:[%s934_s1 + $0x98] sm:$0xff]  ;;  %p606_p1 = scmp.lt.s32.totalorder %s430_s20, %s430_s20 }
  0x14   :  { %459 = vmatprep.subr.mxu0 %v50_v34  ;;  %524 = vmatmul.mubr.msk.f32.vlgmr.msra.gmra.mxu1 %vm90_vm1, %v86_v32  ;;  %v32_v41 = vld [vmem:[%s934_s1 + $0x20] sm:$0xff]  ;;  %v247_v43 = vld [vmem:[%s936_s3 + $0x68] sm:$0xff]  ;;  %v31_v44 = vld [vmem:[%s934_s1 + $0x18] sm:$0xff] }
  0x15   :  { %460 = vmatpush3.msra.mxu0 %v34_v35  ;;  %526 = vmatprep.subr.mxu1 %v623_v5  ;;  %v46_v45 = vld [vmem:[%s934_s1 + $0x90] sm:$0xff]  ;;  %v246_v46 = vld [vmem:[%s936_s3 + $0x60] sm:$0xff]  ;;  %v45_v48 = vld [vmem:[%s934_s1 + $0x88] sm:$0xff] }
  0x16   :  { %461 = vmatprep.subr.mxu0 %v49_v36  ;;  %527 = vmatpush3.msra.mxu1 %v249_v37  ;;  %v30_v47 = vld [vmem:[%s934_s1 + $0x10] sm:$0xff]  ;;  %v245_v49 = vld [vmem:[%s936_s3 + $0x58] sm:$0xff]  ;;  %v29_v50 = vld [vmem:[%s934_s1 + $0x8] sm:$0xff] }
  0x17   :  { %462 = vmatpush3.msra.mxu0 %v33_v38  ;;  %528 = vmatprep.subr.mxu1 %v623_v5  ;;  %v44_v51 = vld [vmem:[%s934_s1 + $0x80] sm:$0xff]  ;;  %v244_v52 = vld [vmem:[%s936_s3 + $0x50] sm:$0xff]  ;;  %v243_v54 = vld [vmem:[%s936_s3 + $0x48] sm:$0xff] }
  0x18   :  { %463 = vmatprep.subr.mxu0 %v48_v39  ;;  %529 = vmatpush3.msra.mxu1 %v248_v40  ;;  %v28_v53 = vld [vmem:[%s934_s1] sm:$0xff]  ;;  %v241_v56 = vld [vmem:[%s936_s3 + $0x38] sm:$0xff]  ;;  %v240_v57 = vld [vmem:[%s936_s3 + $0x30] sm:$0xff] }
  0x19   :  { %464 = vmatpush3.msra.mxu0 %v32_v41  ;;  %530 = vmatprep.subr.mxu1 %v623_v5  ;;  %v242_v55 = vld [vmem:[%s936_s3 + $0x40] sm:$0xff]  ;;  %v239_v58 = vld [vmem:[%s936_s3 + $0x28] sm:$0xff]  ;;  %v237_v60 = vld [vmem:[%s936_s3 + $0x18] sm:$0xff] }
  0x1a   :  { %465 = vmatprep.subr.mxu0 %v47_v42  ;;  %531 = vmatpush3.msra.mxu1 %v247_v43  ;;  %v238_v59 = vld [vmem:[%s936_s3 + $0x20] sm:$0xff]  ;;  %v236_v61 = vld [vmem:[%s936_s3 + $0x10] sm:$0xff]  ;;  %v235_v62 = vld [vmem:[%s936_s3 + $0x8] sm:$0xff] }
  0x1b   :  { %466 = vmatpush3.msra.mxu0 %v31_v44  ;;  %532 = vmatprep.subr.mxu1 %v623_v5  ;;  %v234_v63 = vld [vmem:[%s936_s3] sm:$0xff]  ;;  %v343_v0 = vld [vmem:[%s938_s5 + $0x78] sm:$0xff]  ;;  %v342_v1 = vld [vmem:[%s938_s5 + $0x70] sm:$0xff] }
  0x1c   :  { %467 = vmatprep.subr.mxu0 %v46_v45  ;;  %533 = vmatpush3.msra.mxu1 %v246_v46  ;;  %v341_v2 = vld [vmem:[%s938_s5 + $0x68] sm:$0xff]  ;;  %v340_v3 = vld [vmem:[%s938_s5 + $0x60] sm:$0xff]  ;;  %v339_v4 = vld [vmem:[%s938_s5 + $0x58] sm:$0xff] }
  0x1d   :  { %468 = vmatpush3.msra.mxu0 %v30_v47  ;;  %534 = vmatprep.subr.mxu1 %v623_v5  ;;  %v338_v6 = vld [vmem:[%s938_s5 + $0x50] sm:$0xff]  ;;  %v337_v7 = vld [vmem:[%s938_s5 + $0x48] sm:$0xff]  ;;  %v336_v8 = vld [vmem:[%s938_s5 + $0x40] sm:$0xff] }
  0x1e   :  { %469 = vmatprep.subr.mxu0 %v45_v48  ;;  %535 = vmatpush3.msra.mxu1 %v245_v49  ;;  %v335_v9 = vld [vmem:[%s938_s5 + $0x38] sm:$0xff]  ;;  %v334_v10 = vld [vmem:[%s938_s5 + $0x30] sm:$0xff]  ;;  %v333_v11 = vld [vmem:[%s938_s5 + $0x28] sm:$0xff] }
  0x1f   :  { %470 = vmatpush3.msra.mxu0 %v29_v50  ;;  %536 = vmatprep.subr.mxu1 %v623_v5  ;;  %v332_v12 = vld [vmem:[%s938_s5 + $0x20] sm:$0xff]  ;;  %v331_v13 = vld [vmem:[%s938_s5 + $0x18] sm:$0xff]  ;;  %v330_v23 = vld [vmem:[%s938_s5 + $0x10] sm:$0xff] }
  0x20   :  { %471 = vmatprep.subr.mxu0 %v44_v51  ;;  %537 = vmatpush3.msra.mxu1 %v244_v52  ;;  %v437_v18 = vld [vmem:[%s935_s2] ss:$0 sm:$0xff]  ;;  %v329_v24 = vld [vmem:[%s938_s5 + $0x8] sm:$0xff] }
  0x21   :  { %472 = vmatpush3.msra.mxu0 %v28_v53  ;;  %538 = vmatprep.subr.mxu1 %v623_v5  ;;  %v328_v25 = vld [vmem:[%s938_s5] sm:$0xff]  ;;  %s601_s5 = scalar_lea.vmem %s430_s20, 32 }
  0x22   :  { %158 = vmatmul.mubr.f32.vlgmr.msra.gmra.mxu0 %v725_v26  ;;  %539 = vmatpush3.msra.mxu1 %v243_v54  ;;  %v439_v26 = vld [vmem:[%s937_s4] ss:$0 sm:$0xff]  ;;  %p602_p0 = scmp.ne.s32.totalorder %s430_s20, %s601_s5  ;;  %p607_p2 = scmp.lt.s32.totalorder %s601_s5, %s601_s5 }
  0x23   :  { %540 = vmatprep.subr.mxu1 %v623_v5  ;;  %558 = vmatprep.mubr.msk.f32.mxu1 %vm625_vm0, %v623_v5  ;;  %v440_v31 = vld [vmem:[%s939_s6] ss:$0 sm:$0xff] }
  0x24   :  { %541 = vmatpush3.msra.mxu1 %v242_v55  ;;  %561 = vmatprep.subr.mxu0 %v623_v5  ;;  %p608_p3 = por %p607_p2, %p606_p1 }
  0x25   :  { %542 = vmatprep.subr.mxu1 %v623_v5  ;;  %593 = vmatprep.mubr.msk.f32.mxu0 %vm625_vm0, %v623_v5 }
  0x26   :  { %543 = vmatpush3.msra.mxu1 %v241_v56  ;;  %562 = vmatpush3.msra.mxu0 %v343_v0  ;;  %p609_p4 = pnand %p608_p3, %p602_p0 }
  0x27   :  { %544 = vmatprep.subr.mxu1 %v623_v5  ;;  %563 = vmatprep.subr.mxu0 %v623_v5 }
  0x28   :  { %545 = vmatpush3.msra.mxu1 %v240_v57  ;;  %564 = vmatpush3.msra.mxu0 %v342_v1 }
  0x29   :  { %546 = vmatprep.subr.mxu1 %v623_v5  ;;  %565 = vmatprep.subr.mxu0 %v623_v5 }
  0x2a   :  { %547 = vmatpush3.msra.mxu1 %v239_v58  ;;  %566 = vmatpush3.msra.mxu0 %v341_v2 }
  0x2b   :  { %548 = vmatprep.subr.mxu1 %v623_v5  ;;  %567 = vmatprep.subr.mxu0 %v623_v5 }
  0x2c   :  { %549 = vmatpush3.msra.mxu1 %v238_v59  ;;  %568 = vmatpush3.msra.mxu0 %v340_v3 }
  0x2d   :  { %550 = vmatprep.subr.mxu1 %v623_v5  ;;  %569 = vmatprep.subr.mxu0 %v623_v5 }
  0x2e   :  { %551 = vmatpush3.msra.mxu1 %v237_v60  ;;  %570 = vmatpush3.msra.mxu0 %v339_v4 }
  0x2f   :  { %552 = vmatprep.subr.mxu1 %v623_v5  ;;  %571 = vmatprep.subr.mxu0 %v623_v5 }
  0x30   :  { %553 = vmatpush3.msra.mxu1 %v236_v61  ;;  %572 = vmatpush3.msra.mxu0 %v338_v6 }
  0x31   :  { %554 = vmatprep.subr.mxu1 %v623_v5  ;;  %573 = vmatprep.subr.mxu0 %v623_v5 }
  0x32   :  { %555 = vmatpush3.msra.mxu1 %v235_v62  ;;  %574 = vmatpush3.msra.mxu0 %v337_v7 }
  0x33   :  { %556 = vmatprep.subr.mxu1 %v623_v5  ;;  %575 = vmatprep.subr.mxu0 %v623_v5 }
  0x34   :  { %557 = vmatpush3.msra.mxu1 %v234_v63  ;;  %576 = vmatpush3.msra.mxu0 %v336_v8 }
  0x35   :  { %577 = vmatprep.subr.mxu0 %v623_v5 }
  0x36   :  { %578 = vmatpush3.msra.mxu0 %v335_v9 }
  0x37   :  { %579 = vmatprep.subr.mxu0 %v623_v5 }
  0x38   :  { %580 = vmatpush3.msra.mxu0 %v334_v10 }
  0x39   :  { %581 = vmatprep.subr.mxu0 %v623_v5 }
  0x3a   :  { %582 = vmatpush3.msra.mxu0 %v333_v11 }
  0x3b   :  { %583 = vmatprep.subr.mxu0 %v623_v5 }
  0x3c   :  { %584 = vmatpush3.msra.mxu0 %v332_v12 }
  0x3d   :  { %585 = vmatprep.subr.mxu0 %v623_v5 }
  0x3e   :  { %586 = vmatpush3.msra.mxu0 %v331_v13 }
  0x3f   :  { %587 = vmatprep.subr.mxu0 %v623_v5 }
  0x40   :  { %588 = vmatpush3.msra.mxu0 %v330_v23 }
  0x41   :  { %589 = vmatprep.subr.mxu0 %v623_v5 }
  0x42   :  { %590 = vmatpush3.msra.mxu0 %v329_v24 }
  0x43   :  { %591 = vmatprep.subr.mxu0 %v623_v5 }
  0x44   :  { %592 = vmatpush3.msra.mxu0 %v328_v25 }
  0xd4   :  { %v229_v14 = vpop.f32.mrf.mxu1 }
  0xd6   :  { %v525_v15 = vpop.f32.mrf.mxu1 }
  0xe2   :  { %v473_v16 = vpop.f32.mrf.mxu0 }
  0xe4   :  { %v474_v17 = vpop.f32.mrf.mxu0 }
  0xe5   :  { %v475_v19 = vadd.f32 %v474_v17, %v473_v16 }
  0xe7   :  { %v160_v20 = vadd.f32 %v475_v19, %v437_v18 }
  0xe9   :  { %v230_v21 = vadd.f32 %v229_v14, %v160_v20 }
  0xeb   :  { %v233_v22 = vmax.f32 %v230_v21, 0.0 }
  0xed   :  { %559 = vmatmul.mubr.f32.vlgmr.msra.gmra.mxu1 %v233_v22 }
 0x1ad   :  { %v323_v27 = vpop.f32.mrf.mxu1 }
 0x1ae   :  { %v324_v28 = vadd.f32 %v439_v26, %v323_v27 }
 0x1af   :  { %v560_v29 = vpop.f32.mrf.mxu1 }
 0x1b0   :  { %v327_v30 = vmax.f32 %v324_v28, 0.0 }
 0x1b2   :  { %594 = vmatmul.mubr.f32.vlgmr.msra.gmra.mxu0 %v327_v30 }
 0x272   :  { %v417_v5 = vpop.f32.mrf.mxu0 }
 0x273   :  { %v418_v32 = vadd.f32 %v440_v31, %v417_v5 }
 0x274   :  { %v595_v33 = vpop.f32.mrf.mxu0 }
 0x275   :  { %422 = vst.msk [vmem:[#allocation2] sm:$0x3] %vm421_vm2, %v418_v32 }
 0x276   :  { %612 = shalt.err (!%p609_p4)
}
 0x277   :  { %432 = dma.vmem_to_hbm [thread:$0]  %s430_s20, 32, %s940_s7, [#allocation3]  }
 0x278   :  { %621 = dma.done.wait [#allocation3], 32  }
 0x279   :  { %622 = vsyncadd [#allocation3], 4294967264 }
 0x27a   :  { %436 = vsyncpa [#allocation3], 1 }

// kernel: alexnet_getter_forward.2
= control target key start
LH: loop header
LB: loop body
LE: loop exit
PB: predicated region body
PF: predicated region fallthrough
CT: control target
= control target key end

     0   :  { %v19954_v3 = vmov 0.0   ;;  %vm545_vm0 = vcmask 523264   ;;  %vm3079_vm1 = vcmask 1045504   ;;  %vm3066_vm2 = vcmask 244736   ;;  %s19921_s0 = inlined_call_operand.vmem [shape: f32[128,192], index: 0, kind: input, shape index: {}]   ;;  %s19922_s2 = inlined_call_operand.vmem [shape: f32[3,64,128], index: 2, kind: input, shape index: {}]   ;;  %s19923_s1 = inlined_call_operand.vmem [shape: f32[3,192,512], index: 1, kind: input, shape index: {}]   ;;  %s19924_s4 = inlined_call_operand.vmem [shape: f32[3,512,240], index: 4, kind: input, shape index: {}]   ;;  %s19925_s3 = inlined_call_operand.vmem [shape: f32[1,512], index: 3, kind: input, shape index: {}]   ;;  %s19926_s5 = inlined_call_operand.vmem [shape: f32[3,30,64], index: 5, kind: input, shape index: {}]   ;;  %s19927_s7 = inlined_call_operand.vmem [shape: f32[5,30,30], index: 7, kind: input, shape index: {}]   ;;  %s19928_s6 = inlined_call_operand.vmem [shape: f32[5,240,360], index: 6, kind: input, shape index: {}]   ;;  %s19929_s9 = inlined_call_operand.vmem [shape: f32[3,360,168], index: 9, kind: input, shape index: {}]   ;;  %s19930_s8 = inlined_call_operand.vmem [shape: f32[1,360], index: 8, kind: input, shape index: {}]   ;;  %s19931_s11 = inlined_call_operand.vmem [shape: f32[3,168,224], index: 11, kind: input, shape index: {}]   ;;  %s19932_s10 = inlined_call_operand.vmem [shape: f32[3,14,30], index: 10, kind: input, shape index: {}]   ;;  %s19933_s12 = inlined_call_operand.vmem [shape: f32[3,14,14], index: 12, kind: input, shape index: {}, may-alias: {12,15,18}]   ;;  %s19934_s14 = inlined_call_operand.vmem [shape: f32[3,224,224], index: 14, kind: input, shape index: {}]   ;;  %s19935_s13 = inlined_call_operand.vmem [shape: f32[1,224], index: 13, kind: input, shape index: {}]   ;;  %s19936_s15 = inlined_call_operand.vmem [shape: f32[3,14,14], index: 15, kind: input, shape index: {}, may-alias: {12,15,18}]   ;;  %s19937_s17 = inlined_call_operand.vmem [shape: f32[3,224,224], index: 17, kind: input, shape index: {}]   ;;  %s19938_s16 = inlined_call_operand.vmem [shape: f32[1,224], index: 16, kind: input, shape index: {}]   ;;  %s19939_s18 = inlined_call_operand.vmem [shape: f32[3,14,14], index: 18, kind: input, shape index: {}, may-alias: {12,15,18}]   ;;  %s19940_s20 = inlined_call_operand.vmem [shape: f32[3,224,96], index: 20, kind: input, shape index: {}]   ;;  %s19941_s19 = inlined_call_operand.vmem [shape: f32[1,224], index: 19, kind: input, shape index: {}]   ;;  %s19942_s21 = inlined_call_operand.vmem [shape: f32[3,6,14], index: 21, kind: input, shape index: {}]   ;;  %s19943_s23 = inlined_call_operand.vmem [shape: f32[3,96,288], index: 23, kind: input, shape index: {}]   ;;  %s19944_s22 = inlined_call_operand.vmem [shape: f32[3,2,6], index: 22, kind: input, shape index: {}]   ;;  %s19945_s24 = inlined_call_operand.vmem [shape: f32[2,288], index: 24, kind: output, shape index: {}]  }
   0x1   :  { %19968 = sst [smem:[#allocation29_spill]] %s19921_s0  ;;  %399 = vmatprep.mubr.f32.mxu1 %v19954_v3  ;;  %181 = vmatprep.mubr.f32.mxu0 %v19954_v3  ;;  %vm3462_vm3 = vcmask 916480   ;;  %vm5151_vm4 = vcmask 850944   ;;  %vm6169_vm5 = vcmask 113664   ;;  %vm6430_vm6 = vcmask 326656  }
   0x2   :  { %19969 = sst [smem:[#allocation30_spill]] %s19922_s2  ;;  %vm7123_vm7 = vcmask 785408   ;;  %vm11522_vm8 = vmmov 0   ;;  %vm8797_vm9 = vcmask 48128   ;;  %vm9589_vm10 = vcmask 1041408  }
   0x3   :  { %19970 = sst [smem:[#allocation31_spill]] %s19923_s1  ;;  %vm9590_vm11 = vcmask 1043458   ;;  %vm9592_vm13 = vcmask 259076  }
   0x4   :  { %19971 = sst [smem:[#allocation32_spill]] %s19924_s4  ;;  %vm9591_vm12 = vmor %vm9590_vm11, %vm9589_vm10 }
   0x5   :  { %19972 = sst [smem:[#allocation33_spill]] %s19925_s3  ;;  %vm9593_vm14 = vmor %vm9592_vm13, %vm9591_vm12 }
   0x6   :  { %19973 = sst [smem:[#allocation34_spill]] %s19926_s5 }
   0x7   :  { %19974 = sst [smem:[#allocation35_spill]] %s19927_s7 }
   0x8   :  { %19975 = sst [smem:[#allocation36_spill]] %s19928_s6 }
   0x9   :  { %19976 = sst [smem:[#allocation37_spill]] %s19929_s9 }
   0xa   :  { %s19977_s27 = sld [smem:[#allocation29_spill]] }
   0xb   :  { %s19978_s25 = sld [smem:[#allocation30_spill]] }
   0xc   :  { %s19979_s26 = sld [smem:[#allocation31_spill]] }
   0xd   :  { %s19980_s2 = sld [smem:[#allocation32_spill]] }
   0xe   :  { %s19992_s0 = sld [smem:[#allocation33_spill]] }
   0xf   :  { %s20057_s5 = sld [smem:[#allocation34_spill]] }
  0x10   :  { %v108_v0 = vld [vmem:[%s19977_s27 + $0xf8] sm:$0xff]  ;;  %v107_v1 = vld [vmem:[%s19977_s27 + $0xf0] sm:$0xff]  ;;  %v106_v2 = vld [vmem:[%s19977_s27 + $0xe8] sm:$0xff]  ;;  %s20059_s30 = sld [smem:[#allocation35_spill]] }
  0x11   :  { %335 = vmatprep.subr.mxu1 %v108_v0  ;;  %v105_v4 = vld [vmem:[%s19977_s27 + $0xe0] sm:$0xff]  ;;  %117 = vmatprep.subr.mxu0 %v108_v0  ;;  %v104_v5 = vld [vmem:[%s19977_s27 + $0xd8] sm:$0xff]  ;;  %v103_v6 = vld [vmem:[%s19977_s27 + $0xd0] sm:$0xff]  ;;  %s20060_s28 = sld [smem:[#allocation36_spill]] }
  0x12   :  { %336 = vmatpush1.msra.mxu1 %v107_v1  ;;  %118 = vmatpush1.msra.mxu0 %v107_v1  ;;  %v102_v7 = vld [vmem:[%s19977_s27 + $0xc8] sm:$0xff]  ;;  %v101_v8 = vld [vmem:[%s19977_s27 + $0xc0] sm:$0xff]  ;;  %v100_v9 = vld [vmem:[%s19977_s27 + $0xb8] sm:$0xff]  ;;  %s20061_s7 = sld [smem:[#allocation37_spill]] }
  0x13   :  { %337 = vmatprep.subr.mxu1 %v106_v2  ;;  %119 = vmatprep.subr.mxu0 %v106_v2  ;;  %v99_v10 = vld [vmem:[%s19977_s27 + $0xb0] sm:$0xff]  ;;  %v98_v11 = vld [vmem:[%s19977_s27 + $0xa8] sm:$0xff]  ;;  %v97_v12 = vld [vmem:[%s19977_s27 + $0xa0] sm:$0xff] }
  0x14   :  { %338 = vmatpush1.msra.mxu1 %v105_v4  ;;  %120 = vmatpush1.msra.mxu0 %v105_v4  ;;  %v96_v13 = vld [vmem:[%s19977_s27 + $0x98] sm:$0xff]  ;;  %v95_v14 = vld [vmem:[%s19977_s27 + $0x90] sm:$0xff]  ;;  %v94_v15 = vld [vmem:[%s19977_s27 + $0x88] sm:$0xff] }
  0x15   :  { %339 = vmatprep.subr.mxu1 %v104_v5  ;;  %121 = vmatprep.subr.mxu0 %v104_v5  ;;  %v93_v16 = vld [vmem:[%s19977_s27 + $0x80] sm:$0xff]  ;;  %v92_v17 = vld [vmem:[%s19977_s27 + $0x78] sm:$0xff]  ;;  %v91_v18 = vld [vmem:[%s19977_s27 + $0x70] sm:$0xff] }
  0x16   :  { %340 = vmatpush1.msra.mxu1 %v103_v6  ;;  %122 = vmatpush1.msra.mxu0 %v103_v6  ;;  %v90_v19 = vld [vmem:[%s19977_s27 + $0x68] sm:$0xff]  ;;  %v89_v20 = vld [vmem:[%s19977_s27 + $0x60] sm:$0xff]  ;;  %v88_v21 = vld [vmem:[%s19977_s27 + $0x58] sm:$0xff] }
  0x17   :  { %341 = vmatprep.subr.mxu1 %v102_v7  ;;  %123 = vmatprep.subr.mxu0 %v102_v7  ;;  %v87_v22 = vld [vmem:[%s19977_s27 + $0x50] sm:$0xff]  ;;  %v86_v23 = vld [vmem:[%s19977_s27 + $0x48] sm:$0xff]  ;;  %v85_v24 = vld [vmem:[%s19977_s27 + $0x40] sm:$0xff] }
  0x18   :  { %342 = vmatpush1.msra.mxu1 %v101_v8  ;;  %124 = vmatpush1.msra.mxu0 %v101_v8  ;;  %v84_v25 = vld [vmem:[%s19977_s27 + $0x38] sm:$0xff]  ;;  %v83_v26 = vld [vmem:[%s19977_s27 + $0x30] sm:$0xff]  ;;  %v82_v27 = vld [vmem:[%s19977_s27 + $0x28] sm:$0xff] }
  0x19   :  { %343 = vmatprep.subr.mxu1 %v100_v9  ;;  %125 = vmatprep.subr.mxu0 %v100_v9  ;;  %v81_v28 = vld [vmem:[%s19977_s27 + $0x20] sm:$0xff]  ;;  %v80_v29 = vld [vmem:[%s19977_s27 + $0x18] sm:$0xff]  ;;  %v79_v30 = vld [vmem:[%s19977_s27 + $0x10] sm:$0xff] }
  0x1a   :  { %344 = vmatpush1.msra.mxu1 %v99_v10  ;;  %126 = vmatpush1.msra.mxu0 %v99_v10  ;;  %v78_v31 = vld [vmem:[%s19977_s27 + $0x8] sm:$0xff]  ;;  %v77_v32 = vld [vmem:[%s19977_s27] sm:$0xff]  ;;  %v9670_v36 = vld [vmem:[%s19979_s26 + $0x4f8] sm:$0xff] }
  0x1b   :  { %345 = vmatprep.subr.mxu1 %v98_v11  ;;  %127 = vmatprep.subr.mxu0 %v98_v11  ;;  %v9599_v33 = vld [vmem:[%s19978_s25 + $0x40] sm:$0xff]  ;;  %v9668_v35 = vld [vmem:[%s19979_s26 + $0x4e8] sm:$0xff]  ;;  %v9669_v38 = vld [vmem:[%s19979_s26 + $0x4f0] sm:$0xff] }
  0x1c   :  { %346 = vmatpush1.msra.mxu1 %v97_v12  ;;  %128 = vmatpush1.msra.mxu0 %v97_v12  ;;  %v109_v34 = vld [vmem:[%s19978_s25] sm:$0xff]  ;;  %v9600_v39 = vld [vmem:[%s19978_s25 + $0x48] sm:$0xff]  ;;  %v9666_v42 = vld [vmem:[%s19979_s26 + $0x4d8] sm:$0xff] }
  0x1d   :  { %347 = vmatprep.subr.mxu1 %v96_v13  ;;  %129 = vmatprep.subr.mxu0 %v96_v13  ;;  %v9667_v37 = vld [vmem:[%s19979_s26 + $0x4e0] sm:$0xff]  ;;  %v110_v40 = vld [vmem:[%s19978_s25 + $0x8] sm:$0xff]  ;;  %v9665_v44 = vld [vmem:[%s19979_s26 + $0x4d0] sm:$0xff] }
  0x1e   :  { %348 = vmatpush1.msra.mxu1 %v95_v14  ;;  %130 = vmatpush1.msra.mxu0 %v95_v14  ;;  %v9664_v41 = vld [vmem:[%s19979_s26 + $0x4c8] sm:$0xff]  ;;  %v9663_v43 = vld [vmem:[%s19979_s26 + $0x4c0] sm:$0xff]  ;;  %v9601_v45 = vld [vmem:[%s19978_s25 + $0x50] sm:$0xff] }
  0x1f   :  { %349 = vmatprep.subr.mxu1 %v94_v15  ;;  %131 = vmatprep.subr.mxu0 %v94_v15  ;;  %v111_v46 = vld [vmem:[%s19978_s25 + $0x10] sm:$0xff]  ;;  %v9660_v47 = vld [vmem:[%s19979_s26 + $0x4a8] sm:$0xff]  ;;  %v9662_v48 = vld [vmem:[%s19979_s26 + $0x4b8] sm:$0xff] }
  0x20   :  { %350 = vmatpush1.msra.mxu1 %v93_v16  ;;  %132 = vmatpush1.msra.mxu0 %v93_v16  ;;  %v9659_v49 = vld [vmem:[%s19979_s26 + $0x4a0] sm:$0xff]  ;;  %v9661_v50 = vld [vmem:[%s19979_s26 + $0x4b0] sm:$0xff]  ;;  %v9602_v51 = vld [vmem:[%s19978_s25 + $0x58] sm:$0xff] }
  0x21   :  { %351 = vmatprep.subr.mxu1 %v92_v17  ;;  %133 = vmatprep.subr.mxu0 %v92_v17  ;;  %v112_v52 = vld [vmem:[%s19978_s25 + $0x18] sm:$0xff]  ;;  %v9656_v53 = vld [vmem:[%s19979_s26 + $0x488] sm:$0xff]  ;;  %v9655_v55 = vld [vmem:[%s19979_s26 + $0x480] sm:$0xff] }
  0x22   :  { %352 = vmatpush1.msra.mxu1 %v91_v18  ;;  %134 = vmatpush1.msra.mxu0 %v91_v18  ;;  %v9658_v54 = vld [vmem:[%s19979_s26 + $0x498] sm:$0xff]  ;;  %v9657_v56 = vld [vmem:[%s19979_s26 + $0x490] sm:$0xff]  ;;  %v9603_v57 = vld [vmem:[%s19978_s25 + $0x60] sm:$0xff] }
  0x23   :  { %353 = vmatprep.subr.mxu1 %v90_v19  ;;  %135 = vmatprep.subr.mxu0 %v90_v19  ;;  %v113_v58 = vld [vmem:[%s19978_s25 + $0x20] sm:$0xff]  ;;  %v9652_v59 = vld [vmem:[%s19979_s26 + $0x468] sm:$0xff]  ;;  %v9654_v60 = vld [vmem:[%s19979_s26 + $0x478] sm:$0xff] }
  0x24   :  { %354 = vmatpush1.msra.mxu1 %v89_v20  ;;  %136 = vmatpush1.msra.mxu0 %v89_v20  ;;  %v9651_v61 = vld [vmem:[%s19979_s26 + $0x460] sm:$0xff]  ;;  %v9653_v62 = vld [vmem:[%s19979_s26 + $0x470] sm:$0xff]  ;;  %v9604_v63 = vld [vmem:[%s19978_s25 + $0x68] sm:$0xff] }
  0x25   :  { %355 = vmatprep.subr.mxu1 %v88_v21  ;;  %137 = vmatprep.subr.mxu0 %v88_v21  ;;  %v114_v0 = vld [vmem:[%s19978_s25 + $0x28] sm:$0xff]  ;;  %v9650_v2 = vld [vmem:[%s19979_s26 + $0x458] sm:$0xff]  ;;  %v9647_v4 = vld [vmem:[%s19979_s26 + $0x440] sm:$0xff] }
  0x26   :  { %356 = vmatpush1.msra.mxu1 %v87_v22  ;;  %138 = vmatpush1.msra.mxu0 %v87_v22  ;;  %v9648_v1 = vld [vmem:[%s19979_s26 + $0x448] sm:$0xff]  ;;  %v9649_v5 = vld [vmem:[%s19979_s26 + $0x450] sm:$0xff]  ;;  %v9646_v9 = vld [vmem:[%s19979_s26 + $0x438] sm:$0xff] }
  0x27   :  { %357 = vmatprep.subr.mxu1 %v86_v23  ;;  %139 = vmatprep.subr.mxu0 %v86_v23  ;;  %v9605_v6 = vld [vmem:[%s19978_s25 + $0x70] sm:$0xff]  ;;  %v9644_v8 = vld [vmem:[%s19979_s26 + $0x428] sm:$0xff]  ;;  %v9643_v10 = vld [vmem:[%s19979_s26 + $0x420] sm:$0xff] }
  0x28   :  { %358 = vmatpush1.msra.mxu1 %v85_v24  ;;  %140 = vmatpush1.msra.mxu0 %v85_v24  ;;  %v115_v7 = vld [vmem:[%s19978_s25 + $0x30] sm:$0xff]  ;;  %v9606_v12 = vld [vmem:[%s19978_s25 + $0x78] sm:$0xff]  ;;  %v9640_v14 = vld [vmem:[%s19979_s26 + $0x408] sm:$0xff] }
  0x29   :  { %359 = vmatprep.subr.mxu1 %v84_v25  ;;  %141 = vmatprep.subr.mxu0 %v84_v25  ;;  %v9645_v11 = vld [vmem:[%s19979_s26 + $0x430] sm:$0xff]  ;;  %v116_v13 = vld [vmem:[%s19978_s25 + $0x38] sm:$0xff]  ;;  %v9639_v16 = vld [vmem:[%s19979_s26 + $0x400] sm:$0xff] }
  0x2a   :  { %360 = vmatpush1.msra.mxu1 %v83_v26  ;;  %142 = vmatpush1.msra.mxu0 %v83_v26  ;;  %v9642_v15 = vld [vmem:[%s19979_s26 + $0x418] sm:$0xff]  ;;  %v9641_v17 = vld [vmem:[%s19979_s26 + $0x410] sm:$0xff]  ;;  %v9636_v18 = vld [vmem:[%s19979_s26 + $0x3e8] sm:$0xff] }
  0x2b   :  { %361 = vmatprep.subr.mxu1 %v82_v27  ;;  %143 = vmatprep.subr.mxu0 %v82_v27  ;;  %v9638_v19 = vld [vmem:[%s19979_s26 + $0x3f8] sm:$0xff]  ;;  %v9635_v20 = vld [vmem:[%s19979_s26 + $0x3e0] sm:$0xff]  ;;  %v9637_v21 = vld [vmem:[%s19979_s26 + $0x3f0] sm:$0xff] }
  0x2c   :  { %362 = vmatpush1.msra.mxu1 %v81_v28  ;;  %144 = vmatpush1.msra.mxu0 %v81_v28  ;;  %v9632_v22 = vld [vmem:[%s19979_s26 + $0x3c8] sm:$0xff]  ;;  %v9634_v23 = vld [vmem:[%s19979_s26 + $0x3d8] sm:$0xff]  ;;  %v9631_v24 = vld [vmem:[%s19979_s26 + $0x3c0] sm:$0xff] }
  0x2d   :  { %363 = vmatprep.subr.mxu1 %v80_v29  ;;  %145 = vmatprep.subr.mxu0 %v80_v29  ;;  %v9633_v25 = vld [vmem:[%s19979_s26 + $0x3d0] sm:$0xff]  ;;  %v9628_v26 = vld [vmem:[%s19979_s26 + $0x3a8] sm:$0xff]  ;;  %v9630_v27 = vld [vmem:[%s19979_s26 + $0x3b8] sm:$0xff] }
  0x2e   :  { %364 = vmatpush1.msra.mxu1 %v79_v30  ;;  %146 = vmatpush1.msra.mxu0 %v79_v30  ;;  %v9627_v28 = vld [vmem:[%s19979_s26 + $0x3a0] sm:$0xff]  ;;  %v9629_v29 = vld [vmem:[%s19979_s26 + $0x3b0] sm:$0xff]  ;;  %v9624_v30 = vld [vmem:[%s19979_s26 + $0x388] sm:$0xff] }
  0x2f   :  { %365 = vmatprep.subr.mxu1 %v78_v31  ;;  %147 = vmatprep.subr.mxu0 %v78_v31  ;;  %v9626_v31 = vld [vmem:[%s19979_s26 + $0x398] sm:$0xff] }
  0x30   :  { %366 = vmatpush1.msra.mxu1 %v77_v32  ;;  %148 = vmatpush1.msra.mxu0 %v77_v32  ;;  %v9623_v32 = vld [vmem:[%s19979_s26 + $0x380] sm:$0xff] }
  0x31   :  { %400 = vmatmul.mubr.f32.vlgmr.msra.gmra.mxu1 %v9599_v33  ;;  %182 = vmatmul.mubr.f32.vlgmr.msra.gmra.mxu0 %v109_v34  ;;  %v9625_v33 = vld [vmem:[%s19979_s26 + $0x390] sm:$0xff]  ;;  %v9620_v34 = vld [vmem:[%s19979_s26 + $0x368] sm:$0xff] }
  0x32   :  { %405 = vmatprep.mubr.f32.mxu1 %v19954_v3  ;;  %187 = vmatprep.mubr.f32.mxu0 %v19954_v3 }
  0x33   :  { %570 = vmatprep.subr.mxu0 %v9668_v35  ;;  %683 = vmatprep.subr.mxu1 %v9670_v36  ;;  %v9622_v35 = vld [vmem:[%s19979_s26 + $0x378] sm:$0xff]  ;;  %v9619_v36 = vld [vmem:[%s19979_s26 + $0x360] sm:$0xff] }
  0x34   :  { %571 = vmatpush1.msra.mxu0 %v9667_v37  ;;  %684 = vmatpush1.msra.mxu1 %v9669_v38  ;;  %v9621_v37 = vld [vmem:[%s19979_s26 + $0x370] sm:$0xff]  ;;  %v9616_v38 = vld [vmem:[%s19979_s26 + $0x348] sm:$0xff] }
  0x35   :  { %406 = vmatmul.mubr.f32.gmra.mxu1 %v9600_v39  ;;  %188 = vmatmul.mubr.f32.gmra.mxu0 %v110_v40  ;;  %v9618_v39 = vld [vmem:[%s19979_s26 + $0x358] sm:$0xff]  ;;  %v9615_v40 = vld [vmem:[%s19979_s26 + $0x340] sm:$0xff] }
  0x36   :  { %411 = vmatprep.mubr.f32.mxu1 %v19954_v3  ;;  %193 = vmatprep.mubr.f32.mxu0 %v19954_v3 }
  0x37   :  { %572 = vmatprep.subr.mxu0 %v9664_v41  ;;  %685 = vmatprep.subr.mxu1 %v9666_v42  ;;  %v9617_v41 = vld [vmem:[%s19979_s26 + $0x350] sm:$0xff]  ;;  %v9612_v42 = vld [vmem:[%s19979_s26 + $0x328] sm:$0xff] }
  0x38   :  { %573 = vmatpush1.msra.mxu0 %v9663_v43  ;;  %686 = vmatpush1.msra.mxu1 %v9665_v44  ;;  %v9614_v43 = vld [vmem:[%s19979_s26 + $0x338] sm:$0xff]  ;;  %v9611_v44 = vld [vmem:[%s19979_s26 + $0x320] sm:$0xff] }
  0x39   :  { %412 = vmatmul.mubr.f32.gmra.mxu1 %v9601_v45  ;;  %194 = vmatmul.mubr.f32.gmra.mxu0 %v111_v46  ;;  %v9613_v45 = vld [vmem:[%s19979_s26 + $0x330] sm:$0xff]  ;;  %v9608_v46 = vld [vmem:[%s19979_s26 + $0x308] sm:$0xff] }
  0x3a   :  { %417 = vmatprep.mubr.f32.mxu1 %v19954_v3  ;;  %199 = vmatprep.mubr.f32.mxu0 %v19954_v3 }
  0x3b   :  { %574 = vmatprep.subr.mxu0 %v9660_v47  ;;  %687 = vmatprep.subr.mxu1 %v9662_v48  ;;  %v9610_v47 = vld [vmem:[%s19979_s26 + $0x318] sm:$0xff]  ;;  %v9607_v48 = vld [vmem:[%s19979_s26 + $0x300] sm:$0xff] }
  0x3c   :  { %575 = vmatpush1.msra.mxu0 %v9659_v49  ;;  %688 = vmatpush1.msra.mxu1 %v9661_v50  ;;  %v9609_v49 = vld [vmem:[%s19979_s26 + $0x310] sm:$0xff]  ;;  %v9700_v50 = vld [vmem:[%s19979_s26 + $0x5e8] sm:$0xff] }
  0x3d   :  { %418 = vmatmul.mubr.f32.gmra.mxu1 %v9602_v51  ;;  %200 = vmatmul.mubr.f32.gmra.mxu0 %v112_v52  ;;  %v9702_v51 = vld [vmem:[%s19979_s26 + $0x5f8] sm:$0xff]  ;;  %v9699_v52 = vld [vmem:[%s19979_s26 + $0x5e0] sm:$0xff] }
  0x3e   :  { %423 = vmatprep.mubr.f32.mxu1 %v19954_v3  ;;  %205 = vmatprep.mubr.f32.mxu0 %v19954_v3 }
  0x3f   :  { %576 = vmatprep.subr.mxu0 %v9656_v53  ;;  %689 = vmatprep.subr.mxu1 %v9658_v54  ;;  %v9701_v53 = vld [vmem:[%s19979_s26 + $0x5f0] sm:$0xff]  ;;  %v9696_v54 = vld [vmem:[%s19979_s26 + $0x5c8] sm:$0xff] }
  0x40   :  { %577 = vmatpush1.msra.mxu0 %v9655_v55  ;;  %690 = vmatpush1.msra.mxu1 %v9657_v56  ;;  %v9698_v55 = vld [vmem:[%s19979_s26 + $0x5d8] sm:$0xff]  ;;  %v9695_v56 = vld [vmem:[%s19979_s26 + $0x5c0] sm:$0xff] }
  0x41   :  { %424 = vmatmul.mubr.f32.gmra.mxu1 %v9603_v57  ;;  %206 = vmatmul.mubr.f32.gmra.mxu0 %v113_v58  ;;  %v9697_v57 = vld [vmem:[%s19979_s26 + $0x5d0] sm:$0xff]  ;;  %v9692_v58 = vld [vmem:[%s19979_s26 + $0x5a8] sm:$0xff] }
  0x42   :  { %429 = vmatprep.mubr.f32.mxu1 %v19954_v3  ;;  %211 = vmatprep.mubr.f32.mxu0 %v19954_v3 }
  0x43   :  { %578 = vmatprep.subr.mxu0 %v9652_v59  ;;  %691 = vmatprep.subr.mxu1 %v9654_v60  ;;  %v9694_v59 = vld [vmem:[%s19979_s26 + $0x5b8] sm:$0xff]  ;;  %v9691_v60 = vld [vmem:[%s19979_s26 + $0x5a0] sm:$0xff] }
  0x44   :  { %579 = vmatpush1.msra.mxu0 %v9651_v61  ;;  %692 = vmatpush1.msra.mxu1 %v9653_v62  ;;  %v9693_v61 = vld [vmem:[%s19979_s26 + $0x5b0] sm:$0xff]  ;;  %v9688_v62 = vld [vmem:[%s19979_s26 + $0x588] sm:$0xff] }
  0x45   :  { %430 = vmatmul.mubr.f32.gmra.mxu1 %v9604_v63  ;;  %212 = vmatmul.mubr.f32.gmra.mxu0 %v114_v0  ;;  %v9690_v63 = vld [vmem:[%s19979_s26 + $0x598] sm:$0xff]  ;;  %v9687_v0 = vld [vmem:[%s19979_s26 + $0x580] sm:$0xff] }
  0x46   :  { %435 = vmatprep.mubr.f32.mxu1 %v19954_v3  ;;  %217 = vmatprep.mubr.f32.mxu0 %v19954_v3 }
  0x47   :  { %580 = vmatprep.subr.mxu0 %v9648_v1  ;;  %693 = vmatprep.subr.mxu1 %v9650_v2  ;;  %v9689_v1 = vld [vmem:[%s19979_s26 + $0x590] sm:$0xff]  ;;  %v9684_v2 = vld [vmem:[%s19979_s26 + $0x568] sm:$0xff] }
  0x48   :  { %581 = vmatpush1.msra.mxu0 %v9647_v4  ;;  %694 = vmatpush1.msra.mxu1 %v9649_v5  ;;  %v9686_v4 = vld [vmem:[%s19979_s26 + $0x578] sm:$0xff]  ;;  %v9683_v5 = vld [vmem:[%s19979_s26 + $0x560] sm:$0xff] }
  0x49   :  { %436 = vmatmul.mubr.f32.gmra.mxu1 %v9605_v6  ;;  %218 = vmatmul.mubr.f32.gmra.mxu0 %v115_v7  ;;  %v9685_v6 = vld [vmem:[%s19979_s26 + $0x570] sm:$0xff]  ;;  %v9680_v7 = vld [vmem:[%s19979_s26 + $0x548] sm:$0xff] }
  0x4a   :  { %441 = vmatprep.mubr.f32.mxu1 %v19954_v3  ;;  %223 = vmatprep.mubr.f32.mxu0 %v19954_v3 }
  0x4b   :  { %582 = vmatprep.subr.mxu0 %v9644_v8  ;;  %695 = vmatprep.subr.mxu1 %v9646_v9  ;;  %v9682_v8 = vld [vmem:[%s19979_s26 + $0x558] sm:$0xff]  ;;  %v9679_v9 = vld [vmem:[%s19979_s26 + $0x540] sm:$0xff] }
  0x4c   :  { %583 = vmatpush1.msra.mxu0 %v9643_v10  ;;  %696 = vmatpush1.msra.mxu1 %v9645_v11  ;;  %v9681_v10 = vld [vmem:[%s19979_s26 + $0x550] sm:$0xff]  ;;  %v9676_v11 = vld [vmem:[%s19979_s26 + $0x528] sm:$0xff] }
  0x4d   :  { %442 = vmatmul.mubr.f32.gmra.mxu1 %v9606_v12  ;;  %224 = vmatmul.mubr.f32.gmra.mxu0 %v116_v13  ;;  %v9678_v12 = vld [vmem:[%s19979_s26 + $0x538] sm:$0xff]  ;;  %v9675_v13 = vld [vmem:[%s19979_s26 + $0x520] sm:$0xff] }
  0x4e   :  { %584 = vmatprep.subr.mxu0 %v9640_v14  ;;  %697 = vmatprep.subr.mxu1 %v9642_v15  ;;  %v9677_v14 = vld [vmem:[%s19979_s26 + $0x530] sm:$0xff]  ;;  %v9672_v15 = vld [vmem:[%s19979_s26 + $0x508] sm:$0xff] }
  0x4f   :  { %585 = vmatpush1.msra.mxu0 %v9639_v16  ;;  %698 = vmatpush1.msra.mxu1 %v9641_v17  ;;  %v9674_v16 = vld [vmem:[%s19979_s26 + $0x518] sm:$0xff]  ;;  %v9671_v17 = vld [vmem:[%s19979_s26 + $0x500] sm:$0xff] }
  0x50   :  { %586 = vmatprep.subr.mxu0 %v9636_v18  ;;  %699 = vmatprep.subr.mxu1 %v9638_v19  ;;  %v9673_v18 = vld [vmem:[%s19979_s26 + $0x510] sm:$0xff]  ;;  %v291_v19 = vld [vmem:[%s19979_s26 + $0x1e8] sm:$0xff] }
  0x51   :  { %587 = vmatpush1.msra.mxu0 %v9635_v20  ;;  %700 = vmatpush1.msra.mxu1 %v9637_v21  ;;  %v293_v20 = vld [vmem:[%s19979_s26 + $0x1f8] sm:$0xff] }
  0x52   :  { %588 = vmatprep.subr.mxu0 %v9632_v22  ;;  %701 = vmatprep.subr.mxu1 %v9634_v23  ;;  %v290_v23 = vld [vmem:[%s19979_s26 + $0x1e0] sm:$0xff] }
  0x53   :  { %589 = vmatpush1.msra.mxu0 %v9631_v24  ;;  %702 = vmatpush1.msra.mxu1 %v9633_v25  ;;  %v292_v24 = vld [vmem:[%s19979_s26 + $0x1f0] sm:$0xff]  ;;  %v287_v25 = vld [vmem:[%s19979_s26 + $0x1c8] sm:$0xff] }
  0x54   :  { %590 = vmatprep.subr.mxu0 %v9628_v26  ;;  %703 = vmatprep.subr.mxu1 %v9630_v27  ;;  %v289_v26 = vld [vmem:[%s19979_s26 + $0x1d8] sm:$0xff]  ;;  %v286_v27 = vld [vmem:[%s19979_s26 + $0x1c0] sm:$0xff] }
  0x55   :  { %591 = vmatpush1.msra.mxu0 %v9627_v28  ;;  %704 = vmatpush1.msra.mxu1 %v9629_v29  ;;  %v288_v28 = vld [vmem:[%s19979_s26 + $0x1d0] sm:$0xff] }
  0x56   :  { %592 = vmatprep.subr.mxu0 %v9624_v30  ;;  %705 = vmatprep.subr.mxu1 %v9626_v31  ;;  %v283_v30 = vld [vmem:[%s19979_s26 + $0x1a8] sm:$0xff]  ;;  %v285_v31 = vld [vmem:[%s19979_s26 + $0x1b8] sm:$0xff] }
  0x57   :  { %593 = vmatpush1.msra.mxu0 %v9623_v32  ;;  %706 = vmatpush1.msra.mxu1 %v9625_v33  ;;  %v282_v32 = vld [vmem:[%s19979_s26 + $0x1a0] sm:$0xff]  ;;  %v284_v33 = vld [vmem:[%s19979_s26 + $0x1b0] sm:$0xff] }
  0x58   :  { %594 = vmatprep.subr.mxu0 %v9620_v34  ;;  %707 = vmatprep.subr.mxu1 %v9622_v35  ;;  %v279_v35 = vld [vmem:[%s19979_s26 + $0x188] sm:$0xff] }
  0x59   :  { %595 = vmatpush1.msra.mxu0 %v9619_v36  ;;  %708 = vmatpush1.msra.mxu1 %v9621_v37  ;;  %v281_v36 = vld [vmem:[%s19979_s26 + $0x198] sm:$0xff]  ;;  %v278_v37 = vld [vmem:[%s19979_s26 + $0x180] sm:$0xff] }
  0x5a   :  { %596 = vmatprep.subr.mxu0 %v9616_v38  ;;  %709 = vmatprep.subr.mxu1 %v9618_v39  ;;  %v280_v38 = vld [vmem:[%s19979_s26 + $0x190] sm:$0xff] }
  0x5b   :  { %597 = vmatpush1.msra.mxu0 %v9615_v40  ;;  %710 = vmatpush1.msra.mxu1 %v9617_v41  ;;  %v275_v40 = vld [vmem:[%s19979_s26 + $0x168] sm:$0xff]  ;;  %v277_v41 = vld [vmem:[%s19979_s26 + $0x178] sm:$0xff] }
  0x5c   :  { %598 = vmatprep.subr.mxu0 %v9612_v42  ;;  %711 = vmatprep.subr.mxu1 %v9614_v43  ;;  %v274_v42 = vld [vmem:[%s19979_s26 + $0x160] sm:$0xff]  ;;  %v276_v43 = vld [vmem:[%s19979_s26 + $0x170] sm:$0xff] }
  0x5d   :  { %599 = vmatpush1.msra.mxu0 %v9611_v44  ;;  %712 = vmatpush1.msra.mxu1 %v9613_v45  ;;  %v271_v44 = vld [vmem:[%s19979_s26 + $0x148] sm:$0xff]  ;;  %v273_v45 = vld [vmem:[%s19979_s26 + $0x158] sm:$0xff] }
  0x5e   :  { %600 = vmatprep.subr.mxu0 %v9608_v46  ;;  %713 = vmatprep.subr.mxu1 %v9610_v47  ;;  %v270_v47 = vld [vmem:[%s19979_s26 + $0x140] sm:$0xff] }
  0x5f   :  { %601 = vmatpush1.msra.mxu0 %v9607_v48  ;;  %714 = vmatpush1.msra.mxu1 %v9609_v49  ;;  %v272_v48 = vld [vmem:[%s19979_s26 + $0x150] sm:$0xff]  ;;  %v267_v49 = vld [vmem:[%s19979_s26 + $0x128] sm:$0xff] }
  0x60   :  { %618 = vmatprep.subr.mxu0 %v9700_v50  ;;  %731 = vmatprep.subr.mxu1 %v9702_v51  ;;  %v269_v50 = vld [vmem:[%s19979_s26 + $0x138] sm:$0xff]  ;;  %v266_v51 = vld [vmem:[%s19979_s26 + $0x120] sm:$0xff] }
  0x61   :  { %619 = vmatpush2.msra.mxu0 %v9699_v52  ;;  %732 = vmatpush2.msra.mxu1 %v9701_v53  ;;  %v268_v52 = vld [vmem:[%s19979_s26 + $0x130] sm:$0xff] }
  0x62   :  { %620 = vmatprep.subr.mxu0 %v9696_v54  ;;  %733 = vmatprep.subr.mxu1 %v9698_v55  ;;  %v263_v54 = vld [vmem:[%s19979_s26 + $0x108] sm:$0xff]  ;;  %v265_v55 = vld [vmem:[%s19979_s26 + $0x118] sm:$0xff] }
  0x63   :  { %621 = vmatpush2.msra.mxu0 %v9695_v56  ;;  %734 = vmatpush2.msra.mxu1 %v9697_v57  ;;  %v262_v56 = vld [vmem:[%s19979_s26 + $0x100] sm:$0xff]  ;;  %v264_v57 = vld [vmem:[%s19979_s26 + $0x110] sm:$0xff] }
  0x64   :  { %622 = vmatprep.subr.mxu0 %v9692_v58  ;;  %735 = vmatprep.subr.mxu1 %v9694_v59  ;;  %v259_v58 = vld [vmem:[%s19979_s26 + $0xe8] sm:$0xff]  ;;  %v261_v59 = vld [vmem:[%s19979_s26 + $0xf8] sm:$0xff] }
  0x65   :  { %623 = vmatpush2.msra.mxu0 %v9691_v60  ;;  %736 = vmatpush2.msra.mxu1 %v9693_v61  ;;  %v258_v61 = vld [vmem:[%s19979_s26 + $0xe0] sm:$0xff] }
  0x66   :  { %624 = vmatprep.subr.mxu0 %v9688_v62  ;;  %737 = vmatprep.subr.mxu1 %v9690_v63  ;;  %v260_v62 = vld [vmem:[%s19979_s26 + $0xf0] sm:$0xff]  ;;  %v255_v63 = vld [vmem:[%s19979_s26 + $0xc8] sm:$0xff] }
  0x67   :  { %625 = vmatpush2.msra.mxu0 %v9687_v0  ;;  %738 = vmatpush2.msra.mxu1 %v9689_v1  ;;  %v257_v0 = vld [vmem:[%s19979_s26 + $0xd8] sm:$0xff] }
  0x68   :  { %626 = vmatprep.subr.mxu0 %v9684_v2  ;;  %739 = vmatprep.subr.mxu1 %v9686_v4  ;;  %v254_v2 = vld [vmem:[%s19979_s26 + $0xc0] sm:$0xff]  ;;  %v256_v4 = vld [vmem:[%s19979_s26 + $0xd0] sm:$0xff] }
  0x69   :  { %627 = vmatpush2.msra.mxu0 %v9683_v5  ;;  %740 = vmatpush2.msra.mxu1 %v9685_v6  ;;  %v251_v5 = vld [vmem:[%s19979_s26 + $0xa8] sm:$0xff]  ;;  %v253_v6 = vld [vmem:[%s19979_s26 + $0xb8] sm:$0xff] }
  0x6a   :  { %628 = vmatprep.subr.mxu0 %v9680_v7  ;;  %741 = vmatprep.subr.mxu1 %v9682_v8  ;;  %v250_v7 = vld [vmem:[%s19979_s26 + $0xa0] sm:$0xff]  ;;  %v252_v8 = vld [vmem:[%s19979_s26 + $0xb0] sm:$0xff] }
  0x6b   :  { %629 = vmatpush2.msra.mxu0 %v9679_v9  ;;  %742 = vmatpush2.msra.mxu1 %v9681_v10  ;;  %v247_v10 = vld [vmem:[%s19979_s26 + $0x88] sm:$0xff] }
  0x6c   :  { %630 = vmatprep.subr.mxu0 %v9676_v11  ;;  %743 = vmatprep.subr.mxu1 %v9678_v12  ;;  %v249_v11 = vld [vmem:[%s19979_s26 + $0x98] sm:$0xff] }
  0x6d   :  { %631 = vmatpush2.msra.mxu0 %v9675_v13  ;;  %744 = vmatpush2.msra.mxu1 %v9677_v14  ;;  %v246_v13 = vld [vmem:[%s19979_s26 + $0x80] sm:$0xff]  ;;  %v248_v14 = vld [vmem:[%s19979_s26 + $0x90] sm:$0xff] }
  0x6e   :  { %632 = vmatprep.subr.mxu0 %v9672_v15  ;;  %745 = vmatprep.subr.mxu1 %v9674_v16  ;;  %v243_v15 = vld [vmem:[%s19979_s26 + $0x68] sm:$0xff]  ;;  %v245_v16 = vld [vmem:[%s19979_s26 + $0x78] sm:$0xff] }
  0x6f   :  { %633 = vmatpush2.msra.mxu0 %v9671_v17  ;;  %746 = vmatpush2.msra.mxu1 %v9673_v18  ;;  %v242_v18 = vld [vmem:[%s19979_s26 + $0x60] sm:$0xff] }
  0x70   :  { %820 = vmatprep.subr.mxu0 %v291_v19  ;;  %933 = vmatprep.subr.mxu1 %v293_v20  ;;  %v244_v19 = vld [vmem:[%s19979_s26 + $0x70] sm:$0xff] }
  0xf1   :  { %v401_v21 = vpop.f32.mrf.mxu1  ;;  %v12245_v12 = vpop.f32.mrf.mxu0 }
  0xf3   :  { %v403_v22 = vpop.f32.mrf.mxu1  ;;  %v12267_v20 = vpop.f32.mrf.mxu0 }
  0xf4   :  { %9703 = vmatprep.mubr.msk.f32.mxu0 %vm545_vm0, %v403_v22  ;;  %9711 = vmatprep.mubr.msk.f32.mxu1 %vm545_vm0, %v403_v22  ;;  %v241_v22 = vld [vmem:[%s19979_s26 + $0x58] sm:$0xff] }
  0xf5   :  { %635 = vmatmul.mubr.f32.vlgmr.msra.gmra.mxu0 %v401_v21  ;;  %748 = vmatmul.mubr.f32.vlgmr.msra.gmra.mxu1 %v401_v21  ;;  %v407_v29 = vpop.f32.mrf.mxu1  ;;  %v239_v21 = vld [vmem:[%s19979_s26 + $0x48] sm:$0xff] }
  0xf6   :  { %821 = vmatpush1.msra.mxu0 %v290_v23  ;;  %934 = vmatpush1.msra.mxu1 %v292_v24  ;;  %v238_v24 = vld [vmem:[%s19979_s26 + $0x40] sm:$0xff] }
  0xf7   :  { %822 = vmatprep.subr.mxu0 %v287_v25  ;;  %935 = vmatprep.subr.mxu1 %v289_v26  ;;  %v409_v34 = vpop.f32.mrf.mxu1  ;;  %v240_v25 = vld [vmem:[%s19979_s26 + $0x50] sm:$0xff]  ;;  %v235_v26 = vld [vmem:[%s19979_s26 + $0x28] sm:$0xff] }
  0xf8   :  { %823 = vmatpush1.msra.mxu0 %v286_v27  ;;  %936 = vmatpush1.msra.mxu1 %v288_v28  ;;  %v237_v27 = vld [vmem:[%s19979_s26 + $0x38] sm:$0xff]  ;;  %v12289_v28 = vpop.f32.mrf.mxu0 }
  0xf9   :  { %824 = vmatprep.subr.mxu0 %v283_v30  ;;  %937 = vmatprep.subr.mxu1 %v285_v31  ;;  %v12147_v39 = vpop.f32.mrf.mxu1  ;;  %v236_v30 = vld [vmem:[%s19979_s26 + $0x30] sm:$0xff] }
  0xfa   :  { %825 = vmatpush1.msra.mxu0 %v282_v32  ;;  %938 = vmatpush1.msra.mxu1 %v284_v33  ;;  %v231_v32 = vld [vmem:[%s19979_s26 + $0x8] sm:$0xff]  ;;  %v233_v33 = vld [vmem:[%s19979_s26 + $0x18] sm:$0xff] }
  0xfb   :  { %826 = vmatprep.subr.mxu0 %v279_v35  ;;  %939 = vmatprep.subr.mxu1 %v281_v36  ;;  %v415_v46 = vpop.f32.mrf.mxu1  ;;  %v230_v35 = vld [vmem:[%s19979_s26] sm:$0xff]  ;;  %v232_v36 = vld [vmem:[%s19979_s26 + $0x10] sm:$0xff] }
  0xfc   :  { %827 = vmatpush1.msra.mxu0 %v278_v37  ;;  %940 = vmatpush1.msra.mxu1 %v280_v38  ;;  %v323_v37 = vld [vmem:[%s19979_s26 + $0x2e8] sm:$0xff]  ;;  %v325_v38 = vld [vmem:[%s19979_s26 + $0x2f8] sm:$0xff] }
  0xfd   :  { %828 = vmatprep.subr.mxu0 %v275_v40  ;;  %941 = vmatprep.subr.mxu1 %v277_v41  ;;  %v419_v53 = vpop.f32.mrf.mxu1  ;;  %v322_v40 = vld [vmem:[%s19979_s26 + $0x2e0] sm:$0xff]  ;;  %v324_v41 = vld [vmem:[%s19979_s26 + $0x2f0] sm:$0xff] }
  0xfe   :  { %829 = vmatpush1.msra.mxu0 %v274_v42  ;;  %942 = vmatpush1.msra.mxu1 %v276_v43  ;;  %v319_v43 = vld [vmem:[%s19979_s26 + $0x2c8] sm:$0xff] }
  0xff   :  { %830 = vmatprep.subr.mxu0 %v271_v44  ;;  %943 = vmatprep.subr.mxu1 %v273_v45  ;;  %v421_v60 = vpop.f32.mrf.mxu1  ;;  %v321_v44 = vld [vmem:[%s19979_s26 + $0x2d8] sm:$0xff] }
 0x100   :  { %831 = vmatpush1.msra.mxu0 %v270_v47  ;;  %944 = vmatpush1.msra.mxu1 %v272_v48  ;;  %v320_v47 = vld [vmem:[%s19979_s26 + $0x2d0] sm:$0xff]  ;;  %v315_v48 = vld [vmem:[%s19979_s26 + $0x2a8] sm:$0xff] }
 0x101   :  { %832 = vmatprep.subr.mxu0 %v267_v49  ;;  %945 = vmatprep.subr.mxu1 %v269_v50  ;;  %v425_v1 = vpop.f32.mrf.mxu1  ;;  %v317_v49 = vld [vmem:[%s19979_s26 + $0x2b8] sm:$0xff] }
 0x102   :  { %833 = vmatpush1.msra.mxu0 %v266_v51  ;;  %946 = vmatpush1.msra.mxu1 %v268_v52  ;;  %v314_v51 = vld [vmem:[%s19979_s26 + $0x2a0] sm:$0xff]  ;;  %v316_v52 = vld [vmem:[%s19979_s26 + $0x2b0] sm:$0xff] }
 0x103   :  { %9704 = vmatprep.mubr.msk.f32.mxu0 %vm545_vm0, %v409_v34  ;;  %9712 = vmatprep.mubr.msk.f32.mxu1 %vm545_vm0, %v409_v34  ;;  %v427_v9 = vpop.f32.mrf.mxu1  ;;  %v12303_v34 = vpop.f32.mrf.mxu0 }
 0x104   :  { %834 = vmatprep.subr.mxu0 %v263_v54  ;;  %947 = vmatprep.subr.mxu1 %v265_v55  ;;  %v311_v54 = vld [vmem:[%s19979_s26 + $0x288] sm:$0xff]  ;;  %v313_v55 = vld [vmem:[%s19979_s26 + $0x298] sm:$0xff] }
 0x105   :  { %641 = vmatmul.mubr.f32.gmra.mxu0 %v407_v29  ;;  %754 = vmatmul.mubr.f32.gmra.mxu1 %v407_v29  ;;  %v431_v17 = vpop.f32.mrf.mxu1  ;;  %v234_v29 = vld [vmem:[%s19979_s26 + $0x20] sm:$0xff]  ;;  %v12325_v42 = vpop.f32.mrf.mxu0 }
 0x106   :  { %835 = vmatpush1.msra.mxu0 %v262_v56  ;;  %948 = vmatpush1.msra.mxu1 %v264_v57  ;;  %v310_v57 = vld [vmem:[%s19979_s26 + $0x280] sm:$0xff] }
 0x107   :  { %836 = vmatprep.subr.mxu0 %v259_v58  ;;  %949 = vmatprep.subr.mxu1 %v261_v59  ;;  %v433_v23 = vpop.f32.mrf.mxu1  ;;  %v12347_v50 = vpop.f32.mrf.mxu0  ;;  %v312_v58 = vld [vmem:[%s19979_s26 + $0x290] sm:$0xff]  ;;  %v307_v59 = vld [vmem:[%s19979_s26 + $0x268] sm:$0xff] }
 0x108   :  { %837 = vmatpush1.msra.mxu0 %v258_v61  ;;  %950 = vmatpush1.msra.mxu1 %v260_v62  ;;  %v306_v61 = vld [vmem:[%s19979_s26 + $0x260] sm:$0xff]  ;;  %v308_v62 = vld [vmem:[%s19979_s26 + $0x270] sm:$0xff] }
 0x109   :  { %9705 = vmatprep.mubr.msk.f32.mxu0 %vm545_vm0, %v415_v46  ;;  %9713 = vmatprep.mubr.msk.f32.mxu1 %vm545_vm0, %v415_v46  ;;  %v437_v31 = vpop.f32.mrf.mxu1  ;;  %v318_v46 = vld [vmem:[%s19979_s26 + $0x2c0] sm:$0xff]  ;;  %v12361_v56 = vpop.f32.mrf.mxu0 }
 0x10a   :  { %838 = vmatprep.subr.mxu0 %v255_v63  ;;  %951 = vmatprep.subr.mxu1 %v257_v0  ;;  %v303_v63 = vld [vmem:[%s19979_s26 + $0x248] sm:$0xff]  ;;  %v305_v0 = vld [vmem:[%s19979_s26 + $0x258] sm:$0xff] }
 0x10b   :  { %647 = vmatmul.mubr.f32.gmra.mxu0 %v12147_v39  ;;  %760 = vmatmul.mubr.f32.gmra.mxu1 %v12147_v39  ;;  %v439_v39 = vpop.f32.mrf.mxu1 }
 0x10c   :  { %839 = vmatpush1.msra.mxu0 %v254_v2  ;;  %952 = vmatpush1.msra.mxu1 %v256_v4  ;;  %v302_v2 = vld [vmem:[%s19979_s26 + $0x240] sm:$0xff]  ;;  %v304_v4 = vld [vmem:[%s19979_s26 + $0x250] sm:$0xff] }
 0x10d   :  { %840 = vmatprep.subr.mxu0 %v251_v5  ;;  %953 = vmatprep.subr.mxu1 %v253_v6  ;;  %v443_v45 = vpop.f32.mrf.mxu1  ;;  %v299_v5 = vld [vmem:[%s19979_s26 + $0x228] sm:$0xff]  ;;  %v301_v6 = vld [vmem:[%s19979_s26 + $0x238] sm:$0xff] }
 0x10e   :  { %841 = vmatpush1.msra.mxu0 %v250_v7  ;;  %954 = vmatpush1.msra.mxu1 %v252_v8  ;;  %v298_v7 = vld [vmem:[%s19979_s26 + $0x220] sm:$0xff]  ;;  %v300_v8 = vld [vmem:[%s19979_s26 + $0x230] sm:$0xff] }
 0x10f   :  { %9706 = vmatprep.mubr.msk.f32.mxu0 %vm545_vm0, %v421_v60  ;;  %9714 = vmatprep.mubr.msk.f32.mxu1 %vm545_vm0, %v421_v60  ;;  %v309_v60 = vld [vmem:[%s19979_s26 + $0x278] sm:$0xff] }
 0x110   :  { %842 = vmatprep.subr.mxu0 %v247_v10  ;;  %955 = vmatprep.subr.mxu1 %v249_v11  ;;  %v295_v10 = vld [vmem:[%s19979_s26 + $0x208] sm:$0xff]  ;;  %v297_v11 = vld [vmem:[%s19979_s26 + $0x218] sm:$0xff] }
 0x111   :  { %653 = vmatmul.mubr.f32.gmra.mxu0 %v419_v53  ;;  %766 = vmatmul.mubr.f32.gmra.mxu1 %v419_v53  ;;  %v445_v53 = vpop.f32.mrf.mxu1 }
 0x112   :  { %843 = vmatpush1.msra.mxu0 %v246_v13  ;;  %956 = vmatpush1.msra.mxu1 %v248_v14  ;;  %v294_v13 = vld [vmem:[%s19979_s26 + $0x200] sm:$0xff]  ;;  %v296_v14 = vld [vmem:[%s19979_s26 + $0x210] sm:$0xff] }
 0x113   :  { %844 = vmatprep.subr.mxu0 %v243_v15  ;;  %957 = vmatprep.subr.mxu1 %v245_v16  ;;  %v11489_v16 = vld [vmem:[%s19977_s27 + $0xf8] sm:$0xff] }
 0x114   :  { %845 = vmatpush1.msra.mxu0 %v242_v18  ;;  %958 = vmatpush1.msra.mxu1 %v244_v19  ;;  %v11492_v19 = vld [vmem:[%s19977_s27 + $0xe0] sm:$0xff] }
 0x115   :  { %9707 = vmatprep.mubr.msk.f32.mxu0 %vm545_vm0, %v427_v9  ;;  %9715 = vmatprep.mubr.msk.f32.mxu1 %vm545_vm0, %v427_v9 }
 0x116   :  { %846 = vmatprep.subr.mxu0 %v239_v21  ;;  %959 = vmatprep.subr.mxu1 %v241_v22  ;;  %v11494_v22 = vld [vmem:[%s19977_s27 + $0xd0] sm:$0xff] }
 0x117   :  { %659 = vmatmul.mubr.f32.gmra.mxu0 %v425_v1  ;;  %772 = vmatmul.mubr.f32.gmra.mxu1 %v425_v1  ;;  %v12389_v1 = vpop.f32.mrf.mxu0 }
 0x118   :  { %847 = vmatpush1.msra.mxu0 %v238_v24  ;;  %960 = vmatpush1.msra.mxu1 %v240_v25  ;;  %v11496_v24 = vld [vmem:[%s19977_s27 + $0xc0] sm:$0xff]  ;;  %v11497_v25 = vld [vmem:[%s19977_s27 + $0xb8] sm:$0xff] }
 0x119   :  { %848 = vmatprep.subr.mxu0 %v235_v26  ;;  %961 = vmatprep.subr.mxu1 %v237_v27  ;;  %v12409_v9 = vpop.f32.mrf.mxu0  ;;  %v11498_v27 = vld [vmem:[%s19977_s27 + $0xb0] sm:$0xff] }
 0x11a   :  { %849 = vmatpush1.msra.mxu0 %v234_v29  ;;  %962 = vmatpush1.msra.mxu1 %v236_v30  ;;  %v11500_v29 = vld [vmem:[%s19977_s27 + $0xa0] sm:$0xff]  ;;  %v11501_v30 = vld [vmem:[%s19977_s27 + $0x98] sm:$0xff] }
 0x11b   :  { %9708 = vmatprep.mubr.msk.f32.mxu0 %vm545_vm0, %v433_v23  ;;  %9716 = vmatprep.mubr.msk.f32.mxu1 %vm545_vm0, %v433_v23  ;;  %v209_v15 = vpop.f32.mrf.mxu0  ;;  %v11495_v23 = vld [vmem:[%s19977_s27 + $0xc8] sm:$0xff] }
 0x11c   :  { %850 = vmatprep.subr.mxu0 %v231_v32  ;;  %963 = vmatprep.subr.mxu1 %v233_v33  ;;  %v11502_v32 = vld [vmem:[%s19977_s27 + $0x90] sm:$0xff]  ;;  %v11503_v33 = vld [vmem:[%s19977_s27 + $0x88] sm:$0xff] }
 0x11d   :  { %665 = vmatmul.mubr.f32.gmra.mxu0 %v431_v17  ;;  %778 = vmatmul.mubr.f32.gmra.mxu1 %v431_v17  ;;  %v11490_v17 = vld [vmem:[%s19977_s27 + $0xf0] sm:$0xff]  ;;  %v213_v18 = vpop.f32.mrf.mxu0 }
 0x11e   :  { %851 = vmatpush1.msra.mxu0 %v230_v35  ;;  %964 = vmatpush1.msra.mxu1 %v232_v36  ;;  %v11505_v35 = vld [vmem:[%s19977_s27 + $0x78] sm:$0xff] }
 0x11f   :  { %868 = vmatprep.subr.mxu0 %v323_v37  ;;  %981 = vmatprep.subr.mxu1 %v325_v38  ;;  %v215_v21 = vpop.f32.mrf.mxu0  ;;  %v11506_v37 = vld [vmem:[%s19977_s27 + $0x70] sm:$0xff]  ;;  %v11507_v38 = vld [vmem:[%s19977_s27 + $0x68] sm:$0xff] }
 0x120   :  { %869 = vmatpush2.msra.mxu0 %v322_v40  ;;  %982 = vmatpush2.msra.mxu1 %v324_v41  ;;  %v11509_v40 = vld [vmem:[%s19977_s27 + $0x58] sm:$0xff] }
 0x121   :  { %9709 = vmatprep.mubr.msk.f32.mxu0 %vm545_vm0, %v439_v39  ;;  %9717 = vmatprep.mubr.msk.f32.mxu1 %vm545_vm0, %v439_v39  ;;  %v219_v26 = vpop.f32.mrf.mxu0  ;;  %v11508_v39 = vld [vmem:[%s19977_s27 + $0x60] sm:$0xff] }
 0x122   :  { %870 = vmatprep.subr.mxu0 %v319_v43  ;;  %983 = vmatprep.subr.mxu1 %v321_v44  ;;  %v11511_v43 = vld [vmem:[%s19977_s27 + $0x48] sm:$0xff]  ;;  %v11512_v44 = vld [vmem:[%s19977_s27 + $0x40] sm:$0xff] }
 0x123   :  { %671 = vmatmul.mubr.f32.gmra.mxu0 %v437_v31  ;;  %784 = vmatmul.mubr.f32.gmra.mxu1 %v437_v31  ;;  %v221_v31 = vpop.f32.mrf.mxu0 }
 0x124   :  { %871 = vmatpush2.msra.mxu0 %v318_v46  ;;  %984 = vmatpush2.msra.mxu1 %v320_v47  ;;  %v11514_v46 = vld [vmem:[%s19977_s27 + $0x30] sm:$0xff]  ;;  %v11515_v47 = vld [vmem:[%s19977_s27 + $0x28] sm:$0xff] }
 0x125   :  { %872 = vmatprep.subr.mxu0 %v315_v48  ;;  %985 = vmatprep.subr.mxu1 %v317_v49  ;;  %v225_v36 = vpop.f32.mrf.mxu0  ;;  %v11516_v48 = vld [vmem:[%s19977_s27 + $0x20] sm:$0xff]  ;;  %v11517_v49 = vld [vmem:[%s19977_s27 + $0x18] sm:$0xff] }
 0x126   :  { %873 = vmatpush2.msra.mxu0 %v314_v51  ;;  %986 = vmatpush2.msra.mxu1 %v316_v52  ;;  %v9735_v51 = vld [vmem:[%s19978_s25 + $0x80] sm:$0xff]  ;;  %v11519_v52 = vld [vmem:[%s19977_s27 + $0x8] sm:$0xff] }
 0x127   :  { %9710 = vmatprep.mubr.msk.f32.mxu0 %vm545_vm0, %v445_v53  ;;  %9718 = vmatprep.mubr.msk.f32.mxu1 %vm545_vm0, %v445_v53  ;;  %v227_v41 = vpop.f32.mrf.mxu0  ;;  %v11520_v53 = vld [vmem:[%s19977_s27] sm:$0xff] }
 0x128   :  { %874 = vmatprep.subr.mxu0 %v311_v54  ;;  %987 = vmatprep.subr.mxu1 %v313_v55  ;;  %v9736_v54 = vld [vmem:[%s19978_s25 + $0x88] sm:$0xff]  ;;  %v9737_v55 = vld [vmem:[%s19978_s25 + $0x90] sm:$0xff] }
 0x129   :  { %677 = vmatmul.mubr.f32.gmra.mxu0 %v443_v45  ;;  %790 = vmatmul.mubr.f32.gmra.mxu1 %v443_v45  ;;  %v11513_v45 = vld [vmem:[%s19977_s27 + $0x38] sm:$0xff] }
 0x12a   :  { %875 = vmatpush2.msra.mxu0 %v310_v57  ;;  %988 = vmatpush2.msra.mxu1 %v312_v58  ;;  %v9739_v57 = vld [vmem:[%s19978_s25 + $0xa0] sm:$0xff]  ;;  %v9804_v58 = vld [vmem:[%s19979_s26 + $0x7e8] sm:$0xff] }
 0x12b   :  { %876 = vmatprep.subr.mxu0 %v307_v59  ;;  %989 = vmatprep.subr.mxu1 %v309_v60  ;;  %v9806_v59 = vld [vmem:[%s19979_s26 + $0x7f8] sm:$0xff]  ;;  %v9803_v60 = vld [vmem:[%s19979_s26 + $0x7e0] sm:$0xff] }
 0x12c   :  { %877 = vmatpush2.msra.mxu0 %v306_v61  ;;  %990 = vmatpush2.msra.mxu1 %v308_v62  ;;  %v9805_v61 = vld [vmem:[%s19979_s26 + $0x7f0] sm:$0xff]  ;;  %v9800_v62 = vld [vmem:[%s19979_s26 + $0x7c8] sm:$0xff] }
 0x12d   :  { %878 = vmatprep.subr.mxu0 %v303_v63  ;;  %991 = vmatprep.subr.mxu1 %v305_v0  ;;  %v9802_v63 = vld [vmem:[%s19979_s26 + $0x7d8] sm:$0xff]  ;;  %v9740_v0 = vld [vmem:[%s19978_s25 + $0xa8] sm:$0xff] }
 0x12e   :  { %879 = vmatpush2.msra.mxu0 %v302_v2  ;;  %992 = vmatpush2.msra.mxu1 %v304_v4  ;;  %v9801_v2 = vld [vmem:[%s19979_s26 + $0x7d0] sm:$0xff]  ;;  %v9796_v4 = vld [vmem:[%s19979_s26 + $0x7a8] sm:$0xff] }
 0x12f   :  { %880 = vmatprep.subr.mxu0 %v299_v5  ;;  %993 = vmatprep.subr.mxu1 %v301_v6  ;;  %v9741_v5 = vld [vmem:[%s19978_s25 + $0xb0] sm:$0xff]  ;;  %v9798_v6 = vld [vmem:[%s19979_s26 + $0x7b8] sm:$0xff] }
 0x130   :  { %881 = vmatpush2.msra.mxu0 %v298_v7  ;;  %9719 = vmatprep.mubr.msk.f32.mxu0 %vm545_vm0, %v12267_v20  ;;  %v9795_v7 = vld [vmem:[%s19979_s26 + $0x7a0] sm:$0xff] }
 0x131   :  { %994 = vmatpush2.msra.mxu1 %v300_v8  ;;  %9727 = vmatprep.mubr.msk.f32.mxu1 %vm545_vm0, %v12267_v20  ;;  %v11493_v20 = vld [vmem:[%s19977_s27 + $0xd8] sm:$0xff]  ;;  %v9797_v8 = vld [vmem:[%s19979_s26 + $0x7b0] sm:$0xff] }
 0x132   :  { %882 = vmatprep.subr.mxu0 %v295_v10  ;;  %995 = vmatprep.subr.mxu1 %v297_v11  ;;  %v9794_v10 = vld [vmem:[%s19979_s26 + $0x798] sm:$0xff]  ;;  %v9791_v11 = vld [vmem:[%s19979_s26 + $0x780] sm:$0xff] }
 0x133   :  { %883 = vmatpush2.msra.mxu0 %v294_v13  ;;  %996 = vmatpush2.msra.mxu1 %v296_v14  ;;  %v9793_v13 = vld [vmem:[%s19979_s26 + $0x790] sm:$0xff]  ;;  %v9788_v14 = vld [vmem:[%s19979_s26 + $0x768] sm:$0xff] }
 0x134   :  { %885 = vmatmul.mubr.f32.vlgmr.msra.gmra.mxu0 %v12245_v12  ;;  %998 = vmatmul.mubr.f32.vlgmr.msra.gmra.mxu1 %v12245_v12  ;;  %v11491_v12 = vld [vmem:[%s19977_s27 + $0xe8] sm:$0xff] }
 0x135   :  { %1055 = vmatprep.subr.mxu0 %v11489_v16  ;;  %9720 = vmatprep.mubr.msk.f32.mxu0 %vm545_vm0, %v12303_v34  ;;  %v9742_v16 = vld [vmem:[%s19978_s25 + $0xb8] sm:$0xff] }
 0x136   :  { %9728 = vmatprep.mubr.msk.f32.mxu1 %vm545_vm0, %v12303_v34  ;;  %1056 = vmatpush1.msra.mxu0 %v11490_v17  ;;  %v11504_v34 = vld [vmem:[%s19977_s27 + $0x80] sm:$0xff] }
 0x137   :  { %1057 = vmatprep.subr.mxu0 %v11491_v12  ;;  %1289 = vmatprep.subr.mxu1 %v9804_v58  ;;  %v9787_v17 = vld [vmem:[%s19979_s26 + $0x760] sm:$0xff]  ;;  %v9784_v12 = vld [vmem:[%s19979_s26 + $0x748] sm:$0xff] }
 0x138   :  { %1058 = vmatpush1.msra.mxu0 %v11492_v19  ;;  %1004 = vmatmul.mubr.f32.gmra.mxu1 %v12289_v28  ;;  %v9786_v19 = vld [vmem:[%s19979_s26 + $0x758] sm:$0xff]  ;;  %v9744_v58 = vld [vmem:[%s19979_s26 + $0x608] sm:$0xff] }
 0x139   :  { %891 = vmatmul.mubr.f32.gmra.mxu0 %v12289_v28  ;;  %1059 = vmatprep.subr.mxu0 %v11493_v20  ;;  %v11499_v28 = vld [vmem:[%s19977_s27 + $0xa8] sm:$0xff]  ;;  %v9783_v20 = vld [vmem:[%s19979_s26 + $0x740] sm:$0xff] }
 0x13a   :  { %9721 = vmatprep.mubr.msk.f32.mxu0 %vm545_vm0, %v12347_v50  ;;  %9729 = vmatprep.mubr.msk.f32.mxu1 %vm545_vm0, %v12347_v50  ;;  %v11518_v50 = vld [vmem:[%s19977_s27 + $0x10] sm:$0xff] }
 0x13b   :  { %1060 = vmatpush1.msra.mxu0 %v11494_v22  ;;  %1290 = vmatpush1.msra.mxu1 %v9803_v60  ;;  %v9780_v22 = vld [vmem:[%s19979_s26 + $0x728] sm:$0xff]  ;;  %v9743_v60 = vld [vmem:[%s19979_s26 + $0x600] sm:$0xff] }
 0x13c   :  { %1061 = vmatprep.subr.mxu0 %v11495_v23  ;;  %1010 = vmatmul.mubr.f32.gmra.mxu1 %v12325_v42  ;;  %v9782_v23 = vld [vmem:[%s19979_s26 + $0x738] sm:$0xff] }
 0x13d   :  { %1062 = vmatpush1.msra.mxu0 %v11496_v24  ;;  %9730 = vmatprep.mubr.msk.f32.mxu1 %vm545_vm0, %v12389_v1  ;;  %v9779_v24 = vld [vmem:[%s19979_s26 + $0x720] sm:$0xff] }
 0x13e   :  { %897 = vmatmul.mubr.f32.gmra.mxu0 %v12325_v42  ;;  %1063 = vmatprep.subr.mxu0 %v11497_v25  ;;  %v11510_v42 = vld [vmem:[%s19977_s27 + $0x50] sm:$0xff] }
 0x13f   :  { %9722 = vmatprep.mubr.msk.f32.mxu0 %vm545_vm0, %v12389_v1  ;;  %1064 = vmatpush1.msra.mxu0 %v11498_v27  ;;  %v9799_v1 = vld [vmem:[%s19979_s26 + $0x7c0] sm:$0xff]  ;;  %v9781_v25 = vld [vmem:[%s19979_s26 + $0x730] sm:$0xff]  ;;  %v9778_v27 = vld [vmem:[%s19979_s26 + $0x718] sm:$0xff] }
 0x140   :  { %1065 = vmatprep.subr.mxu0 %v11499_v28  ;;  %1016 = vmatmul.mubr.f32.gmra.mxu1 %v12361_v56  ;;  %v9775_v28 = vld [vmem:[%s19979_s26 + $0x700] sm:$0xff] }
 0x141   :  { %1066 = vmatpush1.msra.mxu0 %v11500_v29  ;;  %9731 = vmatprep.mubr.msk.f32.mxu1 %vm545_vm0, %v209_v15  ;;  %v9777_v29 = vld [vmem:[%s19979_s26 + $0x710] sm:$0xff] }
 0x142   :  { %903 = vmatmul.mubr.f32.gmra.mxu0 %v12361_v56  ;;  %1067 = vmatprep.subr.mxu0 %v11501_v30  ;;  %v9738_v56 = vld [vmem:[%s19978_s25 + $0x98] sm:$0xff]  ;;  %v9772_v30 = vld [vmem:[%s19979_s26 + $0x6e8] sm:$0xff] }
 0x143   :  { %9723 = vmatprep.mubr.msk.f32.mxu0 %vm545_vm0, %v209_v15  ;;  %1068 = vmatpush1.msra.mxu0 %v11502_v32  ;;  %v9790_v15 = vld [vmem:[%s19979_s26 + $0x778] sm:$0xff]  ;;  %v9771_v32 = vld [vmem:[%s19979_s26 + $0x6e0] sm:$0xff] }
 0x144   :  { %1069 = vmatprep.subr.mxu0 %v11503_v33  ;;  %1022 = vmatmul.mubr.f32.gmra.mxu1 %v12409_v9  ;;  %v9773_v33 = vld [vmem:[%s19979_s26 + $0x6f0] sm:$0xff] }
 0x145   :  { %1070 = vmatpush1.msra.mxu0 %v11504_v34  ;;  %9732 = vmatprep.mubr.msk.f32.mxu1 %vm545_vm0, %v215_v21  ;;  %v9768_v34 = vld [vmem:[%s19979_s26 + $0x6c8] sm:$0xff] }
 0x146   :  { %909 = vmatmul.mubr.f32.gmra.mxu0 %v12409_v9  ;;  %1071 = vmatprep.subr.mxu0 %v11505_v35  ;;  %v9792_v9 = vld [vmem:[%s19979_s26 + $0x788] sm:$0xff]  ;;  %v9770_v35 = vld [vmem:[%s19979_s26 + $0x6d8] sm:$0xff] }
 0x147   :  { %9724 = vmatprep.mubr.msk.f32.mxu0 %vm545_vm0, %v215_v21  ;;  %1072 = vmatpush1.msra.mxu0 %v11506_v37  ;;  %v9785_v21 = vld [vmem:[%s19979_s26 + $0x750] sm:$0xff] }
 0x148   :  { %1073 = vmatprep.subr.mxu0 %v11507_v38  ;;  %1028 = vmatmul.mubr.f32.gmra.mxu1 %v213_v18  ;;  %v9769_v37 = vld [vmem:[%s19979_s26 + $0x6d0] sm:$0xff]  ;;  %v9764_v38 = vld [vmem:[%s19979_s26 + $0x6a8] sm:$0xff] }
 0x149   :  { %1074 = vmatpush1.msra.mxu0 %v11508_v39  ;;  %9733 = vmatprep.mubr.msk.f32.mxu1 %vm545_vm0, %v221_v31  ;;  %v9766_v39 = vld [vmem:[%s19979_s26 + $0x6b8] sm:$0xff] }
 0x14a   :  { %915 = vmatmul.mubr.f32.gmra.mxu0 %v213_v18  ;;  %1075 = vmatprep.subr.mxu0 %v11509_v40  ;;  %v9789_v18 = vld [vmem:[%s19979_s26 + $0x770] sm:$0xff]  ;;  %v9763_v40 = vld [vmem:[%s19979_s26 + $0x6a0] sm:$0xff] }
 0x14b   :  { %9725 = vmatprep.mubr.msk.f32.mxu0 %vm545_vm0, %v221_v31  ;;  %1076 = vmatpush1.msra.mxu0 %v11510_v42  ;;  %v9774_v31 = vld [vmem:[%s19979_s26 + $0x6f8] sm:$0xff]  ;;  %v9760_v42 = vld [vmem:[%s19979_s26 + $0x688] sm:$0xff] }
 0x14c   :  { %1077 = vmatprep.subr.mxu0 %v11511_v43  ;;  %1034 = vmatmul.mubr.f32.gmra.mxu1 %v219_v26  ;;  %v9762_v43 = vld [vmem:[%s19979_s26 + $0x698] sm:$0xff] }
 0x14d   :  { %1078 = vmatpush1.msra.mxu0 %v11512_v44  ;;  %9734 = vmatprep.mubr.msk.f32.mxu1 %vm545_vm0, %v227_v41  ;;  %v9759_v44 = vld [vmem:[%s19979_s26 + $0x680] sm:$0xff] }
 0x14e   :  { %921 = vmatmul.mubr.f32.gmra.mxu0 %v219_v26  ;;  %1079 = vmatprep.subr.mxu0 %v11513_v45  ;;  %v9776_v26 = vld [vmem:[%s19979_s26 + $0x708] sm:$0xff]  ;;  %v9761_v45 = vld [vmem:[%s19979_s26 + $0x690] sm:$0xff] }
 0x14f   :  { %9726 = vmatprep.mubr.msk.f32.mxu0 %vm545_vm0, %v227_v41  ;;  %1080 = vmatpush1.msra.mxu0 %v11514_v46  ;;  %v9765_v41 = vld [vmem:[%s19979_s26 + $0x6b0] sm:$0xff]  ;;  %v9756_v46 = vld [vmem:[%s19979_s26 + $0x668] sm:$0xff] }
 0x150   :  { %1081 = vmatprep.subr.mxu0 %v11515_v47  ;;  %1040 = vmatmul.mubr.f32.gmra.mxu1 %v225_v36  ;;  %v9758_v47 = vld [vmem:[%s19979_s26 + $0x678] sm:$0xff] }
 0x151   :  { %1082 = vmatpush1.msra.mxu0 %v11516_v48  ;;  %1291 = vmatprep.subr.mxu1 %v9800_v62  ;;  %v9755_v48 = vld [vmem:[%s19979_s26 + $0x660] sm:$0xff]  ;;  %v9836_v62 = vld [vmem:[%s19979_s26 + $0x8e8] sm:$0xff] }
 0x152   :  { %927 = vmatmul.mubr.f32.gmra.mxu0 %v225_v36  ;;  %1083 = vmatprep.subr.mxu0 %v11517_v49  ;;  %v9767_v36 = vld [vmem:[%s19979_s26 + $0x6c0] sm:$0xff]  ;;  %v9757_v49 = vld [vmem:[%s19979_s26 + $0x670] sm:$0xff] }
 0x153   :  { %1084 = vmatpush1.msra.mxu0 %v11518_v50  ;;  %1119 = vmatprep.mubr.f32.mxu0 %v19954_v3  ;;  %v9752_v50 = vld [vmem:[%s19979_s26 + $0x648] sm:$0xff] }
 0x154   :  { %1085 = vmatprep.subr.mxu0 %v11519_v52  ;;  %1292 = vmatpush1.msra.mxu1 %v9799_v1  ;;  %v9751_v52 = vld [vmem:[%s19979_s26 + $0x640] sm:$0xff]  ;;  %v9837_v1 = vld [vmem:[%s19979_s26 + $0x8f0] sm:$0xff] }
 0x155   :  { %1086 = vmatpush1.msra.mxu0 %v11520_v53  ;;  %1293 = vmatprep.subr.mxu1 %v9796_v4  ;;  %v9753_v53 = vld [vmem:[%s19979_s26 + $0x650] sm:$0xff]  ;;  %v9834_v4 = vld [vmem:[%s19979_s26 + $0x8d8] sm:$0xff] }
 0x156   :  { %1120 = vmatmul.mubr.f32.vlgmr.msra.gmra.mxu0 %v9735_v51  ;;  %1402 = vmatprep.subr.mxu0 %v9806_v59  ;;  %v9754_v51 = vld [vmem:[%s19979_s26 + $0x658] sm:$0xff] }
 0x157   :  { %1125 = vmatprep.mubr.f32.mxu0 %v19954_v3  ;;  %1403 = vmatpush1.msra.mxu0 %v9805_v61  ;;  %v9746_v59 = vld [vmem:[%s19979_s26 + $0x618] sm:$0xff]  ;;  %v9745_v61 = vld [vmem:[%s19979_s26 + $0x610] sm:$0xff] }
 0x158   :  { %1404 = vmatprep.subr.mxu0 %v9802_v63  ;;  %1294 = vmatpush1.msra.mxu1 %v9795_v7  ;;  %v9838_v63 = vld [vmem:[%s19979_s26 + $0x8f8] sm:$0xff]  ;;  %v9828_v7 = vld [vmem:[%s19979_s26 + $0x8a8] sm:$0xff] }
 0x159   :  { %1405 = vmatpush1.msra.mxu0 %v9801_v2  ;;  %1295 = vmatprep.subr.mxu1 %v9792_v9  ;;  %v9832_v2 = vld [vmem:[%s19979_s26 + $0x8c8] sm:$0xff]  ;;  %v9827_v9 = vld [vmem:[%s19979_s26 + $0x8a0] sm:$0xff] }
 0x15a   :  { %1126 = vmatmul.mubr.f32.gmra.mxu0 %v9736_v54  ;;  %1406 = vmatprep.subr.mxu0 %v9798_v6  ;;  %v9748_v54 = vld [vmem:[%s19979_s26 + $0x628] sm:$0xff]  ;;  %v9833_v6 = vld [vmem:[%s19979_s26 + $0x8d0] sm:$0xff] }
 0x15b   :  { %1131 = vmatprep.mubr.f32.mxu0 %v19954_v3  ;;  %1407 = vmatpush1.msra.mxu0 %v9797_v8  ;;  %v9830_v8 = vld [vmem:[%s19979_s26 + $0x8b8] sm:$0xff] }
 0x15c   :  { %1408 = vmatprep.subr.mxu0 %v9794_v10  ;;  %1296 = vmatpush1.msra.mxu1 %v9791_v11  ;;  %v9829_v10 = vld [vmem:[%s19979_s26 + $0x8b0] sm:$0xff]  ;;  %v9824_v11 = vld [vmem:[%s19979_s26 + $0x888] sm:$0xff] }
 0x15d   :  { %1409 = vmatpush1.msra.mxu0 %v9793_v13  ;;  %1297 = vmatprep.subr.mxu1 %v9788_v14  ;;  %v9826_v13 = vld [vmem:[%s19979_s26 + $0x898] sm:$0xff]  ;;  %v9823_v14 = vld [vmem:[%s19979_s26 + $0x880] sm:$0xff] }
 0x15e   :  { %1132 = vmatmul.mubr.f32.gmra.mxu0 %v9737_v55  ;;  %1410 = vmatprep.subr.mxu0 %v9790_v15  ;;  %v9750_v55 = vld [vmem:[%s19979_s26 + $0x638] sm:$0xff]  ;;  %v9825_v15 = vld [vmem:[%s19979_s26 + $0x890] sm:$0xff] }
 0x15f   :  { %1137 = vmatprep.mubr.f32.mxu0 %v19954_v3  ;;  %1298 = vmatpush1.msra.mxu1 %v9787_v17  ;;  %v9822_v17 = vld [vmem:[%s19979_s26 + $0x878] sm:$0xff] }
 0x160   :  { %1411 = vmatpush1.msra.mxu0 %v9789_v18  ;;  %1299 = vmatprep.subr.mxu1 %v9784_v12  ;;  %v9819_v18 = vld [vmem:[%s19979_s26 + $0x860] sm:$0xff]  ;;  %v9821_v12 = vld [vmem:[%s19979_s26 + $0x870] sm:$0xff] }
 0x161   :  { %1412 = vmatprep.subr.mxu0 %v9786_v19  ;;  %1300 = vmatpush1.msra.mxu1 %v9783_v20  ;;  %v9816_v19 = vld [vmem:[%s19979_s26 + $0x848] sm:$0xff]  ;;  %v9818_v20 = vld [vmem:[%s19979_s26 + $0x858] sm:$0xff] }
 0x162   :  { %1138 = vmatmul.mubr.f32.gmra.mxu0 %v9738_v56  ;;  %1301 = vmatprep.subr.mxu1 %v9780_v22  ;;  %v9747_v56 = vld [vmem:[%s19979_s26 + $0x620] sm:$0xff]  ;;  %v9817_v22 = vld [vmem:[%s19979_s26 + $0x850] sm:$0xff] }
 0x163   :  { %1143 = vmatprep.mubr.f32.mxu0 %v19954_v3  ;;  %1413 = vmatpush1.msra.mxu0 %v9785_v21  ;;  %v9815_v21 = vld [vmem:[%s19979_s26 + $0x840] sm:$0xff] }
 0x164   :  { %1414 = vmatprep.subr.mxu0 %v9782_v23  ;;  %1302 = vmatpush1.msra.mxu1 %v9779_v24  ;;  %v9812_v23 = vld [vmem:[%s19979_s26 + $0x828] sm:$0xff]  ;;  %v9814_v24 = vld [vmem:[%s19979_s26 + $0x838] sm:$0xff] }
 0x165   :  { %1415 = vmatpush1.msra.mxu0 %v9781_v25  ;;  %1303 = vmatprep.subr.mxu1 %v9776_v26  ;;  %v9811_v25 = vld [vmem:[%s19979_s26 + $0x820] sm:$0xff]  ;;  %v9813_v26 = vld [vmem:[%s19979_s26 + $0x830] sm:$0xff] }
 0x166   :  { %1144 = vmatmul.mubr.f32.gmra.mxu0 %v9739_v57  ;;  %1416 = vmatprep.subr.mxu0 %v9778_v27  ;;  %v9749_v57 = vld [vmem:[%s19979_s26 + $0x630] sm:$0xff]  ;;  %v9808_v27 = vld [vmem:[%s19979_s26 + $0x808] sm:$0xff] }
 0x167   :  { %1149 = vmatprep.mubr.f32.mxu0 %v19954_v3  ;;  %1304 = vmatpush1.msra.mxu1 %v9775_v28  ;;  %v9810_v28 = vld [vmem:[%s19979_s26 + $0x818] sm:$0xff] }
 0x168   :  { %1417 = vmatpush1.msra.mxu0 %v9777_v29  ;;  %1305 = vmatprep.subr.mxu1 %v9772_v30  ;;  %v9807_v29 = vld [vmem:[%s19979_s26 + $0x800] sm:$0xff]  ;;  %v9809_v30 = vld [vmem:[%s19979_s26 + $0x810] sm:$0xff] }
 0x169   :  { %1418 = vmatprep.subr.mxu0 %v9774_v31  ;;  %1306 = vmatpush1.msra.mxu1 %v9771_v32  ;;  %v1664_v31 = vld [vmem:[%s19980_s2 + $0xf8] sm:$0xff] }
 0x16a   :  { %1150 = vmatmul.mubr.f32.gmra.mxu0 %v9740_v0  ;;  %1307 = vmatprep.subr.mxu1 %v9768_v34  ;;  %v9835_v0 = vld [vmem:[%s19979_s26 + $0x8e0] sm:$0xff]  ;;  %v1728_v32 = vld [vmem:[%s19980_s2 + $0x2f8] sm:$0xff] }
 0x16b   :  { %1155 = vmatprep.mubr.f32.mxu0 %v19954_v3  ;;  %1419 = vmatpush1.msra.mxu0 %v9773_v33 }
 0x16c   :  { %1420 = vmatprep.subr.mxu0 %v9770_v35  ;;  %1308 = vmatpush1.msra.mxu1 %v9767_v36 }
 0x16d   :  { %1421 = vmatpush1.msra.mxu0 %v9769_v37  ;;  %1309 = vmatprep.subr.mxu1 %v9764_v38 }
 0x16e   :  { %1156 = vmatmul.mubr.f32.gmra.mxu0 %v9741_v5  ;;  %1422 = vmatprep.subr.mxu0 %v9766_v39  ;;  %v9831_v5 = vld [vmem:[%s19979_s26 + $0x8c0] sm:$0xff] }
 0x16f   :  { %1161 = vmatprep.mubr.f32.mxu0 %v19954_v3  ;;  %1310 = vmatpush1.msra.mxu1 %v9763_v40 }
 0x170   :  { %1423 = vmatpush1.msra.mxu0 %v9765_v41  ;;  %1311 = vmatprep.subr.mxu1 %v9760_v42 }
 0x171   :  { %1424 = vmatprep.subr.mxu0 %v9762_v43  ;;  %1312 = vmatpush1.msra.mxu1 %v9759_v44 }
 0x172   :  { %1162 = vmatmul.mubr.f32.gmra.mxu0 %v9742_v16  ;;  %1313 = vmatprep.subr.mxu1 %v9756_v46  ;;  %v9820_v16 = vld [vmem:[%s19979_s26 + $0x868] sm:$0xff] }
 0x173   :  { %1425 = vmatpush1.msra.mxu0 %v9761_v45  ;;  %1314 = vmatpush1.msra.mxu1 %v9755_v48 }
 0x174   :  { %1426 = vmatprep.subr.mxu0 %v9758_v47  ;;  %1315 = vmatprep.subr.mxu1 %v9752_v50 }
 0x175   :  { %1427 = vmatpush1.msra.mxu0 %v9757_v49  ;;  %1316 = vmatpush1.msra.mxu1 %v9751_v52 }
 0x176   :  { %1428 = vmatprep.subr.mxu0 %v9754_v51  ;;  %1317 = vmatprep.subr.mxu1 %v9748_v54 }
 0x177   :  { %1429 = vmatpush1.msra.mxu0 %v9753_v53  ;;  %1318 = vmatpush1.msra.mxu1 %v9747_v56 }
 0x178   :  { %1430 = vmatprep.subr.mxu0 %v9750_v55  ;;  %1319 = vmatprep.subr.mxu1 %v9744_v58 }
 0x179   :  { %1431 = vmatpush1.msra.mxu0 %v9749_v57  ;;  %1320 = vmatpush1.msra.mxu1 %v9743_v60 }
 0x17a   :  { %1432 = vmatprep.subr.mxu0 %v9746_v59  ;;  %1337 = vmatprep.subr.mxu1 %v9836_v62 }
 0x17b   :  { %1433 = vmatpush1.msra.mxu0 %v9745_v61  ;;  %1338 = vmatpush2.msra.mxu1 %v9835_v0 }
 0x17c   :  { %1450 = vmatprep.subr.mxu0 %v9838_v63  ;;  %1339 = vmatprep.subr.mxu1 %v9832_v2 }
 0x17d   :  { %1451 = vmatpush2.msra.mxu0 %v9837_v1  ;;  %1340 = vmatpush2.msra.mxu1 %v9831_v5 }
 0x17e   :  { %1452 = vmatprep.subr.mxu0 %v9834_v4  ;;  %1341 = vmatprep.subr.mxu1 %v9828_v7 }
 0x17f   :  { %1453 = vmatpush2.msra.mxu0 %v9833_v6  ;;  %1342 = vmatpush2.msra.mxu1 %v9827_v9 }
 0x180   :  { %1454 = vmatprep.subr.mxu0 %v9830_v8  ;;  %1343 = vmatprep.subr.mxu1 %v9824_v11 }
 0x181   :  { %1455 = vmatpush2.msra.mxu0 %v9829_v10  ;;  %1344 = vmatpush2.msra.mxu1 %v9823_v14  ;;  %v1727_v14 = vld [vmem:[%s19980_s2 + $0x2f0] sm:$0xff] }
 0x182   :  { %1456 = vmatprep.subr.mxu0 %v9826_v13  ;;  %1345 = vmatprep.subr.mxu1 %v9820_v16  ;;  %v1663_v13 = vld [vmem:[%s19980_s2 + $0xf0] sm:$0xff]  ;;  %v1726_v16 = vld [vmem:[%s19980_s2 + $0x2e8] sm:$0xff] }
 0x183   :  { %1457 = vmatpush2.msra.mxu0 %v9825_v15  ;;  %1346 = vmatpush2.msra.mxu1 %v9819_v18  ;;  %v1662_v15 = vld [vmem:[%s19980_s2 + $0xe8] sm:$0xff] }
 0x184   :  { %1458 = vmatprep.subr.mxu0 %v9822_v17  ;;  %1347 = vmatprep.subr.mxu1 %v9816_v19  ;;  %v1725_v19 = vld [vmem:[%s19980_s2 + $0x2e0] sm:$0xff] }
 0x185   :  { %1459 = vmatpush2.msra.mxu0 %v9821_v12  ;;  %1348 = vmatpush2.msra.mxu1 %v9815_v21  ;;  %v1661_v12 = vld [vmem:[%s19980_s2 + $0xe0] sm:$0xff]  ;;  %v1724_v21 = vld [vmem:[%s19980_s2 + $0x2d8] sm:$0xff] }
 0x186   :  { %1460 = vmatprep.subr.mxu0 %v9818_v20  ;;  %1349 = vmatprep.subr.mxu1 %v9812_v23  ;;  %v1660_v20 = vld [vmem:[%s19980_s2 + $0xd8] sm:$0xff] }
 0x187   :  { %1461 = vmatpush2.msra.mxu0 %v9817_v22  ;;  %1350 = vmatpush2.msra.mxu1 %v9811_v25  ;;  %v1723_v25 = vld [vmem:[%s19980_s2 + $0x2d0] sm:$0xff] }
 0x188   :  { %1462 = vmatprep.subr.mxu0 %v9814_v24  ;;  %1351 = vmatprep.subr.mxu1 %v9808_v27  ;;  %v1659_v24 = vld [vmem:[%s19980_s2 + $0xd0] sm:$0xff]  ;;  %v1722_v27 = vld [vmem:[%s19980_s2 + $0x2c8] sm:$0xff] }
 0x189   :  { %1463 = vmatpush2.msra.mxu0 %v9813_v26  ;;  %1352 = vmatpush2.msra.mxu1 %v9807_v29  ;;  %v1658_v26 = vld [vmem:[%s19980_s2 + $0xc8] sm:$0xff] }
 0x18a   :  { %1464 = vmatprep.subr.mxu0 %v9810_v28  ;;  %1761 = vmatprep.subr.mxu1 %v1664_v31  ;;  %v1721_v31 = vld [vmem:[%s19980_s2 + $0x2c0] sm:$0xff] }
 0x18b   :  { %1465 = vmatpush2.msra.mxu0 %v9809_v30  ;;  %v1657_v30 = vld [vmem:[%s19980_s2 + $0xc0] sm:$0xff] }
 0x18c   :  { %1874 = vmatprep.subr.mxu0 %v1728_v32  ;;  %v1656_v32 = vld [vmem:[%s19980_s2 + $0xb8] sm:$0xff] }
 0x1b5   :  { %v636_v33 = vpop.f32.mrf.mxu0 }
 0x1b7   :  { %v12879_v34 = vpop.f32.mrf.mxu0 }
 0x1c5   :  { %v642_v35 = vpop.f32.mrf.mxu0 }
 0x1c7   :  { %v12881_v36 = vpop.f32.mrf.mxu0 }
 0x1cb   :  { %v648_v37 = vpop.f32.mrf.mxu0 }
 0x1cd   :  { %v12883_v38 = vpop.f32.mrf.mxu0 }
 0x1d1   :  { %v654_v39 = vpop.f32.mrf.mxu0 }
 0x1d3   :  { %v12885_v40 = vpop.f32.mrf.mxu0 }
 0x1d7   :  { %v660_v41 = vpop.f32.mrf.mxu0 }
 0x1d9   :  { %v12887_v42 = vpop.f32.mrf.mxu0 }
 0x1dd   :  { %v666_v43 = vpop.f32.mrf.mxu0 }
 0x1df   :  { %v12889_v44 = vpop.f32.mrf.mxu0 }
 0x1e3   :  { %v672_v45 = vpop.f32.mrf.mxu0 }
 0x1e5   :  { %v12891_v46 = vpop.f32.mrf.mxu0 }
 0x1e9   :  { %v678_v47 = vpop.f32.mrf.mxu0 }
 0x1eb   :  { %v12893_v48 = vpop.f32.mrf.mxu0 }
 0x1ec   :  { %19981 = vst [vmem:[#allocation2_spill] sm:$0xff] %v12893_v48 }
 0x1f4   :  { %v886_v49 = vpop.f32.mrf.mxu0 }
 0x1f5   :  { %v12895_v50 = vadd.f32 %v886_v49, %v636_v33  ;;  %v1720_v33 = vld [vmem:[%s19980_s2 + $0x2b8] sm:$0xff] }
 0x1f6   :  { %v12897_v51 = vpop.f32.mrf.mxu0 }
 0x1f7   :  { %v889_v3 = vadd.f32 %v12897_v51, %v12879_v34 }
 0x1f9   :  { %v892_v52 = vpop.f32.mrf.mxu0 }
 0x1fa   :  { %v12899_v53 = vadd.f32 %v892_v52, %v642_v35  ;;  %v1653_v52 = vld [vmem:[%s19980_s2 + $0xa0] sm:$0xff] }
 0x1fb   :  { %v12901_v54 = vpop.f32.mrf.mxu0 }
 0x1fe   :  { %v898_v55 = vpop.f32.mrf.mxu0 }
 0x1ff   :  { %v12903_v56 = vadd.f32 %v898_v55, %v648_v37  ;;  %v1717_v55 = vld [vmem:[%s19980_s2 + $0x2a0] sm:$0xff] }
 0x200   :  { %v12905_v57 = vpop.f32.mrf.mxu0 }
 0x202   :  { %v904_v58 = vpop.f32.mrf.mxu0 }
 0x203   :  { %v12907_v59 = vadd.f32 %v904_v58, %v654_v39  ;;  %v1655_v39 = vld [vmem:[%s19980_s2 + $0xb0] sm:$0xff]  ;;  %v1652_v58 = vld [vmem:[%s19980_s2 + $0x98] sm:$0xff] }
 0x204   :  { %v12909_v60 = vpop.f32.mrf.mxu0 }
 0x206   :  { %v910_v61 = vpop.f32.mrf.mxu0 }
 0x207   :  { %v12911_v62 = vadd.f32 %v910_v61, %v660_v41  ;;  %v1719_v41 = vld [vmem:[%s19980_s2 + $0x2b0] sm:$0xff]  ;;  %v1716_v61 = vld [vmem:[%s19980_s2 + $0x298] sm:$0xff] }
 0x208   :  { %v12913_v63 = vpop.f32.mrf.mxu0 }
 0x20a   :  { %v916_v0 = vpop.f32.mrf.mxu0 }
 0x20b   :  { %v12915_v1 = vadd.f32 %v916_v0, %v666_v43  ;;  %v1654_v43 = vld [vmem:[%s19980_s2 + $0xa8] sm:$0xff] }
 0x20c   :  { %v12917_v2 = vpop.f32.mrf.mxu0 }
 0x20e   :  { %v922_v4 = vpop.f32.mrf.mxu0 }
 0x20f   :  { %v12919_v5 = vadd.f32 %v922_v4, %v672_v45  ;;  %v1718_v45 = vld [vmem:[%s19980_s2 + $0x2a8] sm:$0xff] }
 0x210   :  { %v12921_v6 = vpop.f32.mrf.mxu0 }
 0x211   :  { %19982 = vst [vmem:[#allocation3_spill] sm:$0xff] %v12919_v5 }
 0x212   :  { %v928_v7 = vpop.f32.mrf.mxu0 }
 0x213   :  { %v12923_v8 = vadd.f32 %v928_v7, %v678_v47  ;;  %v1651_v7 = vld [vmem:[%s19980_s2 + $0x90] sm:$0xff] }
 0x214   :  { %v12925_v9 = vpop.f32.mrf.mxu0 }
 0x215   :  { %19983 = vst [vmem:[#allocation4_spill] sm:$0xff] %v12923_v8  ;;  %19984 = vst [vmem:[#allocation5_spill] sm:$0xff] %v12925_v9 }
 0x216   :  { %v1121_v10 = vpop.f32.mrf.mxu0 }
 0x218   :  { %v1123_v11 = vpop.f32.mrf.mxu0 }
 0x219   :  { %9839 = vmatprep.mubr.msk.f32.mxu1 %vm545_vm0, %v1123_v11  ;;  %9847 = vmatprep.mubr.msk.f32.mxu0 %vm545_vm0, %v1123_v11  ;;  %v1650_v11 = vld [vmem:[%s19980_s2 + $0x88] sm:$0xff] }
 0x21a   :  { %v1127_v17 = vpop.f32.mrf.mxu0  ;;  %1354 = vmatmul.mubr.f32.vlgmr.msra.gmra.mxu1 %v1121_v10  ;;  %1467 = vmatmul.mubr.f32.vlgmr.msra.gmra.mxu0 %v1121_v10  ;;  %v1715_v10 = vld [vmem:[%s19980_s2 + $0x290] sm:$0xff] }
 0x21b   :  { %1762 = vmatpush1.msra.mxu1 %v1663_v13  ;;  %1875 = vmatpush1.msra.mxu0 %v1727_v14  ;;  %v1714_v13 = vld [vmem:[%s19980_s2 + $0x288] sm:$0xff] }
 0x21c   :  { %v1129_v18 = vpop.f32.mrf.mxu0  ;;  %1763 = vmatprep.subr.mxu1 %v1662_v15  ;;  %1876 = vmatprep.subr.mxu0 %v1726_v16  ;;  %v1649_v16 = vld [vmem:[%s19980_s2 + $0x80] sm:$0xff] }
 0x21d   :  { %9840 = vmatprep.mubr.msk.f32.mxu1 %vm545_vm0, %v1129_v18  ;;  %9848 = vmatprep.mubr.msk.f32.mxu0 %vm545_vm0, %v1129_v18  ;;  %v1648_v18 = vld [vmem:[%s19980_s2 + $0x78] sm:$0xff] }
 0x21e   :  { %v1133_v22 = vpop.f32.mrf.mxu0  ;;  %1360 = vmatmul.mubr.f32.gmra.mxu1 %v1127_v17  ;;  %1473 = vmatmul.mubr.f32.gmra.mxu0 %v1127_v17  ;;  %v1713_v17 = vld [vmem:[%s19980_s2 + $0x280] sm:$0xff] }
 0x21f   :  { %1764 = vmatpush1.msra.mxu1 %v1661_v12  ;;  %1877 = vmatpush1.msra.mxu0 %v1725_v19  ;;  %v1712_v12 = vld [vmem:[%s19980_s2 + $0x278] sm:$0xff]  ;;  %v1647_v19 = vld [vmem:[%s19980_s2 + $0x70] sm:$0xff] }
 0x220   :  { %v1135_v23 = vpop.f32.mrf.mxu0  ;;  %1765 = vmatprep.subr.mxu1 %v1660_v20  ;;  %1878 = vmatprep.subr.mxu0 %v1724_v21  ;;  %v1711_v20 = vld [vmem:[%s19980_s2 + $0x270] sm:$0xff]  ;;  %v1646_v21 = vld [vmem:[%s19980_s2 + $0x68] sm:$0xff] }
 0x221   :  { %9841 = vmatprep.mubr.msk.f32.mxu1 %vm545_vm0, %v1135_v23  ;;  %9849 = vmatprep.mubr.msk.f32.mxu0 %vm545_vm0, %v1135_v23  ;;  %v1645_v23 = vld [vmem:[%s19980_s2 + $0x60] sm:$0xff] }
 0x222   :  { %v1139_v28 = vpop.f32.mrf.mxu0  ;;  %1366 = vmatmul.mubr.f32.gmra.mxu1 %v1133_v22  ;;  %1479 = vmatmul.mubr.f32.gmra.mxu0 %v1133_v22  ;;  %v1710_v22 = vld [vmem:[%s19980_s2 + $0x268] sm:$0xff] }
 0x223   :  { %1766 = vmatpush1.msra.mxu1 %v1659_v24  ;;  %1879 = vmatpush1.msra.mxu0 %v1723_v25  ;;  %v1709_v24 = vld [vmem:[%s19980_s2 + $0x260] sm:$0xff]  ;;  %v1644_v25 = vld [vmem:[%s19980_s2 + $0x58] sm:$0xff] }
 0x224   :  { %v1141_v29 = vpop.f32.mrf.mxu0  ;;  %1767 = vmatprep.subr.mxu1 %v1658_v26  ;;  %1880 = vmatprep.subr.mxu0 %v1722_v27  ;;  %v1708_v26 = vld [vmem:[%s19980_s2 + $0x258] sm:$0xff]  ;;  %v1643_v27 = vld [vmem:[%s19980_s2 + $0x50] sm:$0xff] }
 0x225   :  { %9842 = vmatprep.mubr.msk.f32.mxu1 %vm545_vm0, %v1141_v29  ;;  %9850 = vmatprep.mubr.msk.f32.mxu0 %vm545_vm0, %v1141_v29  ;;  %v1642_v29 = vld [vmem:[%s19980_s2 + $0x48] sm:$0xff] }
 0x226   :  { %v1145_v35 = vpop.f32.mrf.mxu0  ;;  %1372 = vmatmul.mubr.f32.gmra.mxu1 %v1139_v28  ;;  %1485 = vmatmul.mubr.f32.gmra.mxu0 %v1139_v28  ;;  %v1707_v28 = vld [vmem:[%s19980_s2 + $0x250] sm:$0xff] }
 0x227   :  { %1768 = vmatpush1.msra.mxu1 %v1657_v30  ;;  %1881 = vmatpush1.msra.mxu0 %v1721_v31  ;;  %v1706_v30 = vld [vmem:[%s19980_s2 + $0x248] sm:$0xff]  ;;  %v1641_v31 = vld [vmem:[%s19980_s2 + $0x40] sm:$0xff] }
 0x228   :  { %v1147_v37 = vpop.f32.mrf.mxu0  ;;  %1769 = vmatprep.subr.mxu1 %v1656_v32  ;;  %1882 = vmatprep.subr.mxu0 %v1720_v33  ;;  %v1705_v32 = vld [vmem:[%s19980_s2 + $0x240] sm:$0xff]  ;;  %v1640_v33 = vld [vmem:[%s19980_s2 + $0x38] sm:$0xff] }
 0x229   :  { %9843 = vmatprep.mubr.msk.f32.mxu1 %vm545_vm0, %v1147_v37  ;;  %9851 = vmatprep.mubr.msk.f32.mxu0 %vm545_vm0, %v1147_v37  ;;  %v1639_v37 = vld [vmem:[%s19980_s2 + $0x30] sm:$0xff] }
 0x22a   :  { %v1151_v47 = vpop.f32.mrf.mxu0  ;;  %1378 = vmatmul.mubr.f32.gmra.mxu1 %v1145_v35  ;;  %1491 = vmatmul.mubr.f32.gmra.mxu0 %v1145_v35  ;;  %v1704_v35 = vld [vmem:[%s19980_s2 + $0x238] sm:$0xff] }
 0x22b   :  { %1770 = vmatpush1.msra.mxu1 %v1655_v39  ;;  %1883 = vmatpush1.msra.mxu0 %v1719_v41  ;;  %v1703_v39 = vld [vmem:[%s19980_s2 + $0x230] sm:$0xff]  ;;  %v1638_v41 = vld [vmem:[%s19980_s2 + $0x28] sm:$0xff] }
 0x22c   :  { %v1153_v49 = vpop.f32.mrf.mxu0  ;;  %1771 = vmatprep.subr.mxu1 %v1654_v43  ;;  %1884 = vmatprep.subr.mxu0 %v1718_v45  ;;  %v1702_v43 = vld [vmem:[%s19980_s2 + $0x228] sm:$0xff]  ;;  %v1637_v45 = vld [vmem:[%s19980_s2 + $0x20] sm:$0xff] }
 0x22d   :  { %9844 = vmatprep.mubr.msk.f32.mxu1 %vm545_vm0, %v1153_v49  ;;  %9852 = vmatprep.mubr.msk.f32.mxu0 %vm545_vm0, %v1153_v49  ;;  %v1636_v49 = vld [vmem:[%s19980_s2 + $0x18] sm:$0xff] }
 0x22e   :  { %v1157_v0 = vpop.f32.mrf.mxu0  ;;  %1384 = vmatmul.mubr.f32.gmra.mxu1 %v1151_v47  ;;  %1497 = vmatmul.mubr.f32.gmra.mxu0 %v1151_v47  ;;  %v1701_v47 = vld [vmem:[%s19980_s2 + $0x220] sm:$0xff] }
 0x22f   :  { %1772 = vmatpush1.msra.mxu1 %v1653_v52  ;;  %1885 = vmatpush1.msra.mxu0 %v1717_v55  ;;  %v1700_v52 = vld [vmem:[%s19980_s2 + $0x218] sm:$0xff]  ;;  %v1635_v55 = vld [vmem:[%s19980_s2 + $0x10] sm:$0xff] }
 0x230   :  { %v1159_v4 = vpop.f32.mrf.mxu0  ;;  %1773 = vmatprep.subr.mxu1 %v1652_v58  ;;  %1886 = vmatprep.subr.mxu0 %v1716_v61  ;;  %v1699_v58 = vld [vmem:[%s19980_s2 + $0x210] sm:$0xff]  ;;  %v1634_v61 = vld [vmem:[%s19980_s2 + $0x8] sm:$0xff] }
 0x231   :  { %9845 = vmatprep.mubr.msk.f32.mxu1 %vm545_vm0, %v1159_v4  ;;  %9853 = vmatprep.mubr.msk.f32.mxu0 %vm545_vm0, %v1159_v4  ;;  %v1633_v4 = vld [vmem:[%s19980_s2] sm:$0xff] }
 0x232   :  { %v1163_v14 = vpop.f32.mrf.mxu0  ;;  %1390 = vmatmul.mubr.f32.gmra.mxu1 %v1157_v0  ;;  %1503 = vmatmul.mubr.f32.gmra.mxu0 %v1157_v0  ;;  %v1698_v0 = vld [vmem:[%s19980_s2 + $0x208] sm:$0xff] }
 0x233   :  { %1774 = vmatpush1.msra.mxu1 %v1651_v7  ;;  %1887 = vmatpush1.msra.mxu0 %v1715_v10  ;;  %v1697_v7 = vld [vmem:[%s19980_s2 + $0x200] sm:$0xff]  ;;  %v1696_v10 = vld [vmem:[%s19980_s2 + $0x1f8] sm:$0xff] }
 0x234   :  { %v1165_v15 = vpop.f32.mrf.mxu0  ;;  %1775 = vmatprep.subr.mxu1 %v1650_v11  ;;  %1888 = vmatprep.subr.mxu0 %v1714_v13  ;;  %v1760_v11 = vld [vmem:[%s19980_s2 + $0x3f8] sm:$0xff]  ;;  %v1695_v13 = vld [vmem:[%s19980_s2 + $0x1f0] sm:$0xff] }
 0x235   :  { %9846 = vmatprep.mubr.msk.f32.mxu1 %vm545_vm0, %v1165_v15  ;;  %9854 = vmatprep.mubr.msk.f32.mxu0 %vm545_vm0, %v1165_v15  ;;  %v1694_v15 = vld [vmem:[%s19980_s2 + $0x1e8] sm:$0xff] }
 0x236   :  { %1396 = vmatmul.mubr.f32.gmra.mxu1 %v1163_v14  ;;  %1509 = vmatmul.mubr.f32.gmra.mxu0 %v1163_v14  ;;  %v1759_v14 = vld [vmem:[%s19980_s2 + $0x3f0] sm:$0xff] }
 0x237   :  { %1776 = vmatpush1.msra.mxu1 %v1649_v16  ;;  %1889 = vmatpush1.msra.mxu0 %v1713_v17  ;;  %v1758_v16 = vld [vmem:[%s19980_s2 + $0x3e8] sm:$0xff]  ;;  %v1693_v17 = vld [vmem:[%s19980_s2 + $0x1e0] sm:$0xff] }
 0x238   :  { %1777 = vmatprep.subr.mxu1 %v1648_v18  ;;  %1890 = vmatprep.subr.mxu0 %v1712_v12  ;;  %v1757_v18 = vld [vmem:[%s19980_s2 + $0x3e0] sm:$0xff]  ;;  %v1692_v12 = vld [vmem:[%s19980_s2 + $0x1d8] sm:$0xff] }
 0x239   :  { %1778 = vmatpush1.msra.mxu1 %v1647_v19  ;;  %1891 = vmatpush1.msra.mxu0 %v1711_v20  ;;  %v1756_v19 = vld [vmem:[%s19980_s2 + $0x3d8] sm:$0xff]  ;;  %v1691_v20 = vld [vmem:[%s19980_s2 + $0x1d0] sm:$0xff] }
 0x23a   :  { %1779 = vmatprep.subr.mxu1 %v1646_v21  ;;  %1892 = vmatprep.subr.mxu0 %v1710_v22  ;;  %v1755_v21 = vld [vmem:[%s19980_s2 + $0x3d0] sm:$0xff]  ;;  %v1690_v22 = vld [vmem:[%s19980_s2 + $0x1c8] sm:$0xff] }
 0x23b   :  { %1780 = vmatpush1.msra.mxu1 %v1645_v23  ;;  %1893 = vmatpush1.msra.mxu0 %v1709_v24  ;;  %v1754_v23 = vld [vmem:[%s19980_s2 + $0x3c8] sm:$0xff]  ;;  %v1689_v24 = vld [vmem:[%s19980_s2 + $0x1c0] sm:$0xff] }
 0x23c   :  { %1781 = vmatprep.subr.mxu1 %v1644_v25  ;;  %1894 = vmatprep.subr.mxu0 %v1708_v26  ;;  %v1753_v25 = vld [vmem:[%s19980_s2 + $0x3c0] sm:$0xff]  ;;  %v1688_v26 = vld [vmem:[%s19980_s2 + $0x1b8] sm:$0xff] }
 0x23d   :  { %1782 = vmatpush1.msra.mxu1 %v1643_v27  ;;  %1895 = vmatpush1.msra.mxu0 %v1707_v28  ;;  %v1752_v27 = vld [vmem:[%s19980_s2 + $0x3b8] sm:$0xff]  ;;  %v1687_v28 = vld [vmem:[%s19980_s2 + $0x1b0] sm:$0xff] }
 0x23e   :  { %1783 = vmatprep.subr.mxu1 %v1642_v29  ;;  %1896 = vmatprep.subr.mxu0 %v1706_v30  ;;  %v1751_v29 = vld [vmem:[%s19980_s2 + $0x3b0] sm:$0xff]  ;;  %v1686_v30 = vld [vmem:[%s19980_s2 + $0x1a8] sm:$0xff] }
 0x23f   :  { %1784 = vmatpush1.msra.mxu1 %v1641_v31  ;;  %1897 = vmatpush1.msra.mxu0 %v1705_v32  ;;  %v1750_v31 = vld [vmem:[%s19980_s2 + $0x3a8] sm:$0xff]  ;;  %v1685_v32 = vld [vmem:[%s19980_s2 + $0x1a0] sm:$0xff] }
 0x240   :  { %1785 = vmatprep.subr.mxu1 %v1640_v33  ;;  %1898 = vmatprep.subr.mxu0 %v1704_v35  ;;  %v1749_v33 = vld [vmem:[%s19980_s2 + $0x3a0] sm:$0xff]  ;;  %v1684_v35 = vld [vmem:[%s19980_s2 + $0x198] sm:$0xff] }
 0x241   :  { %1786 = vmatpush1.msra.mxu1 %v1639_v37  ;;  %1899 = vmatpush1.msra.mxu0 %v1703_v39  ;;  %v1748_v37 = vld [vmem:[%s19980_s2 + $0x398] sm:$0xff]  ;;  %v1683_v39 = vld [vmem:[%s19980_s2 + $0x190] sm:$0xff] }
 0x242   :  { %1787 = vmatprep.subr.mxu1 %v1638_v41  ;;  %1900 = vmatprep.subr.mxu0 %v1702_v43  ;;  %v1747_v41 = vld [vmem:[%s19980_s2 + $0x390] sm:$0xff]  ;;  %v1682_v43 = vld [vmem:[%s19980_s2 + $0x188] sm:$0xff] }
 0x243   :  { %1788 = vmatpush1.msra.mxu1 %v1637_v45  ;;  %1901 = vmatpush1.msra.mxu0 %v1701_v47  ;;  %v1746_v45 = vld [vmem:[%s19980_s2 + $0x388] sm:$0xff]  ;;  %v1681_v47 = vld [vmem:[%s19980_s2 + $0x180] sm:$0xff] }
 0x244   :  { %1789 = vmatprep.subr.mxu1 %v1636_v49  ;;  %1902 = vmatprep.subr.mxu0 %v1700_v52  ;;  %v1745_v49 = vld [vmem:[%s19980_s2 + $0x380] sm:$0xff]  ;;  %v1680_v52 = vld [vmem:[%s19980_s2 + $0x178] sm:$0xff] }
 0x245   :  { %1790 = vmatpush1.msra.mxu1 %v1635_v55  ;;  %1903 = vmatpush1.msra.mxu0 %v1699_v58  ;;  %v1744_v55 = vld [vmem:[%s19980_s2 + $0x378] sm:$0xff]  ;;  %v1679_v58 = vld [vmem:[%s19980_s2 + $0x170] sm:$0xff] }
 0x246   :  { %1791 = vmatprep.subr.mxu1 %v1634_v61  ;;  %1904 = vmatprep.subr.mxu0 %v1698_v0  ;;  %v1743_v61 = vld [vmem:[%s19980_s2 + $0x370] sm:$0xff]  ;;  %v1678_v0 = vld [vmem:[%s19980_s2 + $0x168] sm:$0xff] }
 0x247   :  { %1792 = vmatpush1.msra.mxu1 %v1633_v4  ;;  %1905 = vmatpush1.msra.mxu0 %v1697_v7  ;;  %v1742_v4 = vld [vmem:[%s19980_s2 + $0x368] sm:$0xff]  ;;  %v1677_v7 = vld [vmem:[%s19980_s2 + $0x160] sm:$0xff] }
 0x248   :  { %1793 = vmatprep.subr.mxu1 %v1696_v10  ;;  %1906 = vmatprep.subr.mxu0 %v1760_v11  ;;  %v1741_v10 = vld [vmem:[%s19980_s2 + $0x360] sm:$0xff]  ;;  %v1676_v11 = vld [vmem:[%s19980_s2 + $0x158] sm:$0xff] }
 0x249   :  { %1794 = vmatpush2.msra.mxu1 %v1695_v13  ;;  %1907 = vmatpush2.msra.mxu0 %v1759_v14  ;;  %v1740_v13 = vld [vmem:[%s19980_s2 + $0x358] sm:$0xff]  ;;  %v1675_v14 = vld [vmem:[%s19980_s2 + $0x150] sm:$0xff] }
 0x24a   :  { %1795 = vmatprep.subr.mxu1 %v1694_v15  ;;  %1908 = vmatprep.subr.mxu0 %v1758_v16  ;;  %v1739_v15 = vld [vmem:[%s19980_s2 + $0x350] sm:$0xff]  ;;  %v1674_v16 = vld [vmem:[%s19980_s2 + $0x148] sm:$0xff] }
 0x24b   :  { %1796 = vmatpush2.msra.mxu1 %v1693_v17  ;;  %1909 = vmatpush2.msra.mxu0 %v1757_v18  ;;  %v1738_v17 = vld [vmem:[%s19980_s2 + $0x348] sm:$0xff]  ;;  %v1673_v18 = vld [vmem:[%s19980_s2 + $0x140] sm:$0xff] }
 0x24c   :  { %1797 = vmatprep.subr.mxu1 %v1692_v12  ;;  %1910 = vmatprep.subr.mxu0 %v1756_v19  ;;  %v1737_v12 = vld [vmem:[%s19980_s2 + $0x340] sm:$0xff]  ;;  %v1672_v19 = vld [vmem:[%s19980_s2 + $0x138] sm:$0xff] }
 0x24d   :  { %1798 = vmatpush2.msra.mxu1 %v1691_v20  ;;  %1911 = vmatpush2.msra.mxu0 %v1755_v21  ;;  %v1736_v20 = vld [vmem:[%s19980_s2 + $0x338] sm:$0xff]  ;;  %v1671_v21 = vld [vmem:[%s19980_s2 + $0x130] sm:$0xff] }
 0x24e   :  { %1799 = vmatprep.subr.mxu1 %v1690_v22  ;;  %1912 = vmatprep.subr.mxu0 %v1754_v23  ;;  %v1735_v22 = vld [vmem:[%s19980_s2 + $0x330] sm:$0xff]  ;;  %v1670_v23 = vld [vmem:[%s19980_s2 + $0x128] sm:$0xff] }
 0x24f   :  { %1800 = vmatpush2.msra.mxu1 %v1689_v24  ;;  %1913 = vmatpush2.msra.mxu0 %v1753_v25  ;;  %v1734_v24 = vld [vmem:[%s19980_s2 + $0x328] sm:$0xff]  ;;  %v13291_v25 = vpop.f32.mrf.mxu1 }
 0x250   :  { %1801 = vmatprep.subr.mxu1 %v1688_v26  ;;  %1914 = vmatprep.subr.mxu0 %v1752_v27  ;;  %v1669_v26 = vld [vmem:[%s19980_s2 + $0x120] sm:$0xff] }
 0x251   :  { %1802 = vmatpush2.msra.mxu1 %v1687_v28  ;;  %1915 = vmatpush2.msra.mxu0 %v1751_v29  ;;  %v1733_v27 = vld [vmem:[%s19980_s2 + $0x320] sm:$0xff]  ;;  %v1668_v28 = vld [vmem:[%s19980_s2 + $0x118] sm:$0xff] }
 0x252   :  { %1803 = vmatprep.subr.mxu1 %v1686_v30  ;;  %1916 = vmatprep.subr.mxu0 %v1750_v31  ;;  %v1732_v29 = vld [vmem:[%s19980_s2 + $0x318] sm:$0xff]  ;;  %v1667_v30 = vld [vmem:[%s19980_s2 + $0x110] sm:$0xff] }
 0x253   :  { %1804 = vmatpush2.msra.mxu1 %v1685_v32  ;;  %1917 = vmatpush2.msra.mxu0 %v1749_v33  ;;  %v1731_v31 = vld [vmem:[%s19980_s2 + $0x310] sm:$0xff]  ;;  %v1666_v32 = vld [vmem:[%s19980_s2 + $0x108] sm:$0xff] }
 0x254   :  { %1805 = vmatprep.subr.mxu1 %v1684_v35  ;;  %1918 = vmatprep.subr.mxu0 %v1748_v37  ;;  %v1730_v33 = vld [vmem:[%s19980_s2 + $0x308] sm:$0xff]  ;;  %v751_v35 = vpop.f32.mrf.mxu1  ;;  %v1665_v37 = vld [vmem:[%s19980_s2 + $0x100] sm:$0xff] }
 0x255   :  { %1806 = vmatpush2.msra.mxu1 %v1683_v39  ;;  %1919 = vmatpush2.msra.mxu0 %v1747_v41  ;;  %v1729_v39 = vld [vmem:[%s19980_s2 + $0x300] sm:$0xff]  ;;  %v9886_v41 = vld [vmem:[%s19980_s2 + $0x4f8] sm:$0xff] }
 0x256   :  { %1807 = vmatprep.subr.mxu1 %v1682_v43  ;;  %1920 = vmatprep.subr.mxu0 %v1746_v45  ;;  %v9950_v43 = vld [vmem:[%s19980_s2 + $0x6f8] sm:$0xff]  ;;  %v755_v45 = vpop.f32.mrf.mxu1 }
 0x257   :  { %1808 = vmatpush2.msra.mxu1 %v1681_v47  ;;  %1921 = vmatpush2.msra.mxu0 %v1745_v49 }
 0x258   :  { %1809 = vmatprep.subr.mxu1 %v1680_v52  ;;  %1922 = vmatprep.subr.mxu0 %v1744_v55  ;;  %v757_v47 = vpop.f32.mrf.mxu1 }
 0x259   :  { %1810 = vmatpush2.msra.mxu1 %v1679_v58  ;;  %1923 = vmatpush2.msra.mxu0 %v1743_v61 }
 0x25a   :  { %1811 = vmatprep.subr.mxu1 %v1678_v0  ;;  %1924 = vmatprep.subr.mxu0 %v1742_v4  ;;  %v13329_v49 = vpop.f32.mrf.mxu1 }
 0x25b   :  { %1812 = vmatpush2.msra.mxu1 %v1677_v7  ;;  %1925 = vmatpush2.msra.mxu0 %v1741_v10 }
 0x25c   :  { %1813 = vmatprep.subr.mxu1 %v1676_v11  ;;  %1926 = vmatprep.subr.mxu0 %v1740_v13  ;;  %v13331_v52 = vpop.f32.mrf.mxu1 }
 0x25d   :  { %1814 = vmatpush2.msra.mxu1 %v1675_v14  ;;  %1927 = vmatpush2.msra.mxu0 %v1739_v15 }
 0x25e   :  { %1815 = vmatprep.subr.mxu1 %v1674_v16  ;;  %1928 = vmatprep.subr.mxu0 %v1738_v17  ;;  %v13333_v55 = vpop.f32.mrf.mxu1 }
 0x25f   :  { %1816 = vmatpush2.msra.mxu1 %v1673_v18  ;;  %1929 = vmatpush2.msra.mxu0 %v1737_v12 }
 0x260   :  { %1817 = vmatprep.subr.mxu1 %v1672_v19  ;;  %1930 = vmatprep.subr.mxu0 %v1736_v20  ;;  %v13335_v58 = vpop.f32.mrf.mxu1 }
 0x261   :  { %1818 = vmatpush2.msra.mxu1 %v1671_v21  ;;  %1931 = vmatpush2.msra.mxu0 %v1735_v22 }
 0x262   :  { %1819 = vmatprep.subr.mxu1 %v1670_v23  ;;  %1932 = vmatprep.subr.mxu0 %v1734_v24  ;;  %v13337_v61 = vpop.f32.mrf.mxu1 }
 0x263   :  { %1820 = vmatpush2.msra.mxu1 %v1669_v26  ;;  %1933 = vmatpush2.msra.mxu0 %v1733_v27 }
 0x264   :  { %1821 = vmatprep.subr.mxu1 %v1668_v28  ;;  %1934 = vmatprep.subr.mxu0 %v1732_v29  ;;  %v13339_v0 = vpop.f32.mrf.mxu1  ;;  %v1549_v28 = vlaneseq }
 0x265   :  { %1822 = vmatpush2.msra.mxu1 %v1667_v30  ;;  %1935 = vmatpush2.msra.mxu0 %v1731_v31 }
 0x266   :  { %1823 = vmatprep.subr.mxu1 %v1666_v32  ;;  %1936 = vmatprep.subr.mxu0 %v1730_v33  ;;  %v13341_v4 = vpop.f32.mrf.mxu1  ;;  %v13369_v30 = vshrl.u32 %v1549_v28, 7 }
 0x267   :  { %1824 = vmatpush2.msra.mxu1 %v1665_v37  ;;  %1937 = vmatpush2.msra.mxu0 %v1729_v39  ;;  %v1547_v37 = vld [vmem:[%s19992_s0] sm:$0xf] }
 0x268   :  { %2116 = vmatprep.subr.mxu1 %v9886_v41  ;;  %2229 = vmatprep.subr.mxu0 %v9950_v43  ;;  %v13343_v7 = vpop.f32.mrf.mxu1  ;;  %19989 = vst [vmem:[#allocation10_spill] sm:$0xff] %v13369_v30  ;;  %v13374_v32 = vsub.s32 0, %v13369_v30  ;;  %v13381_v39 = vsub.s32 1, %v13369_v30  ;;  %v1563_v41 = vsub.s32 3, %v13369_v30  ;;  %v19995_v5 = vsub.s32 2, %v13369_v30 }
 0x26a   :  { %v13345_v10 = vpop.f32.mrf.mxu1  ;;  %19991 = vst [vmem:[#allocation12_spill] sm:$0xff] %v13374_v32  ;;  %19993 = vst [vmem:[#allocation13_spill] sm:$0xff] %v13381_v39  ;;  %v13390_v33 = vrot.slane %v1547_v37, %v13374_v32 }
 0x26b   :  { %19985 = vst [vmem:[#allocation6_spill] sm:$0xff] %v13345_v10 }
 0x26c   :  { %v13347_v11 = vpop.f32.mrf.mxu1 }
 0x26e   :  { %v13349_v13 = vpop.f32.mrf.mxu1 }
 0x26f   :  { %19986 = vst [vmem:[#allocation7_spill] sm:$0xff] %v13349_v13 }
 0x270   :  { %v13351_v14 = vpop.f32.mrf.mxu1 }
 0x271   :  { %19987 = vst [vmem:[#allocation8_spill] sm:$0xff] %v13351_v14  ;;  %v13394_v14 = vrot.slane %v1547_v37, %v19995_v5  ;;  %v895_v5 = vadd.f32 %v12901_v54, %v12881_v36 }
 0x272   :  { %v999_v15 = vpop.f32.mrf.mxu1 }
 0x273   :  { %v1000_v28 = vadd.f32 %v999_v15, %v13291_v25  ;;  %v13400_v25 = vrot.slane %v1547_v37, %v1563_v41 }
 0x274   :  { %v1001_v16 = vpop.f32.mrf.mxu1 }
 0x275   :  { %v1002_v8 = vadd.f32 %v1001_v16, %v751_v35 }
 0x276   :  { %v1005_v17 = vpop.f32.mrf.mxu1 }
 0x277   :  { %v1006_v16 = vadd.f32 %v1005_v17, %v755_v45 }
 0x278   :  { %v1007_v18 = vpop.f32.mrf.mxu1 }
 0x279   :  { %v1008_v32 = vadd.f32 %v1007_v18, %v757_v47 }
 0x27a   :  { %v13353_v12 = vpop.f32.mrf.mxu1 }
 0x27c   :  { %v1013_v19 = vpop.f32.mrf.mxu1 }
 0x27d   :  { %v1014_v18 = vadd.f32 %v1013_v19, %v13331_v52  ;;  %v9949_v52 = vld [vmem:[%s19980_s2 + $0x6f0] sm:$0xff]  ;;  %v1012_v19 = vadd.f32 %v13353_v12, %v13329_v49 }
 0x27e   :  { %v13355_v20 = vpop.f32.mrf.mxu1 }
 0x280   :  { %v1019_v21 = vpop.f32.mrf.mxu1 }
 0x282   :  { %v13357_v22 = vpop.f32.mrf.mxu1 }
 0x284   :  { %v13359_v23 = vpop.f32.mrf.mxu1 }
 0x286   :  { %v13361_v24 = vpop.f32.mrf.mxu1 }
 0x288   :  { %v13363_v26 = vpop.f32.mrf.mxu1 }
 0x28a   :  { %v13365_v27 = vpop.f32.mrf.mxu1 }
 0x28b   :  { %19988 = vst [vmem:[#allocation9_spill] sm:$0xff] %v13365_v27 }
 0x28c   :  { %v13367_v29 = vpop.f32.mrf.mxu1 }
 0x28e   :  { %v13371_v31 = vpop.f32.mrf.mxu1 }
 0x28f   :  { %19990 = vst [vmem:[#allocation11_spill] sm:$0xff] %v13371_v31 }
 0x290   :  { %v13384_v43 = vpop.f32.mrf.mxu1 }
 0x291   :  { %19994 = vst [vmem:[#allocation14_spill] sm:$0xff] %v13384_v43  ;;  %v13398_v43 = vrot.slane %v1547_v37, %v13381_v39 }
 0x2da   :  { %v1355_v31 = vpop.f32.mrf.mxu1  ;;  %v1468_v13 = vpop.f32.mrf.mxu0 }
 0x2db   :  { %v1515_v9 = vadd.f32 %v1355_v31, %v12895_v50  ;;  %v1517_v48 = vadd.f32 %v1468_v13, %v1000_v28  ;;  %v901_v28 = vadd.f32 %v12905_v57, %v12883_v38  ;;  %v1020_v38 = vadd.f32 %v1019_v21, %v13335_v58  ;;  %v9883_v21 = vld [vmem:[%s19980_s2 + $0x4e0] sm:$0xff] }
 0x2dc   :  { %v1357_v15 = vpop.f32.mrf.mxu1  ;;  %v1470_v34 = vpop.f32.mrf.mxu0 }
 0x2dd   :  { %v1516_v51 = vadd.f32 %v1357_v15, %v889_v3  ;;  %v1518_v35 = vadd.f32 %v1470_v34, %v1002_v8  ;;  %v1569_v27 = vadd.f32 %v13390_v33, %v1515_v9  ;;  %v1571_v50 = vadd.f32 %v13394_v14, %v1517_v48  ;;  %v9948_v34 = vld [vmem:[%s19980_s2 + $0x6e8] sm:$0xff] }
 0x2de   :  { %v1361_v10 = vpop.f32.mrf.mxu1  ;;  %v1474_v30 = vpop.f32.mrf.mxu0 }
 0x2df   :  { %v1570_v13 = vadd.f32 %v13398_v43, %v1516_v51  ;;  %v1572_v31 = vadd.f32 %v13400_v25, %v1518_v35  ;;  %v1519_v37 = vadd.f32 %v1361_v10, %v12899_v53  ;;  %v1521_v41 = vadd.f32 %v1474_v30, %v1006_v16  ;;  %v9885_v30 = vld [vmem:[%s19980_s2 + $0x4f0] sm:$0xff]  ;;  %v9947_v35 = vld [vmem:[%s19980_s2 + $0x6e0] sm:$0xff] }
 0x2e0   :  { %v1363_v3 = vpop.f32.mrf.mxu1  ;;  %v1476_v8 = vpop.f32.mrf.mxu0  ;;  %v13414_v36 = vmax.f32 %v1569_v27, 0.0  ;;  %v13418_v15 = vmax.f32 %v1571_v50, 0.0  ;;  %v907_v16 = vadd.f32 %v12909_v60, %v12885_v40  ;;  %v9882_v40 = vld [vmem:[%s19980_s2 + $0x4d8] sm:$0xff] }
 0x2e1   :  { %v1520_v45 = vadd.f32 %v1363_v3, %v895_v5  ;;  %v1522_v47 = vadd.f32 %v1476_v8, %v1008_v32  ;;  %v13409_v17 = vmax.f32 %v1570_v13, 0.0  ;;  %v13411_v9 = vmax.f32 %v1572_v31, 0.0  ;;  %v9884_v32 = vld [vmem:[%s19980_s2 + $0x4e8] sm:$0xff] }
 0x2e2   :  { %v1367_v48 = vpop.f32.mrf.mxu1  ;;  %v1480_v54 = vpop.f32.mrf.mxu0  ;;  %v1573_v51 = vadd.f32 %v13390_v33, %v1519_v37  ;;  %v1575_v49 = vadd.f32 %v13394_v14, %v1521_v41 }
 0x2e3   :  { %v1574_v53 = vadd.f32 %v13398_v43, %v1520_v45  ;;  %v1576_v10 = vadd.f32 %v13400_v25, %v1522_v47  ;;  %1825 = vmatprep.mubr.f32.mxu1 %v13409_v17  ;;  %1938 = vmatprep.mubr.f32.mxu0 %v13411_v9  ;;  %v1523_v5 = vadd.f32 %v1367_v48, %v12903_v56  ;;  %v9946_v56 = vld [vmem:[%s19980_s2 + $0x6d8] sm:$0xff] }
 0x2e4   :  { %v1369_v57 = vpop.f32.mrf.mxu1  ;;  %v1482_v27 = vpop.f32.mrf.mxu0  ;;  %1826 = vmatmul.mubr.f32.vlgmr.msra.gmra.mxu1 %v13414_v36  ;;  %1939 = vmatmul.mubr.f32.vlgmr.msra.gmra.mxu0 %v13418_v15  ;;  %v1525_v41 = vadd.f32 %v1480_v54, %v1012_v19  ;;  %v13464_v47 = vmax.f32 %v1573_v51, 0.0  ;;  %v913_v51 = vadd.f32 %v12913_v63, %v12887_v42  ;;  %v9878_v42 = vld [vmem:[%s19980_s2 + $0x4b8] sm:$0xff] }
 0x2e5   :  { %v1524_v12 = vadd.f32 %v1369_v57, %v901_v28  ;;  %v1526_v58 = vadd.f32 %v1482_v27, %v1014_v18  ;;  %2117 = vmatpush1.msra.mxu1 %v9885_v30  ;;  %2230 = vmatpush1.msra.mxu0 %v9949_v52  ;;  %v13452_v31 = vmax.f32 %v1574_v53, 0.0  ;;  %v13454_v37 = vmax.f32 %v1576_v10, 0.0  ;;  %v9881_v28 = vld [vmem:[%s19980_s2 + $0x4d0] sm:$0xff]  ;;  %v9880_v30 = vld [vmem:[%s19980_s2 + $0x4c8] sm:$0xff]  ;;  %v9942_v63 = vld [vmem:[%s19980_s2 + $0x6b8] sm:$0xff] }
 0x2e6   :  { %v1373_v50 = vpop.f32.mrf.mxu1  ;;  %v1486_v13 = vpop.f32.mrf.mxu0  ;;  %2118 = vmatprep.subr.mxu1 %v9884_v32  ;;  %2231 = vmatprep.subr.mxu0 %v9948_v34  ;;  %v13466_v18 = vmax.f32 %v1575_v49, 0.0  ;;  %v9945_v53 = vld [vmem:[%s19980_s2 + $0x6d0] sm:$0xff]  ;;  %v1018_v10 = vadd.f32 %v13355_v20, %v13333_v55  ;;  %v9944_v52 = vld [vmem:[%s19980_s2 + $0x6c8] sm:$0xff]  ;;  %v1577_v57 = vadd.f32 %v13390_v33, %v1523_v5  ;;  %v1579_v27 = vadd.f32 %v13394_v14, %v1525_v41  ;;  %v9879_v55 = vld [vmem:[%s19980_s2 + $0x4c0] sm:$0xff] }
 0x2e7   :  { %v1578_v3 = vadd.f32 %v13398_v43, %v1524_v12  ;;  %v1580_v8 = vadd.f32 %v13400_v25, %v1526_v58  ;;  %2119 = vmatpush1.msra.mxu1 %v9883_v21  ;;  %2232 = vmatpush1.msra.mxu0 %v9947_v35  ;;  %v9943_v20 = vld [vmem:[%s19980_s2 + $0x6c0] sm:$0xff]  ;;  %v1026_v49 = vadd.f32 %v13359_v23, %v13339_v0 }
 0x2e8   :  { %v1375_v60 = vpop.f32.mrf.mxu1  ;;  %v1488_v45 = vpop.f32.mrf.mxu0  ;;  %1831 = vmatprep.mubr.f32.mxu1 %v13452_v31  ;;  %1944 = vmatprep.mubr.f32.mxu0 %v13454_v37  ;;  %v1527_v12 = vadd.f32 %v1373_v50, %v12907_v59  ;;  %v1529_v35 = vadd.f32 %v1486_v13, %v1018_v10  ;;  %v13515_v23 = vmax.f32 %v1577_v57, 0.0  ;;  %v13517_v50 = vmax.f32 %v1579_v27, 0.0 }
 0x2e9   :  { %v1528_v48 = vadd.f32 %v1375_v60, %v907_v16  ;;  %v1530_v54 = vadd.f32 %v1488_v45, %v1020_v38  ;;  %2120 = vmatprep.subr.mxu1 %v9882_v40  ;;  %2233 = vmatprep.subr.mxu0 %v9946_v56  ;;  %v13494_v32 = vmax.f32 %v1578_v3, 0.0  ;;  %v13496_v34 = vmax.f32 %v1580_v8, 0.0  ;;  %v9877_v3 = vld [vmem:[%s19980_s2 + $0x4b0] sm:$0xff]  ;;  %v9876_v56 = vld [vmem:[%s19980_s2 + $0x4a8] sm:$0xff] }
 0x2ea   :  { %v1379_v19 = vpop.f32.mrf.mxu1  ;;  %v1492_v38 = vpop.f32.mrf.mxu0  ;;  %1832 = vmatmul.mubr.f32.gmra.mxu1 %v13464_v47  ;;  %1945 = vmatmul.mubr.f32.gmra.mxu0 %v13466_v18  ;;  %v9941_v8 = vld [vmem:[%s19980_s2 + $0x6b0] sm:$0xff]  ;;  %v1024_v40 = vadd.f32 %v13357_v22, %v13337_v61  ;;  %v9940_v60 = vld [vmem:[%s19980_s2 + $0x6a8] sm:$0xff]  ;;  %v9875_v61 = vld [vmem:[%s19980_s2 + $0x4a0] sm:$0xff] }
 0x2eb   :  { %2121 = vmatpush1.msra.mxu1 %v9881_v28  ;;  %2234 = vmatpush1.msra.mxu0 %v9945_v53  ;;  %v1582_v16 = vadd.f32 %v13398_v43, %v1528_v48  ;;  %v1584_v5 = vadd.f32 %v13400_v25, %v1530_v54  ;;  %v1581_v54 = vadd.f32 %v13390_v33, %v1527_v12  ;;  %v9939_v22 = vld [vmem:[%s19980_s2 + $0x6a0] sm:$0xff]  ;;  %v9937_v12 = vld [vmem:[%s19980_s2 + $0x690] sm:$0xff] }
 0x2ec   :  { %v1381_v58 = vpop.f32.mrf.mxu1  ;;  %v1494_v21 = vpop.f32.mrf.mxu0  ;;  %2122 = vmatprep.subr.mxu1 %v9880_v30  ;;  %2235 = vmatprep.subr.mxu0 %v9944_v52  ;;  %v1583_v28 = vadd.f32 %v13394_v14, %v1529_v35  ;;  %v919_v30 = vadd.f32 %v12917_v2, %v12889_v44  ;;  %v1032_v52 = vadd.f32 %v13363_v26, %v13343_v7  ;;  %v9874_v44 = vld [vmem:[%s19980_s2 + $0x498] sm:$0xff]  ;;  %v9936_v35 = vld [vmem:[%s19980_s2 + $0x688] sm:$0xff] }
 0x2ed   :  { %2123 = vmatpush1.msra.mxu1 %v9879_v55  ;;  %2236 = vmatpush1.msra.mxu0 %v9943_v20  ;;  %v1532_v13 = vadd.f32 %v1381_v58, %v913_v51  ;;  %v1534_v41 = vadd.f32 %v1494_v21, %v1026_v49  ;;  %v13545_v53 = vmax.f32 %v1582_v16, 0.0  ;;  %v13547_v10 = vmax.f32 %v1584_v5, 0.0  ;;  %v9872_v21 = vld [vmem:[%s19980_s2 + $0x488] sm:$0xff] }
 0x2ee   :  { %v13511_v59 = vpop.f32.mrf.mxu1  ;;  %v13513_v0 = vpop.f32.mrf.mxu0  ;;  %1837 = vmatprep.mubr.f32.mxu1 %v13494_v32  ;;  %1950 = vmatprep.mubr.f32.mxu0 %v13496_v34  ;;  %v1531_v57 = vadd.f32 %v1379_v19, %v12911_v62  ;;  %v1533_v20 = vadd.f32 %v1492_v38, %v1024_v40  ;;  %v9938_v62 = vld [vmem:[%s19980_s2 + $0x698] sm:$0xff]  ;;  %v13566_v2 = vmax.f32 %v1581_v54, 0.0  ;;  %v13568_v7 = vmax.f32 %v1583_v28, 0.0  ;;  %v9873_v38 = vld [vmem:[%s19980_s2 + $0x490] sm:$0xff] }
 0x2ef   :  { %2124 = vmatprep.subr.mxu1 %v9878_v42  ;;  %2237 = vmatprep.subr.mxu0 %v9942_v63  ;;  %v1586_v51 = vadd.f32 %v13398_v43, %v1532_v13  ;;  %v1588_v49 = vadd.f32 %v13400_v25, %v1534_v41  ;;  %v1030_v58 = vadd.f32 %v13361_v24, %v13341_v4  ;;  %v9871_v4 = vld [vmem:[%s19980_s2 + $0x480] sm:$0xff]  ;;  %v9869_v54 = vld [vmem:[%s19980_s2 + $0x470] sm:$0xff] }
 0x2f0   :  { %v1387_v45 = vpop.f32.mrf.mxu1  ;;  %v1500_v48 = vpop.f32.mrf.mxu0  ;;  %1838 = vmatmul.mubr.f32.gmra.mxu1 %v13515_v23  ;;  %1951 = vmatmul.mubr.f32.gmra.mxu0 %v13517_v50  ;;  %v1585_v42 = vadd.f32 %v13390_v33, %v1531_v57  ;;  %v1587_v63 = vadd.f32 %v13394_v14, %v1533_v20  ;;  %v9935_v24 = vld [vmem:[%s19980_s2 + $0x680] sm:$0xff]  ;;  %v1535_v40 = vadd.f32 %v13511_v59, %v12915_v1  ;;  %v9933_v28 = vld [vmem:[%s19980_s2 + $0x670] sm:$0xff]  ;;  %v9932_v57 = vld [vmem:[%s19980_s2 + $0x668] sm:$0xff] }
 0x2f1   :  { %2125 = vmatpush1.msra.mxu1 %v9877_v3  ;;  %2238 = vmatpush1.msra.mxu0 %v9941_v8  ;;  %v1536_v26 = vadd.f32 %v1387_v45, %v919_v30  ;;  %v1538_v19 = vadd.f32 %v1500_v48, %v1032_v52  ;;  %v13596_v13 = vmax.f32 %v1586_v51, 0.0  ;;  %v13598_v41 = vmax.f32 %v1588_v49, 0.0  ;;  %v9868_v52 = vld [vmem:[%s19980_s2 + $0x468] sm:$0xff]  ;;  %v9867_v49 = vld [vmem:[%s19980_s2 + $0x460] sm:$0xff] }
 0x2f2   :  { %v13554_v27 = vpop.f32.mrf.mxu1  ;;  %v13556_v55 = vpop.f32.mrf.mxu0  ;;  %2126 = vmatprep.subr.mxu1 %v9876_v56  ;;  %2239 = vmatprep.subr.mxu0 %v9940_v60  ;;  %v925_v3 = vadd.f32 %v12921_v6, %v12891_v46  ;;  %v1038_v8 = vadd.f32 %v13367_v29, %v13347_v11  ;;  %v1537_v56 = vadd.f32 %v13513_v0, %v1030_v58  ;;  %v9870_v46 = vld [vmem:[%s19980_s2 + $0x478] sm:$0xff]  ;;  %v13615_v29 = vmax.f32 %v1585_v42, 0.0  ;;  %v20000_v58 = vld [vmem:[#allocation8_spill] sm:$0xff] }
 0x2f3   :  { %2127 = vmatpush1.msra.mxu1 %v9875_v61  ;;  %2240 = vmatpush1.msra.mxu0 %v9939_v22  ;;  %v1590_v60 = vadd.f32 %v13398_v43, %v1536_v26  ;;  %v1592_v45 = vadd.f32 %v13400_v25, %v1538_v19  ;;  %v9934_v6 = vld [vmem:[%s19980_s2 + $0x678] sm:$0xff]  ;;  %v13617_v59 = vmax.f32 %v1587_v63, 0.0  ;;  %v19996_v61 = vld [vmem:[#allocation6_spill] sm:$0xff]  ;;  %v1589_v20 = vadd.f32 %v13390_v33, %v1535_v40 }
 0x2f4   :  { %1843 = vmatprep.mubr.f32.mxu1 %v13545_v53  ;;  %1956 = vmatprep.mubr.f32.mxu0 %v13547_v10  ;;  %v1393_v16 = vpop.f32.mrf.mxu1  ;;  %v1506_v5 = vpop.f32.mrf.mxu0  ;;  %v19997_v22 = vld [vmem:[#allocation9_spill] sm:$0xff]  ;;  %v1591_v51 = vadd.f32 %v13394_v14, %v1537_v56  ;;  %v19998_v19 = vld [vmem:[#allocation2_spill] sm:$0xff] }
 0x2f5   :  { %2128 = vmatprep.subr.mxu1 %v9874_v44  ;;  %2241 = vmatprep.subr.mxu0 %v9938_v62  ;;  %v1540_v0 = vadd.f32 %v1393_v16, %v925_v3  ;;  %v1542_v48 = vadd.f32 %v1506_v5, %v1038_v8  ;;  %v1036_v30 = vadd.f32 %v19997_v22, %v19996_v61  ;;  %v9931_v44 = vld [vmem:[%s19980_s2 + $0x660] sm:$0xff]  ;;  %v13645_v62 = vmax.f32 %v1590_v60, 0.0  ;;  %v20002_v16 = vld [vmem:[#allocation3_spill] sm:$0xff]  ;;  %v9866_v8 = vld [vmem:[%s19980_s2 + $0x458] sm:$0xff] }
 0x2f6   :  { %1844 = vmatmul.mubr.f32.gmra.mxu1 %v13566_v2  ;;  %1957 = vmatmul.mubr.f32.gmra.mxu0 %v13568_v7  ;;  %v1397_v1 = vpop.f32.mrf.mxu1  ;;  %v1510_v11 = vpop.f32.mrf.mxu0  ;;  %v13647_v26 = vmax.f32 %v1592_v45, 0.0  ;;  %v1539_v5 = vadd.f32 %v13554_v27, %v20002_v16  ;;  %v9930_v27 = vld [vmem:[%s19980_s2 + $0x658] sm:$0xff]  ;;  %v13664_v40 = vmax.f32 %v1589_v20, 0.0  ;;  %v13666_v56 = vmax.f32 %v1591_v51, 0.0  ;;  %v9865_v45 = vld [vmem:[%s19980_s2 + $0x450] sm:$0xff] }
 0x2f7   :  { %2129 = vmatpush1.msra.mxu1 %v9873_v38  ;;  %2242 = vmatpush1.msra.mxu0 %v9937_v12  ;;  %v19999_v38 = vld [vmem:[#allocation5_spill] sm:$0xff]  ;;  %v1596_v3 = vadd.f32 %v13400_v25, %v1542_v48  ;;  %v20005_v51 = vld [vmem:[#allocation4_spill] sm:$0xff] }
 0x2f8   :  { %2130 = vmatprep.subr.mxu1 %v9872_v21  ;;  %2243 = vmatprep.subr.mxu0 %v9936_v35  ;;  %v931_v12 = vadd.f32 %v19999_v38, %v19998_v19  ;;  %v20001_v21 = vld [vmem:[#allocation14_spill] sm:$0xff]  ;;  %v1399_v42 = vpop.f32.mrf.mxu1  ;;  %v1512_v63 = vpop.f32.mrf.mxu0  ;;  %v1593_v61 = vadd.f32 %v13390_v33, %v1539_v5 }
 0x2f9   :  { %2131 = vmatpush1.msra.mxu1 %v9871_v4  ;;  %2244 = vmatpush1.msra.mxu0 %v9935_v24  ;;  %v1044_v35 = vadd.f32 %v20001_v21, %v20000_v58  ;;  %v1541_v4 = vadd.f32 %v13556_v55, %v1036_v30  ;;  %v1594_v24 = vadd.f32 %v13398_v43, %v1540_v0  ;;  %v20004_v0 = vld [vmem:[#allocation11_spill] sm:$0xff]  ;;  %v9863_v30 = vld [vmem:[%s19980_s2 + $0x440] sm:$0xff]  ;;  %v13696_v20 = vmax.f32 %v1596_v3, 0.0  ;;  %v9926_v58 = vld [vmem:[%s19980_s2 + $0x638] sm:$0xff] }
 0x2fa   :  { %1849 = vmatprep.mubr.f32.mxu1 %v13596_v13  ;;  %1962 = vmatprep.mubr.f32.mxu0 %v13598_v41  ;;  %v1544_v55 = vadd.f32 %v1399_v42, %v931_v12  ;;  %v9862_v12 = vld [vmem:[%s19980_s2 + $0x438] sm:$0xff]  ;;  %v9859_v42 = vld [vmem:[%s19980_s2 + $0x420] sm:$0xff] }
 0x2fb   :  { %2132 = vmatprep.subr.mxu1 %v9870_v46  ;;  %2245 = vmatprep.subr.mxu0 %v9934_v6  ;;  %v1546_v60 = vadd.f32 %v1512_v63, %v1044_v35  ;;  %v9929_v46 = vld [vmem:[%s19980_s2 + $0x650] sm:$0xff]  ;;  %v20003_v6 = vld [vmem:[#allocation7_spill] sm:$0xff]  ;;  %v1595_v22 = vadd.f32 %v13394_v14, %v1541_v4  ;;  %v9923_v63 = vld [vmem:[%s19980_s2 + $0x620] sm:$0xff] }
 0x2fc   :  { %1850 = vmatmul.mubr.f32.gmra.mxu1 %v13615_v29  ;;  %1963 = vmatmul.mubr.f32.gmra.mxu0 %v13617_v59  ;;  %v1042_v48 = vadd.f32 %v20004_v0, %v20003_v6  ;;  %v1598_v19 = vadd.f32 %v13398_v43, %v1544_v55  ;;  %v9861_v43 = vld [vmem:[%s19980_s2 + $0x430] sm:$0xff]  ;;  %v9924_v35 = vld [vmem:[%s19980_s2 + $0x628] sm:$0xff]  ;;  %v9919_v6 = vld [vmem:[%s19980_s2 + $0x600] sm:$0xff] }
 0x2fd   :  { %2133 = vmatpush1.msra.mxu1 %v9869_v54  ;;  %2246 = vmatpush1.msra.mxu0 %v9933_v28  ;;  %v9864_v54 = vld [vmem:[%s19980_s2 + $0x448] sm:$0xff]  ;;  %v1600_v38 = vadd.f32 %v13400_v25, %v1546_v60  ;;  %v13709_v21 = vmax.f32 %v1595_v22, 0.0  ;;  %v9925_v25 = vld [vmem:[%s19980_s2 + $0x630] sm:$0xff]  ;;  %v9918_v0 = vld [vmem:[%s19980_s2 + $0x5f8] sm:$0xff] }
 0x2fe   :  { %2134 = vmatprep.subr.mxu1 %v9868_v52  ;;  %2247 = vmatprep.subr.mxu0 %v9932_v57  ;;  %v9928_v28 = vld [vmem:[%s19980_s2 + $0x648] sm:$0xff]  ;;  %v9927_v52 = vld [vmem:[%s19980_s2 + $0x640] sm:$0xff]  ;;  %v13694_v57 = vmax.f32 %v1594_v24, 0.0  ;;  %v13735_v4 = vmax.f32 %v1598_v19, 0.0  ;;  %v9921_v55 = vld [vmem:[%s19980_s2 + $0x610] sm:$0xff] }
 0x2ff   :  { %2135 = vmatpush1.msra.mxu1 %v9867_v49  ;;  %2248 = vmatpush1.msra.mxu0 %v9931_v44  ;;  %v1543_v49 = vadd.f32 %v1397_v1, %v20005_v51  ;;  %v1545_v44 = vadd.f32 %v1510_v11, %v1042_v48  ;;  %v13707_v1 = vmax.f32 %v1593_v61, 0.0  ;;  %v9860_v11 = vld [vmem:[%s19980_s2 + $0x428] sm:$0xff]  ;;  %v13737_v24 = vmax.f32 %v1600_v38, 0.0  ;;  %v9982_v48 = vld [vmem:[%s19980_s2 + $0x7f8] sm:$0xff]  ;;  %v9977_v19 = vld [vmem:[%s19980_s2 + $0x7d0] sm:$0xff] }
 0x300   :  { %1855 = vmatprep.mubr.f32.mxu1 %v13645_v62  ;;  %1968 = vmatprep.mubr.f32.mxu0 %v13647_v26  ;;  %v9856_v60 = vld [vmem:[%s19980_s2 + $0x408] sm:$0xff]  ;;  %v9914_v51 = vld [vmem:[%s19980_s2 + $0x5d8] sm:$0xff] }
 0x301   :  { %2136 = vmatprep.subr.mxu1 %v9866_v8  ;;  %2249 = vmatprep.subr.mxu0 %v9930_v27  ;;  %v1597_v16 = vadd.f32 %v13390_v33, %v1543_v49  ;;  %v1599_v5 = vadd.f32 %v13394_v14, %v1545_v44  ;;  %v9858_v14 = vld [vmem:[%s19980_s2 + $0x418] sm:$0xff]  ;;  %v9857_v27 = vld [vmem:[%s19980_s2 + $0x410] sm:$0xff]  ;;  %v9916_v61 = vld [vmem:[%s19980_s2 + $0x5e8] sm:$0xff] }
 0x302   :  { %1856 = vmatmul.mubr.f32.gmra.mxu1 %v13664_v40  ;;  %1969 = vmatmul.mubr.f32.gmra.mxu0 %v13666_v56  ;;  %v9922_v33 = vld [vmem:[%s19980_s2 + $0x618] sm:$0xff]  ;;  %v9980_v22 = vld [vmem:[%s19980_s2 + $0x7e8] sm:$0xff]  ;;  %v9913_v44 = vld [vmem:[%s19980_s2 + $0x5d0] sm:$0xff] }
 0x303   :  { %2137 = vmatpush1.msra.mxu1 %v9865_v45  ;;  %2250 = vmatpush1.msra.mxu0 %v9929_v46  ;;  %v13745_v3 = vmax.f32 %v1597_v16, 0.0  ;;  %v13747_v8 = vmax.f32 %v1599_v5, 0.0  ;;  %v9920_v45 = vld [vmem:[%s19980_s2 + $0x608] sm:$0xff]  ;;  %v9855_v46 = vld [vmem:[%s19980_s2 + $0x400] sm:$0xff]  ;;  %v9978_v49 = vld [vmem:[%s19980_s2 + $0x7d8] sm:$0xff] }
 0x304   :  { %2138 = vmatprep.subr.mxu1 %v9864_v54  ;;  %2251 = vmatprep.subr.mxu0 %v9928_v28  ;;  %v9917_v54 = vld [vmem:[%s19980_s2 + $0x5f0] sm:$0xff]  ;;  %v9912_v38 = vld [vmem:[%s19980_s2 + $0x5c8] sm:$0xff] }
 0x305   :  { %2139 = vmatpush1.msra.mxu1 %v9863_v30  ;;  %2252 = vmatpush1.msra.mxu0 %v9927_v52  ;;  %v9981_v28 = vld [vmem:[%s19980_s2 + $0x7f0] sm:$0xff]  ;;  %v9915_v30 = vld [vmem:[%s19980_s2 + $0x5e0] sm:$0xff]  ;;  %v9908_v5 = vld [vmem:[%s19980_s2 + $0x5a8] sm:$0xff] }
 0x306   :  { %1861 = vmatprep.mubr.f32.mxu1 %v13694_v57  ;;  %1974 = vmatprep.mubr.f32.mxu0 %v13696_v20  ;;  %v9979_v52 = vld [vmem:[%s19980_s2 + $0x7e0] sm:$0xff]  ;;  %v9973_v16 = vld [vmem:[%s19980_s2 + $0x7b0] sm:$0xff] }
 0x307   :  { %2140 = vmatprep.subr.mxu1 %v9862_v12  ;;  %2253 = vmatprep.subr.mxu0 %v9926_v58  ;;  %v9976_v12 = vld [vmem:[%s19980_s2 + $0x7c8] sm:$0xff]  ;;  %v9911_v58 = vld [vmem:[%s19980_s2 + $0x5c0] sm:$0xff] }
 0x308   :  { %1862 = vmatmul.mubr.f32.gmra.mxu1 %v13707_v1  ;;  %1975 = vmatmul.mubr.f32.gmra.mxu0 %v13709_v21 }
 0x309   :  { %2141 = vmatpush1.msra.mxu1 %v9861_v43  ;;  %2254 = vmatpush1.msra.mxu0 %v9925_v25  ;;  %v9975_v43 = vld [vmem:[%s19980_s2 + $0x7c0] sm:$0xff]  ;;  %v9910_v25 = vld [vmem:[%s19980_s2 + $0x5b8] sm:$0xff] }
 0x30a   :  { %2142 = vmatprep.subr.mxu1 %v9860_v11  ;;  %2255 = vmatprep.subr.mxu0 %v9924_v35  ;;  %v9974_v11 = vld [vmem:[%s19980_s2 + $0x7b8] sm:$0xff]  ;;  %v9909_v35 = vld [vmem:[%s19980_s2 + $0x5b0] sm:$0xff] }
 0x30b   :  { %2143 = vmatpush1.msra.mxu1 %v9859_v42  ;;  %2256 = vmatpush1.msra.mxu0 %v9923_v63  ;;  %v9972_v42 = vld [vmem:[%s19980_s2 + $0x7a8] sm:$0xff]  ;;  %v9907_v63 = vld [vmem:[%s19980_s2 + $0x5a0] sm:$0xff] }
 0x30c   :  { %1867 = vmatprep.mubr.f32.mxu1 %v13735_v4  ;;  %1980 = vmatprep.mubr.f32.mxu0 %v13737_v24 }
 0x30d   :  { %2144 = vmatprep.subr.mxu1 %v9858_v14  ;;  %2257 = vmatprep.subr.mxu0 %v9922_v33  ;;  %v9971_v14 = vld [vmem:[%s19980_s2 + $0x7a0] sm:$0xff]  ;;  %v9906_v33 = vld [vmem:[%s19980_s2 + $0x598] sm:$0xff] }
 0x30e   :  { %1868 = vmatmul.mubr.f32.gmra.mxu1 %v13745_v3  ;;  %1981 = vmatmul.mubr.f32.gmra.mxu0 %v13747_v8 }
 0x30f   :  { %2145 = vmatpush1.msra.mxu1 %v9857_v27  ;;  %2258 = vmatpush1.msra.mxu0 %v9921_v55  ;;  %v9970_v27 = vld [vmem:[%s19980_s2 + $0x798] sm:$0xff]  ;;  %v9905_v55 = vld [vmem:[%s19980_s2 + $0x590] sm:$0xff] }
 0x310   :  { %2146 = vmatprep.subr.mxu1 %v9856_v60  ;;  %2180 = vmatprep.mubr.f32.mxu1 %v13409_v17  ;;  %v9969_v60 = vld [vmem:[%s19980_s2 + $0x790] sm:$0xff] }
 0x311   :  { %2259 = vmatprep.subr.mxu0 %v9920_v45  ;;  %2293 = vmatprep.mubr.f32.mxu0 %v13411_v9  ;;  %v9904_v45 = vld [vmem:[%s19980_s2 + $0x588] sm:$0xff] }
 0x312   :  { %2147 = vmatpush1.msra.mxu1 %v9855_v46  ;;  %2260 = vmatpush1.msra.mxu0 %v9919_v6  ;;  %v9968_v46 = vld [vmem:[%s19980_s2 + $0x788] sm:$0xff]  ;;  %v9903_v6 = vld [vmem:[%s19980_s2 + $0x580] sm:$0xff] }
 0x313   :  { %2148 = vmatprep.subr.mxu1 %v9918_v0  ;;  %2261 = vmatprep.subr.mxu0 %v9982_v48  ;;  %v9967_v0 = vld [vmem:[%s19980_s2 + $0x780] sm:$0xff]  ;;  %v9902_v48 = vld [vmem:[%s19980_s2 + $0x578] sm:$0xff] }
 0x314   :  { %2149 = vmatpush2.msra.mxu1 %v9917_v54  ;;  %2262 = vmatpush2.msra.mxu0 %v9981_v28  ;;  %v9966_v54 = vld [vmem:[%s19980_s2 + $0x778] sm:$0xff]  ;;  %v9901_v28 = vld [vmem:[%s19980_s2 + $0x570] sm:$0xff] }
 0x315   :  { %2150 = vmatprep.subr.mxu1 %v9916_v61  ;;  %2263 = vmatprep.subr.mxu0 %v9980_v22  ;;  %v9965_v61 = vld [vmem:[%s19980_s2 + $0x770] sm:$0xff]  ;;  %v9900_v22 = vld [vmem:[%s19980_s2 + $0x568] sm:$0xff] }
 0x316   :  { %2151 = vmatpush2.msra.mxu1 %v9915_v30  ;;  %2264 = vmatpush2.msra.mxu0 %v9979_v52  ;;  %v9964_v30 = vld [vmem:[%s19980_s2 + $0x768] sm:$0xff]  ;;  %v9899_v52 = vld [vmem:[%s19980_s2 + $0x560] sm:$0xff] }
 0x317   :  { %2152 = vmatprep.subr.mxu1 %v9914_v51  ;;  %2265 = vmatprep.subr.mxu0 %v9978_v49  ;;  %v9963_v51 = vld [vmem:[%s19980_s2 + $0x760] sm:$0xff]  ;;  %v9898_v49 = vld [vmem:[%s19980_s2 + $0x558] sm:$0xff] }
 0x318   :  { %2153 = vmatpush2.msra.mxu1 %v9913_v44  ;;  %2266 = vmatpush2.msra.mxu0 %v9977_v19  ;;  %v9962_v44 = vld [vmem:[%s19980_s2 + $0x758] sm:$0xff]  ;;  %v9897_v19 = vld [vmem:[%s19980_s2 + $0x550] sm:$0xff] }
 0x319   :  { %2154 = vmatprep.subr.mxu1 %v9912_v38  ;;  %2267 = vmatprep.subr.mxu0 %v9976_v12  ;;  %v9961_v38 = vld [vmem:[%s19980_s2 + $0x750] sm:$0xff]  ;;  %v9896_v12 = vld [vmem:[%s19980_s2 + $0x548] sm:$0xff] }
 0x31a   :  { %2155 = vmatpush2.msra.mxu1 %v9911_v58  ;;  %2268 = vmatpush2.msra.mxu0 %v9975_v43  ;;  %v9960_v58 = vld [vmem:[%s19980_s2 + $0x748] sm:$0xff]  ;;  %v9895_v43 = vld [vmem:[%s19980_s2 + $0x540] sm:$0xff] }
 0x31b   :  { %2156 = vmatprep.subr.mxu1 %v9910_v25  ;;  %2269 = vmatprep.subr.mxu0 %v9974_v11  ;;  %v9959_v25 = vld [vmem:[%s19980_s2 + $0x740] sm:$0xff]  ;;  %v9894_v11 = vld [vmem:[%s19980_s2 + $0x538] sm:$0xff] }
 0x31c   :  { %2157 = vmatpush2.msra.mxu1 %v9909_v35  ;;  %2270 = vmatpush2.msra.mxu0 %v9973_v16  ;;  %v9958_v35 = vld [vmem:[%s19980_s2 + $0x738] sm:$0xff]  ;;  %v9893_v16 = vld [vmem:[%s19980_s2 + $0x530] sm:$0xff] }
 0x31d   :  { %2158 = vmatprep.subr.mxu1 %v9908_v5  ;;  %2271 = vmatprep.subr.mxu0 %v9972_v42  ;;  %v9957_v5 = vld [vmem:[%s19980_s2 + $0x730] sm:$0xff]  ;;  %v9892_v42 = vld [vmem:[%s19980_s2 + $0x528] sm:$0xff] }
 0x31e   :  { %2159 = vmatpush2.msra.mxu1 %v9907_v63  ;;  %2272 = vmatpush2.msra.mxu0 %v9971_v14  ;;  %v9956_v63 = vld [vmem:[%s19980_s2 + $0x728] sm:$0xff]  ;;  %v9891_v14 = vld [vmem:[%s19980_s2 + $0x520] sm:$0xff] }
 0x31f   :  { %2160 = vmatprep.subr.mxu1 %v9906_v33  ;;  %2273 = vmatprep.subr.mxu0 %v9970_v27  ;;  %v9955_v33 = vld [vmem:[%s19980_s2 + $0x720] sm:$0xff]  ;;  %v9890_v27 = vld [vmem:[%s19980_s2 + $0x518] sm:$0xff] }
 0x320   :  { %2161 = vmatpush2.msra.mxu1 %v9905_v55  ;;  %2274 = vmatpush2.msra.mxu0 %v9969_v60  ;;  %v9954_v55 = vld [vmem:[%s19980_s2 + $0x718] sm:$0xff]  ;;  %v9889_v60 = vld [vmem:[%s19980_s2 + $0x510] sm:$0xff] }
 0x321   :  { %2162 = vmatprep.subr.mxu1 %v9904_v45  ;;  %2275 = vmatprep.subr.mxu0 %v9968_v46  ;;  %v9953_v45 = vld [vmem:[%s19980_s2 + $0x710] sm:$0xff]  ;;  %v9888_v46 = vld [vmem:[%s19980_s2 + $0x508] sm:$0xff] }
 0x322   :  { %2163 = vmatpush2.msra.mxu1 %v9903_v6  ;;  %2276 = vmatpush2.msra.mxu0 %v9967_v0  ;;  %v9952_v6 = vld [vmem:[%s19980_s2 + $0x708] sm:$0xff]  ;;  %v9887_v0 = vld [vmem:[%s19980_s2 + $0x500] sm:$0xff] }
 0x323   :  { %2164 = vmatprep.subr.mxu1 %v9902_v48  ;;  %2277 = vmatprep.subr.mxu0 %v9966_v54  ;;  %v9951_v48 = vld [vmem:[%s19980_s2 + $0x700] sm:$0xff]  ;;  %v10014_v54 = vld [vmem:[%s19980_s2 + $0x8f8] sm:$0xff] }
 0x324   :  { %2165 = vmatpush2.msra.mxu1 %v9901_v28  ;;  %2278 = vmatpush2.msra.mxu0 %v9965_v61  ;;  %v10078_v28 = vld [vmem:[%s19980_s2 + $0xaf8] sm:$0xff]  ;;  %v10013_v61 = vld [vmem:[%s19980_s2 + $0x8f0] sm:$0xff] }
 0x325   :  { %2166 = vmatprep.subr.mxu1 %v9900_v22  ;;  %2279 = vmatprep.subr.mxu0 %v9964_v30  ;;  %v10077_v22 = vld [vmem:[%s19980_s2 + $0xaf0] sm:$0xff]  ;;  %v10012_v30 = vld [vmem:[%s19980_s2 + $0x8e8] sm:$0xff] }
 0x326   :  { %2167 = vmatpush2.msra.mxu1 %v9899_v52  ;;  %2280 = vmatpush2.msra.mxu0 %v9963_v51  ;;  %v10076_v52 = vld [vmem:[%s19980_s2 + $0xae8] sm:$0xff]  ;;  %v10011_v51 = vld [vmem:[%s19980_s2 + $0x8e0] sm:$0xff] }
 0x327   :  { %2168 = vmatprep.subr.mxu1 %v9898_v49  ;;  %2281 = vmatprep.subr.mxu0 %v9962_v44  ;;  %v10075_v49 = vld [vmem:[%s19980_s2 + $0xae0] sm:$0xff]  ;;  %v10010_v44 = vld [vmem:[%s19980_s2 + $0x8d8] sm:$0xff] }
 0x328   :  { %2169 = vmatpush2.msra.mxu1 %v9897_v19  ;;  %2282 = vmatpush2.msra.mxu0 %v9961_v38  ;;  %v10074_v19 = vld [vmem:[%s19980_s2 + $0xad8] sm:$0xff]  ;;  %v10009_v38 = vld [vmem:[%s19980_s2 + $0x8d0] sm:$0xff] }
 0x329   :  { %2170 = vmatprep.subr.mxu1 %v9896_v12  ;;  %2283 = vmatprep.subr.mxu0 %v9960_v58  ;;  %v10073_v12 = vld [vmem:[%s19980_s2 + $0xad0] sm:$0xff]  ;;  %v10008_v58 = vld [vmem:[%s19980_s2 + $0x8c8] sm:$0xff] }
 0x32a   :  { %2171 = vmatpush2.msra.mxu1 %v9895_v43  ;;  %2284 = vmatpush2.msra.mxu0 %v9959_v25  ;;  %v10072_v43 = vld [vmem:[%s19980_s2 + $0xac8] sm:$0xff]  ;;  %v10007_v25 = vld [vmem:[%s19980_s2 + $0x8c0] sm:$0xff] }
 0x32b   :  { %2172 = vmatprep.subr.mxu1 %v9894_v11  ;;  %2285 = vmatprep.subr.mxu0 %v9958_v35  ;;  %v10071_v11 = vld [vmem:[%s19980_s2 + $0xac0] sm:$0xff]  ;;  %v10006_v35 = vld [vmem:[%s19980_s2 + $0x8b8] sm:$0xff] }
 0x32c   :  { %2173 = vmatpush2.msra.mxu1 %v9893_v16  ;;  %2286 = vmatpush2.msra.mxu0 %v9957_v5  ;;  %v10070_v16 = vld [vmem:[%s19980_s2 + $0xab8] sm:$0xff]  ;;  %v10005_v5 = vld [vmem:[%s19980_s2 + $0x8b0] sm:$0xff] }
 0x32d   :  { %2174 = vmatprep.subr.mxu1 %v9892_v42  ;;  %2287 = vmatprep.subr.mxu0 %v9956_v63  ;;  %v10069_v42 = vld [vmem:[%s19980_s2 + $0xab0] sm:$0xff]  ;;  %v10004_v63 = vld [vmem:[%s19980_s2 + $0x8a8] sm:$0xff] }
 0x32e   :  { %2175 = vmatpush2.msra.mxu1 %v9891_v14  ;;  %2288 = vmatpush2.msra.mxu0 %v9955_v33  ;;  %v10068_v14 = vld [vmem:[%s19980_s2 + $0xaa8] sm:$0xff]  ;;  %v10003_v33 = vld [vmem:[%s19980_s2 + $0x8a0] sm:$0xff] }
 0x32f   :  { %2176 = vmatprep.subr.mxu1 %v9890_v27  ;;  %2289 = vmatprep.subr.mxu0 %v9954_v55  ;;  %v10067_v27 = vld [vmem:[%s19980_s2 + $0xaa0] sm:$0xff]  ;;  %v10002_v55 = vld [vmem:[%s19980_s2 + $0x898] sm:$0xff] }
 0x330   :  { %2177 = vmatpush2.msra.mxu1 %v9889_v60  ;;  %2290 = vmatpush2.msra.mxu0 %v9953_v45  ;;  %v10066_v60 = vld [vmem:[%s19980_s2 + $0xa98] sm:$0xff]  ;;  %v10001_v45 = vld [vmem:[%s19980_s2 + $0x890] sm:$0xff] }
 0x331   :  { %2178 = vmatprep.subr.mxu1 %v9888_v46  ;;  %2291 = vmatprep.subr.mxu0 %v9952_v6  ;;  %v10065_v46 = vld [vmem:[%s19980_s2 + $0xa90] sm:$0xff]  ;;  %v10000_v6 = vld [vmem:[%s19980_s2 + $0x888] sm:$0xff] }
 0x332   :  { %2179 = vmatpush2.msra.mxu1 %v9887_v0  ;;  %2292 = vmatpush2.msra.mxu0 %v9951_v48  ;;  %v10064_v0 = vld [vmem:[%s19980_s2 + $0xa88] sm:$0xff]  ;;  %v9999_v48 = vld [vmem:[%s19980_s2 + $0x880] sm:$0xff] }
 0x333   :  { %2181 = vmatmul.mubr.f32.vlgmr.msra.gmra.mxu1 %v13414_v36  ;;  %2294 = vmatmul.mubr.f32.vlgmr.msra.gmra.mxu0 %v13418_v15 }
 0x334   :  { %2487 = vmatprep.subr.mxu1 %v10014_v54  ;;  %2600 = vmatprep.subr.mxu0 %v10078_v28  ;;  %v10063_v54 = vld [vmem:[%s19980_s2 + $0xa80] sm:$0xff]  ;;  %v9998_v28 = vld [vmem:[%s19980_s2 + $0x878] sm:$0xff] }
 0x335   :  { %2186 = vmatprep.mubr.f32.mxu1 %v13452_v31  ;;  %2299 = vmatprep.mubr.f32.mxu0 %v13454_v37 }
 0x336   :  { %2488 = vmatpush1.msra.mxu1 %v10013_v61  ;;  %2601 = vmatpush1.msra.mxu0 %v10077_v22  ;;  %v10062_v61 = vld [vmem:[%s19980_s2 + $0xa78] sm:$0xff]  ;;  %v9997_v22 = vld [vmem:[%s19980_s2 + $0x870] sm:$0xff] }
 0x337   :  { %2489 = vmatprep.subr.mxu1 %v10012_v30  ;;  %2602 = vmatprep.subr.mxu0 %v10076_v52  ;;  %v10061_v30 = vld [vmem:[%s19980_s2 + $0xa70] sm:$0xff]  ;;  %v9996_v52 = vld [vmem:[%s19980_s2 + $0x868] sm:$0xff] }
 0x338   :  { %2490 = vmatpush1.msra.mxu1 %v10011_v51  ;;  %2603 = vmatpush1.msra.mxu0 %v10075_v49  ;;  %v10060_v51 = vld [vmem:[%s19980_s2 + $0xa68] sm:$0xff]  ;;  %v9995_v49 = vld [vmem:[%s19980_s2 + $0x860] sm:$0xff] }
 0x339   :  { %2187 = vmatmul.mubr.f32.gmra.mxu1 %v13464_v47  ;;  %2300 = vmatmul.mubr.f32.gmra.mxu0 %v13466_v18 }
 0x33a   :  { %2491 = vmatprep.subr.mxu1 %v10010_v44  ;;  %2604 = vmatprep.subr.mxu0 %v10074_v19  ;;  %v10059_v44 = vld [vmem:[%s19980_s2 + $0xa60] sm:$0xff]  ;;  %v9994_v19 = vld [vmem:[%s19980_s2 + $0x858] sm:$0xff] }
 0x33b   :  { %2192 = vmatprep.mubr.f32.mxu1 %v13494_v32  ;;  %2305 = vmatprep.mubr.f32.mxu0 %v13496_v34 }
 0x33c   :  { %2492 = vmatpush1.msra.mxu1 %v10009_v38  ;;  %2605 = vmatpush1.msra.mxu0 %v10073_v12  ;;  %v10058_v38 = vld [vmem:[%s19980_s2 + $0xa58] sm:$0xff]  ;;  %v9993_v12 = vld [vmem:[%s19980_s2 + $0x850] sm:$0xff] }
 0x33d   :  { %2493 = vmatprep.subr.mxu1 %v10008_v58  ;;  %2606 = vmatprep.subr.mxu0 %v10072_v43  ;;  %v10057_v58 = vld [vmem:[%s19980_s2 + $0xa50] sm:$0xff]  ;;  %v9992_v43 = vld [vmem:[%s19980_s2 + $0x848] sm:$0xff] }
 0x33e   :  { %2494 = vmatpush1.msra.mxu1 %v10007_v25  ;;  %2607 = vmatpush1.msra.mxu0 %v10071_v11  ;;  %v10056_v25 = vld [vmem:[%s19980_s2 + $0xa48] sm:$0xff]  ;;  %v9991_v11 = vld [vmem:[%s19980_s2 + $0x840] sm:$0xff] }
 0x33f   :  { %2193 = vmatmul.mubr.f32.gmra.mxu1 %v13515_v23  ;;  %2306 = vmatmul.mubr.f32.gmra.mxu0 %v13517_v50 }
 0x340   :  { %2495 = vmatprep.subr.mxu1 %v10006_v35  ;;  %2608 = vmatprep.subr.mxu0 %v10070_v16  ;;  %v10055_v35 = vld [vmem:[%s19980_s2 + $0xa40] sm:$0xff]  ;;  %v9990_v16 = vld [vmem:[%s19980_s2 + $0x838] sm:$0xff] }
 0x341   :  { %2198 = vmatprep.mubr.f32.mxu1 %v13545_v53  ;;  %2311 = vmatprep.mubr.f32.mxu0 %v13547_v10 }
 0x342   :  { %2496 = vmatpush1.msra.mxu1 %v10005_v5  ;;  %2609 = vmatpush1.msra.mxu0 %v10069_v42  ;;  %v10054_v5 = vld [vmem:[%s19980_s2 + $0xa38] sm:$0xff]  ;;  %v9989_v42 = vld [vmem:[%s19980_s2 + $0x830] sm:$0xff] }
 0x343   :  { %2497 = vmatprep.subr.mxu1 %v10004_v63  ;;  %2610 = vmatprep.subr.mxu0 %v10068_v14  ;;  %v10053_v63 = vld [vmem:[%s19980_s2 + $0xa30] sm:$0xff]  ;;  %v9988_v14 = vld [vmem:[%s19980_s2 + $0x828] sm:$0xff] }
 0x344   :  { %2498 = vmatpush1.msra.mxu1 %v10003_v33  ;;  %2611 = vmatpush1.msra.mxu0 %v10067_v27  ;;  %v10052_v33 = vld [vmem:[%s19980_s2 + $0xa28] sm:$0xff]  ;;  %v9987_v27 = vld [vmem:[%s19980_s2 + $0x820] sm:$0xff] }
 0x345   :  { %2199 = vmatmul.mubr.f32.gmra.mxu1 %v13566_v2  ;;  %2312 = vmatmul.mubr.f32.gmra.mxu0 %v13568_v7 }
 0x346   :  { %2499 = vmatprep.subr.mxu1 %v10002_v55  ;;  %2612 = vmatprep.subr.mxu0 %v10066_v60  ;;  %v10051_v55 = vld [vmem:[%s19980_s2 + $0xa20] sm:$0xff]  ;;  %v9986_v60 = vld [vmem:[%s19980_s2 + $0x818] sm:$0xff] }
 0x347   :  { %2204 = vmatprep.mubr.f32.mxu1 %v13596_v13  ;;  %2317 = vmatprep.mubr.f32.mxu0 %v13598_v41 }
 0x348   :  { %2500 = vmatpush1.msra.mxu1 %v10001_v45  ;;  %2613 = vmatpush1.msra.mxu0 %v10065_v46  ;;  %v10050_v45 = vld [vmem:[%s19980_s2 + $0xa18] sm:$0xff]  ;;  %v9985_v46 = vld [vmem:[%s19980_s2 + $0x810] sm:$0xff] }
 0x349   :  { %2501 = vmatprep.subr.mxu1 %v10000_v6  ;;  %2614 = vmatprep.subr.mxu0 %v10064_v0  ;;  %v10049_v6 = vld [vmem:[%s19980_s2 + $0xa10] sm:$0xff]  ;;  %v9984_v0 = vld [vmem:[%s19980_s2 + $0x808] sm:$0xff] }
 0x34a   :  { %2502 = vmatpush1.msra.mxu1 %v9999_v48  ;;  %2615 = vmatpush1.msra.mxu0 %v10063_v54  ;;  %v10048_v48 = vld [vmem:[%s19980_s2 + $0xa08] sm:$0xff]  ;;  %v9983_v54 = vld [vmem:[%s19980_s2 + $0x800] sm:$0xff] }
 0x34b   :  { %2205 = vmatmul.mubr.f32.gmra.mxu1 %v13615_v29  ;;  %2318 = vmatmul.mubr.f32.gmra.mxu0 %v13617_v59 }
 0x34c   :  { %2503 = vmatprep.subr.mxu1 %v9998_v28  ;;  %2616 = vmatprep.subr.mxu0 %v10062_v61  ;;  %v10047_v28 = vld [vmem:[%s19980_s2 + $0xa00] sm:$0xff]  ;;  %v10046_v61 = vld [vmem:[%s19980_s2 + $0x9f8] sm:$0xff] }
 0x34d   :  { %2210 = vmatprep.mubr.f32.mxu1 %v13645_v62  ;;  %2323 = vmatprep.mubr.f32.mxu0 %v13647_v26 }
 0x34e   :  { %2504 = vmatpush1.msra.mxu1 %v9997_v22  ;;  %2617 = vmatpush1.msra.mxu0 %v10061_v30  ;;  %v10110_v22 = vld [vmem:[%s19980_s2 + $0xbf8] sm:$0xff]  ;;  %v10109_v30 = vld [vmem:[%s19980_s2 + $0xbf0] sm:$0xff] }
 0x34f   :  { %2505 = vmatprep.subr.mxu1 %v9996_v52  ;;  %2618 = vmatprep.subr.mxu0 %v10060_v51  ;;  %v10108_v52 = vld [vmem:[%s19980_s2 + $0xbe8] sm:$0xff]  ;;  %v10043_v51 = vld [vmem:[%s19980_s2 + $0x9e0] sm:$0xff] }
 0x350   :  { %2506 = vmatpush1.msra.mxu1 %v9995_v49  ;;  %2619 = vmatpush1.msra.mxu0 %v10059_v44  ;;  %v10107_v49 = vld [vmem:[%s19980_s2 + $0xbe0] sm:$0xff]  ;;  %v10042_v44 = vld [vmem:[%s19980_s2 + $0x9d8] sm:$0xff] }
 0x351   :  { %2211 = vmatmul.mubr.f32.gmra.mxu1 %v13664_v40  ;;  %2324 = vmatmul.mubr.f32.gmra.mxu0 %v13666_v56 }
 0x352   :  { %2507 = vmatprep.subr.mxu1 %v9994_v19  ;;  %2620 = vmatprep.subr.mxu0 %v10058_v38  ;;  %v10106_v19 = vld [vmem:[%s19980_s2 + $0xbd8] sm:$0xff]  ;;  %v10041_v38 = vld [vmem:[%s19980_s2 + $0x9d0] sm:$0xff] }
 0x353   :  { %2216 = vmatprep.mubr.f32.mxu1 %v13694_v57  ;;  %2329 = vmatprep.mubr.f32.mxu0 %v13696_v20 }
 0x354   :  { %2508 = vmatpush1.msra.mxu1 %v9993_v12  ;;  %2621 = vmatpush1.msra.mxu0 %v10057_v58  ;;  %v10105_v12 = vld [vmem:[%s19980_s2 + $0xbd0] sm:$0xff]  ;;  %v10040_v58 = vld [vmem:[%s19980_s2 + $0x9c8] sm:$0xff] }
 0x355   :  { %2509 = vmatprep.subr.mxu1 %v9992_v43  ;;  %2622 = vmatprep.subr.mxu0 %v10056_v25  ;;  %v10104_v43 = vld [vmem:[%s19980_s2 + $0xbc8] sm:$0xff]  ;;  %v10039_v25 = vld [vmem:[%s19980_s2 + $0x9c0] sm:$0xff] }
 0x356   :  { %2510 = vmatpush1.msra.mxu1 %v9991_v11  ;;  %2623 = vmatpush1.msra.mxu0 %v10055_v35  ;;  %v10103_v11 = vld [vmem:[%s19980_s2 + $0xbc0] sm:$0xff]  ;;  %v10038_v35 = vld [vmem:[%s19980_s2 + $0x9b8] sm:$0xff] }
 0x357   :  { %2217 = vmatmul.mubr.f32.gmra.mxu1 %v13707_v1  ;;  %2330 = vmatmul.mubr.f32.gmra.mxu0 %v13709_v21 }
 0x358   :  { %2511 = vmatprep.subr.mxu1 %v9990_v16  ;;  %2624 = vmatprep.subr.mxu0 %v10054_v5  ;;  %v10102_v16 = vld [vmem:[%s19980_s2 + $0xbb8] sm:$0xff]  ;;  %v10037_v5 = vld [vmem:[%s19980_s2 + $0x9b0] sm:$0xff] }
 0x359   :  { %2222 = vmatprep.mubr.f32.mxu1 %v13735_v4  ;;  %2335 = vmatprep.mubr.f32.mxu0 %v13737_v24 }
 0x35a   :  { %2512 = vmatpush1.msra.mxu1 %v9989_v42  ;;  %2625 = vmatpush1.msra.mxu0 %v10053_v63  ;;  %v10101_v42 = vld [vmem:[%s19980_s2 + $0xbb0] sm:$0xff]  ;;  %v10036_v63 = vld [vmem:[%s19980_s2 + $0x9a8] sm:$0xff] }
 0x35b   :  { %2513 = vmatprep.subr.mxu1 %v9988_v14  ;;  %2626 = vmatprep.subr.mxu0 %v10052_v33  ;;  %v10100_v14 = vld [vmem:[%s19980_s2 + $0xba8] sm:$0xff]  ;;  %v10035_v33 = vld [vmem:[%s19980_s2 + $0x9a0] sm:$0xff] }
 0x35c   :  { %2514 = vmatpush1.msra.mxu1 %v9987_v27  ;;  %2627 = vmatpush1.msra.mxu0 %v10051_v55  ;;  %v10099_v27 = vld [vmem:[%s19980_s2 + $0xba0] sm:$0xff]  ;;  %v10034_v55 = vld [vmem:[%s19980_s2 + $0x998] sm:$0xff] }
 0x35d   :  { %2223 = vmatmul.mubr.f32.gmra.mxu1 %v13745_v3  ;;  %2336 = vmatmul.mubr.f32.gmra.mxu0 %v13747_v8 }
 0x35e   :  { %2515 = vmatprep.subr.mxu1 %v9986_v60  ;;  %2628 = vmatprep.subr.mxu0 %v10050_v45  ;;  %v10098_v60 = vld [vmem:[%s19980_s2 + $0xb98] sm:$0xff]  ;;  %v10033_v45 = vld [vmem:[%s19980_s2 + $0x990] sm:$0xff] }
 0x35f   :  { %2516 = vmatpush1.msra.mxu1 %v9985_v46  ;;  %2551 = vmatprep.mubr.f32.mxu1 %v13409_v17  ;;  %v10045_v17 = vld [vmem:[%s19980_s2 + $0x9f0] sm:$0xff] }
 0x360   :  { %2629 = vmatpush1.msra.mxu0 %v10049_v6  ;;  %2664 = vmatprep.mubr.f32.mxu0 %v13411_v9  ;;  %v10044_v9 = vld [vmem:[%s19980_s2 + $0x9e8] sm:$0xff]  ;;  %v10097_v46 = vld [vmem:[%s19980_s2 + $0xb90] sm:$0xff] }
 0x361   :  { %2517 = vmatprep.subr.mxu1 %v9984_v0  ;;  %2630 = vmatprep.subr.mxu0 %v10048_v48  ;;  %v10032_v6 = vld [vmem:[%s19980_s2 + $0x988] sm:$0xff]  ;;  %v10031_v48 = vld [vmem:[%s19980_s2 + $0x980] sm:$0xff] }
 0x362   :  { %2518 = vmatpush1.msra.mxu1 %v9983_v54  ;;  %2631 = vmatpush1.msra.mxu0 %v10047_v28  ;;  %v10096_v0 = vld [vmem:[%s19980_s2 + $0xb88] sm:$0xff]  ;;  %v10095_v54 = vld [vmem:[%s19980_s2 + $0xb80] sm:$0xff]  ;;  %v10030_v28 = vld [vmem:[%s19980_s2 + $0x978] sm:$0xff] }
 0x363   :  { %2519 = vmatprep.subr.mxu1 %v10046_v61  ;;  %2632 = vmatprep.subr.mxu0 %v10110_v22  ;;  %v10094_v61 = vld [vmem:[%s19980_s2 + $0xb78] sm:$0xff]  ;;  %v10029_v22 = vld [vmem:[%s19980_s2 + $0x970] sm:$0xff] }
 0x364   :  { %2520 = vmatpush2.msra.mxu1 %v10045_v17  ;;  %2633 = vmatpush2.msra.mxu0 %v10109_v30  ;;  %v10093_v17 = vld [vmem:[%s19980_s2 + $0xb70] sm:$0xff]  ;;  %v10028_v30 = vld [vmem:[%s19980_s2 + $0x968] sm:$0xff] }
 0x365   :  { %2521 = vmatprep.subr.mxu1 %v10044_v9  ;;  %2634 = vmatprep.subr.mxu0 %v10108_v52  ;;  %v10092_v9 = vld [vmem:[%s19980_s2 + $0xb68] sm:$0xff]  ;;  %v10027_v52 = vld [vmem:[%s19980_s2 + $0x960] sm:$0xff] }
 0x366   :  { %2522 = vmatpush2.msra.mxu1 %v10043_v51  ;;  %2635 = vmatpush2.msra.mxu0 %v10107_v49  ;;  %v10091_v51 = vld [vmem:[%s19980_s2 + $0xb60] sm:$0xff]  ;;  %v10026_v49 = vld [vmem:[%s19980_s2 + $0x958] sm:$0xff] }
 0x367   :  { %2523 = vmatprep.subr.mxu1 %v10042_v44  ;;  %2636 = vmatprep.subr.mxu0 %v10106_v19  ;;  %v10090_v44 = vld [vmem:[%s19980_s2 + $0xb58] sm:$0xff]  ;;  %v10025_v19 = vld [vmem:[%s19980_s2 + $0x950] sm:$0xff] }
 0x368   :  { %2524 = vmatpush2.msra.mxu1 %v10041_v38  ;;  %2637 = vmatpush2.msra.mxu0 %v10105_v12  ;;  %v10089_v38 = vld [vmem:[%s19980_s2 + $0xb50] sm:$0xff]  ;;  %v10024_v12 = vld [vmem:[%s19980_s2 + $0x948] sm:$0xff] }
 0x369   :  { %2525 = vmatprep.subr.mxu1 %v10040_v58  ;;  %2638 = vmatprep.subr.mxu0 %v10104_v43  ;;  %v10088_v58 = vld [vmem:[%s19980_s2 + $0xb48] sm:$0xff]  ;;  %v10023_v43 = vld [vmem:[%s19980_s2 + $0x940] sm:$0xff] }
 0x36a   :  { %2526 = vmatpush2.msra.mxu1 %v10039_v25  ;;  %2639 = vmatpush2.msra.mxu0 %v10103_v11  ;;  %v10087_v25 = vld [vmem:[%s19980_s2 + $0xb40] sm:$0xff]  ;;  %v10022_v11 = vld [vmem:[%s19980_s2 + $0x938] sm:$0xff] }
 0x36b   :  { %2527 = vmatprep.subr.mxu1 %v10038_v35  ;;  %2640 = vmatprep.subr.mxu0 %v10102_v16  ;;  %v10086_v35 = vld [vmem:[%s19980_s2 + $0xb38] sm:$0xff]  ;;  %v10021_v16 = vld [vmem:[%s19980_s2 + $0x930] sm:$0xff] }
 0x36c   :  { %2528 = vmatpush2.msra.mxu1 %v10037_v5  ;;  %2641 = vmatpush2.msra.mxu0 %v10101_v42  ;;  %v10085_v5 = vld [vmem:[%s19980_s2 + $0xb30] sm:$0xff]  ;;  %v10020_v42 = vld [vmem:[%s19980_s2 + $0x928] sm:$0xff] }
 0x36d   :  { %2529 = vmatprep.subr.mxu1 %v10036_v63  ;;  %2642 = vmatprep.subr.mxu0 %v10100_v14  ;;  %v10084_v63 = vld [vmem:[%s19980_s2 + $0xb28] sm:$0xff]  ;;  %v10019_v14 = vld [vmem:[%s19980_s2 + $0x920] sm:$0xff] }
 0x36e   :  { %2530 = vmatpush2.msra.mxu1 %v10035_v33  ;;  %2643 = vmatpush2.msra.mxu0 %v10099_v27  ;;  %v10083_v33 = vld [vmem:[%s19980_s2 + $0xb20] sm:$0xff]  ;;  %v10018_v27 = vld [vmem:[%s19980_s2 + $0x918] sm:$0xff] }
 0x36f   :  { %2531 = vmatprep.subr.mxu1 %v10034_v55  ;;  %2644 = vmatprep.subr.mxu0 %v10098_v60  ;;  %v10082_v55 = vld [vmem:[%s19980_s2 + $0xb18] sm:$0xff]  ;;  %v10017_v60 = vld [vmem:[%s19980_s2 + $0x910] sm:$0xff] }
 0x370   :  { %2532 = vmatpush2.msra.mxu1 %v10033_v45  ;;  %2645 = vmatpush2.msra.mxu0 %v10097_v46  ;;  %v10081_v45 = vld [vmem:[%s19980_s2 + $0xb10] sm:$0xff]  ;;  %v10016_v46 = vld [vmem:[%s19980_s2 + $0x908] sm:$0xff] }
 0x371   :  { %2533 = vmatprep.subr.mxu1 %v10032_v6  ;;  %2646 = vmatprep.subr.mxu0 %v10096_v0  ;;  %v10080_v6 = vld [vmem:[%s19980_s2 + $0xb08] sm:$0xff]  ;;  %v10015_v0 = vld [vmem:[%s19980_s2 + $0x900] sm:$0xff] }
 0x372   :  { %2534 = vmatpush2.msra.mxu1 %v10031_v48  ;;  %2647 = vmatpush2.msra.mxu0 %v10095_v54  ;;  %v10079_v48 = vld [vmem:[%s19980_s2 + $0xb00] sm:$0xff] }
 0x373   :  { %2535 = vmatprep.subr.mxu1 %v10030_v28  ;;  %2648 = vmatprep.subr.mxu0 %v10094_v61 }
 0x374   :  { %2536 = vmatpush2.msra.mxu1 %v10029_v22  ;;  %2649 = vmatpush2.msra.mxu0 %v10093_v17 }
 0x375   :  { %2537 = vmatprep.subr.mxu1 %v10028_v30  ;;  %2650 = vmatprep.subr.mxu0 %v10092_v9 }
 0x376   :  { %2538 = vmatpush2.msra.mxu1 %v10027_v52  ;;  %2651 = vmatpush2.msra.mxu0 %v10091_v51 }
 0x377   :  { %2539 = vmatprep.subr.mxu1 %v10026_v49  ;;  %2652 = vmatprep.subr.mxu0 %v10090_v44 }
 0x378   :  { %2540 = vmatpush2.msra.mxu1 %v10025_v19  ;;  %2653 = vmatpush2.msra.mxu0 %v10089_v38 }
 0x379   :  { %2541 = vmatprep.subr.mxu1 %v10024_v12  ;;  %2654 = vmatprep.subr.mxu0 %v10088_v58 }
 0x37a   :  { %2542 = vmatpush2.msra.mxu1 %v10023_v43  ;;  %2655 = vmatpush2.msra.mxu0 %v10087_v25 }
 0x37b   :  { %2543 = vmatprep.subr.mxu1 %v10022_v11  ;;  %2656 = vmatprep.subr.mxu0 %v10086_v35 }
 0x37c   :  { %2544 = vmatpush2.msra.mxu1 %v10021_v16  ;;  %2657 = vmatpush2.msra.mxu0 %v10085_v5 }
 0x37d   :  { %2545 = vmatprep.subr.mxu1 %v10020_v42  ;;  %2658 = vmatprep.subr.mxu0 %v10084_v63 }
 0x37e   :  { %2546 = vmatpush2.msra.mxu1 %v10019_v14  ;;  %2659 = vmatpush2.msra.mxu0 %v10083_v33 }
 0x37f   :  { %2547 = vmatprep.subr.mxu1 %v10018_v27  ;;  %2660 = vmatprep.subr.mxu0 %v10082_v55 }
 0x380   :  { %2548 = vmatpush2.msra.mxu1 %v10017_v60  ;;  %2661 = vmatpush2.msra.mxu0 %v10081_v45 }
 0x381   :  { %2549 = vmatprep.subr.mxu1 %v10016_v46  ;;  %2662 = vmatprep.subr.mxu0 %v10080_v6 }
 0x382   :  { %2550 = vmatpush2.msra.mxu1 %v10015_v0  ;;  %2663 = vmatpush2.msra.mxu0 %v10079_v48 }
 0x383   :  { %2552 = vmatmul.mubr.f32.vlgmr.msra.gmra.mxu1 %v13414_v36  ;;  %2665 = vmatmul.mubr.f32.vlgmr.msra.gmra.mxu0 %v13418_v15  ;;  %v20006_v36 = vmov 0.0  }
 0x384   :  { %2557 = vmatprep.mubr.f32.mxu1 %v13452_v31  ;;  %2670 = vmatprep.mubr.f32.mxu0 %v13454_v37 }
 0x387   :  { %2558 = vmatmul.mubr.f32.gmra.mxu1 %v13464_v47  ;;  %2671 = vmatmul.mubr.f32.gmra.mxu0 %v13466_v18 }
 0x388   :  { %2563 = vmatprep.mubr.f32.mxu1 %v13494_v32  ;;  %2676 = vmatprep.mubr.f32.mxu0 %v13496_v34 }
 0x38b   :  { %2564 = vmatmul.mubr.f32.gmra.mxu1 %v13515_v23  ;;  %2677 = vmatmul.mubr.f32.gmra.mxu0 %v13517_v50 }
 0x38c   :  { %2569 = vmatprep.mubr.f32.mxu1 %v13545_v53  ;;  %2682 = vmatprep.mubr.f32.mxu0 %v13547_v10 }
 0x38f   :  { %2570 = vmatmul.mubr.f32.gmra.mxu1 %v13566_v2  ;;  %2683 = vmatmul.mubr.f32.gmra.mxu0 %v13568_v7 }
 0x390   :  { %2575 = vmatprep.mubr.f32.mxu1 %v13596_v13  ;;  %2688 = vmatprep.mubr.f32.mxu0 %v13598_v41 }
 0x393   :  { %2576 = vmatmul.mubr.f32.gmra.mxu1 %v13615_v29  ;;  %2689 = vmatmul.mubr.f32.gmra.mxu0 %v13617_v59 }
 0x394   :  { %2581 = vmatprep.mubr.f32.mxu1 %v13645_v62  ;;  %2694 = vmatprep.mubr.f32.mxu0 %v13647_v26 }
 0x397   :  { %2582 = vmatmul.mubr.f32.gmra.mxu1 %v13664_v40  ;;  %2695 = vmatmul.mubr.f32.gmra.mxu0 %v13666_v56 }
 0x398   :  { %2587 = vmatprep.mubr.f32.mxu1 %v13694_v57  ;;  %2700 = vmatprep.mubr.f32.mxu0 %v13696_v20 }
 0x39b   :  { %2588 = vmatmul.mubr.f32.gmra.mxu1 %v13707_v1  ;;  %2701 = vmatmul.mubr.f32.gmra.mxu0 %v13709_v21 }
 0x39c   :  { %2593 = vmatprep.mubr.f32.mxu1 %v13735_v4  ;;  %2706 = vmatprep.mubr.f32.mxu0 %v13737_v24 }
 0x39f   :  { %2594 = vmatmul.mubr.f32.gmra.mxu1 %v13745_v3  ;;  %2707 = vmatmul.mubr.f32.gmra.mxu0 %v13747_v8 }
 0x3a0   :  { %2809 = vmatprep.mubr.f32.mxu1 %v20006_v36  ;;  %3029 = vmatprep.mubr.f32.mxu0 %v20006_v36 }
 0x3a4   :  { %v1827_v15 = vpop.f32.mrf.mxu1  ;;  %v1940_v31 = vpop.f32.mrf.mxu0 }
 0x3a5   :  { %v14413_v37 = vadd.f32 %v1940_v31, %v1827_v15 }
 0x3a6   :  { %v14415_v47 = vpop.f32.mrf.mxu1  ;;  %v14417_v18 = vpop.f32.mrf.mxu0 }
 0x3a7   :  { %20007 = vst [vmem:[#allocation6_spill] sm:$0xff] %v14413_v37 }
 0x3aa   :  { %v1833_v32 = vpop.f32.mrf.mxu1  ;;  %v1946_v34 = vpop.f32.mrf.mxu0 }
 0x3ab   :  { %v14419_v23 = vadd.f32 %v1946_v34, %v1833_v32 }
 0x3ac   :  { %v14421_v50 = vpop.f32.mrf.mxu1  ;;  %v14423_v53 = vpop.f32.mrf.mxu0 }
 0x3ad   :  { %20008 = vst [vmem:[#allocation9_spill] sm:$0xff] %v14419_v23 }
 0x3b0   :  { %v1839_v10 = vpop.f32.mrf.mxu1  ;;  %v1952_v2 = vpop.f32.mrf.mxu0 }
 0x3b1   :  { %v14425_v7 = vadd.f32 %v1952_v2, %v1839_v10 }
 0x3b2   :  { %v14427_v13 = vpop.f32.mrf.mxu1  ;;  %v14429_v41 = vpop.f32.mrf.mxu0 }
 0x3b3   :  { %20009 = vst [vmem:[#allocation2_spill] sm:$0xff] %v14425_v7 }
 0x3b6   :  { %v1845_v29 = vpop.f32.mrf.mxu1  ;;  %v1958_v59 = vpop.f32.mrf.mxu0 }
 0x3b7   :  { %v14431_v62 = vadd.f32 %v1958_v59, %v1845_v29 }
 0x3b8   :  { %v14433_v26 = vpop.f32.mrf.mxu1  ;;  %v14435_v40 = vpop.f32.mrf.mxu0 }
 0x3b9   :  { %20010 = vst [vmem:[#allocation5_spill] sm:$0xff] %v14431_v62 }
 0x3bc   :  { %v1851_v56 = vpop.f32.mrf.mxu1  ;;  %v1964_v57 = vpop.f32.mrf.mxu0 }
 0x3bd   :  { %v14437_v20 = vadd.f32 %v1964_v57, %v1851_v56 }
 0x3be   :  { %v14439_v1 = vpop.f32.mrf.mxu1  ;;  %v14441_v21 = vpop.f32.mrf.mxu0 }
 0x3bf   :  { %20011 = vst [vmem:[#allocation8_spill] sm:$0xff] %v14437_v20  ;;  %v14545_v20 = vadd.f32 %v14429_v41, %v14427_v13 }
 0x3c2   :  { %v1857_v4 = vpop.f32.mrf.mxu1  ;;  %v1970_v24 = vpop.f32.mrf.mxu0 }
 0x3c3   :  { %v14443_v3 = vadd.f32 %v1970_v24, %v1857_v4 }
 0x3c4   :  { %v14445_v8 = vpop.f32.mrf.mxu1  ;;  %v14447_v54 = vpop.f32.mrf.mxu0 }
 0x3c5   :  { %20012 = vst [vmem:[#allocation14_spill] sm:$0xff] %v14443_v3  ;;  %v1967_v3 = vadd.f32 %v14441_v21, %v14439_v1 }
 0x3c8   :  { %v1863_v28 = vpop.f32.mrf.mxu1  ;;  %v1976_v61 = vpop.f32.mrf.mxu0 }
 0x3c9   :  { %v14449_v22 = vadd.f32 %v1976_v61, %v1863_v28 }
 0x3ca   :  { %v14451_v17 = vpop.f32.mrf.mxu1  ;;  %v14453_v30 = vpop.f32.mrf.mxu0 }
 0x3cb   :  { %20013 = vst [vmem:[#allocation3_spill] sm:$0xff] %v14449_v22 }
 0x3ce   :  { %v1869_v9 = vpop.f32.mrf.mxu1  ;;  %v1982_v52 = vpop.f32.mrf.mxu0 }
 0x3cf   :  { %v14455_v51 = vadd.f32 %v1982_v52, %v1869_v9 }
 0x3d0   :  { %v14457_v49 = vpop.f32.mrf.mxu1  ;;  %v14459_v44 = vpop.f32.mrf.mxu0 }
 0x3f3   :  { %v2182_v19 = vpop.f32.mrf.mxu1  ;;  %v2295_v38 = vpop.f32.mrf.mxu0 }
 0x3f4   :  { %v14461_v12 = vadd.f32 %v2295_v38, %v2182_v19 }
 0x3f5   :  { %v14463_v58 = vpop.f32.mrf.mxu1  ;;  %v14465_v43 = vpop.f32.mrf.mxu0 }
 0x3f6   :  { %20014 = vst [vmem:[#allocation7_spill] sm:$0xff] %v14461_v12 }
 0x3f9   :  { %v2188_v11 = vpop.f32.mrf.mxu1  ;;  %v2301_v35 = vpop.f32.mrf.mxu0 }
 0x3fa   :  { %v14469_v16 = vadd.f32 %v2301_v35, %v2188_v11 }
 0x3fb   :  { %v14473_v42 = vpop.f32.mrf.mxu1  ;;  %v14475_v63 = vpop.f32.mrf.mxu0 }
 0x3fc   :  { %20015 = vst [vmem:[#allocation11_spill] sm:$0xff] %v14469_v16 }
 0x3ff   :  { %v14477_v14 = vpop.f32.mrf.mxu1  ;;  %v14479_v33 = vpop.f32.mrf.mxu0 }
 0x400   :  { %v14569_v1 = vadd.f32 %v14479_v33, %v14477_v14 }
 0x401   :  { %v14481_v27 = vpop.f32.mrf.mxu1  ;;  %v14483_v55 = vpop.f32.mrf.mxu0 }
 0x405   :  { %v14485_v60 = vpop.f32.mrf.mxu1  ;;  %v14487_v45 = vpop.f32.mrf.mxu0 }
 0x407   :  { %v14489_v46 = vpop.f32.mrf.mxu1  ;;  %v14491_v6 = vpop.f32.mrf.mxu0 }
 0x408   :  { %v2316_v14 = vadd.f32 %v14491_v6, %v14489_v46 }
 0x40b   :  { %v14493_v0 = vpop.f32.mrf.mxu1  ;;  %v14495_v48 = vpop.f32.mrf.mxu0 }
 0x40d   :  { %v14497_v15 = vpop.f32.mrf.mxu1  ;;  %v14499_v31 = vpop.f32.mrf.mxu0 }
 0x411   :  { %v14501_v32 = vpop.f32.mrf.mxu1  ;;  %v14503_v34 = vpop.f32.mrf.mxu0 }
 0x412   :  { %v2326_v33 = vadd.f32 %v14503_v34, %v14501_v32 }
 0x413   :  { %v2214_v10 = vpop.f32.mrf.mxu1  ;;  %v2327_v2 = vpop.f32.mrf.mxu0 }
 0x417   :  { %v2218_v29 = vpop.f32.mrf.mxu1  ;;  %v2331_v59 = vpop.f32.mrf.mxu0 }
 0x419   :  { %v2220_v56 = vpop.f32.mrf.mxu1  ;;  %v2333_v57 = vpop.f32.mrf.mxu0 }
 0x41a   :  { %v2334_v21 = vadd.f32 %v2333_v57, %v2220_v56 }
 0x41d   :  { %v2224_v4 = vpop.f32.mrf.mxu1  ;;  %v2337_v24 = vpop.f32.mrf.mxu0 }
 0x41f   :  { %v2226_v28 = vpop.f32.mrf.mxu1  ;;  %v2339_v61 = vpop.f32.mrf.mxu0 }
 0x420   :  { %v2340_v22 = vadd.f32 %v2339_v61, %v2226_v28 }
 0x443   :  { %v14505_v9 = vpop.f32.mrf.mxu1  ;;  %v14507_v52 = vpop.f32.mrf.mxu0 }
 0x444   :  { %20016 = vst [vmem:[#allocation4_spill] sm:$0xff] %v14505_v9  ;;  %20017 = vst [vmem:[#allocation15_spill] sm:$0xff] %v14507_v52 }
 0x445   :  { %v14509_v19 = vpop.f32.mrf.mxu1  ;;  %v14511_v38 = vpop.f32.mrf.mxu0 }
 0x446   :  { %20018 = vst [vmem:[#allocation16_spill] sm:$0xff] %v14509_v19  ;;  %20019 = vst [vmem:[#allocation17_spill] sm:$0xff] %v14511_v38 }
 0x447   :  { %v14513_v11 = vpop.f32.mrf.mxu1  ;;  %v14515_v35 = vpop.f32.mrf.mxu0 }
 0x448   :  { %20020 = vst [vmem:[#allocation18_spill] sm:$0xff] %v14513_v11  ;;  %20021 = vst [vmem:[#allocation19_spill] sm:$0xff] %v14515_v35 }
 0x449   :  { %v14517_v25 = vpop.f32.mrf.mxu1  ;;  %v14519_v5 = vpop.f32.mrf.mxu0 }
 0x44a   :  { %20022 = vst [vmem:[#allocation20_spill] sm:$0xff] %v14517_v25  ;;  %20023 = vst [vmem:[#allocation21_spill] sm:$0xff] %v14519_v5 }
 0x44b   :  { %v14521_v39 = vpop.f32.mrf.mxu1  ;;  %v14523_v36 = vpop.f32.mrf.mxu0 }
 0x44c   :  { %20024 = vst [vmem:[#allocation22_spill] sm:$0xff] %v14521_v39  ;;  %20025 = vst [vmem:[#allocation23_spill] sm:$0xff] %v14523_v36 }
 0x44d   :  { %v14525_v12 = vpop.f32.mrf.mxu1  ;;  %v14527_v37 = vpop.f32.mrf.mxu0 }
 0x44e   :  { %20026 = vst [vmem:[#allocation24_spill] sm:$0xff] %v14525_v12  ;;  %20027 = vst [vmem:[#allocation25_spill] sm:$0xff] %v14527_v37  ;;  %v14537_v37 = vadd.f32 %v14417_v18, %v14415_v47  ;;  %v14541_v12 = vadd.f32 %v14423_v53, %v14421_v50  ;;  %v1973_v47 = vadd.f32 %v14447_v54, %v14445_v8 }
 0x44f   :  { %v14529_v16 = vpop.f32.mrf.mxu1  ;;  %v14531_v23 = vpop.f32.mrf.mxu0  ;;  %v1979_v18 = vadd.f32 %v14453_v30, %v14451_v17  ;;  %v1985_v50 = vadd.f32 %v14459_v44, %v14457_v49  ;;  %v2338_v53 = vadd.f32 %v2337_v24, %v2224_v4  ;;  %v14573_v8 = vadd.f32 %v14483_v55, %v14481_v27 }
 0x450   :  { %20028 = vst [vmem:[#allocation26_spill] sm:$0xff] %v14529_v16  ;;  %20029 = vst [vmem:[#allocation27_spill] sm:$0xff] %v14531_v23  ;;  %v2314_v54 = vadd.f32 %v14487_v45, %v14485_v60  ;;  %v2332_v17 = vadd.f32 %v2331_v59, %v2218_v29  ;;  %v2322_v60 = vadd.f32 %v14499_v31, %v14497_v15 }
 0x451   :  { %v14533_v52 = vpop.f32.mrf.mxu1  ;;  %v2686_v9 = vpop.f32.mrf.mxu0  ;;  %v2356_v27 = vmax.f32 %v14455_v51, %v2338_v53  ;;  %v2355_v45 = vmax.f32 %v1979_v18, %v2334_v21  ;;  %v20042_v18 = vld [vmem:[#allocation20_spill] sm:$0xff] }
 0x452   :  { %20030 = vst [vmem:[#allocation28_spill] sm:$0xff] %v14533_v52  ;;  %v14549_v52 = vadd.f32 %v14435_v40, %v14433_v26  ;;  %v14561_v26 = vadd.f32 %v14465_v43, %v14463_v58  ;;  %v14565_v40 = vadd.f32 %v14475_v63, %v14473_v42  ;;  %v2328_v58 = vadd.f32 %v2327_v2, %v2214_v10 }
 0x453   :  { %v2577_v38 = vpop.f32.mrf.mxu1  ;;  %v2690_v19 = vpop.f32.mrf.mxu0  ;;  %v2357_v43 = vmax.f32 %v1985_v50, %v2340_v22  ;;  %v20031_v22 = vld [vmem:[#allocation3_spill] sm:$0xff]  ;;  %v20043_v50 = vld [vmem:[#allocation21_spill] sm:$0xff] }
 0x454   :  { %v2353_v6 = vmax.f32 %v1973_v47, %v2328_v58  ;;  %v2675_v53 = vadd.f32 %v20043_v50, %v20042_v18  ;;  %v20047_v58 = vld [vmem:[#allocation16_spill] sm:$0xff] }
 0x455   :  { %v2579_v35 = vpop.f32.mrf.mxu1  ;;  %v2692_v11 = vpop.f32.mrf.mxu0  ;;  %v20037_v4 = vld [vmem:[#allocation24_spill] sm:$0xff]  ;;  %v20038_v24 = vld [vmem:[#allocation25_spill] sm:$0xff] }
 0x456   :  { %v2693_v32 = vadd.f32 %v2692_v11, %v2579_v35  ;;  %v2681_v28 = vadd.f32 %v20038_v24, %v20037_v4  ;;  %v20041_v11 = vld [vmem:[#allocation23_spill] sm:$0xff] }
 0x457   :  { %v2583_v7 = vpop.f32.mrf.mxu1  ;;  %v2696_v5 = vpop.f32.mrf.mxu0  ;;  %v20035_v31 = vld [vmem:[#allocation26_spill] sm:$0xff]  ;;  %v20036_v2 = vld [vmem:[#allocation27_spill] sm:$0xff] }
 0x458   :  { %v2697_v10 = vadd.f32 %v2696_v5, %v2583_v7  ;;  %v2351_v7 = vmax.f32 %v1967_v3, %v2322_v60  ;;  %v2685_v56 = vadd.f32 %v20036_v2, %v20035_v31  ;;  %v2349_v3 = vmax.f32 %v14549_v52, %v2316_v14 }
 0x459   :  { %v2585_v25 = vpop.f32.mrf.mxu1  ;;  %v2698_v39 = vpop.f32.mrf.mxu0  ;;  %v2347_v52 = vmax.f32 %v14545_v20, %v14573_v8  ;;  %v20048_v20 = vld [vmem:[#allocation17_spill] sm:$0xff] }
 0x45a   :  { %v2699_v29 = vadd.f32 %v2698_v39, %v2585_v25  ;;  %v20033_v25 = vld [vmem:[#allocation28_spill] sm:$0xff]  ;;  %v2722_v61 = vmax.f32 %v2351_v7, %v2693_v32  ;;  %v2669_v8 = vadd.f32 %v20048_v20, %v20047_v58  ;;  %v10118_v7 = vld [vmem:[%s20057_s5 + $0x38] sm:$0x3f] }
 0x45b   :  { %v2589_v36 = vpop.f32.mrf.mxu1  ;;  %v2702_v62 = vpop.f32.mrf.mxu0  ;;  %v2687_v5 = vadd.f32 %v2686_v9, %v20033_v25  ;;  %v20039_v9 = vld [vmem:[#allocation5_spill] sm:$0xff]  ;;  %v10125_v32 = vld [vmem:[%s20057_s5 + $0x50] sm:$0xff] }
 0x45c   :  { %v2703_v55 = vadd.f32 %v2702_v62, %v2589_v36  ;;  %v20032_v36 = vld [vmem:[#allocation14_spill] sm:$0xff]  ;;  %v2691_v62 = vadd.f32 %v2690_v19, %v2577_v38  ;;  %v2348_v19 = vmax.f32 %v20039_v9, %v2314_v54 }
 0x45d   :  { %v2591_v23 = vpop.f32.mrf.mxu1  ;;  %v2704_v16 = vpop.f32.mrf.mxu0  ;;  %v2352_v39 = vmax.f32 %v20032_v36, %v2326_v33  ;;  %v20040_v38 = vld [vmem:[#allocation22_spill] sm:$0xff]  ;;  %v10126_v36 = vld [vmem:[%s20057_s5 + $0x58] sm:$0x3f] }
 0x45e   :  { %v2705_v42 = vadd.f32 %v2704_v16, %v2591_v23  ;;  %v2320_v23 = vadd.f32 %v14495_v48, %v14493_v0  ;;  %v2354_v16 = vmax.f32 %v20031_v22, %v2332_v17  ;;  %v14601_v0 = vmax.f32 %v2353_v6, %v2699_v29  ;;  %v20034_v48 = vld [vmem:[#allocation8_spill] sm:$0xff]  ;;  %v20045_v54 = vld [vmem:[#allocation18_spill] sm:$0xff]  ;;  %v20046_v17 = vld [vmem:[#allocation19_spill] sm:$0xff] }
 0x45f   :  { %v2595_v13 = vpop.f32.mrf.mxu1  ;;  %v2708_v41 = vpop.f32.mrf.mxu0  ;;  %v14608_v57 = vmax.f32 %v2352_v39, %v2697_v10  ;;  %v2679_v35 = vadd.f32 %v20041_v11, %v20040_v38  ;;  %v20054_v29 = vld [vmem:[#allocation6_spill] sm:$0xff]  ;;  %v20058_v10 = vmov 0.0   ;;  %v2730_v6 = vld [vmem:[%s20057_s5 + $0x8] sm:$0xff] }
 0x460   :  { %v2709_v30 = vadd.f32 %v2708_v41, %v2595_v13  ;;  %v14591_v34 = vmax.f32 %v2355_v45, %v2705_v42  ;;  %v14596_v51 = vmax.f32 %v2354_v16, %v2703_v55  ;;  %v2350_v15 = vmax.f32 %v20034_v48, %v2320_v23  ;;  %v20044_v41 = vld [vmem:[#allocation2_spill] sm:$0xff]  ;;  %v20049_v42 = vld [vmem:[#allocation4_spill] sm:$0xff]  ;;  %v20051_v55 = vld [vmem:[#allocation9_spill] sm:$0xff] }
 0x461   :  { %v2597_v49 = vpop.f32.mrf.mxu1  ;;  %v2710_v44 = vpop.f32.mrf.mxu0  ;;  %v2720_v13 = vmax.f32 %v2349_v3, %v2687_v5  ;;  %v2346_v21 = vmax.f32 %v20044_v41, %v14569_v1  ;;  %v2343_v1 = vmax.f32 %v14537_v37, %v14561_v26  ;;  %v20055_v23 = vld [vmem:[#allocation7_spill] sm:$0xff]  ;;  %v2729_v37 = vld [vmem:[%s20057_s5] sm:$0xff] }
 0x462   :  { %v2711_v63 = vadd.f32 %v2710_v44, %v2597_v49  ;;  %v14589_v46 = vmax.f32 %v2356_v27, %v2709_v30  ;;  %v2721_v47 = vmax.f32 %v2350_v15, %v2691_v62  ;;  %v2673_v30 = vadd.f32 %v20046_v17, %v20045_v54  ;;  %v10123_v26 = vld [vmem:[%s20057_s5 + $0x40] sm:$0xff]  ;;  %v10116_v62 = vld [vmem:[%s20057_s5 + $0x28] sm:$0xff] }
 0x463   :  { %v2719_v49 = vmax.f32 %v2348_v19, %v2685_v56  ;;  %v2345_v44 = vmax.f32 %v14541_v12, %v14565_v40  ;;  %v2717_v33 = vmax.f32 %v2346_v21, %v2679_v35  ;;  %v20052_v12 = vld [vmem:[#allocation11_spill] sm:$0xff]  ;;  %v2714_v45 = vmax.f32 %v2343_v1, %v2669_v8  ;;  %v10115_v39 = vld [vmem:[%s20057_s5 + $0x20] sm:$0xff] }
 0x464   :  { %v14584_v59 = vmax.f32 %v2357_v43, %v2711_v63  ;;  %v2718_v43 = vmax.f32 %v2347_v52, %v2681_v28  ;;  %v20050_v63 = vld [vmem:[#allocation15_spill] sm:$0xff]  ;;  %v20053_v40 = vmax.f32 %v20051_v55, %v20052_v12  ;;  %v20056_v22 = vmax.f32 %v20054_v29, %v20055_v23  ;;  %v10137_v1 = vld [vmem:[%s20059_s30 + $0x20] sm:$0xff]  ;;  %v10192_v12 = vld [vmem:[%s20060_s28 + $0x438] sm:$0xff] }
 0x465   :  { %v2667_v14 = vadd.f32 %v20050_v63, %v20049_v42  ;;  %v2716_v27 = vmax.f32 %v2345_v44, %v2675_v53  ;;  %v10193_v55 = vld [vmem:[%s20060_s28 + $0x440] sm:$0xff]  ;;  %v10190_v29 = vld [vmem:[%s20060_s28 + $0x428] sm:$0xff] }
 0x466   :  { %2761 = vmatprep.subr.mxu1 %v14584_v59  ;;  %2981 = vmatprep.subr.mxu0 %v14584_v59  ;;  %v2715_v60 = vmax.f32 %v20053_v40, %v2673_v30  ;;  %v10194_v40 = vld [vmem:[%s20060_s28 + $0x448] sm:$0xff]  ;;  %v10189_v23 = vld [vmem:[%s20060_s28 + $0x420] sm:$0xff] }
 0x467   :  { %2762 = vmatpush1.msra.mxu1 %v14589_v46  ;;  %2982 = vmatpush1.msra.mxu0 %v14589_v46  ;;  %v2713_v16 = vmax.f32 %v20056_v22, %v2667_v14  ;;  %v10191_v22 = vld [vmem:[%s20060_s28 + $0x430] sm:$0xff] }
 0x468   :  { %2763 = vmatprep.subr.mxu1 %v14591_v34  ;;  %2983 = vmatprep.subr.mxu0 %v14591_v34 }
 0x469   :  { %2764 = vmatpush1.msra.mxu1 %v14596_v51  ;;  %2984 = vmatpush1.msra.mxu0 %v14596_v51 }
 0x46a   :  { %2765 = vmatprep.subr.mxu1 %v14601_v0  ;;  %2985 = vmatprep.subr.mxu0 %v14601_v0 }
 0x46b   :  { %2766 = vmatpush1.msra.mxu1 %v14608_v57  ;;  %2986 = vmatpush1.msra.mxu0 %v14608_v57 }
 0x46c   :  { %2767 = vmatprep.subr.mxu1 %v2722_v61  ;;  %2987 = vmatprep.subr.mxu0 %v2722_v61 }
 0x46d   :  { %2768 = vmatpush1.msra.mxu1 %v2721_v47  ;;  %2988 = vmatpush1.msra.mxu0 %v2721_v47 }
 0x46e   :  { %2769 = vmatprep.subr.mxu1 %v2720_v13  ;;  %2989 = vmatprep.subr.mxu0 %v2720_v13 }
 0x46f   :  { %2770 = vmatpush1.msra.mxu1 %v2719_v49  ;;  %2990 = vmatpush1.msra.mxu0 %v2719_v49 }
 0x470   :  { %2771 = vmatprep.subr.mxu1 %v2718_v43  ;;  %2991 = vmatprep.subr.mxu0 %v2718_v43 }
 0x471   :  { %2772 = vmatpush1.msra.mxu1 %v2717_v33  ;;  %2992 = vmatpush1.msra.mxu0 %v2717_v33 }
 0x472   :  { %2773 = vmatprep.subr.mxu1 %v2716_v27  ;;  %2993 = vmatprep.subr.mxu0 %v2716_v27 }
 0x473   :  { %2774 = vmatpush1.msra.mxu1 %v2715_v60  ;;  %2994 = vmatpush1.msra.mxu0 %v2715_v60 }
 0x474   :  { %2775 = vmatprep.subr.mxu1 %v2714_v45  ;;  %2995 = vmatprep.subr.mxu0 %v2714_v45 }
 0x475   :  { %2776 = vmatpush1.msra.mxu1 %v2713_v16  ;;  %2996 = vmatpush1.msra.mxu0 %v2713_v16 }
 0x476   :  { %10111 = vmatmul.mubr.msk.f32.vlgmr.msra.gmra.mxu1 %vm545_vm0, %v2729_v37  ;;  %2867 = vmatprep.subr.mxu1 %v14584_v59  ;;  %v10124_v59 = vld [vmem:[%s20057_s5 + $0x48] sm:$0xff]  ;;  %v3064_v37 = vld [vmem:[%s20059_s30 + $0x10] sm:$0xff] }
 0x477   :  { %2868 = vmatpush1.msra.mxu1 %v14589_v46  ;;  %2815 = vmatprep.mubr.f32.mxu1 %v20058_v10  ;;  %v2731_v46 = vld [vmem:[%s20057_s5 + $0x10] sm:$0xff] }
 0x478   :  { %2869 = vmatprep.subr.mxu1 %v14591_v34  ;;  %10127 = vmatmul.mubr.msk.f32.vlgmr.msra.gmra.mxu0 %vm545_vm0, %v10123_v26  ;;  %v2732_v34 = vld [vmem:[%s20057_s5 + $0x18] sm:$0x3f]  ;;  %v10187_v26 = vld [vmem:[%s20060_s28 + $0x410] sm:$0xff] }
 0x479   :  { %2870 = vmatpush1.msra.mxu1 %v14596_v51  ;;  %3035 = vmatprep.mubr.f32.mxu0 %v20058_v10  ;;  %v10117_v51 = vld [vmem:[%s20057_s5 + $0x30] sm:$0xff] }
 0x47a   :  { %10112 = vmatmul.mubr.msk.f32.gmra.mxu1 %vm545_vm0, %v2730_v6  ;;  %2871 = vmatprep.subr.mxu1 %v14601_v0  ;;  %v10186_v6 = vld [vmem:[%s20060_s28 + $0x408] sm:$0xff] }
 0x47b   :  { %2872 = vmatpush1.msra.mxu1 %v14608_v57  ;;  %2821 = vmatprep.mubr.f32.mxu1 %v20058_v10 }
 0x47c   :  { %2873 = vmatprep.subr.mxu1 %v2722_v61  ;;  %10128 = vmatmul.mubr.msk.f32.gmra.mxu0 %vm545_vm0, %v10124_v59  ;;  %v10188_v59 = vld [vmem:[%s20060_s28 + $0x418] sm:$0xff] }
 0x47d   :  { %2874 = vmatpush1.msra.mxu1 %v2721_v47  ;;  %3041 = vmatprep.mubr.f32.mxu0 %v20058_v10 }
 0x47e   :  { %10113 = vmatmul.mubr.msk.f32.gmra.mxu1 %vm545_vm0, %v2731_v46  ;;  %2875 = vmatprep.subr.mxu1 %v2720_v13  ;;  %v10140_v46 = vld [vmem:[%s20059_s30 + $0x38] sm:$0x3f] }
 0x47f   :  { %2876 = vmatpush1.msra.mxu1 %v2719_v49  ;;  %2827 = vmatprep.mubr.f32.mxu1 %v20058_v10 }
 0x480   :  { %2877 = vmatprep.subr.mxu1 %v2718_v43  ;;  %10129 = vmatmul.mubr.msk.f32.gmra.mxu0 %vm545_vm0, %v10125_v32  ;;  %v3065_v32 = vld [vmem:[%s20059_s30 + $0x18] sm:$0x3f] }
 0x481   :  { %2878 = vmatpush1.msra.mxu1 %v2717_v33  ;;  %3047 = vmatprep.mubr.f32.mxu0 %v20058_v10 }
 0x482   :  { %10114 = vmatmul.mubr.msk.f32.gmra.mxu1 %vm545_vm0, %v2732_v34  ;;  %2879 = vmatprep.subr.mxu1 %v2716_v27  ;;  %v3062_v27 = vld [vmem:[%s20059_s30] sm:$0xff]  ;;  %v10184_v34 = vld [vmem:[%s20060_s28 + $0x3f8] sm:$0xff] }
 0x483   :  { %2880 = vmatpush1.msra.mxu1 %v2715_v60  ;;  %2915 = vmatprep.mubr.f32.mxu1 %v20058_v10  ;;  %v10138_v60 = vld [vmem:[%s20059_s30 + $0x28] sm:$0xff] }
 0x484   :  { %2881 = vmatprep.subr.mxu1 %v2714_v45  ;;  %10130 = vmatmul.mubr.msk.f32.gmra.mxu0 %vm545_vm0, %v10126_v36  ;;  %v3063_v45 = vld [vmem:[%s20059_s30 + $0x8] sm:$0xff]  ;;  %v10183_v36 = vld [vmem:[%s20060_s28 + $0x3f0] sm:$0xff] }
 0x485   :  { %2882 = vmatpush1.msra.mxu1 %v2713_v16  ;;  %3346 = vmatprep.mubr.f32.mxu0 %v20058_v10  ;;  %v10139_v16 = vld [vmem:[%s20059_s30 + $0x30] sm:$0xff] }
 0x486   :  { %10119 = vmatmul.mubr.msk.f32.vlgmr.msra.gmra.mxu1 %vm545_vm0, %v10115_v39  ;;  %v10185_v39 = vld [vmem:[%s20060_s28 + $0x400] sm:$0xff] }
 0x487   :  { %2921 = vmatprep.mubr.f32.mxu1 %v20058_v10 }
 0x48a   :  { %10120 = vmatmul.mubr.msk.f32.gmra.mxu1 %vm545_vm0, %v10116_v62  ;;  %v10181_v62 = vld [vmem:[%s20060_s28 + $0x3e0] sm:$0xff] }
 0x48b   :  { %2927 = vmatprep.mubr.f32.mxu1 %v20058_v10 }
 0x48e   :  { %10121 = vmatmul.mubr.msk.f32.gmra.mxu1 %vm545_vm0, %v10117_v51  ;;  %v10180_v51 = vld [vmem:[%s20060_s28 + $0x3d8] sm:$0xff] }
 0x48f   :  { %2933 = vmatprep.mubr.f32.mxu1 %v20058_v10 }
 0x492   :  { %10122 = vmatmul.mubr.msk.f32.gmra.mxu1 %vm545_vm0, %v10118_v7  ;;  %v10182_v7 = vld [vmem:[%s20060_s28 + $0x3e8] sm:$0xff] }
 0x493   :  { %3150 = vmatprep.mubr.f32.mxu1 %v20058_v10 }
 0x536   :  { %v2811_v25 = vpop.f32.mrf.mxu1 }
 0x538   :  { %v2813_v5 = vpop.f32.mrf.mxu1  ;;  %v3031_v48 = vpop.f32.mrf.mxu0 }
 0x53a   :  { %v2817_v0 = vpop.f32.mrf.mxu1  ;;  %v3033_v2 = vpop.f32.mrf.mxu0 }
 0x53c   :  { %v2819_v15 = vpop.f32.mrf.mxu1  ;;  %v3037_v3 = vpop.f32.mrf.mxu0 }
 0x53e   :  { %v2823_v31 = vpop.f32.mrf.mxu1  ;;  %v3039_v28 = vpop.f32.mrf.mxu0 }
 0x540   :  { %v2825_v56 = vpop.f32.mrf.mxu1  ;;  %v3043_v19 = vpop.f32.mrf.mxu0 }
 0x542   :  { %v2829_v57 = vpop.f32.mrf.mxu1  ;;  %v3045_v35 = vpop.f32.mrf.mxu0 }
 0x544   :  { %v2831_v4 = vpop.f32.mrf.mxu1  ;;  %v3049_v18 = vpop.f32.mrf.mxu0 }
 0x546   :  { %v2917_v24 = vpop.f32.mrf.mxu1  ;;  %v3051_v54 = vpop.f32.mrf.mxu0 }
 0x547   :  { %v2940_v8 = vmax.f32 %v2811_v25, %v2917_v24  ;;  %v10178_v25 = vld [vmem:[%s20060_s28 + $0x3c8] sm:$0xff] }
 0x548   :  { %v2919_v61 = vpop.f32.mrf.mxu1  ;;  %v10170_v24 = vld [vmem:[%s20060_s28 + $0x388] sm:$0xff] }
 0x549   :  { %v2941_v58 = vmax.f32 %v2813_v5, %v2919_v61  ;;  %v14738_v33 = vmax.f32 %v2940_v8, %v3031_v48  ;;  %v10177_v5 = vld [vmem:[%s20060_s28 + $0x3c0] sm:$0xff]  ;;  %v10175_v48 = vld [vmem:[%s20060_s28 + $0x3b0] sm:$0xff] }
 0x54a   :  { %v2923_v9 = vpop.f32.mrf.mxu1  ;;  %v10165_v61 = vld [vmem:[%s20060_s28 + $0x360] sm:$0xff]  ;;  %v10147_v8 = vld [vmem:[%s20060_s28 + $0x2d0] sm:$0xff] }
 0x54b   :  { %v2942_v49 = vmax.f32 %v2817_v0, %v2923_v9  ;;  %v14734_v14 = vmax.f32 %v2941_v58, %v3033_v2  ;;  %v10179_v0 = vld [vmem:[%s20060_s28 + $0x3d0] sm:$0xff]  ;;  %v10172_v2 = vld [vmem:[%s20060_s28 + $0x398] sm:$0xff] }
 0x54c   :  { %v2925_v38 = vpop.f32.mrf.mxu1  ;;  %v10167_v9 = vld [vmem:[%s20060_s28 + $0x370] sm:$0xff]  ;;  %v10148_v58 = vld [vmem:[%s20060_s28 + $0x2d8] sm:$0xff] }
 0x54d   :  { %v2943_v17 = vmax.f32 %v2819_v15, %v2925_v38  ;;  %v14730_v63 = vmax.f32 %v2942_v49, %v3037_v3  ;;  %v10174_v15 = vld [vmem:[%s20060_s28 + $0x3a8] sm:$0xff]  ;;  %v10169_v3 = vld [vmem:[%s20060_s28 + $0x380] sm:$0xff]  ;;  %v10152_v49 = vld [vmem:[%s20060_s28 + $0x2f8] sm:$0xff] }
 0x54e   :  { %v2929_v11 = vpop.f32.mrf.mxu1  ;;  %v10162_v38 = vld [vmem:[%s20060_s28 + $0x348] sm:$0xff] }
 0x54f   :  { %v2944_v21 = vmax.f32 %v2823_v31, %v2929_v11  ;;  %v14726_v42 = vmax.f32 %v2943_v17, %v3039_v28  ;;  %v10176_v31 = vld [vmem:[%s20060_s28 + $0x3b8] sm:$0xff]  ;;  %v10166_v28 = vld [vmem:[%s20060_s28 + $0x368] sm:$0xff] }
 0x550   :  { %v2931_v47 = vpop.f32.mrf.mxu1  ;;  %v10164_v11 = vld [vmem:[%s20060_s28 + $0x358] sm:$0xff]  ;;  %v10150_v17 = vld [vmem:[%s20060_s28 + $0x2e8] sm:$0xff] }
 0x551   :  { %v2945_v13 = vmax.f32 %v2825_v56, %v2931_v47  ;;  %v14720_v43 = vmax.f32 %v2944_v21, %v3043_v19  ;;  %v10171_v56 = vld [vmem:[%s20060_s28 + $0x390] sm:$0xff] }
 0x552   :  { %v2935_v52 = vpop.f32.mrf.mxu1  ;;  %v10163_v19 = vld [vmem:[%s20060_s28 + $0x350] sm:$0xff] }
 0x553   :  { %v2946_v50 = vmax.f32 %v2829_v57, %v2935_v52  ;;  %v14714_v20 = vmax.f32 %v2945_v13, %v3045_v35  ;;  %v10173_v57 = vld [vmem:[%s20060_s28 + $0x3a0] sm:$0xff]  ;;  %v10160_v35 = vld [vmem:[%s20060_s28 + $0x338] sm:$0xff]  ;;  %v10159_v47 = vld [vmem:[%s20060_s28 + $0x330] sm:$0xff] }
 0x554   :  { %v2937_v53 = vpop.f32.mrf.mxu1  ;;  %v10161_v52 = vld [vmem:[%s20060_s28 + $0x340] sm:$0xff]  ;;  %v10154_v13 = vld [vmem:[%s20060_s28 + $0x308] sm:$0xff]  ;;  %v10155_v21 = vld [vmem:[%s20060_s28 + $0x310] sm:$0xff] }
 0x555   :  { %v2947_v41 = vmax.f32 %v2831_v4, %v2937_v53  ;;  %v14712_v44 = vmax.f32 %v2946_v50, %v3049_v18  ;;  %v10168_v4 = vld [vmem:[%s20060_s28 + $0x378] sm:$0xff]  ;;  %v10157_v18 = vld [vmem:[%s20060_s28 + $0x320] sm:$0xff]  ;;  %v10158_v53 = vld [vmem:[%s20060_s28 + $0x328] sm:$0xff] }
 0x556   :  { %v10156_v50 = vld [vmem:[%s20060_s28 + $0x318] sm:$0xff] }
 0x557   :  { %v14710_v30 = vmax.f32 %v2947_v41, %v3051_v54  ;;  %v10153_v41 = vld [vmem:[%s20060_s28 + $0x300] sm:$0xff]  ;;  %v10151_v54 = vld [vmem:[%s20060_s28 + $0x2f0] sm:$0xff] }
 0x559   :  { %10131 = vmatprep.subr.msk.mxu1 %vm3079_vm1, %v14710_v30  ;;  %10141 = vmatprep.subr.msk.mxu0 %vm3079_vm1, %v14710_v30 }
 0x55a   :  { %10132 = vmatpush1.msk.msra.mxu1 %vm3079_vm1, %v14712_v44  ;;  %10142 = vmatpush1.msk.msra.mxu0 %vm3079_vm1, %v14712_v44 }
 0x55b   :  { %3112 = vmatprep.subr.mxu1 %v14714_v20  ;;  %3308 = vmatprep.subr.mxu0 %v14714_v20 }
 0x55c   :  { %3113 = vmatpush1.msra.mxu1 %v14720_v43  ;;  %3309 = vmatpush1.msra.mxu0 %v14720_v43 }
 0x55d   :  { %3114 = vmatprep.subr.mxu1 %v14726_v42  ;;  %3310 = vmatprep.subr.mxu0 %v14726_v42 }
 0x55e   :  { %3115 = vmatpush1.msra.mxu1 %v14730_v63  ;;  %3311 = vmatpush1.msra.mxu0 %v14730_v63 }
 0x55f   :  { %3116 = vmatprep.subr.mxu1 %v14734_v14  ;;  %3312 = vmatprep.subr.mxu0 %v14734_v14 }
 0x560   :  { %3117 = vmatpush1.msra.mxu1 %v14738_v33  ;;  %3313 = vmatpush1.msra.mxu0 %v14738_v33 }
 0x561   :  { %10143 = vmatmul.mubr.msk.f32.vlgmr.msra.gmra.mxu0 %vm3066_vm2, %v10137_v1  ;;  %10133 = vmatmul.mubr.msk.f32.vlgmr.msra.gmra.mxu1 %vm3066_vm2, %v3062_v27  ;;  %v10149_v1 = vld [vmem:[%s20060_s28 + $0x2e0] sm:$0xff]  ;;  %v10235_v27 = vld [vmem:[%s20060_s28 + $0x590] sm:$0xff] }
 0x562   :  { %3352 = vmatprep.mubr.f32.mxu0 %v20058_v10  ;;  %3156 = vmatprep.mubr.f32.mxu1 %v20058_v10 }
 0x563   :  { %3475 = vmatprep.subr.mxu1 %v10193_v55  ;;  %3564 = vmatprep.subr.mxu0 %v20058_v10  ;;  %v10234_v55 = vld [vmem:[%s20060_s28 + $0x588] sm:$0xff] }
 0x564   :  { %3476 = vmatpush1.msra.mxu1 %v10192_v12  ;;  %3565 = vmatpush1.msra.mxu0 %v10194_v40  ;;  %v10236_v12 = vld [vmem:[%s20060_s28 + $0x598] sm:$0xff] }
 0x565   :  { %10144 = vmatmul.mubr.msk.f32.gmra.mxu0 %vm3066_vm2, %v10138_v60  ;;  %10134 = vmatmul.mubr.msk.f32.gmra.mxu1 %vm3066_vm2, %v3063_v45  ;;  %v10232_v40 = vld [vmem:[%s20060_s28 + $0x578] sm:$0xff]  ;;  %v10231_v60 = vld [vmem:[%s20060_s28 + $0x570] sm:$0xff]  ;;  %v10233_v45 = vld [vmem:[%s20060_s28 + $0x580] sm:$0xff] }
 0x566   :  { %3358 = vmatprep.mubr.f32.mxu0 %v20058_v10  ;;  %3162 = vmatprep.mubr.f32.mxu1 %v20058_v10 }
 0x567   :  { %3477 = vmatprep.subr.mxu1 %v10190_v29  ;;  %3566 = vmatprep.subr.mxu0 %v20058_v10  ;;  %v10229_v29 = vld [vmem:[%s20060_s28 + $0x560] sm:$0xff] }
 0x568   :  { %3478 = vmatpush1.msra.mxu1 %v10189_v23  ;;  %3567 = vmatpush1.msra.mxu0 %v10191_v22  ;;  %v10228_v23 = vld [vmem:[%s20060_s28 + $0x558] sm:$0xff]  ;;  %v10230_v22 = vld [vmem:[%s20060_s28 + $0x568] sm:$0xff] }
 0x569   :  { %10145 = vmatmul.mubr.msk.f32.gmra.mxu0 %vm3066_vm2, %v10139_v16  ;;  %10135 = vmatmul.mubr.msk.f32.gmra.mxu1 %vm3066_vm2, %v3064_v37  ;;  %v10226_v16 = vld [vmem:[%s20060_s28 + $0x548] sm:$0xff]  ;;  %v10225_v37 = vld [vmem:[%s20060_s28 + $0x540] sm:$0xff] }
 0x56a   :  { %3364 = vmatprep.mubr.f32.mxu0 %v20058_v10  ;;  %3168 = vmatprep.mubr.f32.mxu1 %v20058_v10 }
 0x56b   :  { %3479 = vmatprep.subr.mxu1 %v10187_v26  ;;  %3568 = vmatprep.subr.mxu0 %v20058_v10  ;;  %v10227_v26 = vld [vmem:[%s20060_s28 + $0x550] sm:$0xff] }
 0x56c   :  { %3480 = vmatpush1.msra.mxu1 %v10186_v6  ;;  %3569 = vmatpush1.msra.mxu0 %v10188_v59  ;;  %v10223_v6 = vld [vmem:[%s20060_s28 + $0x530] sm:$0xff]  ;;  %v10222_v59 = vld [vmem:[%s20060_s28 + $0x528] sm:$0xff] }
 0x56d   :  { %10146 = vmatmul.mubr.msk.f32.gmra.mxu0 %vm3066_vm2, %v10140_v46  ;;  %10136 = vmatmul.mubr.msk.f32.gmra.mxu1 %vm3066_vm2, %v3065_v32  ;;  %v10224_v46 = vld [vmem:[%s20060_s28 + $0x538] sm:$0xff] }
 0x56e   :  { %3481 = vmatprep.subr.mxu1 %v10184_v34  ;;  %3570 = vmatprep.subr.mxu0 %v20058_v10  ;;  %v10220_v32 = vld [vmem:[%s20060_s28 + $0x518] sm:$0xff]  ;;  %v10219_v34 = vld [vmem:[%s20060_s28 + $0x510] sm:$0xff] }
 0x56f   :  { %3482 = vmatpush1.msra.mxu1 %v10183_v36  ;;  %3571 = vmatpush1.msra.mxu0 %v10185_v39  ;;  %v10221_v36 = vld [vmem:[%s20060_s28 + $0x520] sm:$0xff] }
 0x570   :  { %3483 = vmatprep.subr.mxu1 %v10181_v62  ;;  %3572 = vmatprep.subr.mxu0 %v20058_v10  ;;  %v10217_v39 = vld [vmem:[%s20060_s28 + $0x500] sm:$0xff]  ;;  %v10216_v62 = vld [vmem:[%s20060_s28 + $0x4f8] sm:$0xff] }
 0x571   :  { %3484 = vmatpush1.msra.mxu1 %v10180_v51  ;;  %3573 = vmatpush1.msra.mxu0 %v10182_v7  ;;  %v10218_v51 = vld [vmem:[%s20060_s28 + $0x508] sm:$0xff] }
 0x572   :  { %3485 = vmatprep.subr.mxu1 %v10178_v25  ;;  %3574 = vmatprep.subr.mxu0 %v20058_v10  ;;  %v10214_v7 = vld [vmem:[%s20060_s28 + $0x4e8] sm:$0xff]  ;;  %v10213_v25 = vld [vmem:[%s20060_s28 + $0x4e0] sm:$0xff] }
 0x573   :  { %3486 = vmatpush1.msra.mxu1 %v10177_v5  ;;  %3575 = vmatpush1.msra.mxu0 %v10179_v0  ;;  %v10215_v5 = vld [vmem:[%s20060_s28 + $0x4f0] sm:$0xff] }
 0x574   :  { %3487 = vmatprep.subr.mxu1 %v10175_v48  ;;  %3576 = vmatprep.subr.mxu0 %v20058_v10  ;;  %v10211_v0 = vld [vmem:[%s20060_s28 + $0x4d0] sm:$0xff]  ;;  %v10210_v48 = vld [vmem:[%s20060_s28 + $0x4c8] sm:$0xff] }
 0x575   :  { %3488 = vmatpush1.msra.mxu1 %v10174_v15  ;;  %3577 = vmatpush1.msra.mxu0 %v10176_v31  ;;  %v10212_v15 = vld [vmem:[%s20060_s28 + $0x4d8] sm:$0xff] }
 0x576   :  { %3489 = vmatprep.subr.mxu1 %v10172_v2  ;;  %3578 = vmatprep.subr.mxu0 %v20058_v10  ;;  %v10208_v31 = vld [vmem:[%s20060_s28 + $0x4b8] sm:$0xff]  ;;  %v10207_v2 = vld [vmem:[%s20060_s28 + $0x4b0] sm:$0xff] }
 0x577   :  { %3490 = vmatpush1.msra.mxu1 %v10171_v56  ;;  %3579 = vmatpush1.msra.mxu0 %v10173_v57  ;;  %v10209_v56 = vld [vmem:[%s20060_s28 + $0x4c0] sm:$0xff] }
 0x578   :  { %3491 = vmatprep.subr.mxu1 %v10169_v3  ;;  %3580 = vmatprep.subr.mxu0 %v20058_v10  ;;  %v10205_v57 = vld [vmem:[%s20060_s28 + $0x4a0] sm:$0xff]  ;;  %v10204_v3 = vld [vmem:[%s20060_s28 + $0x498] sm:$0xff] }
 0x579   :  { %3492 = vmatpush1.msra.mxu1 %v10168_v4  ;;  %3581 = vmatpush1.msra.mxu0 %v10170_v24  ;;  %v10206_v4 = vld [vmem:[%s20060_s28 + $0x4a8] sm:$0xff] }
 0x57a   :  { %3493 = vmatprep.subr.mxu1 %v10166_v28  ;;  %3582 = vmatprep.subr.mxu0 %v20058_v10  ;;  %v10202_v24 = vld [vmem:[%s20060_s28 + $0x488] sm:$0xff]  ;;  %v10201_v28 = vld [vmem:[%s20060_s28 + $0x480] sm:$0xff] }
 0x57b   :  { %3494 = vmatpush1.msra.mxu1 %v10165_v61  ;;  %3583 = vmatpush1.msra.mxu0 %v10167_v9  ;;  %v10203_v61 = vld [vmem:[%s20060_s28 + $0x490] sm:$0xff] }
 0x57c   :  { %3495 = vmatprep.subr.mxu1 %v10163_v19  ;;  %3584 = vmatprep.subr.mxu0 %v20058_v10  ;;  %v10199_v9 = vld [vmem:[%s20060_s28 + $0x470] sm:$0xff]  ;;  %v10198_v19 = vld [vmem:[%s20060_s28 + $0x468] sm:$0xff] }
 0x57d   :  { %3496 = vmatpush1.msra.mxu1 %v10162_v38  ;;  %3585 = vmatpush1.msra.mxu0 %v10164_v11  ;;  %v10200_v38 = vld [vmem:[%s20060_s28 + $0x478] sm:$0xff] }
 0x57e   :  { %3497 = vmatprep.subr.mxu1 %v10160_v35  ;;  %3586 = vmatprep.subr.mxu0 %v20058_v10  ;;  %v10196_v11 = vld [vmem:[%s20060_s28 + $0x458] sm:$0xff]  ;;  %v10195_v35 = vld [vmem:[%s20060_s28 + $0x450] sm:$0xff] }
 0x57f   :  { %3498 = vmatpush1.msra.mxu1 %v10159_v47  ;;  %3587 = vmatpush1.msra.mxu0 %v10161_v52  ;;  %v10197_v47 = vld [vmem:[%s20060_s28 + $0x460] sm:$0xff]  ;;  %v3221_v52 = vld [vmem:[%s20060_s28 + $0x170] sm:$0xff] }
 0x580   :  { %3499 = vmatprep.subr.mxu1 %v10157_v18  ;;  %3588 = vmatprep.subr.mxu0 %v20058_v10 }
 0x581   :  { %3500 = vmatpush1.msra.mxu1 %v10156_v50  ;;  %3589 = vmatpush1.msra.mxu0 %v10158_v53  ;;  %v3220_v53 = vld [vmem:[%s20060_s28 + $0x168] sm:$0xff] }
 0x582   :  { %3501 = vmatprep.subr.mxu1 %v10154_v13  ;;  %3590 = vmatprep.subr.mxu0 %v20058_v10  ;;  %v3222_v13 = vld [vmem:[%s20060_s28 + $0x178] sm:$0xff] }
 0x583   :  { %3502 = vmatpush1.msra.mxu1 %v10153_v41  ;;  %3591 = vmatpush1.msra.mxu0 %v10155_v21  ;;  %v3218_v41 = vld [vmem:[%s20060_s28 + $0x158] sm:$0xff]  ;;  %v3217_v21 = vld [vmem:[%s20060_s28 + $0x150] sm:$0xff] }
 0x584   :  { %3503 = vmatprep.subr.mxu1 %v10151_v54  ;;  %3592 = vmatprep.subr.mxu0 %v20058_v10  ;;  %v3219_v54 = vld [vmem:[%s20060_s28 + $0x160] sm:$0xff] }
 0x585   :  { %3504 = vmatpush1.msra.mxu1 %v10150_v17  ;;  %3593 = vmatpush1.msra.mxu0 %v10152_v49  ;;  %v3215_v17 = vld [vmem:[%s20060_s28 + $0x140] sm:$0xff]  ;;  %v3214_v49 = vld [vmem:[%s20060_s28 + $0x138] sm:$0xff] }
 0x586   :  { %3505 = vmatprep.subr.mxu1 %v10148_v58  ;;  %3594 = vmatprep.subr.mxu0 %v20058_v10  ;;  %v3216_v58 = vld [vmem:[%s20060_s28 + $0x148] sm:$0xff] }
 0x587   :  { %3506 = vmatpush1.msra.mxu1 %v10147_v8  ;;  %3595 = vmatpush1.msra.mxu0 %v10149_v1  ;;  %v3212_v8 = vld [vmem:[%s20060_s28 + $0x128] sm:$0xff]  ;;  %v3211_v1 = vld [vmem:[%s20060_s28 + $0x120] sm:$0xff] }
 0x588   :  { %3511 = vmatprep.subr.mxu1 %v10235_v27  ;;  %3600 = vmatprep.subr.mxu0 %v20058_v10  ;;  %v3213_v27 = vld [vmem:[%s20060_s28 + $0x130] sm:$0xff] }
 0x589   :  { %3512 = vmatpush2.msra.mxu1 %v10234_v55  ;;  %3601 = vmatpush2.msra.mxu0 %v10236_v12  ;;  %v3209_v55 = vld [vmem:[%s20060_s28 + $0x110] sm:$0xff]  ;;  %v3208_v12 = vld [vmem:[%s20060_s28 + $0x108] sm:$0xff] }
 0x58a   :  { %3513 = vmatprep.subr.mxu1 %v10232_v40  ;;  %3602 = vmatprep.subr.mxu0 %v20058_v10  ;;  %v3210_v40 = vld [vmem:[%s20060_s28 + $0x118] sm:$0xff] }
 0x58b   :  { %3514 = vmatpush2.msra.mxu1 %v10231_v60  ;;  %3603 = vmatpush2.msra.mxu0 %v10233_v45  ;;  %v3206_v60 = vld [vmem:[%s20060_s28 + $0xf8] sm:$0xff]  ;;  %v3205_v45 = vld [vmem:[%s20060_s28 + $0xf0] sm:$0xff] }
 0x58c   :  { %3515 = vmatprep.subr.mxu1 %v10229_v29  ;;  %3604 = vmatprep.subr.mxu0 %v20058_v10  ;;  %v3207_v29 = vld [vmem:[%s20060_s28 + $0x100] sm:$0xff] }
 0x58d   :  { %3516 = vmatpush2.msra.mxu1 %v10228_v23  ;;  %3605 = vmatpush2.msra.mxu0 %v10230_v22  ;;  %v3203_v23 = vld [vmem:[%s20060_s28 + $0xe0] sm:$0xff]  ;;  %v3202_v22 = vld [vmem:[%s20060_s28 + $0xd8] sm:$0xff] }
 0x58e   :  { %3517 = vmatprep.subr.mxu1 %v10226_v16  ;;  %3606 = vmatprep.subr.mxu0 %v20058_v10  ;;  %v3204_v16 = vld [vmem:[%s20060_s28 + $0xe8] sm:$0xff] }
 0x58f   :  { %3518 = vmatpush2.msra.mxu1 %v10225_v37  ;;  %3607 = vmatpush2.msra.mxu0 %v10227_v26  ;;  %v3200_v37 = vld [vmem:[%s20060_s28 + $0xc8] sm:$0xff]  ;;  %v3199_v26 = vld [vmem:[%s20060_s28 + $0xc0] sm:$0xff] }
 0x590   :  { %3519 = vmatprep.subr.mxu1 %v10223_v6  ;;  %3608 = vmatprep.subr.mxu0 %v20058_v10  ;;  %v3201_v6 = vld [vmem:[%s20060_s28 + $0xd0] sm:$0xff] }
 0x591   :  { %3520 = vmatpush2.msra.mxu1 %v10222_v59  ;;  %3609 = vmatpush2.msra.mxu0 %v10224_v46  ;;  %v3197_v59 = vld [vmem:[%s20060_s28 + $0xb0] sm:$0xff]  ;;  %v3196_v46 = vld [vmem:[%s20060_s28 + $0xa8] sm:$0xff] }
 0x592   :  { %3521 = vmatprep.subr.mxu1 %v10220_v32  ;;  %3610 = vmatprep.subr.mxu0 %v20058_v10  ;;  %v3198_v32 = vld [vmem:[%s20060_s28 + $0xb8] sm:$0xff] }
 0x593   :  { %3522 = vmatpush2.msra.mxu1 %v10219_v34  ;;  %3611 = vmatpush2.msra.mxu0 %v10221_v36  ;;  %v3194_v34 = vld [vmem:[%s20060_s28 + $0x98] sm:$0xff]  ;;  %v3193_v36 = vld [vmem:[%s20060_s28 + $0x90] sm:$0xff] }
 0x594   :  { %3523 = vmatprep.subr.mxu1 %v10217_v39  ;;  %3612 = vmatprep.subr.mxu0 %v20058_v10  ;;  %v3195_v39 = vld [vmem:[%s20060_s28 + $0xa0] sm:$0xff] }
 0x595   :  { %3524 = vmatpush2.msra.mxu1 %v10216_v62  ;;  %3613 = vmatpush2.msra.mxu0 %v10218_v51  ;;  %v3191_v62 = vld [vmem:[%s20060_s28 + $0x80] sm:$0xff]  ;;  %v3190_v51 = vld [vmem:[%s20060_s28 + $0x78] sm:$0xff] }
 0x596   :  { %3525 = vmatprep.subr.mxu1 %v10214_v7  ;;  %3614 = vmatprep.subr.mxu0 %v20058_v10  ;;  %v3192_v7 = vld [vmem:[%s20060_s28 + $0x88] sm:$0xff] }
 0x597   :  { %3526 = vmatpush2.msra.mxu1 %v10213_v25  ;;  %3615 = vmatpush2.msra.mxu0 %v10215_v5  ;;  %v3188_v25 = vld [vmem:[%s20060_s28 + $0x68] sm:$0xff]  ;;  %v3187_v5 = vld [vmem:[%s20060_s28 + $0x60] sm:$0xff] }
 0x598   :  { %3527 = vmatprep.subr.mxu1 %v10211_v0  ;;  %3616 = vmatprep.subr.mxu0 %v20058_v10  ;;  %v3189_v0 = vld [vmem:[%s20060_s28 + $0x70] sm:$0xff] }
 0x599   :  { %3528 = vmatpush2.msra.mxu1 %v10210_v48  ;;  %3617 = vmatpush2.msra.mxu0 %v10212_v15  ;;  %v3185_v48 = vld [vmem:[%s20060_s28 + $0x50] sm:$0xff]  ;;  %v3184_v15 = vld [vmem:[%s20060_s28 + $0x48] sm:$0xff] }
 0x59a   :  { %3529 = vmatprep.subr.mxu1 %v10208_v31  ;;  %3618 = vmatprep.subr.mxu0 %v20058_v10  ;;  %v3186_v31 = vld [vmem:[%s20060_s28 + $0x58] sm:$0xff] }
 0x59b   :  { %3530 = vmatpush2.msra.mxu1 %v10207_v2  ;;  %3619 = vmatpush2.msra.mxu0 %v10209_v56  ;;  %v3182_v2 = vld [vmem:[%s20060_s28 + $0x38] sm:$0xff]  ;;  %v3181_v56 = vld [vmem:[%s20060_s28 + $0x30] sm:$0xff] }
 0x59c   :  { %3531 = vmatprep.subr.mxu1 %v10205_v57  ;;  %3620 = vmatprep.subr.mxu0 %v20058_v10  ;;  %v3183_v57 = vld [vmem:[%s20060_s28 + $0x40] sm:$0xff] }
 0x59d   :  { %3532 = vmatpush2.msra.mxu1 %v10204_v3  ;;  %3621 = vmatpush2.msra.mxu0 %v10206_v4  ;;  %v3179_v3 = vld [vmem:[%s20060_s28 + $0x20] sm:$0xff]  ;;  %v3178_v4 = vld [vmem:[%s20060_s28 + $0x18] sm:$0xff] }
 0x59e   :  { %3533 = vmatprep.subr.mxu1 %v10202_v24  ;;  %3622 = vmatprep.subr.mxu0 %v20058_v10  ;;  %v3180_v24 = vld [vmem:[%s20060_s28 + $0x28] sm:$0xff] }
 0x59f   :  { %3534 = vmatpush2.msra.mxu1 %v10201_v28  ;;  %3623 = vmatpush2.msra.mxu0 %v10203_v61  ;;  %v3176_v28 = vld [vmem:[%s20060_s28 + $0x8] sm:$0xff]  ;;  %v3175_v61 = vld [vmem:[%s20060_s28] sm:$0xff] }
 0x5a0   :  { %3535 = vmatprep.subr.mxu1 %v10199_v9  ;;  %3624 = vmatprep.subr.mxu0 %v20058_v10  ;;  %v3177_v9 = vld [vmem:[%s20060_s28 + $0x10] sm:$0xff] }
 0x5a1   :  { %3536 = vmatpush2.msra.mxu1 %v10198_v19  ;;  %3625 = vmatpush2.msra.mxu0 %v10200_v38  ;;  %v3263_v19 = vld [vmem:[%s20060_s28 + $0x2c0] sm:$0xff]  ;;  %v3262_v38 = vld [vmem:[%s20060_s28 + $0x2b8] sm:$0xff] }
 0x5a2   :  { %3537 = vmatprep.subr.mxu1 %v10196_v11  ;;  %3626 = vmatprep.subr.mxu0 %v20058_v10  ;;  %v3264_v11 = vld [vmem:[%s20060_s28 + $0x2c8] sm:$0xff] }
 0x5a3   :  { %3538 = vmatpush2.msra.mxu1 %v10195_v35  ;;  %3627 = vmatpush2.msra.mxu0 %v10197_v47  ;;  %v3260_v35 = vld [vmem:[%s20060_s28 + $0x2a8] sm:$0xff]  ;;  %v3259_v47 = vld [vmem:[%s20060_s28 + $0x2a0] sm:$0xff] }
 0x5a4   :  { %3661 = vmatprep.subr.mxu1 %v3221_v52  ;;  %3750 = vmatprep.subr.mxu0 %v20058_v10  ;;  %v3261_v52 = vld [vmem:[%s20060_s28 + $0x2b0] sm:$0xff] }
 0x621   :  { %v3348_v18 = vpop.f32.mrf.mxu0 }
 0x623   :  { %v3350_v50 = vpop.f32.mrf.mxu0 }
 0x624   :  { %10237 = vmatprep.mubr.msk.f32.mxu1 %vm3462_vm3, %v3350_v50  ;;  %10241 = vmatprep.mubr.msk.f32.mxu0 %vm3462_vm3, %v3350_v50  ;;  %v3256_v50 = vld [vmem:[%s20060_s28 + $0x288] sm:$0xff] }
 0x625   :  { %3540 = vmatmul.mubr.f32.vlgmr.msra.gmra.mxu1 %v3348_v18  ;;  %3629 = vmatmul.mubr.f32.vlgmr.msra.gmra.mxu0 %v3348_v18  ;;  %v3257_v18 = vld [vmem:[%s20060_s28 + $0x290] sm:$0xff] }
 0x626   :  { %3662 = vmatpush1.msra.mxu1 %v3220_v53  ;;  %3751 = vmatpush1.msra.mxu0 %v3222_v13  ;;  %v3258_v53 = vld [vmem:[%s20060_s28 + $0x298] sm:$0xff] }
 0x627   :  { %3663 = vmatprep.subr.mxu1 %v3218_v41  ;;  %3752 = vmatprep.subr.mxu0 %v20058_v10  ;;  %v3254_v13 = vld [vmem:[%s20060_s28 + $0x278] sm:$0xff]  ;;  %v3253_v41 = vld [vmem:[%s20060_s28 + $0x270] sm:$0xff] }
 0x628   :  { %3664 = vmatpush1.msra.mxu1 %v3217_v21  ;;  %3753 = vmatpush1.msra.mxu0 %v3219_v54  ;;  %v3255_v21 = vld [vmem:[%s20060_s28 + $0x280] sm:$0xff]  ;;  %v3354_v54 = vpop.f32.mrf.mxu0 }
 0x629   :  { %3665 = vmatprep.subr.mxu1 %v3215_v17  ;;  %3754 = vmatprep.subr.mxu0 %v20058_v10  ;;  %v3251_v17 = vld [vmem:[%s20060_s28 + $0x260] sm:$0xff] }
 0x62a   :  { %3666 = vmatpush1.msra.mxu1 %v3214_v49  ;;  %3755 = vmatpush1.msra.mxu0 %v3216_v58  ;;  %v3250_v49 = vld [vmem:[%s20060_s28 + $0x258] sm:$0xff]  ;;  %v3252_v58 = vld [vmem:[%s20060_s28 + $0x268] sm:$0xff] }
 0x62b   :  { %3667 = vmatprep.subr.mxu1 %v3212_v8  ;;  %3756 = vmatprep.subr.mxu0 %v20058_v10  ;;  %v3248_v8 = vld [vmem:[%s20060_s28 + $0x248] sm:$0xff] }
 0x62c   :  { %3668 = vmatpush1.msra.mxu1 %v3211_v1  ;;  %3757 = vmatpush1.msra.mxu0 %v3213_v27  ;;  %v3247_v1 = vld [vmem:[%s20060_s28 + $0x240] sm:$0xff]  ;;  %v3249_v27 = vld [vmem:[%s20060_s28 + $0x250] sm:$0xff] }
 0x62d   :  { %3669 = vmatprep.subr.mxu1 %v3209_v55  ;;  %3758 = vmatprep.subr.mxu0 %v20058_v10  ;;  %v3356_v55 = vpop.f32.mrf.mxu0 }
 0x62e   :  { %3670 = vmatpush1.msra.mxu1 %v3208_v12  ;;  %3759 = vmatpush1.msra.mxu0 %v3210_v40  ;;  %v3245_v12 = vld [vmem:[%s20060_s28 + $0x230] sm:$0xff]  ;;  %v3244_v40 = vld [vmem:[%s20060_s28 + $0x228] sm:$0xff] }
 0x62f   :  { %3671 = vmatprep.subr.mxu1 %v3206_v60  ;;  %3760 = vmatprep.subr.mxu0 %v20058_v10  ;;  %v3246_v60 = vld [vmem:[%s20060_s28 + $0x238] sm:$0xff] }
 0x630   :  { %3672 = vmatpush1.msra.mxu1 %v3205_v45  ;;  %3761 = vmatpush1.msra.mxu0 %v3207_v29  ;;  %v3242_v45 = vld [vmem:[%s20060_s28 + $0x218] sm:$0xff]  ;;  %v3360_v29 = vpop.f32.mrf.mxu0 }
 0x631   :  { %3673 = vmatprep.subr.mxu1 %v3203_v23  ;;  %3762 = vmatprep.subr.mxu0 %v20058_v10  ;;  %v3241_v23 = vld [vmem:[%s20060_s28 + $0x210] sm:$0xff] }
 0x632   :  { %3674 = vmatpush1.msra.mxu1 %v3202_v22  ;;  %3763 = vmatpush1.msra.mxu0 %v3204_v16  ;;  %v3243_v22 = vld [vmem:[%s20060_s28 + $0x220] sm:$0xff] }
 0x633   :  { %3675 = vmatprep.subr.mxu1 %v3200_v37  ;;  %3764 = vmatprep.subr.mxu0 %v20058_v10  ;;  %v3239_v16 = vld [vmem:[%s20060_s28 + $0x200] sm:$0xff]  ;;  %v3238_v37 = vld [vmem:[%s20060_s28 + $0x1f8] sm:$0xff] }
 0x634   :  { %3676 = vmatpush1.msra.mxu1 %v3199_v26  ;;  %3765 = vmatpush1.msra.mxu0 %v3201_v6  ;;  %v3240_v26 = vld [vmem:[%s20060_s28 + $0x208] sm:$0xff]  ;;  %v3362_v6 = vpop.f32.mrf.mxu0 }
 0x635   :  { %3677 = vmatprep.subr.mxu1 %v3197_v59  ;;  %3766 = vmatprep.subr.mxu0 %v20058_v10  ;;  %v3236_v59 = vld [vmem:[%s20060_s28 + $0x1e8] sm:$0xff] }
 0x636   :  { %3678 = vmatpush1.msra.mxu1 %v3196_v46  ;;  %3767 = vmatpush1.msra.mxu0 %v3198_v32  ;;  %v3152_v46 = vpop.f32.mrf.mxu1  ;;  %v3235_v32 = vld [vmem:[%s20060_s28 + $0x1e0] sm:$0xff] }
 0x637   :  { %3679 = vmatprep.subr.mxu1 %v3194_v34  ;;  %3768 = vmatprep.subr.mxu0 %v20058_v10  ;;  %v3237_v34 = vld [vmem:[%s20060_s28 + $0x1f0] sm:$0xff] }
 0x638   :  { %3680 = vmatpush1.msra.mxu1 %v3193_v36  ;;  %3769 = vmatpush1.msra.mxu0 %v3195_v39  ;;  %v3366_v36 = vpop.f32.mrf.mxu0  ;;  %v3233_v39 = vld [vmem:[%s20060_s28 + $0x1d0] sm:$0xff] }
 0x639   :  { %3681 = vmatprep.subr.mxu1 %v3191_v62  ;;  %3770 = vmatprep.subr.mxu0 %v20058_v10  ;;  %v3154_v62 = vpop.f32.mrf.mxu1 }
 0x63a   :  { %3682 = vmatpush1.msra.mxu1 %v3190_v51  ;;  %3771 = vmatpush1.msra.mxu0 %v3192_v7  ;;  %v3232_v51 = vld [vmem:[%s20060_s28 + $0x1c8] sm:$0xff]  ;;  %v3234_v7 = vld [vmem:[%s20060_s28 + $0x1d8] sm:$0xff] }
 0x63b   :  { %3683 = vmatprep.subr.mxu1 %v3188_v25  ;;  %3772 = vmatprep.subr.mxu0 %v20058_v10  ;;  %v3230_v25 = vld [vmem:[%s20060_s28 + $0x1b8] sm:$0xff] }
 0x63c   :  { %3684 = vmatpush1.msra.mxu1 %v3187_v5  ;;  %3773 = vmatpush1.msra.mxu0 %v3189_v0  ;;  %v3368_v5 = vpop.f32.mrf.mxu0  ;;  %v3229_v0 = vld [vmem:[%s20060_s28 + $0x1b0] sm:$0xff] }
 0x63d   :  { %3685 = vmatprep.subr.mxu1 %v3185_v48  ;;  %3774 = vmatprep.subr.mxu0 %v20058_v10  ;;  %v3231_v48 = vld [vmem:[%s20060_s28 + $0x1c0] sm:$0xff] }
 0x63e   :  { %3686 = vmatpush1.msra.mxu1 %v3184_v15  ;;  %3775 = vmatpush1.msra.mxu0 %v3186_v31  ;;  %v3158_v15 = vpop.f32.mrf.mxu1  ;;  %v3227_v31 = vld [vmem:[%s20060_s28 + $0x1a0] sm:$0xff] }
 0x63f   :  { %3687 = vmatprep.subr.mxu1 %v3182_v2  ;;  %3776 = vmatprep.subr.mxu0 %v20058_v10  ;;  %v3226_v2 = vld [vmem:[%s20060_s28 + $0x198] sm:$0xff] }
 0x640   :  { %3688 = vmatpush1.msra.mxu1 %v3181_v56  ;;  %3777 = vmatpush1.msra.mxu0 %v3183_v57  ;;  %v3228_v56 = vld [vmem:[%s20060_s28 + $0x1a8] sm:$0xff] }
 0x641   :  { %3689 = vmatprep.subr.mxu1 %v3179_v3  ;;  %3778 = vmatprep.subr.mxu0 %v20058_v10  ;;  %v3224_v57 = vld [vmem:[%s20060_s28 + $0x188] sm:$0xff]  ;;  %v3160_v3 = vpop.f32.mrf.mxu1 }
 0x642   :  { %3690 = vmatpush1.msra.mxu1 %v3178_v4  ;;  %3779 = vmatpush1.msra.mxu0 %v3180_v24  ;;  %v3223_v4 = vld [vmem:[%s20060_s28 + $0x180] sm:$0xff]  ;;  %v3225_v24 = vld [vmem:[%s20060_s28 + $0x190] sm:$0xff] }
 0x643   :  { %3691 = vmatprep.subr.mxu1 %v3176_v28  ;;  %3780 = vmatprep.subr.mxu0 %v20058_v10  ;;  %v10309_v28 = vld [vmem:[%s20060_s28 + $0x710] sm:$0xff] }
 0x644   :  { %3692 = vmatpush1.msra.mxu1 %v3175_v61  ;;  %3781 = vmatpush1.msra.mxu0 %v3177_v9  ;;  %v3164_v61 = vpop.f32.mrf.mxu1  ;;  %v10308_v9 = vld [vmem:[%s20060_s28 + $0x708] sm:$0xff] }
 0x645   :  { %3697 = vmatprep.subr.mxu1 %v3263_v19  ;;  %3786 = vmatprep.subr.mxu0 %v20058_v10  ;;  %v10306_v19 = vld [vmem:[%s20060_s28 + $0x6f8] sm:$0xff] }
 0x646   :  { %3698 = vmatpush2.msra.mxu1 %v3262_v38  ;;  %3787 = vmatpush2.msra.mxu0 %v3264_v11  ;;  %v10305_v38 = vld [vmem:[%s20060_s28 + $0x6f0] sm:$0xff]  ;;  %v3166_v11 = vpop.f32.mrf.mxu1 }
 0x647   :  { %3699 = vmatprep.subr.mxu1 %v3260_v35  ;;  %3788 = vmatprep.subr.mxu0 %v20058_v10  ;;  %v10303_v35 = vld [vmem:[%s20060_s28 + $0x6e0] sm:$0xff] }
 0x648   :  { %3700 = vmatpush2.msra.mxu1 %v3259_v47  ;;  %3789 = vmatpush2.msra.mxu0 %v3261_v52  ;;  %v10302_v47 = vld [vmem:[%s20060_s28 + $0x6d8] sm:$0xff]  ;;  %v10300_v52 = vld [vmem:[%s20060_s28 + $0x6c8] sm:$0xff] }
 0x649   :  { %3701 = vmatprep.subr.mxu1 %v3257_v18  ;;  %3790 = vmatprep.subr.mxu0 %v20058_v10  ;;  %v3170_v18 = vpop.f32.mrf.mxu1 }
 0x64a   :  { %3702 = vmatpush2.msra.mxu1 %v3256_v50  ;;  %3791 = vmatpush2.msra.mxu0 %v3258_v53  ;;  %v10299_v50 = vld [vmem:[%s20060_s28 + $0x6c0] sm:$0xff]  ;;  %v10297_v53 = vld [vmem:[%s20060_s28 + $0x6b0] sm:$0xff] }
 0x64b   :  { %3703 = vmatprep.subr.mxu1 %v3254_v13  ;;  %3792 = vmatprep.subr.mxu0 %v20058_v10  ;;  %v3172_v13 = vpop.f32.mrf.mxu1 }
 0x64c   :  { %3704 = vmatpush2.msra.mxu1 %v3253_v41  ;;  %3793 = vmatpush2.msra.mxu0 %v3255_v21  ;;  %v10296_v41 = vld [vmem:[%s20060_s28 + $0x6a8] sm:$0xff]  ;;  %v10294_v21 = vld [vmem:[%s20060_s28 + $0x698] sm:$0xff] }
 0x64d   :  { %3705 = vmatprep.subr.mxu1 %v3251_v17  ;;  %3794 = vmatprep.subr.mxu0 %v20058_v10  ;;  %v10291_v17 = vld [vmem:[%s20060_s28 + $0x680] sm:$0xff] }
 0x64e   :  { %3706 = vmatpush2.msra.mxu1 %v3250_v49  ;;  %3795 = vmatpush2.msra.mxu0 %v3252_v58  ;;  %v10290_v49 = vld [vmem:[%s20060_s28 + $0x678] sm:$0xff]  ;;  %v10288_v58 = vld [vmem:[%s20060_s28 + $0x668] sm:$0xff] }
 0x64f   :  { %3707 = vmatprep.subr.mxu1 %v3248_v8  ;;  %3796 = vmatprep.subr.mxu0 %v20058_v10  ;;  %v10287_v8 = vld [vmem:[%s20060_s28 + $0x660] sm:$0xff] }
 0x650   :  { %3708 = vmatpush2.msra.mxu1 %v3247_v1  ;;  %3797 = vmatpush2.msra.mxu0 %v3249_v27  ;;  %v10253_v1 = vld [vmem:[%s20059_s30 + $0x40] sm:$0xff]  ;;  %v10285_v27 = vld [vmem:[%s20060_s28 + $0x650] sm:$0xff] }
 0x651   :  { %3709 = vmatprep.subr.mxu1 %v3245_v12  ;;  %3798 = vmatprep.subr.mxu0 %v20058_v10  ;;  %v10310_v12 = vld [vmem:[%s20060_s28 + $0x718] sm:$0xff] }
 0x652   :  { %3710 = vmatpush2.msra.mxu1 %v3244_v40  ;;  %3799 = vmatpush2.msra.mxu0 %v3246_v60  ;;  %v10282_v40 = vld [vmem:[%s20060_s28 + $0x638] sm:$0xff]  ;;  %v10281_v60 = vld [vmem:[%s20060_s28 + $0x630] sm:$0xff] }
 0x653   :  { %3711 = vmatprep.subr.mxu1 %v3242_v45  ;;  %3800 = vmatprep.subr.mxu0 %v20058_v10  ;;  %v10254_v45 = vld [vmem:[%s20059_s30 + $0x48] sm:$0xff] }
 0x654   :  { %10238 = vmatprep.mubr.msk.f32.mxu1 %vm3462_vm3, %v3356_v55  ;;  %10242 = vmatprep.mubr.msk.f32.mxu0 %vm3462_vm3, %v3356_v55  ;;  %v10284_v55 = vld [vmem:[%s20060_s28 + $0x648] sm:$0xff] }
 0x655   :  { %3712 = vmatpush2.msra.mxu1 %v3241_v23  ;;  %3801 = vmatpush2.msra.mxu0 %v3243_v22  ;;  %v10278_v23 = vld [vmem:[%s20060_s28 + $0x618] sm:$0xff]  ;;  %v10307_v22 = vld [vmem:[%s20060_s28 + $0x700] sm:$0xff] }
 0x656   :  { %3546 = vmatmul.mubr.f32.gmra.mxu1 %v3354_v54  ;;  %3634 = vmatmul.mubr.f32.gmra.mxu0 %v3354_v54  ;;  %v10293_v54 = vld [vmem:[%s20060_s28 + $0x690] sm:$0xff] }
 0x657   :  { %3713 = vmatprep.subr.mxu1 %v3239_v16  ;;  %3802 = vmatprep.subr.mxu0 %v20058_v10  ;;  %v10276_v16 = vld [vmem:[%s20060_s28 + $0x608] sm:$0xff] }
 0x658   :  { %3714 = vmatpush2.msra.mxu1 %v3238_v37  ;;  %3803 = vmatpush2.msra.mxu0 %v3240_v26  ;;  %v10275_v37 = vld [vmem:[%s20060_s28 + $0x600] sm:$0xff]  ;;  %v10255_v26 = vld [vmem:[%s20059_s30 + $0x50] sm:$0xff] }
 0x659   :  { %3715 = vmatprep.subr.mxu1 %v3236_v59  ;;  %3804 = vmatprep.subr.mxu0 %v20058_v10  ;;  %v10272_v59 = vld [vmem:[%s20060_s28 + $0x5e8] sm:$0xff] }
 0x65a   :  { %10239 = vmatprep.mubr.msk.f32.mxu1 %vm3462_vm3, %v3362_v6  ;;  %10243 = vmatprep.mubr.msk.f32.mxu0 %vm3462_vm3, %v3362_v6  ;;  %v10273_v6 = vld [vmem:[%s20060_s28 + $0x5f0] sm:$0xff] }
 0x65b   :  { %3716 = vmatpush2.msra.mxu1 %v3235_v32  ;;  %3805 = vmatpush2.msra.mxu0 %v3237_v34  ;;  %v10270_v32 = vld [vmem:[%s20060_s28 + $0x5d8] sm:$0xff]  ;;  %v10269_v34 = vld [vmem:[%s20060_s28 + $0x5d0] sm:$0xff] }
 0x65c   :  { %3552 = vmatmul.mubr.f32.gmra.mxu1 %v3360_v29  ;;  %3639 = vmatmul.mubr.f32.gmra.mxu0 %v3360_v29  ;;  %v10279_v29 = vld [vmem:[%s20060_s28 + $0x620] sm:$0xff] }
 0x65d   :  { %3717 = vmatprep.subr.mxu1 %v3233_v39  ;;  %3806 = vmatprep.subr.mxu0 %v20058_v10  ;;  %v10267_v39 = vld [vmem:[%s20060_s28 + $0x5c0] sm:$0xff] }
 0x65e   :  { %3718 = vmatpush2.msra.mxu1 %v3232_v51  ;;  %3807 = vmatpush2.msra.mxu0 %v3234_v7  ;;  %v10266_v51 = vld [vmem:[%s20060_s28 + $0x5b8] sm:$0xff]  ;;  %v10264_v7 = vld [vmem:[%s20060_s28 + $0x5a8] sm:$0xff] }
 0x65f   :  { %3719 = vmatprep.subr.mxu1 %v3230_v25  ;;  %3808 = vmatprep.subr.mxu0 %v20058_v10  ;;  %v10298_v25 = vld [vmem:[%s20060_s28 + $0x6b8] sm:$0xff] }
 0x660   :  { %10240 = vmatprep.mubr.msk.f32.mxu1 %vm3462_vm3, %v3368_v5  ;;  %10244 = vmatprep.mubr.msk.f32.mxu0 %vm3462_vm3, %v3368_v5  ;;  %v10263_v5 = vld [vmem:[%s20060_s28 + $0x5a0] sm:$0xff] }
 0x661   :  { %3720 = vmatpush2.msra.mxu1 %v3229_v0  ;;  %3809 = vmatpush2.msra.mxu0 %v3231_v48  ;;  %v10351_v0 = vld [vmem:[%s20060_s28 + $0x860] sm:$0xff] }
 0x662   :  { %3558 = vmatmul.mubr.f32.gmra.mxu1 %v3366_v36  ;;  %3644 = vmatmul.mubr.f32.gmra.mxu0 %v3366_v36  ;;  %v10256_v36 = vld [vmem:[%s20059_s30 + $0x58] sm:$0x3f]  ;;  %v10295_v48 = vld [vmem:[%s20060_s28 + $0x6a0] sm:$0xff] }
 0x663   :  { %3721 = vmatprep.subr.mxu1 %v3227_v31  ;;  %3810 = vmatprep.subr.mxu0 %v20058_v10  ;;  %v10348_v31 = vld [vmem:[%s20060_s28 + $0x848] sm:$0xff] }
 0x664   :  { %3722 = vmatpush2.msra.mxu1 %v3226_v2  ;;  %3811 = vmatpush2.msra.mxu0 %v3228_v56  ;;  %v10292_v2 = vld [vmem:[%s20060_s28 + $0x688] sm:$0xff]  ;;  %v10347_v56 = vld [vmem:[%s20060_s28 + $0x840] sm:$0xff] }
 0x665   :  { %3723 = vmatprep.subr.mxu1 %v3224_v57  ;;  %3812 = vmatprep.subr.mxu0 %v20058_v10  ;;  %v10345_v57 = vld [vmem:[%s20060_s28 + $0x830] sm:$0xff] }
 0x666   :  { %3724 = vmatpush2.msra.mxu1 %v3223_v4  ;;  %10245 = vmatprep.mubr.msk.f32.mxu1 %vm3462_vm3, %v3154_v62  ;;  %v10344_v4 = vld [vmem:[%s20060_s28 + $0x828] sm:$0xff] }
 0x667   :  { %3813 = vmatpush2.msra.mxu0 %v3225_v24  ;;  %10249 = vmatprep.mubr.msk.f32.mxu0 %vm3462_vm3, %v3154_v62  ;;  %v10301_v62 = vld [vmem:[%s20060_s28 + $0x6d0] sm:$0xff]  ;;  %v10342_v24 = vld [vmem:[%s20060_s28 + $0x818] sm:$0xff] }
 0x668   :  { %3726 = vmatmul.mubr.f32.vlgmr.msra.gmra.mxu1 %v3152_v46  ;;  %3815 = vmatmul.mubr.f32.vlgmr.msra.gmra.mxu0 %v3152_v46  ;;  %v10304_v46 = vld [vmem:[%s20060_s28 + $0x6e8] sm:$0xff] }
 0x669   :  { %10257 = vmatprep.subr.msk.mxu1 %vm3079_vm1, %v14710_v30  ;;  %4044 = vmatprep.subr.mxu0 %v10309_v28  ;;  %v10286_v28 = vld [vmem:[%s20060_s28 + $0x658] sm:$0xff] }
 0x66a   :  { %10258 = vmatpush1.msk.msra.mxu1 %vm3079_vm1, %v14712_v44  ;;  %4045 = vmatpush1.msra.mxu0 %v10308_v9  ;;  %v10339_v9 = vld [vmem:[%s20060_s28 + $0x800] sm:$0xff] }
 0x66b   :  { %3878 = vmatprep.subr.mxu1 %v14714_v20  ;;  %4046 = vmatprep.subr.mxu0 %v10306_v19  ;;  %v10283_v19 = vld [vmem:[%s20060_s28 + $0x640] sm:$0xff] }
 0x66c   :  { %10246 = vmatprep.mubr.msk.f32.mxu1 %vm3462_vm3, %v3160_v3  ;;  %10250 = vmatprep.mubr.msk.f32.mxu0 %vm3462_vm3, %v3160_v3  ;;  %v10289_v3 = vld [vmem:[%s20060_s28 + $0x670] sm:$0xff] }
 0x66d   :  { %3879 = vmatpush1.msra.mxu1 %v14720_v43  ;;  %4047 = vmatpush1.msra.mxu0 %v10305_v38  ;;  %v10338_v38 = vld [vmem:[%s20060_s28 + $0x7f8] sm:$0xff] }
 0x66e   :  { %3732 = vmatmul.mubr.f32.gmra.mxu1 %v3158_v15  ;;  %3820 = vmatmul.mubr.f32.gmra.mxu0 %v3158_v15  ;;  %v10350_v15 = vld [vmem:[%s20060_s28 + $0x858] sm:$0xff] }
 0x66f   :  { %3880 = vmatprep.subr.mxu1 %v14726_v42  ;;  %4048 = vmatprep.subr.mxu0 %v10303_v35  ;;  %v10280_v35 = vld [vmem:[%s20060_s28 + $0x628] sm:$0xff] }
 0x670   :  { %3881 = vmatpush1.msra.mxu1 %v14730_v63  ;;  %4049 = vmatpush1.msra.mxu0 %v10302_v47  ;;  %v10335_v47 = vld [vmem:[%s20060_s28 + $0x7e0] sm:$0xff] }
 0x671   :  { %3882 = vmatprep.subr.mxu1 %v14734_v14  ;;  %4050 = vmatprep.subr.mxu0 %v10300_v52  ;;  %v10333_v52 = vld [vmem:[%s20060_s28 + $0x7d0] sm:$0xff] }
 0x672   :  { %10247 = vmatprep.mubr.msk.f32.mxu1 %vm3462_vm3, %v3166_v11  ;;  %10251 = vmatprep.mubr.msk.f32.mxu0 %vm3462_vm3, %v3166_v11  ;;  %v10336_v11 = vld [vmem:[%s20060_s28 + $0x7e8] sm:$0xff] }
 0x673   :  { %3883 = vmatpush1.msra.mxu1 %v14738_v33  ;;  %4051 = vmatpush1.msra.mxu0 %v10299_v50  ;;  %v10332_v50 = vld [vmem:[%s20060_s28 + $0x7c8] sm:$0xff] }
 0x674   :  { %3738 = vmatmul.mubr.f32.gmra.mxu1 %v3164_v61  ;;  %3825 = vmatmul.mubr.f32.gmra.mxu0 %v3164_v61  ;;  %v10341_v61 = vld [vmem:[%s20060_s28 + $0x810] sm:$0xff] }
 0x675   :  { %4052 = vmatprep.subr.mxu0 %v10297_v53  ;;  %10248 = vmatprep.mubr.msk.f32.mxu1 %vm3462_vm3, %v3172_v13  ;;  %v10330_v53 = vld [vmem:[%s20060_s28 + $0x7b8] sm:$0xff] }
 0x676   :  { %4053 = vmatpush1.msra.mxu0 %v10296_v41  ;;  %10252 = vmatprep.mubr.msk.f32.mxu0 %vm3462_vm3, %v3172_v13  ;;  %v10274_v13 = vld [vmem:[%s20060_s28 + $0x5f8] sm:$0xff]  ;;  %v10329_v41 = vld [vmem:[%s20060_s28 + $0x7b0] sm:$0xff] }
 0x677   :  { %4054 = vmatprep.subr.mxu0 %v10294_v21  ;;  %4133 = vmatprep.subr.mxu1 %v20058_v10  ;;  %v10327_v21 = vld [vmem:[%s20060_s28 + $0x7a0] sm:$0xff] }
 0x678   :  { %4055 = vmatpush1.msra.mxu0 %v10293_v54  ;;  %3744 = vmatmul.mubr.f32.gmra.mxu1 %v3170_v18  ;;  %v10271_v54 = vld [vmem:[%s20060_s28 + $0x5e0] sm:$0xff] }
 0x679   :  { %3830 = vmatmul.mubr.f32.gmra.mxu0 %v3170_v18  ;;  %4056 = vmatprep.subr.mxu0 %v10291_v17  ;;  %v10277_v18 = vld [vmem:[%s20060_s28 + $0x610] sm:$0xff]  ;;  %v10326_v17 = vld [vmem:[%s20060_s28 + $0x798] sm:$0xff] }
 0x67a   :  { %4057 = vmatpush1.msra.mxu0 %v10290_v49  ;;  %3916 = vmatprep.mubr.f32.mxu1 %v20058_v10  ;;  %v10324_v49 = vld [vmem:[%s20060_s28 + $0x788] sm:$0xff] }
 0x67b   :  { %4058 = vmatprep.subr.mxu0 %v10288_v58  ;;  %v10268_v58 = vld [vmem:[%s20060_s28 + $0x5c8] sm:$0xff] }
 0x67c   :  { %4059 = vmatpush1.msra.mxu0 %v10287_v8  ;;  %10259 = vmatmul.mubr.msk.f32.vlgmr.msra.gmra.mxu1 %vm3066_vm2, %v10253_v1  ;;  %v10323_v8 = vld [vmem:[%s20060_s28 + $0x780] sm:$0xff]  ;;  %v10321_v1 = vld [vmem:[%s20060_s28 + $0x770] sm:$0xff] }
 0x67d   :  { %4060 = vmatprep.subr.mxu0 %v10285_v27  ;;  %3922 = vmatprep.mubr.f32.mxu1 %v20058_v10  ;;  %v10265_v27 = vld [vmem:[%s20060_s28 + $0x5b0] sm:$0xff] }
 0x67e   :  { %4061 = vmatpush1.msra.mxu0 %v10284_v55  ;;  %4134 = vmatpush1.msra.mxu1 %v10310_v12  ;;  %v10320_v55 = vld [vmem:[%s20060_s28 + $0x768] sm:$0xff]  ;;  %v10318_v12 = vld [vmem:[%s20060_s28 + $0x758] sm:$0xff] }
 0x67f   :  { %4062 = vmatprep.subr.mxu0 %v10282_v40  ;;  %4135 = vmatprep.subr.mxu1 %v20058_v10  ;;  %v10352_v40 = vld [vmem:[%s20060_s28 + $0x868] sm:$0xff] }
 0x680   :  { %4063 = vmatpush1.msra.mxu0 %v10281_v60  ;;  %10260 = vmatmul.mubr.msk.f32.gmra.mxu1 %vm3066_vm2, %v10254_v45  ;;  %v10317_v60 = vld [vmem:[%s20060_s28 + $0x750] sm:$0xff]  ;;  %v10315_v45 = vld [vmem:[%s20060_s28 + $0x740] sm:$0xff] }
 0x681   :  { %4064 = vmatprep.subr.mxu0 %v10279_v29  ;;  %3928 = vmatprep.mubr.f32.mxu1 %v20058_v10  ;;  %v10349_v29 = vld [vmem:[%s20060_s28 + $0x850] sm:$0xff] }
 0x682   :  { %4065 = vmatpush1.msra.mxu0 %v10278_v23  ;;  %4136 = vmatpush1.msra.mxu1 %v10307_v22  ;;  %v10314_v23 = vld [vmem:[%s20060_s28 + $0x738] sm:$0xff]  ;;  %v10312_v22 = vld [vmem:[%s20060_s28 + $0x728] sm:$0xff] }
 0x683   :  { %4066 = vmatprep.subr.mxu0 %v10276_v16  ;;  %4137 = vmatprep.subr.mxu1 %v20058_v10  ;;  %v10346_v16 = vld [vmem:[%s20060_s28 + $0x838] sm:$0xff] }
 0x684   :  { %4067 = vmatpush1.msra.mxu0 %v10275_v37  ;;  %10261 = vmatmul.mubr.msk.f32.gmra.mxu1 %vm3066_vm2, %v10255_v26  ;;  %v10311_v37 = vld [vmem:[%s20060_s28 + $0x720] sm:$0xff] }
 0x685   :  { %4068 = vmatprep.subr.mxu0 %v10273_v6  ;;  %3934 = vmatprep.mubr.f32.mxu1 %v20058_v10  ;;  %v10343_v26 = vld [vmem:[%s20060_s28 + $0x820] sm:$0xff]  ;;  %v10340_v6 = vld [vmem:[%s20060_s28 + $0x808] sm:$0xff] }
 0x686   :  { %4069 = vmatpush1.msra.mxu0 %v10272_v59  ;;  %4138 = vmatpush1.msra.mxu1 %v10304_v46  ;;  %v10337_v59 = vld [vmem:[%s20060_s28 + $0x7f0] sm:$0xff]  ;;  %v10334_v46 = vld [vmem:[%s20060_s28 + $0x7d8] sm:$0xff] }
 0x687   :  { %4070 = vmatprep.subr.mxu0 %v10270_v32  ;;  %4139 = vmatprep.subr.mxu1 %v20058_v10  ;;  %v10331_v32 = vld [vmem:[%s20060_s28 + $0x7c0] sm:$0xff] }
 0x688   :  { %4071 = vmatpush1.msra.mxu0 %v10269_v34  ;;  %10262 = vmatmul.mubr.msk.f32.gmra.mxu1 %vm3066_vm2, %v10256_v36  ;;  %v10328_v34 = vld [vmem:[%s20060_s28 + $0x7a8] sm:$0xff]  ;;  %v10325_v36 = vld [vmem:[%s20060_s28 + $0x790] sm:$0xff] }
 0x689   :  { %4072 = vmatprep.subr.mxu0 %v10267_v39  ;;  %4140 = vmatpush1.msra.mxu1 %v10301_v62  ;;  %v10322_v39 = vld [vmem:[%s20060_s28 + $0x778] sm:$0xff]  ;;  %v10319_v62 = vld [vmem:[%s20060_s28 + $0x760] sm:$0xff] }
 0x68a   :  { %4073 = vmatpush1.msra.mxu0 %v10266_v51  ;;  %4141 = vmatprep.subr.mxu1 %v20058_v10  ;;  %v10316_v51 = vld [vmem:[%s20060_s28 + $0x748] sm:$0xff] }
 0x68b   :  { %4074 = vmatprep.subr.mxu0 %v10264_v7  ;;  %4142 = vmatpush1.msra.mxu1 %v10298_v25  ;;  %v10313_v7 = vld [vmem:[%s20060_s28 + $0x730] sm:$0xff]  ;;  %v10417_v25 = vld [vmem:[%s20060_s28 + $0x9e0] sm:$0xff] }
 0x68c   :  { %4075 = vmatpush1.msra.mxu0 %v10263_v5  ;;  %4143 = vmatprep.subr.mxu1 %v20058_v10 }
 0x68d   :  { %4080 = vmatprep.subr.mxu0 %v10351_v0  ;;  %4144 = vmatpush1.msra.mxu1 %v10295_v48 }
 0x68e   :  { %4081 = vmatpush2.msra.mxu0 %v10350_v15  ;;  %4145 = vmatprep.subr.mxu1 %v20058_v10 }
 0x68f   :  { %4082 = vmatprep.subr.mxu0 %v10348_v31  ;;  %4146 = vmatpush1.msra.mxu1 %v10292_v2 }
 0x690   :  { %4083 = vmatpush2.msra.mxu0 %v10347_v56  ;;  %4147 = vmatprep.subr.mxu1 %v20058_v10 }
 0x691   :  { %4084 = vmatprep.subr.mxu0 %v10345_v57  ;;  %4148 = vmatpush1.msra.mxu1 %v10289_v3 }
 0x692   :  { %4085 = vmatpush2.msra.mxu0 %v10344_v4  ;;  %4149 = vmatprep.subr.mxu1 %v20058_v10 }
 0x693   :  { %4086 = vmatprep.subr.mxu0 %v10342_v24  ;;  %4150 = vmatpush1.msra.mxu1 %v10286_v28 }
 0x694   :  { %4087 = vmatpush2.msra.mxu0 %v10341_v61  ;;  %4151 = vmatprep.subr.mxu1 %v20058_v10 }
 0x695   :  { %4088 = vmatprep.subr.mxu0 %v10339_v9  ;;  %4152 = vmatpush1.msra.mxu1 %v10283_v19 }
 0x696   :  { %4089 = vmatpush2.msra.mxu0 %v10338_v38  ;;  %4153 = vmatprep.subr.mxu1 %v20058_v10 }
 0x697   :  { %4090 = vmatprep.subr.mxu0 %v10336_v11  ;;  %4154 = vmatpush1.msra.mxu1 %v10280_v35 }
 0x698   :  { %4091 = vmatpush2.msra.mxu0 %v10335_v47  ;;  %4155 = vmatprep.subr.mxu1 %v20058_v10 }
 0x699   :  { %4092 = vmatprep.subr.mxu0 %v10333_v52  ;;  %4156 = vmatpush1.msra.mxu1 %v10277_v18 }
 0x69a   :  { %4093 = vmatpush2.msra.mxu0 %v10332_v50  ;;  %4157 = vmatprep.subr.mxu1 %v20058_v10 }
 0x69b   :  { %4094 = vmatprep.subr.mxu0 %v10330_v53  ;;  %4158 = vmatpush1.msra.mxu1 %v10274_v13 }
 0x69c   :  { %4095 = vmatpush2.msra.mxu0 %v10329_v41  ;;  %4159 = vmatprep.subr.mxu1 %v20058_v10 }
 0x69d   :  { %4096 = vmatprep.subr.mxu0 %v10327_v21  ;;  %4160 = vmatpush1.msra.mxu1 %v10271_v54 }
 0x69e   :  { %4097 = vmatpush2.msra.mxu0 %v10326_v17  ;;  %4161 = vmatprep.subr.mxu1 %v20058_v10 }
 0x69f   :  { %4098 = vmatprep.subr.mxu0 %v10324_v49  ;;  %4162 = vmatpush1.msra.mxu1 %v10268_v58 }
 0x6a0   :  { %4099 = vmatpush2.msra.mxu0 %v10323_v8  ;;  %4163 = vmatprep.subr.mxu1 %v20058_v10 }
 0x6a1   :  { %4100 = vmatprep.subr.mxu0 %v10321_v1  ;;  %4164 = vmatpush1.msra.mxu1 %v10265_v27 }
 0x6a2   :  { %4101 = vmatpush2.msra.mxu0 %v10320_v55  ;;  %4169 = vmatprep.subr.mxu1 %v20058_v10 }
 0x6a3   :  { %4102 = vmatprep.subr.mxu0 %v10318_v12  ;;  %4170 = vmatpush2.msra.mxu1 %v10352_v40 }
 0x6a4   :  { %4103 = vmatpush2.msra.mxu0 %v10317_v60  ;;  %4171 = vmatprep.subr.mxu1 %v20058_v10 }
 0x6a5   :  { %4104 = vmatprep.subr.mxu0 %v10315_v45  ;;  %4172 = vmatpush2.msra.mxu1 %v10349_v29 }
 0x6a6   :  { %4105 = vmatpush2.msra.mxu0 %v10314_v23  ;;  %4173 = vmatprep.subr.mxu1 %v20058_v10 }
 0x6a7   :  { %4106 = vmatprep.subr.mxu0 %v10312_v22  ;;  %4174 = vmatpush2.msra.mxu1 %v10346_v16  ;;  %v10416_v22 = vld [vmem:[%s20060_s28 + $0x9d8] sm:$0xff]  ;;  %v10414_v16 = vld [vmem:[%s20060_s28 + $0x9c8] sm:$0xff] }
 0x6a8   :  { %4107 = vmatpush2.msra.mxu0 %v10311_v37  ;;  %4175 = vmatprep.subr.mxu1 %v20058_v10 }
 0x6a9   :  { %10365 = vmatprep.subr.msk.mxu0 %vm3079_vm1, %v14710_v30  ;;  %4176 = vmatpush2.msra.mxu1 %v10343_v26  ;;  %v10413_v26 = vld [vmem:[%s20060_s28 + $0x9c0] sm:$0xff] }
 0x6aa   :  { %4177 = vmatprep.subr.mxu1 %v20058_v10 }
 0x6ab   :  { %4178 = vmatpush2.msra.mxu1 %v10340_v6 }
 0x6ac   :  { %4179 = vmatprep.subr.mxu1 %v20058_v10 }
 0x6ad   :  { %4180 = vmatpush2.msra.mxu1 %v10337_v59  ;;  %v10411_v59 = vld [vmem:[%s20060_s28 + $0x9b0] sm:$0xff] }
 0x6ae   :  { %4181 = vmatprep.subr.mxu1 %v20058_v10 }
 0x6af   :  { %4182 = vmatpush2.msra.mxu1 %v10334_v46 }
 0x6b0   :  { %4183 = vmatprep.subr.mxu1 %v20058_v10 }
 0x6b1   :  { %4184 = vmatpush2.msra.mxu1 %v10331_v32  ;;  %v10410_v32 = vld [vmem:[%s20060_s28 + $0x9a8] sm:$0xff] }
 0x6b2   :  { %4185 = vmatprep.subr.mxu1 %v20058_v10 }
 0x6b3   :  { %4186 = vmatpush2.msra.mxu1 %v10328_v34  ;;  %v10408_v34 = vld [vmem:[%s20060_s28 + $0x998] sm:$0xff] }
 0x6b4   :  { %4187 = vmatprep.subr.mxu1 %v20058_v10 }
 0x6b5   :  { %4188 = vmatpush2.msra.mxu1 %v10325_v36 }
 0x6b6   :  { %4189 = vmatprep.subr.mxu1 %v20058_v10 }
 0x6b7   :  { %4190 = vmatpush2.msra.mxu1 %v10322_v39  ;;  %v10407_v39 = vld [vmem:[%s20060_s28 + $0x990] sm:$0xff] }
 0x6b8   :  { %4191 = vmatprep.subr.mxu1 %v20058_v10 }
 0x6b9   :  { %4192 = vmatpush2.msra.mxu1 %v10319_v62  ;;  %v10405_v62 = vld [vmem:[%s20060_s28 + $0x980] sm:$0xff] }
 0x6ba   :  { %4193 = vmatprep.subr.mxu1 %v20058_v10 }
 0x6bb   :  { %4194 = vmatpush2.msra.mxu1 %v10316_v51 }
 0x6bc   :  { %4195 = vmatprep.subr.mxu1 %v20058_v10 }
 0x6bd   :  { %4196 = vmatpush2.msra.mxu1 %v10313_v7  ;;  %v10404_v7 = vld [vmem:[%s20060_s28 + $0x978] sm:$0xff] }
 0x6be   :  { %4439 = vmatprep.subr.mxu1 %v10417_v25 }
 0x6e5   :  { %v15735_v5 = vpop.f32.mrf.mxu0  ;;  %v15737_v48 = vpop.f32.mrf.mxu1 }
 0x6e7   :  { %v3632_v0 = vpop.f32.mrf.mxu0  ;;  %v15739_v15 = vpop.f32.mrf.mxu1 }
 0x6e8   :  { %v10402_v0 = vld [vmem:[%s20060_s28 + $0x968] sm:$0xff] }
 0x716   :  { %v3547_v31 = vpop.f32.mrf.mxu1  ;;  %v3635_v2 = vpop.f32.mrf.mxu0 }
 0x718   :  { %v15741_v56 = vpop.f32.mrf.mxu1  ;;  %v3637_v57 = vpop.f32.mrf.mxu0 }
 0x719   :  { %v10398_v57 = vld [vmem:[%s20060_s28 + $0x948] sm:$0xff] }
 0x71c   :  { %v3553_v3 = vpop.f32.mrf.mxu1  ;;  %v3640_v4 = vpop.f32.mrf.mxu0 }
 0x71e   :  { %v15743_v24 = vpop.f32.mrf.mxu1  ;;  %v3642_v28 = vpop.f32.mrf.mxu0 }
 0x71f   :  { %v10361_v28 = vld [vmem:[%s20059_s30 + $0x60] sm:$0xff] }
 0x722   :  { %v3559_v61 = vpop.f32.mrf.mxu1  ;;  %v3645_v9 = vpop.f32.mrf.mxu0 }
 0x724   :  { %v3647_v19 = vpop.f32.mrf.mxu0  ;;  %v15745_v38 = vpop.f32.mrf.mxu1 }
 0x725   :  { %v10418_v19 = vld [vmem:[%s20060_s28 + $0x9e8] sm:$0xff] }
 0x728   :  { %v15747_v11 = vpop.f32.mrf.mxu1  ;;  %v15749_v35 = vpop.f32.mrf.mxu0 }
 0x72a   :  { %v15751_v47 = vpop.f32.mrf.mxu1  ;;  %v3818_v52 = vpop.f32.mrf.mxu0 }
 0x72b   :  { %v10390_v52 = vld [vmem:[%s20060_s28 + $0x908] sm:$0xff] }
 0x72e   :  { %v3733_v18 = vpop.f32.mrf.mxu1  ;;  %v3821_v50 = vpop.f32.mrf.mxu0 }
 0x72f   :  { %v15753_v53 = vadd.f32 %v3733_v18, %v3547_v31  ;;  %v15755_v13 = vadd.f32 %v3821_v50, %v3635_v2  ;;  %v10401_v31 = vld [vmem:[%s20060_s28 + $0x960] sm:$0xff]  ;;  %v10399_v2 = vld [vmem:[%s20060_s28 + $0x950] sm:$0xff]  ;;  %v10362_v50 = vld [vmem:[%s20059_s30 + $0x68] sm:$0xff] }
 0x730   :  { %v15757_v41 = vpop.f32.mrf.mxu1  ;;  %v3823_v21 = vpop.f32.mrf.mxu0  ;;  %v10389_v18 = vld [vmem:[%s20060_s28 + $0x900] sm:$0xff] }
 0x731   :  { %v10387_v21 = vld [vmem:[%s20060_s28 + $0x8f0] sm:$0xff] }
 0x734   :  { %v3739_v54 = vpop.f32.mrf.mxu1  ;;  %v3826_v17 = vpop.f32.mrf.mxu0 }
 0x735   :  { %v15759_v49 = vadd.f32 %v3739_v54, %v3553_v3  ;;  %v15761_v58 = vadd.f32 %v3826_v17, %v3640_v4  ;;  %v10396_v3 = vld [vmem:[%s20060_s28 + $0x938] sm:$0xff]  ;;  %v10395_v4 = vld [vmem:[%s20060_s28 + $0x930] sm:$0xff]  ;;  %v10386_v54 = vld [vmem:[%s20060_s28 + $0x8e8] sm:$0xff] }
 0x736   :  { %v15763_v8 = vpop.f32.mrf.mxu1  ;;  %v3828_v1 = vpop.f32.mrf.mxu0  ;;  %v10415_v17 = vld [vmem:[%s20060_s28 + $0x9d0] sm:$0xff] }
 0x737   :  { %v10384_v1 = vld [vmem:[%s20060_s28 + $0x8d8] sm:$0xff] }
 0x738   :  { %v3745_v27 = vpop.f32.mrf.mxu1 }
 0x739   :  { %v15765_v55 = vadd.f32 %v3745_v27, %v3559_v61  ;;  %v3831_v12 = vpop.f32.mrf.mxu0  ;;  %v10393_v61 = vld [vmem:[%s20060_s28 + $0x920] sm:$0xff]  ;;  %v10383_v27 = vld [vmem:[%s20060_s28 + $0x8d0] sm:$0xff] }
 0x73a   :  { %v15767_v40 = vadd.f32 %v3831_v12, %v3645_v9  ;;  %v15769_v60 = vpop.f32.mrf.mxu1  ;;  %v10392_v9 = vld [vmem:[%s20060_s28 + $0x918] sm:$0xff]  ;;  %v10363_v12 = vld [vmem:[%s20059_s30 + $0x70] sm:$0xff] }
 0x73b   :  { %v3833_v45 = vpop.f32.mrf.mxu0 }
 0x73c   :  { %v3918_v29 = vpop.f32.mrf.mxu1  ;;  %v10381_v45 = vld [vmem:[%s20060_s28 + $0x8c0] sm:$0xff] }
 0x73e   :  { %v3920_v23 = vpop.f32.mrf.mxu1 }
 0x73f   :  { %10353 = vmatprep.mubr.msk.f32.mxu0 %vm3462_vm3, %v3920_v23  ;;  %10357 = vmatprep.mubr.msk.f32.mxu1 %vm3462_vm3, %v3920_v23  ;;  %v10412_v23 = vld [vmem:[%s20060_s28 + $0x9b8] sm:$0xff] }
 0x740   :  { %v3924_v37 = vpop.f32.mrf.mxu1  ;;  %4109 = vmatmul.mubr.f32.vlgmr.msra.gmra.mxu0 %v3918_v29  ;;  %4198 = vmatmul.mubr.f32.vlgmr.msra.gmra.mxu1 %v3918_v29  ;;  %v10380_v29 = vld [vmem:[%s20060_s28 + $0x8b8] sm:$0xff] }
 0x741   :  { %10366 = vmatpush1.msk.msra.mxu0 %vm3079_vm1, %v14712_v44  ;;  %4440 = vmatpush1.msra.mxu1 %v10416_v22  ;;  %v10378_v22 = vld [vmem:[%s20060_s28 + $0x8a8] sm:$0xff] }
 0x742   :  { %4273 = vmatprep.subr.mxu0 %v14714_v20  ;;  %4441 = vmatprep.subr.mxu1 %v10414_v16  ;;  %v3926_v6 = vpop.f32.mrf.mxu1  ;;  %v10377_v16 = vld [vmem:[%s20060_s28 + $0x8a0] sm:$0xff] }
 0x743   :  { %4274 = vmatpush1.msra.mxu0 %v14720_v43  ;;  %4442 = vmatpush1.msra.mxu1 %v10413_v26  ;;  %v10375_v26 = vld [vmem:[%s20060_s28 + $0x890] sm:$0xff] }
 0x744   :  { %10354 = vmatprep.mubr.msk.f32.mxu0 %vm3462_vm3, %v3926_v6  ;;  %10358 = vmatprep.mubr.msk.f32.mxu1 %vm3462_vm3, %v3926_v6  ;;  %v3930_v46 = vpop.f32.mrf.mxu1  ;;  %v10409_v6 = vld [vmem:[%s20060_s28 + $0x9a0] sm:$0xff] }
 0x745   :  { %4275 = vmatprep.subr.mxu0 %v14726_v42  ;;  %4443 = vmatprep.subr.mxu1 %v10411_v59  ;;  %v10374_v59 = vld [vmem:[%s20060_s28 + $0x888] sm:$0xff] }
 0x746   :  { %4115 = vmatmul.mubr.f32.gmra.mxu0 %v3924_v37  ;;  %4203 = vmatmul.mubr.f32.gmra.mxu1 %v3924_v37  ;;  %v3932_v36 = vpop.f32.mrf.mxu1  ;;  %v10364_v37 = vld [vmem:[%s20059_s30 + $0x78] sm:$0x3f] }
 0x747   :  { %4276 = vmatpush1.msra.mxu0 %v14730_v63  ;;  %4444 = vmatpush1.msra.mxu1 %v10410_v32  ;;  %v10406_v32 = vld [vmem:[%s20060_s28 + $0x988] sm:$0xff] }
 0x748   :  { %4277 = vmatprep.subr.mxu0 %v14734_v14  ;;  %4445 = vmatprep.subr.mxu1 %v10408_v34  ;;  %v3936_v51 = vpop.f32.mrf.mxu1  ;;  %v10371_v34 = vld [vmem:[%s20060_s28 + $0x870] sm:$0xff] }
 0x749   :  { %4278 = vmatpush1.msra.mxu0 %v14738_v33  ;;  %4446 = vmatpush1.msra.mxu1 %v10407_v39  ;;  %v10403_v39 = vld [vmem:[%s20060_s28 + $0x970] sm:$0xff] }
 0x74a   :  { %10355 = vmatprep.mubr.msk.f32.mxu0 %vm3462_vm3, %v3932_v36  ;;  %10359 = vmatprep.mubr.msk.f32.mxu1 %vm3462_vm3, %v3932_v36  ;;  %v3938_v25 = vpop.f32.mrf.mxu1  ;;  %v10459_v36 = vld [vmem:[%s20060_s28 + $0xb30] sm:$0xff] }
 0x74b   :  { %4447 = vmatprep.subr.mxu1 %v10405_v62  ;;  %4121 = vmatmul.mubr.f32.gmra.mxu0 %v3930_v46  ;;  %v10458_v62 = vld [vmem:[%s20060_s28 + $0xb28] sm:$0xff] }
 0x74c   :  { %4208 = vmatmul.mubr.f32.gmra.mxu1 %v3930_v46  ;;  %10356 = vmatprep.mubr.msk.f32.mxu0 %vm3462_vm3, %v3938_v25  ;;  %v10372_v46 = vld [vmem:[%s20060_s28 + $0x878] sm:$0xff] }
 0x74d   :  { %4448 = vmatpush1.msra.mxu1 %v10404_v7  ;;  %10360 = vmatprep.mubr.msk.f32.mxu1 %vm3462_vm3, %v3938_v25  ;;  %v10400_v7 = vld [vmem:[%s20060_s28 + $0x958] sm:$0xff]  ;;  %v10455_v25 = vld [vmem:[%s20060_s28 + $0xb10] sm:$0xff] }
 0x74e   :  { %4449 = vmatprep.subr.mxu1 %v10402_v0  ;;  %4528 = vmatprep.subr.mxu0 %v20058_v10  ;;  %v10453_v0 = vld [vmem:[%s20060_s28 + $0xb00] sm:$0xff] }
 0x74f   :  { %4450 = vmatpush1.msra.mxu1 %v10401_v31  ;;  %4127 = vmatmul.mubr.f32.gmra.mxu0 %v3936_v51  ;;  %v10397_v31 = vld [vmem:[%s20060_s28 + $0x940] sm:$0xff] }
 0x750   :  { %4451 = vmatprep.subr.mxu1 %v10399_v2  ;;  %4213 = vmatmul.mubr.f32.gmra.mxu1 %v3936_v51  ;;  %v10456_v51 = vld [vmem:[%s20060_s28 + $0xb18] sm:$0xff] }
 0x751   :  { %4452 = vmatpush1.msra.mxu1 %v10398_v57  ;;  %4311 = vmatprep.mubr.f32.mxu0 %v20058_v10  ;;  %v10452_v2 = vld [vmem:[%s20060_s28 + $0xaf8] sm:$0xff]  ;;  %v10450_v57 = vld [vmem:[%s20060_s28 + $0xae8] sm:$0xff] }
 0x752   :  { %4453 = vmatprep.subr.mxu1 %v10396_v3  ;;  %v10394_v3 = vld [vmem:[%s20060_s28 + $0x928] sm:$0xff] }
 0x753   :  { %4454 = vmatpush1.msra.mxu1 %v10395_v4  ;;  %10367 = vmatmul.mubr.msk.f32.vlgmr.msra.gmra.mxu0 %vm3066_vm2, %v10361_v28  ;;  %v10449_v4 = vld [vmem:[%s20060_s28 + $0xae0] sm:$0xff]  ;;  %v10447_v28 = vld [vmem:[%s20060_s28 + $0xad0] sm:$0xff] }
 0x754   :  { %4455 = vmatprep.subr.mxu1 %v10393_v61  ;;  %4317 = vmatprep.mubr.f32.mxu0 %v20058_v10  ;;  %v10391_v61 = vld [vmem:[%s20060_s28 + $0x910] sm:$0xff] }
 0x755   :  { %4456 = vmatpush1.msra.mxu1 %v10392_v9  ;;  %4529 = vmatpush1.msra.mxu0 %v10418_v19  ;;  %v10446_v9 = vld [vmem:[%s20060_s28 + $0xac8] sm:$0xff]  ;;  %v10444_v19 = vld [vmem:[%s20060_s28 + $0xab8] sm:$0xff] }
 0x756   :  { %4457 = vmatprep.subr.mxu1 %v10390_v52  ;;  %4530 = vmatprep.subr.mxu0 %v20058_v10  ;;  %v10388_v52 = vld [vmem:[%s20060_s28 + $0x8f8] sm:$0xff] }
 0x757   :  { %4458 = vmatpush1.msra.mxu1 %v10389_v18  ;;  %10368 = vmatmul.mubr.msk.f32.gmra.mxu0 %vm3066_vm2, %v10362_v50  ;;  %v10443_v18 = vld [vmem:[%s20060_s28 + $0xab0] sm:$0xff]  ;;  %v10441_v50 = vld [vmem:[%s20060_s28 + $0xaa0] sm:$0xff] }
 0x758   :  { %4459 = vmatprep.subr.mxu1 %v10387_v21  ;;  %4323 = vmatprep.mubr.f32.mxu0 %v20058_v10  ;;  %v10385_v21 = vld [vmem:[%s20060_s28 + $0x8e0] sm:$0xff] }
 0x759   :  { %4460 = vmatpush1.msra.mxu1 %v10386_v54  ;;  %4531 = vmatpush1.msra.mxu0 %v10415_v17  ;;  %v10440_v54 = vld [vmem:[%s20060_s28 + $0xa98] sm:$0xff]  ;;  %v10438_v17 = vld [vmem:[%s20060_s28 + $0xa88] sm:$0xff] }
 0x75a   :  { %4461 = vmatprep.subr.mxu1 %v10384_v1  ;;  %4532 = vmatprep.subr.mxu0 %v20058_v10  ;;  %v10382_v1 = vld [vmem:[%s20060_s28 + $0x8c8] sm:$0xff] }
 0x75b   :  { %4462 = vmatpush1.msra.mxu1 %v10383_v27  ;;  %10369 = vmatmul.mubr.msk.f32.gmra.mxu0 %vm3066_vm2, %v10363_v12  ;;  %v10437_v27 = vld [vmem:[%s20060_s28 + $0xa80] sm:$0xff]  ;;  %v10435_v12 = vld [vmem:[%s20060_s28 + $0xa70] sm:$0xff] }
 0x75c   :  { %4463 = vmatprep.subr.mxu1 %v10381_v45  ;;  %4329 = vmatprep.mubr.f32.mxu0 %v20058_v10  ;;  %v10379_v45 = vld [vmem:[%s20060_s28 + $0x8b0] sm:$0xff] }
 0x75d   :  { %4464 = vmatpush1.msra.mxu1 %v10380_v29  ;;  %4533 = vmatpush1.msra.mxu0 %v10412_v23  ;;  %v10434_v29 = vld [vmem:[%s20060_s28 + $0xa68] sm:$0xff]  ;;  %v10432_v23 = vld [vmem:[%s20060_s28 + $0xa58] sm:$0xff] }
 0x75e   :  { %4465 = vmatprep.subr.mxu1 %v10378_v22  ;;  %4534 = vmatprep.subr.mxu0 %v20058_v10  ;;  %v10376_v22 = vld [vmem:[%s20060_s28 + $0x898] sm:$0xff] }
 0x75f   :  { %4466 = vmatpush1.msra.mxu1 %v10377_v16  ;;  %10370 = vmatmul.mubr.msk.f32.gmra.mxu0 %vm3066_vm2, %v10364_v37  ;;  %v10431_v16 = vld [vmem:[%s20060_s28 + $0xa50] sm:$0xff]  ;;  %v10429_v37 = vld [vmem:[%s20060_s28 + $0xa40] sm:$0xff] }
 0x760   :  { %4467 = vmatprep.subr.mxu1 %v10375_v26  ;;  %4535 = vmatpush1.msra.mxu0 %v10409_v6  ;;  %v10373_v26 = vld [vmem:[%s20060_s28 + $0x880] sm:$0xff]  ;;  %v10428_v6 = vld [vmem:[%s20060_s28 + $0xa38] sm:$0xff] }
 0x761   :  { %4468 = vmatpush1.msra.mxu1 %v10374_v59  ;;  %4536 = vmatprep.subr.mxu0 %v20058_v10  ;;  %v10426_v59 = vld [vmem:[%s20060_s28 + $0xa28] sm:$0xff] }
 0x762   :  { %4469 = vmatprep.subr.mxu1 %v10372_v46  ;;  %4537 = vmatpush1.msra.mxu0 %v10406_v32  ;;  %v10460_v46 = vld [vmem:[%s20060_s28 + $0xb38] sm:$0xff]  ;;  %v10425_v32 = vld [vmem:[%s20060_s28 + $0xa20] sm:$0xff] }
 0x763   :  { %4470 = vmatpush1.msra.mxu1 %v10371_v34  ;;  %4538 = vmatprep.subr.mxu0 %v20058_v10  ;;  %v10423_v34 = vld [vmem:[%s20060_s28 + $0xa10] sm:$0xff] }
 0x764   :  { %4475 = vmatprep.subr.mxu1 %v10459_v36  ;;  %4539 = vmatpush1.msra.mxu0 %v10403_v39  ;;  %v10457_v36 = vld [vmem:[%s20060_s28 + $0xb20] sm:$0xff]  ;;  %v10422_v39 = vld [vmem:[%s20060_s28 + $0xa08] sm:$0xff] }
 0x765   :  { %4476 = vmatpush2.msra.mxu1 %v10458_v62  ;;  %4540 = vmatprep.subr.mxu0 %v20058_v10  ;;  %v10420_v62 = vld [vmem:[%s20060_s28 + $0x9f8] sm:$0xff] }
 0x766   :  { %4477 = vmatprep.subr.mxu1 %v10456_v51  ;;  %4541 = vmatpush1.msra.mxu0 %v10400_v7  ;;  %v10454_v51 = vld [vmem:[%s20060_s28 + $0xb08] sm:$0xff]  ;;  %v10419_v7 = vld [vmem:[%s20060_s28 + $0x9f0] sm:$0xff] }
 0x767   :  { %4478 = vmatpush2.msra.mxu1 %v10455_v25  ;;  %4542 = vmatprep.subr.mxu0 %v20058_v10  ;;  %v10451_v25 = vld [vmem:[%s20060_s28 + $0xaf0] sm:$0xff] }
 0x768   :  { %4479 = vmatprep.subr.mxu1 %v10453_v0  ;;  %4543 = vmatpush1.msra.mxu0 %v10397_v31  ;;  %v10448_v0 = vld [vmem:[%s20060_s28 + $0xad8] sm:$0xff]  ;;  %v10445_v31 = vld [vmem:[%s20060_s28 + $0xac0] sm:$0xff] }
 0x769   :  { %4480 = vmatpush2.msra.mxu1 %v10452_v2  ;;  %4544 = vmatprep.subr.mxu0 %v20058_v10  ;;  %v10439_v2 = vld [vmem:[%s20060_s28 + $0xa90] sm:$0xff] }
 0x76a   :  { %4481 = vmatprep.subr.mxu1 %v10450_v57  ;;  %4545 = vmatpush1.msra.mxu0 %v10394_v3  ;;  %v10436_v57 = vld [vmem:[%s20060_s28 + $0xa78] sm:$0xff]  ;;  %v10433_v3 = vld [vmem:[%s20060_s28 + $0xa60] sm:$0xff] }
 0x76b   :  { %4482 = vmatpush2.msra.mxu1 %v10449_v4  ;;  %4546 = vmatprep.subr.mxu0 %v20058_v10  ;;  %v10430_v4 = vld [vmem:[%s20060_s28 + $0xa48] sm:$0xff] }
 0x76c   :  { %4483 = vmatprep.subr.mxu1 %v10447_v28  ;;  %4547 = vmatpush1.msra.mxu0 %v10391_v61  ;;  %v10427_v28 = vld [vmem:[%s20060_s28 + $0xa30] sm:$0xff]  ;;  %v10424_v61 = vld [vmem:[%s20060_s28 + $0xa18] sm:$0xff] }
 0x76d   :  { %4484 = vmatpush2.msra.mxu1 %v10446_v9  ;;  %4548 = vmatprep.subr.mxu0 %v20058_v10  ;;  %v10421_v9 = vld [vmem:[%s20060_s28 + $0xa00] sm:$0xff] }
 0x76e   :  { %4485 = vmatprep.subr.mxu1 %v10444_v19  ;;  %4549 = vmatpush1.msra.mxu0 %v10388_v52  ;;  %v10525_v19 = vld [vmem:[%s20060_s28 + $0xcb0] sm:$0xff]  ;;  %v3728_v52 = vadd.f32 %v15747_v11, %v15737_v48 }
 0x76f   :  { %4486 = vmatpush2.msra.mxu1 %v10443_v18  ;;  %4550 = vmatprep.subr.mxu0 %v20058_v10  ;;  %v3817_v18 = vadd.f32 %v15749_v35, %v15735_v5 }
 0x770   :  { %4487 = vmatprep.subr.mxu1 %v10441_v50  ;;  %4551 = vmatpush1.msra.mxu0 %v10385_v21 }
 0x771   :  { %4488 = vmatpush2.msra.mxu1 %v10440_v54  ;;  %4552 = vmatprep.subr.mxu0 %v20058_v10 }
 0x772   :  { %4489 = vmatprep.subr.mxu1 %v10438_v17  ;;  %4553 = vmatpush1.msra.mxu0 %v10382_v1 }
 0x773   :  { %4490 = vmatpush2.msra.mxu1 %v10437_v27  ;;  %4554 = vmatprep.subr.mxu0 %v20058_v10 }
 0x774   :  { %4491 = vmatprep.subr.mxu1 %v10435_v12  ;;  %4555 = vmatpush1.msra.mxu0 %v10379_v45 }
 0x775   :  { %4492 = vmatpush2.msra.mxu1 %v10434_v29  ;;  %4556 = vmatprep.subr.mxu0 %v20058_v10 }
 0x776   :  { %4493 = vmatprep.subr.mxu1 %v10432_v23  ;;  %4557 = vmatpush1.msra.mxu0 %v10376_v22 }
 0x777   :  { %4494 = vmatpush2.msra.mxu1 %v10431_v16  ;;  %4558 = vmatprep.subr.mxu0 %v20058_v10 }
 0x778   :  { %4495 = vmatprep.subr.mxu1 %v10429_v37  ;;  %4559 = vmatpush1.msra.mxu0 %v10373_v26 }
 0x779   :  { %4496 = vmatpush2.msra.mxu1 %v10428_v6  ;;  %4564 = vmatprep.subr.mxu0 %v20058_v10 }
 0x77a   :  { %4497 = vmatprep.subr.mxu1 %v10426_v59  ;;  %4565 = vmatpush2.msra.mxu0 %v10460_v46 }
 0x77b   :  { %4498 = vmatpush2.msra.mxu1 %v10425_v32  ;;  %4566 = vmatprep.subr.mxu0 %v20058_v10 }
 0x77c   :  { %4499 = vmatprep.subr.mxu1 %v10423_v34  ;;  %4567 = vmatpush2.msra.mxu0 %v10457_v36 }
 0x77d   :  { %4500 = vmatpush2.msra.mxu1 %v10422_v39  ;;  %4568 = vmatprep.subr.mxu0 %v20058_v10  ;;  %v10521_v39 = vld [vmem:[%s20060_s28 + $0xc90] sm:$0xff] }
 0x77e   :  { %4501 = vmatprep.subr.mxu1 %v10420_v62  ;;  %4569 = vmatpush2.msra.mxu0 %v10454_v51  ;;  %v10513_v51 = vld [vmem:[%s20060_s28 + $0xc50] sm:$0xff] }
 0x77f   :  { %4502 = vmatpush2.msra.mxu1 %v10419_v7  ;;  %4570 = vmatprep.subr.mxu0 %v20058_v10  ;;  %v10469_v7 = vld [vmem:[%s20059_s30 + $0x80] sm:$0xff] }
 0x780   :  { %10473 = vmatprep.subr.msk.mxu1 %vm3079_vm1, %v14710_v30  ;;  %4571 = vmatpush2.msra.mxu0 %v10451_v25  ;;  %v10442_v30 = vld [vmem:[%s20060_s28 + $0xaa8] sm:$0xff] }
 0x781   :  { %4572 = vmatprep.subr.mxu0 %v20058_v10  ;;  %v10512_v25 = vld [vmem:[%s20060_s28 + $0xc48] sm:$0xff] }
 0x782   :  { %4573 = vmatpush2.msra.mxu0 %v10448_v0  ;;  %v10526_v0 = vld [vmem:[%s20060_s28 + $0xcb8] sm:$0xff] }
 0x783   :  { %4574 = vmatprep.subr.mxu0 %v20058_v10 }
 0x784   :  { %4575 = vmatpush2.msra.mxu0 %v10445_v31  ;;  %v10510_v31 = vld [vmem:[%s20060_s28 + $0xc38] sm:$0xff] }
 0x785   :  { %4576 = vmatprep.subr.mxu0 %v20058_v10 }
 0x786   :  { %4577 = vmatpush2.msra.mxu0 %v10442_v30  ;;  %v10523_v30 = vld [vmem:[%s20060_s28 + $0xca0] sm:$0xff] }
 0x787   :  { %4578 = vmatprep.subr.mxu0 %v20058_v10 }
 0x788   :  { %4579 = vmatpush2.msra.mxu0 %v10439_v2  ;;  %v10509_v2 = vld [vmem:[%s20060_s28 + $0xc30] sm:$0xff] }
 0x789   :  { %4580 = vmatprep.subr.mxu0 %v20058_v10 }
 0x78a   :  { %4581 = vmatpush2.msra.mxu0 %v10436_v57  ;;  %v10470_v57 = vld [vmem:[%s20059_s30 + $0x88] sm:$0xff] }
 0x78b   :  { %4582 = vmatprep.subr.mxu0 %v20058_v10 }
 0x78c   :  { %4583 = vmatpush2.msra.mxu0 %v10433_v3  ;;  %v10520_v3 = vld [vmem:[%s20060_s28 + $0xc88] sm:$0xff] }
 0x78d   :  { %4584 = vmatprep.subr.mxu0 %v20058_v10 }
 0x78e   :  { %4585 = vmatpush2.msra.mxu0 %v10430_v4  ;;  %v10507_v4 = vld [vmem:[%s20060_s28 + $0xc20] sm:$0xff] }
 0x78f   :  { %4586 = vmatprep.subr.mxu0 %v20058_v10 }
 0x790   :  { %4587 = vmatpush2.msra.mxu0 %v10427_v28  ;;  %v10517_v28 = vld [vmem:[%s20060_s28 + $0xc70] sm:$0xff] }
 0x791   :  { %4588 = vmatprep.subr.mxu0 %v20058_v10 }
 0x792   :  { %4589 = vmatpush2.msra.mxu0 %v10424_v61  ;;  %v10506_v61 = vld [vmem:[%s20060_s28 + $0xc18] sm:$0xff] }
 0x793   :  { %4590 = vmatprep.subr.mxu0 %v20058_v10 }
 0x794   :  { %4591 = vmatpush2.msra.mxu0 %v10421_v9  ;;  %v10471_v9 = vld [vmem:[%s20059_s30 + $0x90] sm:$0xff] }
 0x795   :  { %4834 = vmatprep.subr.mxu0 %v10525_v19  ;;  %v10514_v19 = vld [vmem:[%s20060_s28 + $0xc58] sm:$0xff] }
 0x800   :  { %v4110_v50 = vpop.f32.mrf.mxu0  ;;  %v4199_v21 = vpop.f32.mrf.mxu1 }
 0x801   :  { %v16113_v54 = vadd.f32 %v4110_v50, %v3728_v52  ;;  %v16115_v17 = vadd.f32 %v4199_v21, %v3817_v18  ;;  %v10504_v52 = vld [vmem:[%s20060_s28 + $0xc08] sm:$0xff]  ;;  %v10511_v18 = vld [vmem:[%s20060_s28 + $0xc40] sm:$0xff]  ;;  %v10472_v21 = vld [vmem:[%s20059_s30 + $0x98] sm:$0x3f] }
 0x802   :  { %v16117_v1 = vpop.f32.mrf.mxu0  ;;  %v4201_v27 = vpop.f32.mrf.mxu1  ;;  %v10503_v50 = vld [vmem:[%s20060_s28 + $0xc00] sm:$0xff] }
 0x803   :  { %v10508_v27 = vld [vmem:[%s20060_s28 + $0xc28] sm:$0xff] }
 0x806   :  { %v4116_v12 = vpop.f32.mrf.mxu0  ;;  %v4204_v45 = vpop.f32.mrf.mxu1 }
 0x807   :  { %v16120_v29 = vadd.f32 %v4116_v12, %v15753_v53  ;;  %v16123_v23 = vadd.f32 %v4204_v45, %v15755_v13  ;;  %v10501_v12 = vld [vmem:[%s20060_s28 + $0xbf0] sm:$0xff]  ;;  %v10500_v45 = vld [vmem:[%s20060_s28 + $0xbe8] sm:$0xff] }
 0x808   :  { %v16125_v48 = vpop.f32.mrf.mxu0  ;;  %v4206_v5 = vpop.f32.mrf.mxu1 }
 0x809   :  { %v10505_v5 = vld [vmem:[%s20060_s28 + $0xc10] sm:$0xff] }
 0x80b   :  { %v4122_v11 = vpop.f32.mrf.mxu0 }
 0x80c   :  { %v16128_v35 = vadd.f32 %v4122_v11, %v15759_v49  ;;  %v4209_v22 = vpop.f32.mrf.mxu1  ;;  %v10498_v11 = vld [vmem:[%s20060_s28 + $0xbd8] sm:$0xff] }
 0x80d   :  { %v16131_v16 = vadd.f32 %v4209_v22, %v15761_v58  ;;  %v16133_v37 = vpop.f32.mrf.mxu0  ;;  %v10524_v58 = vld [vmem:[%s20060_s28 + $0xca8] sm:$0xff]  ;;  %v10497_v22 = vld [vmem:[%s20060_s28 + $0xbd0] sm:$0xff] }
 0x80e   :  { %v4211_v26 = vpop.f32.mrf.mxu1 }
 0x80f   :  { %v4128_v6 = vpop.f32.mrf.mxu0  ;;  %v10502_v26 = vld [vmem:[%s20060_s28 + $0xbf8] sm:$0xff] }
 0x810   :  { %v16136_v53 = vadd.f32 %v4128_v6, %v15765_v55  ;;  %v4214_v13 = vpop.f32.mrf.mxu1  ;;  %v10522_v55 = vld [vmem:[%s20060_s28 + $0xc98] sm:$0xff]  ;;  %v10495_v6 = vld [vmem:[%s20060_s28 + $0xbc0] sm:$0xff] }
 0x811   :  { %v16139_v59 = vadd.f32 %v4214_v13, %v15767_v40  ;;  %v16141_v46 = vpop.f32.mrf.mxu0  ;;  %v10494_v13 = vld [vmem:[%s20060_s28 + $0xbb8] sm:$0xff] }
 0x812   :  { %v4216_v32 = vpop.f32.mrf.mxu1 }
 0x813   :  { %v4313_v49 = vpop.f32.mrf.mxu0  ;;  %v10499_v32 = vld [vmem:[%s20060_s28 + $0xbe0] sm:$0xff] }
 0x815   :  { %v4315_v34 = vpop.f32.mrf.mxu0 }
 0x816   :  { %10461 = vmatprep.mubr.msk.f32.mxu1 %vm3462_vm3, %v4315_v34  ;;  %10465 = vmatprep.mubr.msk.f32.mxu0 %vm3462_vm3, %v4315_v34  ;;  %v10491_v34 = vld [vmem:[%s20060_s28 + $0xba0] sm:$0xff] }
 0x817   :  { %v4319_v36 = vpop.f32.mrf.mxu0  ;;  %4504 = vmatmul.mubr.f32.vlgmr.msra.gmra.mxu1 %v4313_v49  ;;  %4593 = vmatmul.mubr.f32.vlgmr.msra.gmra.mxu0 %v4313_v49  ;;  %v10492_v49 = vld [vmem:[%s20060_s28 + $0xba8] sm:$0xff] }
 0x818   :  { %10474 = vmatpush1.msk.msra.mxu1 %vm3079_vm1, %v14712_v44  ;;  %4835 = vmatpush1.msra.mxu0 %v10524_v58  ;;  %v10496_v58 = vld [vmem:[%s20060_s28 + $0xbc8] sm:$0xff] }
 0x819   :  { %4668 = vmatprep.subr.mxu1 %v14714_v20  ;;  %v4321_v40 = vpop.f32.mrf.mxu0  ;;  %4836 = vmatprep.subr.mxu0 %v10522_v55  ;;  %v10519_v20 = vld [vmem:[%s20060_s28 + $0xc80] sm:$0xff]  ;;  %v10489_v55 = vld [vmem:[%s20060_s28 + $0xb90] sm:$0xff] }
 0x81a   :  { %4669 = vmatpush1.msra.mxu1 %v14720_v43  ;;  %10462 = vmatprep.mubr.msk.f32.mxu1 %vm3462_vm3, %v4321_v40 }
 0x81b   :  { %10466 = vmatprep.mubr.msk.f32.mxu0 %vm3462_vm3, %v4321_v40  ;;  %4670 = vmatprep.subr.mxu1 %v14726_v42  ;;  %v4325_v62 = vpop.f32.mrf.mxu0  ;;  %v10518_v42 = vld [vmem:[%s20060_s28 + $0xc78] sm:$0xff]  ;;  %v10493_v40 = vld [vmem:[%s20060_s28 + $0xbb0] sm:$0xff] }
 0x81c   :  { %4510 = vmatmul.mubr.f32.gmra.mxu1 %v4319_v36  ;;  %4598 = vmatmul.mubr.f32.gmra.mxu0 %v4319_v36  ;;  %v10488_v36 = vld [vmem:[%s20060_s28 + $0xb88] sm:$0xff] }
 0x81d   :  { %4671 = vmatpush1.msra.mxu1 %v14730_v63  ;;  %v4327_v44 = vpop.f32.mrf.mxu0  ;;  %4837 = vmatpush1.msra.mxu0 %v10521_v39  ;;  %v10486_v39 = vld [vmem:[%s20060_s28 + $0xb78] sm:$0xff] }
 0x81e   :  { %4672 = vmatprep.subr.mxu1 %v14734_v14  ;;  %10463 = vmatprep.mubr.msk.f32.mxu1 %vm3462_vm3, %v4327_v44  ;;  %v10516_v14 = vld [vmem:[%s20060_s28 + $0xc68] sm:$0xff] }
 0x81f   :  { %4673 = vmatpush1.msra.mxu1 %v14738_v33  ;;  %10467 = vmatprep.mubr.msk.f32.mxu0 %vm3462_vm3, %v4327_v44  ;;  %v4331_v43 = vpop.f32.mrf.mxu0  ;;  %v10515_v33 = vld [vmem:[%s20060_s28 + $0xc60] sm:$0xff]  ;;  %v10490_v44 = vld [vmem:[%s20060_s28 + $0xb98] sm:$0xff] }
 0x820   :  { %4516 = vmatmul.mubr.f32.gmra.mxu1 %v4325_v62  ;;  %4603 = vmatmul.mubr.f32.gmra.mxu0 %v4325_v62  ;;  %v10485_v62 = vld [vmem:[%s20060_s28 + $0xb70] sm:$0xff] }
 0x821   :  { %v4333_v63 = vpop.f32.mrf.mxu0  ;;  %4923 = vmatprep.subr.mxu1 %v20058_v10  ;;  %4838 = vmatprep.subr.mxu0 %v10519_v20  ;;  %v10483_v20 = vld [vmem:[%s20060_s28 + $0xb60] sm:$0xff] }
 0x822   :  { %10464 = vmatprep.mubr.msk.f32.mxu1 %vm3462_vm3, %v4333_v63  ;;  %10468 = vmatprep.mubr.msk.f32.mxu0 %vm3462_vm3, %v4333_v63  ;;  %v10480_v63 = vld [vmem:[%s20060_s28 + $0xb48] sm:$0xff] }
 0x823   :  { %4839 = vmatpush1.msra.mxu0 %v10518_v42  ;;  %v10487_v42 = vld [vmem:[%s20060_s28 + $0xb80] sm:$0xff] }
 0x824   :  { %4522 = vmatmul.mubr.f32.gmra.mxu1 %v4331_v43  ;;  %4608 = vmatmul.mubr.f32.gmra.mxu0 %v4331_v43  ;;  %v10482_v43 = vld [vmem:[%s20060_s28 + $0xb58] sm:$0xff] }
 0x825   :  { %4706 = vmatprep.mubr.f32.mxu1 %v20058_v10  ;;  %4840 = vmatprep.subr.mxu0 %v10516_v14  ;;  %v10479_v14 = vld [vmem:[%s20060_s28 + $0xb40] sm:$0xff] }
 0x826   :  { %4841 = vmatpush1.msra.mxu0 %v10515_v33  ;;  %v10484_v33 = vld [vmem:[%s20060_s28 + $0xb68] sm:$0xff] }
 0x827   :  { %4842 = vmatprep.subr.mxu0 %v10513_v51  ;;  %v10567_v51 = vld [vmem:[%s20060_s28 + $0xe00] sm:$0xff] }
 0x828   :  { %10475 = vmatmul.mubr.msk.f32.vlgmr.msra.gmra.mxu1 %vm3066_vm2, %v10469_v7  ;;  %4843 = vmatpush1.msra.mxu0 %v10512_v25  ;;  %v10566_v7 = vld [vmem:[%s20060_s28 + $0xdf8] sm:$0xff]  ;;  %v10481_v25 = vld [vmem:[%s20060_s28 + $0xb50] sm:$0xff] }
 0x829   :  { %4712 = vmatprep.mubr.f32.mxu1 %v20058_v10  ;;  %4924 = vmatpush1.msra.mxu1 %v10526_v0  ;;  %v10564_v0 = vld [vmem:[%s20060_s28 + $0xde8] sm:$0xff] }
 0x82a   :  { %4925 = vmatprep.subr.mxu1 %v20058_v10  ;;  %4844 = vmatprep.subr.mxu0 %v10510_v31  ;;  %v10563_v31 = vld [vmem:[%s20060_s28 + $0xde0] sm:$0xff] }
 0x82b   :  { %4926 = vmatpush1.msra.mxu1 %v10523_v30  ;;  %4845 = vmatpush1.msra.mxu0 %v10509_v2  ;;  %v10568_v30 = vld [vmem:[%s20060_s28 + $0xe08] sm:$0xff]  ;;  %v10561_v2 = vld [vmem:[%s20060_s28 + $0xdd0] sm:$0xff] }
 0x82c   :  { %10476 = vmatmul.mubr.msk.f32.gmra.mxu1 %vm3066_vm2, %v10470_v57  ;;  %4927 = vmatprep.subr.mxu1 %v20058_v10  ;;  %v10560_v57 = vld [vmem:[%s20060_s28 + $0xdc8] sm:$0xff] }
 0x82d   :  { %4718 = vmatprep.mubr.f32.mxu1 %v20058_v10  ;;  %4928 = vmatpush1.msra.mxu1 %v10520_v3  ;;  %v10565_v3 = vld [vmem:[%s20060_s28 + $0xdf0] sm:$0xff] }
 0x82e   :  { %4929 = vmatprep.subr.mxu1 %v20058_v10  ;;  %4846 = vmatprep.subr.mxu0 %v10507_v4  ;;  %v10558_v4 = vld [vmem:[%s20060_s28 + $0xdb8] sm:$0xff] }
 0x82f   :  { %4930 = vmatpush1.msra.mxu1 %v10517_v28  ;;  %4847 = vmatpush1.msra.mxu0 %v10506_v61  ;;  %v10557_v28 = vld [vmem:[%s20060_s28 + $0xdb0] sm:$0xff]  ;;  %v10562_v61 = vld [vmem:[%s20060_s28 + $0xdd8] sm:$0xff] }
 0x830   :  { %10477 = vmatmul.mubr.msk.f32.gmra.mxu1 %vm3066_vm2, %v10471_v9  ;;  %4931 = vmatprep.subr.mxu1 %v20058_v10  ;;  %v10559_v9 = vld [vmem:[%s20060_s28 + $0xdc0] sm:$0xff] }
 0x831   :  { %4724 = vmatprep.mubr.f32.mxu1 %v20058_v10  ;;  %4932 = vmatpush1.msra.mxu1 %v10514_v19  ;;  %v10555_v19 = vld [vmem:[%s20060_s28 + $0xda0] sm:$0xff] }
 0x832   :  { %4933 = vmatprep.subr.mxu1 %v20058_v10  ;;  %4848 = vmatprep.subr.mxu0 %v10504_v52  ;;  %v10554_v52 = vld [vmem:[%s20060_s28 + $0xd98] sm:$0xff] }
 0x833   :  { %4934 = vmatpush1.msra.mxu1 %v10511_v18  ;;  %4849 = vmatpush1.msra.mxu0 %v10503_v50  ;;  %v10556_v18 = vld [vmem:[%s20060_s28 + $0xda8] sm:$0xff] }
 0x834   :  { %10478 = vmatmul.mubr.msk.f32.gmra.mxu1 %vm3066_vm2, %v10472_v21  ;;  %4935 = vmatprep.subr.mxu1 %v20058_v10  ;;  %v10552_v50 = vld [vmem:[%s20060_s28 + $0xd88] sm:$0xff]  ;;  %v10551_v21 = vld [vmem:[%s20060_s28 + $0xd80] sm:$0xff] }
 0x835   :  { %4936 = vmatpush1.msra.mxu1 %v10508_v27  ;;  %4850 = vmatprep.subr.mxu0 %v10501_v12  ;;  %v10553_v27 = vld [vmem:[%s20060_s28 + $0xd90] sm:$0xff] }
 0x836   :  { %4937 = vmatprep.subr.mxu1 %v20058_v10  ;;  %4851 = vmatpush1.msra.mxu0 %v10500_v45  ;;  %v10549_v12 = vld [vmem:[%s20060_s28 + $0xd70] sm:$0xff]  ;;  %v10548_v45 = vld [vmem:[%s20060_s28 + $0xd68] sm:$0xff] }
 0x837   :  { %4938 = vmatpush1.msra.mxu1 %v10505_v5  ;;  %4852 = vmatprep.subr.mxu0 %v10498_v11  ;;  %v10550_v5 = vld [vmem:[%s20060_s28 + $0xd78] sm:$0xff] }
 0x838   :  { %4939 = vmatprep.subr.mxu1 %v20058_v10  ;;  %4853 = vmatpush1.msra.mxu0 %v10497_v22  ;;  %v10546_v11 = vld [vmem:[%s20060_s28 + $0xd58] sm:$0xff]  ;;  %v10545_v22 = vld [vmem:[%s20060_s28 + $0xd50] sm:$0xff] }
 0x839   :  { %4940 = vmatpush1.msra.mxu1 %v10502_v26  ;;  %4854 = vmatprep.subr.mxu0 %v10495_v6  ;;  %v10547_v26 = vld [vmem:[%s20060_s28 + $0xd60] sm:$0xff] }
 0x83a   :  { %4941 = vmatprep.subr.mxu1 %v20058_v10  ;;  %4855 = vmatpush1.msra.mxu0 %v10494_v13  ;;  %v10543_v6 = vld [vmem:[%s20060_s28 + $0xd40] sm:$0xff]  ;;  %v10542_v13 = vld [vmem:[%s20060_s28 + $0xd38] sm:$0xff] }
 0x83b   :  { %4942 = vmatpush1.msra.mxu1 %v10499_v32  ;;  %4856 = vmatprep.subr.mxu0 %v10492_v49  ;;  %v10544_v32 = vld [vmem:[%s20060_s28 + $0xd48] sm:$0xff] }
 0x83c   :  { %4943 = vmatprep.subr.mxu1 %v20058_v10  ;;  %4857 = vmatpush1.msra.mxu0 %v10491_v34  ;;  %v10540_v49 = vld [vmem:[%s20060_s28 + $0xd28] sm:$0xff]  ;;  %v10539_v34 = vld [vmem:[%s20060_s28 + $0xd20] sm:$0xff] }
 0x83d   :  { %4944 = vmatpush1.msra.mxu1 %v10496_v58  ;;  %4858 = vmatprep.subr.mxu0 %v10489_v55  ;;  %v10541_v58 = vld [vmem:[%s20060_s28 + $0xd30] sm:$0xff] }
 0x83e   :  { %4945 = vmatprep.subr.mxu1 %v20058_v10  ;;  %4859 = vmatpush1.msra.mxu0 %v10488_v36  ;;  %v10537_v55 = vld [vmem:[%s20060_s28 + $0xd10] sm:$0xff]  ;;  %v10536_v36 = vld [vmem:[%s20060_s28 + $0xd08] sm:$0xff] }
 0x83f   :  { %4946 = vmatpush1.msra.mxu1 %v10493_v40  ;;  %4860 = vmatprep.subr.mxu0 %v10486_v39  ;;  %v10538_v40 = vld [vmem:[%s20060_s28 + $0xd18] sm:$0xff] }
 0x840   :  { %4947 = vmatprep.subr.mxu1 %v20058_v10  ;;  %4861 = vmatpush1.msra.mxu0 %v10485_v62  ;;  %v10534_v39 = vld [vmem:[%s20060_s28 + $0xcf8] sm:$0xff]  ;;  %v10533_v62 = vld [vmem:[%s20060_s28 + $0xcf0] sm:$0xff] }
 0x841   :  { %4948 = vmatpush1.msra.mxu1 %v10490_v44  ;;  %4862 = vmatprep.subr.mxu0 %v10483_v20  ;;  %v10535_v44 = vld [vmem:[%s20060_s28 + $0xd00] sm:$0xff] }
 0x842   :  { %4949 = vmatprep.subr.mxu1 %v20058_v10  ;;  %4863 = vmatpush1.msra.mxu0 %v10482_v43  ;;  %v10531_v20 = vld [vmem:[%s20060_s28 + $0xce0] sm:$0xff]  ;;  %v10530_v43 = vld [vmem:[%s20060_s28 + $0xcd8] sm:$0xff] }
 0x843   :  { %4950 = vmatpush1.msra.mxu1 %v10487_v42  ;;  %4864 = vmatprep.subr.mxu0 %v10480_v63  ;;  %v10532_v42 = vld [vmem:[%s20060_s28 + $0xce8] sm:$0xff] }
 0x844   :  { %4951 = vmatprep.subr.mxu1 %v20058_v10  ;;  %4865 = vmatpush1.msra.mxu0 %v10479_v14  ;;  %v10528_v63 = vld [vmem:[%s20060_s28 + $0xcc8] sm:$0xff]  ;;  %v10527_v14 = vld [vmem:[%s20060_s28 + $0xcc0] sm:$0xff] }
 0x845   :  { %4952 = vmatpush1.msra.mxu1 %v10484_v33  ;;  %4870 = vmatprep.subr.mxu0 %v10567_v51  ;;  %v10529_v33 = vld [vmem:[%s20060_s28 + $0xcd0] sm:$0xff]  ;;  %v5092_v51 = vld [vmem:[%s20061_s7 + $0xf8] sm:$0xff] }
 0x846   :  { %4953 = vmatprep.subr.mxu1 %v20058_v10  ;;  %4871 = vmatpush2.msra.mxu0 %v10566_v7  ;;  %v5150_v7 = vld [vmem:[%s20061_s7 + $0x2c8] sm:$0xff] }
 0x847   :  { %4954 = vmatpush1.msra.mxu1 %v10481_v25  ;;  %4872 = vmatprep.subr.mxu0 %v10564_v0  ;;  %v3730_v25 = vadd.f32 %v15751_v47, %v15739_v15 }
 0x848   :  { %4959 = vmatprep.subr.mxu1 %v20058_v10  ;;  %4873 = vmatpush2.msra.mxu0 %v10563_v31 }
 0x849   :  { %4960 = vmatpush2.msra.mxu1 %v10568_v30  ;;  %4874 = vmatprep.subr.mxu0 %v10561_v2  ;;  %v4219_v30 = vadd.f32 %v16117_v1, %v3730_v25  ;;  %v5140_v25 = vld [vmem:[%s20061_s7 + $0x278] sm:$0xff] }
 0x84a   :  { %4961 = vmatprep.subr.mxu1 %v20058_v10  ;;  %4875 = vmatpush2.msra.mxu0 %v10560_v57 }
 0x84b   :  { %4962 = vmatpush2.msra.mxu1 %v10565_v3  ;;  %4876 = vmatprep.subr.mxu0 %v10558_v4 }
 0x84c   :  { %4963 = vmatprep.subr.mxu1 %v20058_v10  ;;  %4877 = vmatpush2.msra.mxu0 %v10557_v28 }
 0x84d   :  { %4964 = vmatpush2.msra.mxu1 %v10562_v61  ;;  %4878 = vmatprep.subr.mxu0 %v10555_v19  ;;  %v3736_v61 = vadd.f32 %v15757_v41, %v15741_v56 }
 0x84e   :  { %4965 = vmatprep.subr.mxu1 %v20058_v10  ;;  %4879 = vmatpush2.msra.mxu0 %v10554_v52  ;;  %v3742_v52 = vadd.f32 %v15763_v8, %v15743_v24 }
 0x84f   :  { %4966 = vmatpush2.msra.mxu1 %v10559_v9  ;;  %4880 = vmatprep.subr.mxu0 %v10552_v50  ;;  %v4222_v15 = vadd.f32 %v16125_v48, %v3736_v61  ;;  %v5137_v61 = vld [vmem:[%s20061_s7 + $0x260] sm:$0xff] }
 0x850   :  { %4967 = vmatprep.subr.mxu1 %v20058_v10  ;;  %4881 = vmatpush2.msra.mxu0 %v10551_v21  ;;  %v4225_v56 = vadd.f32 %v16133_v37, %v3742_v52  ;;  %v5134_v52 = vld [vmem:[%s20061_s7 + $0x248] sm:$0xff] }
 0x851   :  { %4968 = vmatpush2.msra.mxu1 %v10556_v18  ;;  %4882 = vmatprep.subr.mxu0 %v10549_v12 }
 0x852   :  { %4969 = vmatprep.subr.mxu1 %v20058_v10  ;;  %4883 = vmatpush2.msra.mxu0 %v10548_v45 }
 0x853   :  { %4970 = vmatpush2.msra.mxu1 %v10553_v27  ;;  %4884 = vmatprep.subr.mxu0 %v10546_v11  ;;  %v3748_v27 = vadd.f32 %v15769_v60, %v15745_v38  ;;  %v5091_v38 = vld [vmem:[%s20061_s7 + $0xf0] sm:$0xff]  ;;  %v5149_v60 = vld [vmem:[%s20061_s7 + $0x2c0] sm:$0xff] }
 0x854   :  { %4971 = vmatprep.subr.mxu1 %v20058_v10  ;;  %4885 = vmatpush2.msra.mxu0 %v10545_v22 }
 0x855   :  { %4972 = vmatpush2.msra.mxu1 %v10550_v5  ;;  %4886 = vmatprep.subr.mxu0 %v10543_v6  ;;  %v4228_v45 = vadd.f32 %v16141_v46, %v3748_v27  ;;  %v5131_v27 = vld [vmem:[%s20061_s7 + $0x230] sm:$0xff] }
 0x856   :  { %4973 = vmatprep.subr.mxu1 %v20058_v10  ;;  %4887 = vmatpush2.msra.mxu0 %v10542_v13  ;;  %v5089_v13 = vld [vmem:[%s20061_s7 + $0xe0] sm:$0xff] }
 0x857   :  { %4974 = vmatpush2.msra.mxu1 %v10547_v26  ;;  %4888 = vmatprep.subr.mxu0 %v10540_v49  ;;  %v5088_v49 = vld [vmem:[%s20061_s7 + $0xd8] sm:$0xff] }
 0x858   :  { %4975 = vmatprep.subr.mxu1 %v20058_v10  ;;  %4889 = vmatpush2.msra.mxu0 %v10539_v34  ;;  %v5146_v34 = vld [vmem:[%s20061_s7 + $0x2a8] sm:$0xff] }
 0x859   :  { %4976 = vmatpush2.msra.mxu1 %v10544_v32  ;;  %4890 = vmatprep.subr.mxu0 %v10537_v55  ;;  %v5147_v32 = vld [vmem:[%s20061_s7 + $0x2b0] sm:$0xff] }
 0x85a   :  { %4977 = vmatprep.subr.mxu1 %v20058_v10  ;;  %4891 = vmatpush2.msra.mxu0 %v10536_v36  ;;  %v5087_v36 = vld [vmem:[%s20061_s7 + $0xd0] sm:$0xff] }
 0x85b   :  { %4978 = vmatpush2.msra.mxu1 %v10541_v58  ;;  %4892 = vmatprep.subr.mxu0 %v10534_v39  ;;  %v5086_v39 = vld [vmem:[%s20061_s7 + $0xc8] sm:$0xff] }
 0x85c   :  { %4979 = vmatprep.subr.mxu1 %v20058_v10  ;;  %4893 = vmatpush2.msra.mxu0 %v10533_v62  ;;  %v5144_v62 = vld [vmem:[%s20061_s7 + $0x298] sm:$0xff] }
 0x85d   :  { %4980 = vmatpush2.msra.mxu1 %v10538_v40  ;;  %4894 = vmatprep.subr.mxu0 %v10531_v20  ;;  %v5145_v40 = vld [vmem:[%s20061_s7 + $0x2a0] sm:$0xff] }
 0x85e   :  { %4981 = vmatprep.subr.mxu1 %v20058_v10  ;;  %4895 = vmatpush2.msra.mxu0 %v10530_v43  ;;  %v5085_v43 = vld [vmem:[%s20061_s7 + $0xc0] sm:$0xff] }
 0x85f   :  { %4982 = vmatpush2.msra.mxu1 %v10535_v44  ;;  %4896 = vmatprep.subr.mxu0 %v10528_v63  ;;  %v5084_v63 = vld [vmem:[%s20061_s7 + $0xb8] sm:$0xff] }
 0x860   :  { %4983 = vmatprep.subr.mxu1 %v20058_v10  ;;  %4897 = vmatpush2.msra.mxu0 %v10527_v14  ;;  %v5142_v14 = vld [vmem:[%s20061_s7 + $0x288] sm:$0xff] }
 0x861   :  { %4984 = vmatpush2.msra.mxu1 %v10532_v42  ;;  %5164 = vmatprep.subr.mxu0 %v5092_v51  ;;  %v5143_v42 = vld [vmem:[%s20061_s7 + $0x290] sm:$0xff]  ;;  %v5141_v51 = vld [vmem:[%s20061_s7 + $0x280] sm:$0xff] }
 0x862   :  { %4985 = vmatprep.subr.mxu1 %v20058_v10 }
 0x863   :  { %4986 = vmatpush2.msra.mxu1 %v10529_v33  ;;  %v5083_v33 = vld [vmem:[%s20061_s7 + $0xb0] sm:$0xff] }
 0x864   :  { %5259 = vmatprep.subr.mxu1 %v5150_v7  ;;  %v5082_v7 = vld [vmem:[%s20061_s7 + $0xa8] sm:$0xff] }
 0x8d7   :  { %v4505_v0 = vpop.f32.mrf.mxu1  ;;  %v4594_v31 = vpop.f32.mrf.mxu0 }
 0x8d8   :  { %v16486_v2 = vadd.f32 %v4505_v0, %v16113_v54  ;;  %v16489_v57 = vadd.f32 %v4594_v31, %v16115_v17  ;;  %v5081_v0 = vld [vmem:[%s20061_s7 + $0xa0] sm:$0xff]  ;;  %v5139_v31 = vld [vmem:[%s20061_s7 + $0x270] sm:$0xff] }
 0x8d9   :  { %v4507_v3 = vpop.f32.mrf.mxu1  ;;  %v4596_v4 = vpop.f32.mrf.mxu0 }
 0x8da   :  { %v16491_v28 = vadd.f32 %v4507_v3, %v4219_v30  ;;  %v5080_v30 = vld [vmem:[%s20061_s7 + $0x98] sm:$0xff]  ;;  %v5138_v3 = vld [vmem:[%s20061_s7 + $0x268] sm:$0xff]  ;;  %v5079_v4 = vld [vmem:[%s20061_s7 + $0x90] sm:$0xff] }
 0x8dc   :  { %v4511_v9 = vpop.f32.mrf.mxu1  ;;  %v4599_v19 = vpop.f32.mrf.mxu0 }
 0x8dd   :  { %v16497_v47 = vadd.f32 %v4511_v9, %v16120_v29  ;;  %v16500_v54 = vadd.f32 %v4599_v19, %v16123_v23  ;;  %v5078_v9 = vld [vmem:[%s20061_s7 + $0x88] sm:$0xff]  ;;  %v5136_v19 = vld [vmem:[%s20061_s7 + $0x258] sm:$0xff] }
 0x8de   :  { %v4513_v1 = vpop.f32.mrf.mxu1  ;;  %v4601_v17 = vpop.f32.mrf.mxu0 }
 0x8df   :  { %v16504_v18 = vadd.f32 %v4513_v1, %v4222_v15  ;;  %v5077_v15 = vld [vmem:[%s20061_s7 + $0x80] sm:$0xff]  ;;  %v5135_v1 = vld [vmem:[%s20061_s7 + $0x250] sm:$0xff]  ;;  %v5076_v17 = vld [vmem:[%s20061_s7 + $0x78] sm:$0xff] }
 0x8e0   :  { %v4517_v50 = vpop.f32.mrf.mxu1  ;;  %v4604_v21 = vpop.f32.mrf.mxu0 }
 0x8e1   :  { %v16508_v41 = vadd.f32 %v4517_v50, %v16128_v35  ;;  %v16511_v29 = vadd.f32 %v4604_v21, %v16131_v16  ;;  %v5075_v50 = vld [vmem:[%s20061_s7 + $0x70] sm:$0xff]  ;;  %v5133_v21 = vld [vmem:[%s20061_s7 + $0x240] sm:$0xff] }
 0x8e2   :  { %v4519_v48 = vpop.f32.mrf.mxu1  ;;  %v4606_v23 = vpop.f32.mrf.mxu0 }
 0x8e3   :  { %v16515_v12 = vadd.f32 %v4519_v48, %v4225_v56  ;;  %v5074_v56 = vld [vmem:[%s20061_s7 + $0x68] sm:$0xff]  ;;  %v5132_v48 = vld [vmem:[%s20061_s7 + $0x238] sm:$0xff]  ;;  %v5073_v23 = vld [vmem:[%s20061_s7 + $0x60] sm:$0xff] }
 0x8e4   :  { %v4523_v24 = vpop.f32.mrf.mxu1  ;;  %v4609_v8 = vpop.f32.mrf.mxu0 }
 0x8e5   :  { %v16519_v5 = vadd.f32 %v4523_v24, %v16136_v53  ;;  %v16522_v35 = vadd.f32 %v4609_v8, %v16139_v59  ;;  %v5090_v53 = vld [vmem:[%s20061_s7 + $0xe8] sm:$0xff]  ;;  %v5148_v59 = vld [vmem:[%s20061_s7 + $0x2b8] sm:$0xff]  ;;  %v5071_v8 = vld [vmem:[%s20061_s7 + $0x50] sm:$0xff] }
 0x8e6   :  { %v4525_v37 = vpop.f32.mrf.mxu1  ;;  %v4611_v16 = vpop.f32.mrf.mxu0  ;;  %v5072_v24 = vld [vmem:[%s20061_s7 + $0x58] sm:$0xff] }
 0x8e7   :  { %v16524_v11 = vadd.f32 %v4525_v37, %v4228_v45  ;;  %v5070_v45 = vld [vmem:[%s20061_s7 + $0x48] sm:$0xff]  ;;  %v5069_v37 = vld [vmem:[%s20061_s7 + $0x40] sm:$0xff]  ;;  %v5068_v16 = vld [vmem:[%s20061_s7 + $0x38] sm:$0xff] }
 0x8e8   :  { %v4708_v22 = vpop.f32.mrf.mxu1 }
 0x8ea   :  { %v4710_v26 = vpop.f32.mrf.mxu1 }
 0x8eb   :  { %10569 = vmatprep.mubr.msk.f32.mxu0 %vm3462_vm3, %v4710_v26  ;;  %10573 = vmatprep.mubr.msk.f32.mxu1 %vm3462_vm3, %v4710_v26  ;;  %v5066_v26 = vld [vmem:[%s20061_s7 + $0x28] sm:$0xff] }
 0x8ec   :  { %v4714_v46 = vpop.f32.mrf.mxu1  ;;  %4899 = vmatmul.mubr.f32.vlgmr.msra.gmra.mxu0 %v4708_v22  ;;  %4988 = vmatmul.mubr.f32.vlgmr.msra.gmra.mxu1 %v4708_v22  ;;  %v5067_v22 = vld [vmem:[%s20061_s7 + $0x30] sm:$0xff] }
 0x8ed   :  { %5165 = vmatpush1.msra.mxu0 %v5091_v38  ;;  %5260 = vmatpush1.msra.mxu1 %v5149_v60  ;;  %v5065_v38 = vld [vmem:[%s20061_s7 + $0x20] sm:$0xff]  ;;  %v5064_v60 = vld [vmem:[%s20061_s7 + $0x18] sm:$0xff] }
 0x8ee   :  { %v4716_v6 = vpop.f32.mrf.mxu1  ;;  %5166 = vmatprep.subr.mxu0 %v5090_v53  ;;  %5261 = vmatprep.subr.mxu1 %v5148_v59  ;;  %v5063_v53 = vld [vmem:[%s20061_s7 + $0x10] sm:$0xff]  ;;  %v5062_v59 = vld [vmem:[%s20061_s7 + $0x8] sm:$0xff] }
 0x8ef   :  { %10570 = vmatprep.mubr.msk.f32.mxu0 %vm3462_vm3, %v4716_v6  ;;  %10574 = vmatprep.mubr.msk.f32.mxu1 %vm3462_vm3, %v4716_v6  ;;  %v5124_v6 = vld [vmem:[%s20061_s7 + $0x1f8] sm:$0xff] }
 0x8f0   :  { %v4720_v58 = vpop.f32.mrf.mxu1  ;;  %4905 = vmatmul.mubr.f32.gmra.mxu0 %v4714_v46  ;;  %4993 = vmatmul.mubr.f32.gmra.mxu1 %v4714_v46  ;;  %v5061_v46 = vld [vmem:[%s20061_s7] sm:$0xff] }
 0x8f1   :  { %5167 = vmatpush1.msra.mxu0 %v5089_v13  ;;  %5262 = vmatpush1.msra.mxu1 %v5147_v32  ;;  %v5123_v13 = vld [vmem:[%s20061_s7 + $0x1f0] sm:$0xff]  ;;  %v5122_v32 = vld [vmem:[%s20061_s7 + $0x1e8] sm:$0xff] }
 0x8f2   :  { %v4722_v55 = vpop.f32.mrf.mxu1  ;;  %5168 = vmatprep.subr.mxu0 %v5088_v49  ;;  %5263 = vmatprep.subr.mxu1 %v5146_v34  ;;  %v5121_v49 = vld [vmem:[%s20061_s7 + $0x1e0] sm:$0xff]  ;;  %v5120_v34 = vld [vmem:[%s20061_s7 + $0x1d8] sm:$0xff] }
 0x8f3   :  { %10571 = vmatprep.mubr.msk.f32.mxu0 %vm3462_vm3, %v4722_v55  ;;  %10575 = vmatprep.mubr.msk.f32.mxu1 %vm3462_vm3, %v4722_v55  ;;  %v5118_v55 = vld [vmem:[%s20061_s7 + $0x1c8] sm:$0xff] }
 0x8f4   :  { %v4726_v44 = vpop.f32.mrf.mxu1  ;;  %4911 = vmatmul.mubr.f32.gmra.mxu0 %v4720_v58  ;;  %4998 = vmatmul.mubr.f32.gmra.mxu1 %v4720_v58  ;;  %v5119_v58 = vld [vmem:[%s20061_s7 + $0x1d0] sm:$0xff] }
 0x8f5   :  { %5169 = vmatpush1.msra.mxu0 %v5087_v36  ;;  %5264 = vmatpush1.msra.mxu1 %v5145_v40  ;;  %v5117_v36 = vld [vmem:[%s20061_s7 + $0x1c0] sm:$0xff]  ;;  %v5116_v40 = vld [vmem:[%s20061_s7 + $0x1b8] sm:$0xff] }
 0x8f6   :  { %v4728_v20 = vpop.f32.mrf.mxu1  ;;  %5170 = vmatprep.subr.mxu0 %v5086_v39  ;;  %5265 = vmatprep.subr.mxu1 %v5144_v62  ;;  %v5115_v39 = vld [vmem:[%s20061_s7 + $0x1b0] sm:$0xff]  ;;  %v5114_v62 = vld [vmem:[%s20061_s7 + $0x1a8] sm:$0xff] }
 0x8f7   :  { %10572 = vmatprep.mubr.msk.f32.mxu0 %vm3462_vm3, %v4728_v20  ;;  %10576 = vmatprep.mubr.msk.f32.mxu1 %vm3462_vm3, %v4728_v20  ;;  %v5112_v20 = vld [vmem:[%s20061_s7 + $0x198] sm:$0xff] }
 0x8f8   :  { %4917 = vmatmul.mubr.f32.gmra.mxu0 %v4726_v44  ;;  %5003 = vmatmul.mubr.f32.gmra.mxu1 %v4726_v44  ;;  %v5113_v44 = vld [vmem:[%s20061_s7 + $0x1a0] sm:$0xff] }
 0x8f9   :  { %5171 = vmatpush1.msra.mxu0 %v5085_v43  ;;  %5266 = vmatpush1.msra.mxu1 %v5143_v42  ;;  %v5111_v43 = vld [vmem:[%s20061_s7 + $0x190] sm:$0xff]  ;;  %v5110_v42 = vld [vmem:[%s20061_s7 + $0x188] sm:$0xff] }
 0x8fa   :  { %5172 = vmatprep.subr.mxu0 %v5084_v63  ;;  %5267 = vmatprep.subr.mxu1 %v5142_v14  ;;  %v5109_v63 = vld [vmem:[%s20061_s7 + $0x180] sm:$0xff]  ;;  %v5108_v14 = vld [vmem:[%s20061_s7 + $0x178] sm:$0xff] }
 0x8fb   :  { %5173 = vmatpush1.msra.mxu0 %v5083_v33  ;;  %5268 = vmatpush1.msra.mxu1 %v5141_v51  ;;  %v5107_v33 = vld [vmem:[%s20061_s7 + $0x170] sm:$0xff]  ;;  %v5106_v51 = vld [vmem:[%s20061_s7 + $0x168] sm:$0xff] }
 0x8fc   :  { %5174 = vmatprep.subr.mxu0 %v5082_v7  ;;  %5269 = vmatprep.subr.mxu1 %v5140_v25  ;;  %v5105_v7 = vld [vmem:[%s20061_s7 + $0x160] sm:$0xff]  ;;  %v5104_v25 = vld [vmem:[%s20061_s7 + $0x158] sm:$0xff] }
 0x8fd   :  { %5175 = vmatpush1.msra.mxu0 %v5081_v0  ;;  %5270 = vmatpush1.msra.mxu1 %v5139_v31  ;;  %v5103_v0 = vld [vmem:[%s20061_s7 + $0x150] sm:$0xff]  ;;  %v5102_v31 = vld [vmem:[%s20061_s7 + $0x148] sm:$0xff] }
 0x8fe   :  { %5176 = vmatprep.subr.mxu0 %v5080_v30  ;;  %5271 = vmatprep.subr.mxu1 %v5138_v3  ;;  %v5101_v30 = vld [vmem:[%s20061_s7 + $0x140] sm:$0xff]  ;;  %v5130_v3 = vld [vmem:[%s20061_s7 + $0x228] sm:$0xff] }
 0x8ff   :  { %5177 = vmatpush1.msra.mxu0 %v5079_v4  ;;  %5272 = vmatpush1.msra.mxu1 %v5137_v61  ;;  %v5100_v4 = vld [vmem:[%s20061_s7 + $0x138] sm:$0xff]  ;;  %v5129_v61 = vld [vmem:[%s20061_s7 + $0x220] sm:$0xff] }
 0x900   :  { %5178 = vmatprep.subr.mxu0 %v5078_v9  ;;  %5273 = vmatprep.subr.mxu1 %v5136_v19  ;;  %v5099_v9 = vld [vmem:[%s20061_s7 + $0x130] sm:$0xff]  ;;  %v5128_v19 = vld [vmem:[%s20061_s7 + $0x218] sm:$0xff] }
 0x901   :  { %5179 = vmatpush1.msra.mxu0 %v5077_v15  ;;  %5274 = vmatpush1.msra.mxu1 %v5135_v1  ;;  %v5098_v15 = vld [vmem:[%s20061_s7 + $0x128] sm:$0xff]  ;;  %v5127_v1 = vld [vmem:[%s20061_s7 + $0x210] sm:$0xff] }
 0x902   :  { %5180 = vmatprep.subr.mxu0 %v5076_v17  ;;  %5275 = vmatprep.subr.mxu1 %v5134_v52  ;;  %v5097_v17 = vld [vmem:[%s20061_s7 + $0x120] sm:$0xff]  ;;  %v5126_v52 = vld [vmem:[%s20061_s7 + $0x208] sm:$0xff] }
 0x903   :  { %5181 = vmatpush1.msra.mxu0 %v5075_v50  ;;  %5276 = vmatpush1.msra.mxu1 %v5133_v21  ;;  %v5096_v50 = vld [vmem:[%s20061_s7 + $0x118] sm:$0xff]  ;;  %v5125_v21 = vld [vmem:[%s20061_s7 + $0x200] sm:$0xff] }
 0x904   :  { %5182 = vmatprep.subr.mxu0 %v5074_v56  ;;  %5277 = vmatprep.subr.mxu1 %v5132_v48  ;;  %v5095_v56 = vld [vmem:[%s20061_s7 + $0x110] sm:$0xff]  ;;  %v10612_v48 = vld [vmem:[%s20061_s7 + $0x3c8] sm:$0xff] }
 0x905   :  { %5183 = vmatpush1.msra.mxu0 %v5073_v23  ;;  %5278 = vmatpush1.msra.mxu1 %v5131_v27  ;;  %v5094_v23 = vld [vmem:[%s20061_s7 + $0x108] sm:$0xff]  ;;  %v5093_v27 = vld [vmem:[%s20061_s7 + $0x100] sm:$0xff] }
 0x906   :  { %5184 = vmatprep.subr.mxu0 %v5072_v24  ;;  %5317 = vmatprep.mubr.f32.mxu1 %v20058_v10  ;;  %v10670_v24 = vld [vmem:[%s20061_s7 + $0x598] sm:$0xff] }
 0x907   :  { %5185 = vmatpush1.msra.mxu0 %v5071_v8  ;;  %5279 = vmatprep.subr.mxu1 %v5130_v3  ;;  %v5020_v8 = vld [vmem:[%s19930_s8] sm:$0x7] }
 0x908   :  { %5186 = vmatprep.subr.mxu0 %v5070_v45  ;;  %5280 = vmatpush1.msra.mxu1 %v5129_v61  ;;  %v20062_v45 = vld [vmem:[#allocation10_spill] sm:$0xff] }
 0x909   :  { %5187 = vmatpush1.msra.mxu0 %v5069_v37  ;;  %5281 = vmatprep.subr.mxu1 %v5128_v19  ;;  %v20063_v37 = vsub.s32 2, %v20062_v45  ;;  %v10667_v61 = vld [vmem:[%s20061_s7 + $0x580] sm:$0xff] }
 0x90a   :  { %5188 = vmatprep.subr.mxu0 %v5068_v16  ;;  %5282 = vmatpush1.msra.mxu1 %v5127_v1  ;;  %v10606_v1 = vld [vmem:[%s20061_s7 + $0x398] sm:$0xff] }
 0x90b   :  { %5189 = vmatpush1.msra.mxu0 %v5067_v22  ;;  %5283 = vmatprep.subr.mxu1 %v5126_v52  ;;  %v16810_v16 = vrot.slane %v5020_v8, %v20063_v37 }
 0x90c   :  { %5190 = vmatprep.subr.mxu0 %v5066_v26  ;;  %5284 = vmatpush1.msra.mxu1 %v5125_v21  ;;  %v20064_v26 = vld [vmem:[#allocation12_spill] sm:$0xff] }
 0x90d   :  { %5191 = vmatpush1.msra.mxu0 %v5065_v38  ;;  %5433 = vmatprep.subr.mxu1 %v10612_v48  ;;  %v16813_v38 = vrot.slane %v5020_v8, %v20064_v26  ;;  %v10605_v21 = vld [vmem:[%s20061_s7 + $0x390] sm:$0xff] }
 0x90e   :  { %5192 = vmatprep.subr.mxu0 %v5064_v60 }
 0x90f   :  { %5193 = vmatpush1.msra.mxu0 %v5063_v53 }
 0x910   :  { %5194 = vmatprep.subr.mxu0 %v5062_v59 }
 0x911   :  { %5195 = vmatpush1.msra.mxu0 %v5061_v46  ;;  %v20065_v46 = vld [vmem:[#allocation13_spill] sm:$0xff] }
 0x912   :  { %5196 = vmatprep.subr.mxu0 %v5124_v6  ;;  %v16818_v6 = vrot.slane %v5020_v8, %v20065_v46  ;;  %v10665_v8 = vld [vmem:[%s20061_s7 + $0x570] sm:$0xff] }
 0x913   :  { %5197 = vmatpush2.msra.mxu0 %v5123_v13 }
 0x914   :  { %5198 = vmatprep.subr.mxu0 %v5122_v32 }
 0x915   :  { %5199 = vmatpush2.msra.mxu0 %v5121_v49 }
 0x916   :  { %5200 = vmatprep.subr.mxu0 %v5120_v34 }
 0x917   :  { %5201 = vmatpush2.msra.mxu0 %v5119_v58 }
 0x918   :  { %5202 = vmatprep.subr.mxu0 %v5118_v55 }
 0x919   :  { %5203 = vmatpush2.msra.mxu0 %v5117_v36 }
 0x91a   :  { %5204 = vmatprep.subr.mxu0 %v5116_v40 }
 0x91b   :  { %5205 = vmatpush2.msra.mxu0 %v5115_v39 }
 0x91c   :  { %5206 = vmatprep.subr.mxu0 %v5114_v62 }
 0x91d   :  { %5207 = vmatpush2.msra.mxu0 %v5113_v44 }
 0x91e   :  { %5208 = vmatprep.subr.mxu0 %v5112_v20 }
 0x91f   :  { %5209 = vmatpush2.msra.mxu0 %v5111_v43 }
 0x920   :  { %5210 = vmatprep.subr.mxu0 %v5110_v42 }
 0x921   :  { %5211 = vmatpush2.msra.mxu0 %v5109_v63  ;;  %v10609_v63 = vld [vmem:[%s20061_s7 + $0x3b0] sm:$0xff] }
 0x922   :  { %5212 = vmatprep.subr.mxu0 %v5108_v14 }
 0x923   :  { %5213 = vmatpush2.msra.mxu0 %v5107_v33 }
 0x924   :  { %5214 = vmatprep.subr.mxu0 %v5106_v51  ;;  %v10669_v51 = vld [vmem:[%s20061_s7 + $0x590] sm:$0xff] }
 0x925   :  { %5215 = vmatpush2.msra.mxu0 %v5105_v7 }
 0x926   :  { %5216 = vmatprep.subr.mxu0 %v5104_v25 }
 0x927   :  { %5217 = vmatpush2.msra.mxu0 %v5103_v0  ;;  %v10668_v0 = vld [vmem:[%s20061_s7 + $0x588] sm:$0xff] }
 0x928   :  { %5218 = vmatprep.subr.mxu0 %v5102_v31 }
 0x929   :  { %5219 = vmatpush2.msra.mxu0 %v5101_v30 }
 0x92a   :  { %5220 = vmatprep.subr.mxu0 %v5100_v4 }
 0x92b   :  { %5221 = vmatpush2.msra.mxu0 %v5099_v9 }
 0x92c   :  { %5222 = vmatprep.subr.mxu0 %v5098_v15 }
 0x92d   :  { %5223 = vmatpush2.msra.mxu0 %v5097_v17 }
 0x92e   :  { %5224 = vmatprep.subr.mxu0 %v5096_v50 }
 0x92f   :  { %5225 = vmatpush2.msra.mxu0 %v5095_v56 }
 0x930   :  { %5226 = vmatprep.subr.mxu0 %v5094_v23 }
 0x931   :  { %5227 = vmatpush2.msra.mxu0 %v5093_v27 }
 0x932   :  { %5528 = vmatprep.subr.mxu0 %v10670_v24  ;;  %v10604_v24 = vld [vmem:[%s20061_s7 + $0x388] sm:$0xff] }
 0x9ac   :  { %v4900_v22 = vpop.f32.mrf.mxu0  ;;  %v4989_v60 = vpop.f32.mrf.mxu1 }
 0x9ad   :  { %v5008_v53 = vadd.f32 %v4900_v22, %v16486_v2  ;;  %v5010_v59 = vadd.f32 %v4989_v60, %v16489_v57  ;;  %v10611_v57 = vld [vmem:[%s20061_s7 + $0x3c0] sm:$0xff] }
 0x9ae   :  { %v4902_v13 = vpop.f32.mrf.mxu0  ;;  %v4991_v32 = vpop.f32.mrf.mxu1 }
 0x9af   :  { %v5039_v49 = vadd.f32 %v16810_v16, %v5010_v59  ;;  %v5009_v34 = vadd.f32 %v4902_v13, %v16491_v28  ;;  %v5037_v58 = vadd.f32 %v16813_v38, %v5008_v53  ;;  %v10610_v28 = vld [vmem:[%s20061_s7 + $0x3b8] sm:$0xff]  ;;  %v10603_v13 = vld [vmem:[%s20061_s7 + $0x380] sm:$0xff] }
 0x9b0   :  { %v4906_v55 = vpop.f32.mrf.mxu0  ;;  %v4994_v36 = vpop.f32.mrf.mxu1  ;;  %v10602_v32 = vld [vmem:[%s20061_s7 + $0x378] sm:$0xff] }
 0x9b1   :  { %v16823_v40 = vmax.f32 %v5039_v49, 0.0  ;;  %v5038_v2 = vadd.f32 %v16818_v6, %v5009_v34  ;;  %v5011_v39 = vadd.f32 %v4906_v55, %v16497_v47  ;;  %v5013_v62 = vadd.f32 %v4994_v36, %v16500_v54  ;;  %v10601_v49 = vld [vmem:[%s20061_s7 + $0x370] sm:$0xff]  ;;  %v10662_v34 = vld [vmem:[%s20061_s7 + $0x558] sm:$0xff] }
 0x9b2   :  { %v4908_v44 = vpop.f32.mrf.mxu0  ;;  %v4996_v20 = vpop.f32.mrf.mxu1  ;;  %v16842_v47 = vmax.f32 %v5037_v58, 0.0 }
 0x9b3   :  { %v16834_v43 = vmax.f32 %v5038_v2, 0.0  ;;  %v5012_v42 = vadd.f32 %v4908_v44, %v16504_v18  ;;  %10577 = vmatmul.mubr.msk.f32.vlgmr.msra.gmra.mxu1 %vm5151_vm4, %v16823_v40  ;;  %v5042_v54 = vadd.f32 %v16810_v16, %v5013_v62  ;;  %v10608_v18 = vld [vmem:[%s20061_s7 + $0x3a8] sm:$0xff]  ;;  %v5040_v31 = vadd.f32 %v16813_v38, %v5011_v39  ;;  %v10661_v2 = vld [vmem:[%s20061_s7 + $0x550] sm:$0xff]  ;;  %v10599_v39 = vld [vmem:[%s20061_s7 + $0x360] sm:$0xff] }
 0x9b4   :  { %5434 = vmatpush1.msra.mxu1 %v10611_v57  ;;  %v4912_v14 = vpop.f32.mrf.mxu0  ;;  %v4999_v33 = vpop.f32.mrf.mxu1  ;;  %5323 = vmatprep.mubr.f32.mxu1 %v20058_v10  ;;  %v10598_v44 = vld [vmem:[%s20061_s7 + $0x358] sm:$0xff]  ;;  %v10597_v20 = vld [vmem:[%s20061_s7 + $0x350] sm:$0xff] }
 0x9b5   :  { %v5041_v7 = vadd.f32 %v16818_v6, %v5012_v42  ;;  %v5016_v25 = vadd.f32 %v4999_v33, %v16511_v29  ;;  %5435 = vmatprep.subr.mxu1 %v10610_v28  ;;  %5228 = vmatprep.mubr.f32.mxu0 %v16834_v43  ;;  %v16859_v30 = vmax.f32 %v5042_v54, 0.0  ;;  %v10607_v29 = vld [vmem:[%s20061_s7 + $0x3a0] sm:$0xff]  ;;  %v5014_v17 = vadd.f32 %v4912_v14, %v16508_v41  ;;  %v10658_v28 = vld [vmem:[%s20061_s7 + $0x538] sm:$0xff]  ;;  %v10657_v54 = vld [vmem:[%s20061_s7 + $0x530] sm:$0xff] }
 0x9b6   :  { %5436 = vmatpush1.msra.mxu1 %v10609_v63  ;;  %v4914_v3 = vpop.f32.mrf.mxu0  ;;  %v5001_v4 = vpop.f32.mrf.mxu1  ;;  %5229 = vmatmul.mubr.f32.vlgmr.msra.gmra.mxu0 %v16842_v47  ;;  %v16885_v48 = vmax.f32 %v5040_v31, 0.0  ;;  %v10596_v63 = vld [vmem:[%s20061_s7 + $0x348] sm:$0xff]  ;;  %v10595_v14 = vld [vmem:[%s20061_s7 + $0x340] sm:$0xff]  ;;  %v10653_v31 = vld [vmem:[%s20061_s7 + $0x510] sm:$0xff] }
 0x9b7   :  { %v16868_v9 = vmax.f32 %v5041_v7, 0.0  ;;  %v5045_v19 = vadd.f32 %v16810_v16, %v5016_v25  ;;  %v5015_v15 = vadd.f32 %v4914_v3, %v16515_v12  ;;  %5437 = vmatprep.subr.mxu1 %v10608_v18  ;;  %5529 = vmatpush1.msra.mxu0 %v10669_v51  ;;  %v10666_v12 = vld [vmem:[%s20061_s7 + $0x578] sm:$0xff]  ;;  %v5043_v60 = vadd.f32 %v16813_v38, %v5014_v17  ;;  %v10656_v33 = vld [vmem:[%s20061_s7 + $0x528] sm:$0xff]  ;;  %v10655_v51 = vld [vmem:[%s20061_s7 + $0x520] sm:$0xff] }
 0x9b8   :  { %10578 = vmatmul.mubr.msk.f32.gmra.mxu1 %vm5151_vm4, %v16859_v30  ;;  %5530 = vmatprep.subr.mxu0 %v10668_v0  ;;  %v4918_v52 = vpop.f32.mrf.mxu0  ;;  %v5004_v50 = vpop.f32.mrf.mxu1  ;;  %v10594_v18 = vld [vmem:[%s20061_s7 + $0x338] sm:$0xff]  ;;  %v10593_v7 = vld [vmem:[%s20061_s7 + $0x330] sm:$0xff]  ;;  %v10592_v0 = vld [vmem:[%s20061_s7 + $0x328] sm:$0xff] }
 0x9b9   :  { %v5044_v56 = vadd.f32 %v16818_v6, %v5015_v15  ;;  %5438 = vmatpush1.msra.mxu1 %v10607_v29  ;;  %5531 = vmatpush1.msra.mxu0 %v10667_v61  ;;  %v16887_v41 = vmax.f32 %v5045_v19, 0.0  ;;  %v5019_v23 = vadd.f32 %v5004_v50, %v16522_v35  ;;  %v10664_v35 = vld [vmem:[%s20061_s7 + $0x568] sm:$0xff]  ;;  %v16926_v55 = vmax.f32 %v5043_v60, 0.0  ;;  %v10654_v25 = vld [vmem:[%s20061_s7 + $0x518] sm:$0xff]  ;;  %v10591_v3 = vld [vmem:[%s20061_s7 + $0x320] sm:$0xff] }
 0x9ba   :  { %5439 = vmatprep.subr.mxu1 %v10606_v1  ;;  %5234 = vmatprep.mubr.f32.mxu0 %v16868_v9  ;;  %v4920_v27 = vpop.f32.mrf.mxu0  ;;  %v5006_v37 = vpop.f32.mrf.mxu1  ;;  %v10652_v4 = vld [vmem:[%s20061_s7 + $0x508] sm:$0xff]  ;;  %v10590_v29 = vld [vmem:[%s20061_s7 + $0x318] sm:$0xff]  ;;  %v10651_v61 = vld [vmem:[%s20061_s7 + $0x500] sm:$0xff] }
 0x9bb   :  { %5440 = vmatpush1.msra.mxu1 %v10605_v21  ;;  %5532 = vmatprep.subr.mxu0 %v10666_v12  ;;  %v5018_v22 = vadd.f32 %v4920_v27, %v16524_v11  ;;  %v16902_v53 = vmax.f32 %v5044_v56, 0.0  ;;  %v5048_v59 = vadd.f32 %v16810_v16, %v5019_v23  ;;  %v10663_v11 = vld [vmem:[%s20061_s7 + $0x560] sm:$0xff]  ;;  %v5017_v16 = vadd.f32 %v4918_v52, %v16519_v5  ;;  %v10600_v5 = vld [vmem:[%s20061_s7 + $0x368] sm:$0xff]  ;;  %v10589_v19 = vld [vmem:[%s20061_s7 + $0x310] sm:$0xff] }
 0x9bc   :  { %5235 = vmatmul.mubr.f32.gmra.mxu0 %v16885_v48  ;;  %5329 = vmatprep.mubr.f32.mxu1 %v20058_v10  ;;  %v10650_v15 = vld [vmem:[%s20061_s7 + $0x4f8] sm:$0xff]  ;;  %v10588_v1 = vld [vmem:[%s20061_s7 + $0x308] sm:$0xff]  ;;  %v10649_v17 = vld [vmem:[%s20061_s7 + $0x4f0] sm:$0xff] }
 0x9bd   :  { %5441 = vmatprep.subr.mxu1 %v10604_v24  ;;  %5533 = vmatpush1.msra.mxu0 %v10665_v8  ;;  %v5047_v58 = vadd.f32 %v16818_v6, %v5018_v22  ;;  %v16928_v36 = vmax.f32 %v5048_v59, 0.0  ;;  %v10660_v6 = vld [vmem:[%s20061_s7 + $0x548] sm:$0xff]  ;;  %v5046_v57 = vadd.f32 %v16813_v38, %v5017_v16  ;;  %v10659_v38 = vld [vmem:[%s20061_s7 + $0x540] sm:$0xff]  ;;  %v10586_v21 = vld [vmem:[%s20061_s7 + $0x2f8] sm:$0xff] }
 0x9be   :  { %10579 = vmatmul.mubr.msk.f32.gmra.mxu1 %vm5151_vm4, %v16887_v41  ;;  %5534 = vmatprep.subr.mxu0 %v10664_v35  ;;  %v10587_v52 = vld [vmem:[%s20061_s7 + $0x300] sm:$0xff]  ;;  %v10648_v50 = vld [vmem:[%s20061_s7 + $0x4e8] sm:$0xff]  ;;  %v10585_v56 = vld [vmem:[%s20061_s7 + $0x2f0] sm:$0xff] }
 0x9bf   :  { %5442 = vmatpush1.msra.mxu1 %v10603_v13  ;;  %5535 = vmatpush1.msra.mxu0 %v10663_v11  ;;  %v16946_v62 = vmax.f32 %v5047_v58, 0.0  ;;  %v16963_v42 = vmax.f32 %v5046_v57, 0.0  ;;  %v10647_v12 = vld [vmem:[%s20061_s7 + $0x4e0] sm:$0xff]  ;;  %v10646_v23 = vld [vmem:[%s20061_s7 + $0x4d8] sm:$0xff]  ;;  %v10584_v27 = vld [vmem:[%s20061_s7 + $0x2e8] sm:$0xff] }
 0x9c0   :  { %5443 = vmatprep.subr.mxu1 %v10602_v32  ;;  %5240 = vmatprep.mubr.f32.mxu0 %v16902_v53  ;;  %v10645_v24 = vld [vmem:[%s20061_s7 + $0x4d0] sm:$0xff]  ;;  %v10583_v8 = vld [vmem:[%s20061_s7 + $0x2e0] sm:$0xff]  ;;  %v10706_v37 = vld [vmem:[%s20061_s7 + $0x698] sm:$0xff] }
 0x9c1   :  { %5444 = vmatpush1.msra.mxu1 %v10601_v49  ;;  %5536 = vmatprep.subr.mxu0 %v10662_v34  ;;  %v10582_v22 = vld [vmem:[%s20061_s7 + $0x2d8] sm:$0xff]  ;;  %v10705_v35 = vld [vmem:[%s20061_s7 + $0x690] sm:$0xff]  ;;  %v10704_v59 = vld [vmem:[%s20061_s7 + $0x688] sm:$0xff] }
 0x9c2   :  { %5241 = vmatmul.mubr.f32.gmra.mxu0 %v16926_v55  ;;  %5335 = vmatprep.mubr.f32.mxu1 %v20058_v10  ;;  %v10581_v60 = vld [vmem:[%s20061_s7 + $0x2d0] sm:$0xff]  ;;  %v10644_v13 = vld [vmem:[%s20061_s7 + $0x4c8] sm:$0xff]  ;;  %v10703_v11 = vld [vmem:[%s20061_s7 + $0x680] sm:$0xff] }
 0x9c3   :  { %5445 = vmatprep.subr.mxu1 %v10600_v5  ;;  %5537 = vmatpush1.msra.mxu0 %v10661_v2  ;;  %v10643_v32 = vld [vmem:[%s20061_s7 + $0x4c0] sm:$0xff]  ;;  %v10702_v16 = vld [vmem:[%s20061_s7 + $0x678] sm:$0xff]  ;;  %v10701_v34 = vld [vmem:[%s20061_s7 + $0x670] sm:$0xff] }
 0x9c4   :  { %10580 = vmatmul.mubr.msk.f32.gmra.mxu1 %vm5151_vm4, %v16928_v36  ;;  %5538 = vmatprep.subr.mxu0 %v10660_v6  ;;  %v10642_v49 = vld [vmem:[%s20061_s7 + $0x4b8] sm:$0xff]  ;;  %v10641_v58 = vld [vmem:[%s20061_s7 + $0x4b0] sm:$0xff]  ;;  %v10700_v5 = vld [vmem:[%s20061_s7 + $0x668] sm:$0xff] }
 0x9c5   :  { %5446 = vmatpush1.msra.mxu1 %v10599_v39  ;;  %5497 = vmatprep.mubr.f32.mxu1 %v16834_v43  ;;  %v10640_v2 = vld [vmem:[%s20061_s7 + $0x4a8] sm:$0xff]  ;;  %v10699_v6 = vld [vmem:[%s20061_s7 + $0x660] sm:$0xff]  ;;  %v10698_v39 = vld [vmem:[%s20061_s7 + $0x658] sm:$0xff] }
 0x9c6   :  { %5447 = vmatprep.subr.mxu1 %v10598_v44  ;;  %5539 = vmatpush1.msra.mxu0 %v10659_v38  ;;  %v10639_v57 = vld [vmem:[%s20061_s7 + $0x4a0] sm:$0xff]  ;;  %v10638_v44 = vld [vmem:[%s20061_s7 + $0x498] sm:$0xff]  ;;  %v10697_v38 = vld [vmem:[%s20061_s7 + $0x650] sm:$0xff] }
 0x9c7   :  { %5246 = vmatprep.mubr.f32.mxu0 %v16946_v62  ;;  %5448 = vmatpush1.msra.mxu1 %v10597_v20  ;;  %v10637_v20 = vld [vmem:[%s20061_s7 + $0x490] sm:$0xff] }
 0x9c8   :  { %5540 = vmatprep.subr.mxu0 %v10658_v28  ;;  %5247 = vmatmul.mubr.f32.gmra.mxu0 %v16963_v42  ;;  %v10696_v28 = vld [vmem:[%s20061_s7 + $0x648] sm:$0xff] }
 0x9c9   :  { %5449 = vmatprep.subr.mxu1 %v10596_v63  ;;  %5541 = vmatpush1.msra.mxu0 %v10657_v54  ;;  %v10636_v63 = vld [vmem:[%s20061_s7 + $0x488] sm:$0xff]  ;;  %v10695_v54 = vld [vmem:[%s20061_s7 + $0x640] sm:$0xff] }
 0x9ca   :  { %5450 = vmatpush1.msra.mxu1 %v10595_v14  ;;  %5542 = vmatprep.subr.mxu0 %v10656_v33  ;;  %v10635_v14 = vld [vmem:[%s20061_s7 + $0x480] sm:$0xff]  ;;  %v10694_v33 = vld [vmem:[%s20061_s7 + $0x638] sm:$0xff] }
 0x9cb   :  { %5451 = vmatprep.subr.mxu1 %v10594_v18  ;;  %5543 = vmatpush1.msra.mxu0 %v10655_v51  ;;  %v10634_v18 = vld [vmem:[%s20061_s7 + $0x478] sm:$0xff]  ;;  %v10693_v51 = vld [vmem:[%s20061_s7 + $0x630] sm:$0xff] }
 0x9cc   :  { %5452 = vmatpush1.msra.mxu1 %v10593_v7  ;;  %5544 = vmatprep.subr.mxu0 %v10654_v25  ;;  %v10633_v7 = vld [vmem:[%s20061_s7 + $0x470] sm:$0xff]  ;;  %v10692_v25 = vld [vmem:[%s20061_s7 + $0x628] sm:$0xff] }
 0x9cd   :  { %5453 = vmatprep.subr.mxu1 %v10592_v0  ;;  %5545 = vmatpush1.msra.mxu0 %v10653_v31  ;;  %v10632_v0 = vld [vmem:[%s20061_s7 + $0x468] sm:$0xff]  ;;  %v10691_v31 = vld [vmem:[%s20061_s7 + $0x620] sm:$0xff] }
 0x9ce   :  { %5454 = vmatpush1.msra.mxu1 %v10591_v3  ;;  %5546 = vmatprep.subr.mxu0 %v10652_v4  ;;  %v10631_v3 = vld [vmem:[%s20061_s7 + $0x460] sm:$0xff]  ;;  %v10690_v4 = vld [vmem:[%s20061_s7 + $0x618] sm:$0xff] }
 0x9cf   :  { %5455 = vmatprep.subr.mxu1 %v10590_v29  ;;  %5547 = vmatpush1.msra.mxu0 %v10651_v61  ;;  %v10630_v29 = vld [vmem:[%s20061_s7 + $0x458] sm:$0xff]  ;;  %v10689_v61 = vld [vmem:[%s20061_s7 + $0x610] sm:$0xff] }
 0x9d0   :  { %5456 = vmatpush1.msra.mxu1 %v10589_v19  ;;  %5548 = vmatprep.subr.mxu0 %v10650_v15  ;;  %v10629_v19 = vld [vmem:[%s20061_s7 + $0x450] sm:$0xff]  ;;  %v10628_v15 = vld [vmem:[%s20061_s7 + $0x448] sm:$0xff] }
 0x9d1   :  { %5457 = vmatprep.subr.mxu1 %v10588_v1  ;;  %5549 = vmatpush1.msra.mxu0 %v10649_v17  ;;  %v10687_v1 = vld [vmem:[%s20061_s7 + $0x600] sm:$0xff] }
 0x9d2   :  { %5458 = vmatpush1.msra.mxu1 %v10587_v52  ;;  %5550 = vmatprep.subr.mxu0 %v10648_v50  ;;  %v10627_v17 = vld [vmem:[%s20061_s7 + $0x440] sm:$0xff]  ;;  %v10686_v52 = vld [vmem:[%s20061_s7 + $0x5f8] sm:$0xff] }
 0x9d3   :  { %5459 = vmatprep.subr.mxu1 %v10586_v21  ;;  %5551 = vmatpush1.msra.mxu0 %v10647_v12  ;;  %v10626_v50 = vld [vmem:[%s20061_s7 + $0x438] sm:$0xff]  ;;  %v10685_v21 = vld [vmem:[%s20061_s7 + $0x5f0] sm:$0xff] }
 0x9d4   :  { %5460 = vmatpush1.msra.mxu1 %v10585_v56  ;;  %5552 = vmatprep.subr.mxu0 %v10646_v23  ;;  %v10625_v12 = vld [vmem:[%s20061_s7 + $0x430] sm:$0xff]  ;;  %v10684_v56 = vld [vmem:[%s20061_s7 + $0x5e8] sm:$0xff] }
 0x9d5   :  { %5461 = vmatprep.subr.mxu1 %v10584_v27  ;;  %5553 = vmatpush1.msra.mxu0 %v10645_v24  ;;  %v10624_v23 = vld [vmem:[%s20061_s7 + $0x428] sm:$0xff]  ;;  %v10683_v27 = vld [vmem:[%s20061_s7 + $0x5e0] sm:$0xff] }
 0x9d6   :  { %5586 = vmatprep.mubr.f32.mxu0 %v20058_v10  ;;  %5462 = vmatpush1.msra.mxu1 %v10583_v8  ;;  %v10623_v24 = vld [vmem:[%s20061_s7 + $0x420] sm:$0xff]  ;;  %v10682_v8 = vld [vmem:[%s20061_s7 + $0x5d8] sm:$0xff] }
 0x9d7   :  { %10671 = vmatmul.mubr.msk.f32.vlgmr.msra.gmra.mxu0 %vm5151_vm4, %v16823_v40  ;;  %5710 = vmatprep.subr.mxu0 %v10706_v37  ;;  %v10622_v37 = vld [vmem:[%s20061_s7 + $0x418] sm:$0xff] }
 0x9d8   :  { %5463 = vmatprep.subr.mxu1 %v10582_v22  ;;  %5711 = vmatpush1.msra.mxu0 %v10705_v35  ;;  %v10681_v22 = vld [vmem:[%s20061_s7 + $0x5d0] sm:$0xff] }
 0x9d9   :  { %5464 = vmatpush1.msra.mxu1 %v10581_v60  ;;  %5712 = vmatprep.subr.mxu0 %v10704_v59  ;;  %v10621_v35 = vld [vmem:[%s20061_s7 + $0x410] sm:$0xff]  ;;  %v10680_v60 = vld [vmem:[%s20061_s7 + $0x5c8] sm:$0xff] }
 0x9da   :  { %5465 = vmatprep.subr.mxu1 %v10644_v13  ;;  %5592 = vmatprep.mubr.f32.mxu0 %v20058_v10  ;;  %v10620_v59 = vld [vmem:[%s20061_s7 + $0x408] sm:$0xff]  ;;  %v10679_v13 = vld [vmem:[%s20061_s7 + $0x5c0] sm:$0xff] }
 0x9db   :  { %5713 = vmatpush1.msra.mxu0 %v10703_v11  ;;  %5466 = vmatpush2.msra.mxu1 %v10643_v32  ;;  %v10619_v11 = vld [vmem:[%s20061_s7 + $0x400] sm:$0xff]  ;;  %v10678_v32 = vld [vmem:[%s20061_s7 + $0x5b8] sm:$0xff] }
 0x9dc   :  { %10672 = vmatmul.mubr.msk.f32.gmra.mxu0 %vm5151_vm4, %v16859_v30  ;;  %5714 = vmatprep.subr.mxu0 %v10702_v16  ;;  %v10618_v16 = vld [vmem:[%s20061_s7 + $0x3f8] sm:$0xff] }
 0x9dd   :  { %5467 = vmatprep.subr.mxu1 %v10642_v49  ;;  %5715 = vmatpush1.msra.mxu0 %v10701_v34  ;;  %v10677_v49 = vld [vmem:[%s20061_s7 + $0x5b0] sm:$0xff] }
 0x9de   :  { %5468 = vmatpush2.msra.mxu1 %v10641_v58  ;;  %5716 = vmatprep.subr.mxu0 %v10700_v5  ;;  %v10617_v34 = vld [vmem:[%s20061_s7 + $0x3f0] sm:$0xff]  ;;  %v10676_v58 = vld [vmem:[%s20061_s7 + $0x5a8] sm:$0xff] }
 0x9df   :  { %5469 = vmatprep.subr.mxu1 %v10640_v2  ;;  %5598 = vmatprep.mubr.f32.mxu0 %v20058_v10  ;;  %v10616_v5 = vld [vmem:[%s20061_s7 + $0x3e8] sm:$0xff]  ;;  %v10675_v2 = vld [vmem:[%s20061_s7 + $0x5a0] sm:$0xff] }
 0x9e0   :  { %5717 = vmatpush1.msra.mxu0 %v10699_v6  ;;  %5470 = vmatpush2.msra.mxu1 %v10639_v57  ;;  %v10615_v6 = vld [vmem:[%s20061_s7 + $0x3e0] sm:$0xff]  ;;  %v10738_v57 = vld [vmem:[%s20061_s7 + $0x798] sm:$0xff] }
 0x9e1   :  { %10673 = vmatmul.mubr.msk.f32.gmra.mxu0 %vm5151_vm4, %v16887_v41  ;;  %5718 = vmatprep.subr.mxu0 %v10698_v39  ;;  %v10614_v39 = vld [vmem:[%s20061_s7 + $0x3d8] sm:$0xff] }
 0x9e2   :  { %5471 = vmatprep.subr.mxu1 %v10638_v44  ;;  %5719 = vmatpush1.msra.mxu0 %v10697_v38  ;;  %v10737_v44 = vld [vmem:[%s20061_s7 + $0x790] sm:$0xff] }
 0x9e3   :  { %5472 = vmatpush2.msra.mxu1 %v10637_v20  ;;  %5720 = vmatprep.subr.mxu0 %v10696_v28  ;;  %v10613_v38 = vld [vmem:[%s20061_s7 + $0x3d0] sm:$0xff]  ;;  %v10736_v20 = vld [vmem:[%s20061_s7 + $0x788] sm:$0xff]  ;;  %v10735_v28 = vld [vmem:[%s20061_s7 + $0x780] sm:$0xff] }
 0x9e4   :  { %5473 = vmatprep.subr.mxu1 %v10636_v63  ;;  %5604 = vmatprep.mubr.f32.mxu0 %v20058_v10  ;;  %v10764_v63 = vld [vmem:[%s20061_s7 + $0x868] sm:$0xff] }
 0x9e5   :  { %5721 = vmatpush1.msra.mxu0 %v10695_v54  ;;  %5474 = vmatpush2.msra.mxu1 %v10635_v14  ;;  %v10734_v54 = vld [vmem:[%s20061_s7 + $0x778] sm:$0xff]  ;;  %v10763_v14 = vld [vmem:[%s20061_s7 + $0x860] sm:$0xff] }
 0x9e6   :  { %10674 = vmatmul.mubr.msk.f32.gmra.mxu0 %vm5151_vm4, %v16928_v36  ;;  %5722 = vmatprep.subr.mxu0 %v10694_v33  ;;  %v10733_v33 = vld [vmem:[%s20061_s7 + $0x770] sm:$0xff] }
 0x9e7   :  { %5475 = vmatprep.subr.mxu1 %v10634_v18  ;;  %5723 = vmatpush1.msra.mxu0 %v10693_v51  ;;  %v10762_v18 = vld [vmem:[%s20061_s7 + $0x858] sm:$0xff]  ;;  %v10732_v51 = vld [vmem:[%s20061_s7 + $0x768] sm:$0xff] }
 0x9e8   :  { %5774 = vmatprep.mubr.f32.mxu0 %v16834_v43  ;;  %5476 = vmatpush2.msra.mxu1 %v10633_v7  ;;  %v10688_v43 = vld [vmem:[%s20061_s7 + $0x608] sm:$0xff]  ;;  %v10761_v7 = vld [vmem:[%s20061_s7 + $0x850] sm:$0xff] }
 0x9e9   :  { %5724 = vmatprep.subr.mxu0 %v10692_v25  ;;  %5477 = vmatprep.subr.mxu1 %v10632_v0  ;;  %v10731_v25 = vld [vmem:[%s20061_s7 + $0x760] sm:$0xff]  ;;  %v10760_v0 = vld [vmem:[%s20061_s7 + $0x848] sm:$0xff] }
 0x9ea   :  { %5725 = vmatpush1.msra.mxu0 %v10691_v31  ;;  %5478 = vmatpush2.msra.mxu1 %v10631_v3  ;;  %v10730_v31 = vld [vmem:[%s20061_s7 + $0x758] sm:$0xff]  ;;  %v10759_v3 = vld [vmem:[%s20061_s7 + $0x840] sm:$0xff] }
 0x9eb   :  { %5726 = vmatprep.subr.mxu0 %v10690_v4  ;;  %5479 = vmatprep.subr.mxu1 %v10630_v29  ;;  %v10729_v4 = vld [vmem:[%s20061_s7 + $0x750] sm:$0xff]  ;;  %v10758_v29 = vld [vmem:[%s20061_s7 + $0x838] sm:$0xff] }
 0x9ec   :  { %5727 = vmatpush1.msra.mxu0 %v10689_v61  ;;  %5480 = vmatpush2.msra.mxu1 %v10629_v19  ;;  %v10728_v61 = vld [vmem:[%s20061_s7 + $0x748] sm:$0xff]  ;;  %v10757_v19 = vld [vmem:[%s20061_s7 + $0x830] sm:$0xff] }
 0x9ed   :  { %5728 = vmatprep.subr.mxu0 %v10688_v43  ;;  %5481 = vmatprep.subr.mxu1 %v10628_v15  ;;  %v10727_v43 = vld [vmem:[%s20061_s7 + $0x740] sm:$0xff]  ;;  %v10756_v15 = vld [vmem:[%s20061_s7 + $0x828] sm:$0xff] }
 0x9ee   :  { %5729 = vmatpush1.msra.mxu0 %v10687_v1  ;;  %5482 = vmatpush2.msra.mxu1 %v10627_v17  ;;  %v10726_v1 = vld [vmem:[%s20061_s7 + $0x738] sm:$0xff]  ;;  %v10755_v17 = vld [vmem:[%s20061_s7 + $0x820] sm:$0xff] }
 0x9ef   :  { %5730 = vmatprep.subr.mxu0 %v10686_v52  ;;  %5483 = vmatprep.subr.mxu1 %v10626_v50  ;;  %v10725_v52 = vld [vmem:[%s20061_s7 + $0x730] sm:$0xff]  ;;  %v10754_v50 = vld [vmem:[%s20061_s7 + $0x818] sm:$0xff] }
 0x9f0   :  { %5731 = vmatpush1.msra.mxu0 %v10685_v21  ;;  %5484 = vmatpush2.msra.mxu1 %v10625_v12  ;;  %v10724_v21 = vld [vmem:[%s20061_s7 + $0x728] sm:$0xff]  ;;  %v10753_v12 = vld [vmem:[%s20061_s7 + $0x810] sm:$0xff] }
 0x9f1   :  { %5732 = vmatprep.subr.mxu0 %v10684_v56  ;;  %5485 = vmatprep.subr.mxu1 %v10624_v23  ;;  %v10723_v56 = vld [vmem:[%s20061_s7 + $0x720] sm:$0xff]  ;;  %v10752_v23 = vld [vmem:[%s20061_s7 + $0x808] sm:$0xff] }
 0x9f2   :  { %5733 = vmatpush1.msra.mxu0 %v10683_v27  ;;  %5486 = vmatpush2.msra.mxu1 %v10623_v24  ;;  %v10722_v27 = vld [vmem:[%s20061_s7 + $0x718] sm:$0xff]  ;;  %v10751_v24 = vld [vmem:[%s20061_s7 + $0x800] sm:$0xff] }
 0x9f3   :  { %5734 = vmatprep.subr.mxu0 %v10682_v8  ;;  %5487 = vmatprep.subr.mxu1 %v10622_v37  ;;  %v10721_v8 = vld [vmem:[%s20061_s7 + $0x710] sm:$0xff]  ;;  %v10750_v37 = vld [vmem:[%s20061_s7 + $0x7f8] sm:$0xff] }
 0x9f4   :  { %5735 = vmatpush1.msra.mxu0 %v10681_v22  ;;  %5488 = vmatpush2.msra.mxu1 %v10621_v35  ;;  %v10720_v22 = vld [vmem:[%s20061_s7 + $0x708] sm:$0xff]  ;;  %v10749_v35 = vld [vmem:[%s20061_s7 + $0x7f0] sm:$0xff] }
 0x9f5   :  { %5736 = vmatprep.subr.mxu0 %v10680_v60  ;;  %5489 = vmatprep.subr.mxu1 %v10620_v59  ;;  %v10719_v60 = vld [vmem:[%s20061_s7 + $0x700] sm:$0xff]  ;;  %v10748_v59 = vld [vmem:[%s20061_s7 + $0x7e8] sm:$0xff] }
 0x9f6   :  { %5737 = vmatpush1.msra.mxu0 %v10679_v13  ;;  %5490 = vmatpush2.msra.mxu1 %v10619_v11  ;;  %v10718_v13 = vld [vmem:[%s20061_s7 + $0x6f8] sm:$0xff]  ;;  %v10747_v11 = vld [vmem:[%s20061_s7 + $0x7e0] sm:$0xff] }
 0x9f7   :  { %5738 = vmatprep.subr.mxu0 %v10678_v32  ;;  %5491 = vmatprep.subr.mxu1 %v10618_v16  ;;  %v10717_v32 = vld [vmem:[%s20061_s7 + $0x6f0] sm:$0xff]  ;;  %v10746_v16 = vld [vmem:[%s20061_s7 + $0x7d8] sm:$0xff] }
 0x9f8   :  { %5739 = vmatpush1.msra.mxu0 %v10677_v49  ;;  %5492 = vmatpush2.msra.mxu1 %v10617_v34  ;;  %v10716_v49 = vld [vmem:[%s20061_s7 + $0x6e8] sm:$0xff]  ;;  %v10745_v34 = vld [vmem:[%s20061_s7 + $0x7d0] sm:$0xff] }
 0x9f9   :  { %5740 = vmatprep.subr.mxu0 %v10676_v58  ;;  %5493 = vmatprep.subr.mxu1 %v10616_v5  ;;  %v10715_v58 = vld [vmem:[%s20061_s7 + $0x6e0] sm:$0xff]  ;;  %v10744_v5 = vld [vmem:[%s20061_s7 + $0x7c8] sm:$0xff] }
 0x9fa   :  { %5741 = vmatpush1.msra.mxu0 %v10675_v2  ;;  %5494 = vmatpush2.msra.mxu1 %v10615_v6  ;;  %v10714_v2 = vld [vmem:[%s20061_s7 + $0x6d8] sm:$0xff]  ;;  %v10743_v6 = vld [vmem:[%s20061_s7 + $0x7c0] sm:$0xff] }
 0x9fb   :  { %5742 = vmatprep.subr.mxu0 %v10738_v57  ;;  %5495 = vmatprep.subr.mxu1 %v10614_v39  ;;  %v10713_v57 = vld [vmem:[%s20061_s7 + $0x6d0] sm:$0xff]  ;;  %v10742_v39 = vld [vmem:[%s20061_s7 + $0x7b8] sm:$0xff] }
 0x9fc   :  { %5743 = vmatpush2.msra.mxu0 %v10737_v44  ;;  %5496 = vmatpush2.msra.mxu1 %v10613_v38  ;;  %v10712_v44 = vld [vmem:[%s20061_s7 + $0x6c8] sm:$0xff]  ;;  %v10741_v38 = vld [vmem:[%s20061_s7 + $0x7b0] sm:$0xff] }
 0x9fd   :  { %5744 = vmatprep.subr.mxu0 %v10736_v20  ;;  %5498 = vmatmul.mubr.f32.vlgmr.msra.gmra.mxu1 %v16842_v47  ;;  %v10711_v20 = vld [vmem:[%s20061_s7 + $0x6c0] sm:$0xff] }
 0x9fe   :  { %5745 = vmatpush2.msra.mxu0 %v10735_v28  ;;  %5805 = vmatprep.subr.mxu1 %v10764_v63  ;;  %v10740_v28 = vld [vmem:[%s20061_s7 + $0x7a8] sm:$0xff]  ;;  %v10710_v63 = vld [vmem:[%s20061_s7 + $0x6b8] sm:$0xff] }
 0x9ff   :  { %5503 = vmatprep.mubr.f32.mxu1 %v16868_v9  ;;  %5746 = vmatprep.subr.mxu0 %v10734_v54  ;;  %v10739_v54 = vld [vmem:[%s20061_s7 + $0x7a0] sm:$0xff] }
 0xa00   :  { %5806 = vmatpush1.msra.mxu1 %v10763_v14  ;;  %5747 = vmatpush2.msra.mxu0 %v10733_v33  ;;  %v10709_v14 = vld [vmem:[%s20061_s7 + $0x6b0] sm:$0xff]  ;;  %v10708_v33 = vld [vmem:[%s20061_s7 + $0x6a8] sm:$0xff] }
 0xa01   :  { %5807 = vmatprep.subr.mxu1 %v10762_v18  ;;  %5748 = vmatprep.subr.mxu0 %v10732_v51  ;;  %v10707_v18 = vld [vmem:[%s20061_s7 + $0x6a0] sm:$0xff]  ;;  %v10815_v51 = vld [vmem:[%s19931_s11 + $0x1f0] sm:$0xff] }
 0xa02   :  { %5808 = vmatpush1.msra.mxu1 %v10761_v7  ;;  %5749 = vmatpush2.msra.mxu0 %v10731_v25  ;;  %v10814_v7 = vld [vmem:[%s19931_s11 + $0x1e8] sm:$0xff]  ;;  %v10813_v25 = vld [vmem:[%s19931_s11 + $0x1e0] sm:$0xff] }
 0xa03   :  { %5504 = vmatmul.mubr.f32.gmra.mxu1 %v16885_v48  ;;  %5809 = vmatprep.subr.mxu1 %v10760_v0  ;;  %v10812_v0 = vld [vmem:[%s19931_s11 + $0x1d8] sm:$0xff] }
 0xa04   :  { %5509 = vmatprep.mubr.f32.mxu1 %v16902_v53  ;;  %5750 = vmatprep.subr.mxu0 %v10730_v31  ;;  %v10811_v31 = vld [vmem:[%s19931_s11 + $0x1d0] sm:$0xff] }
 0xa05   :  { %5810 = vmatpush1.msra.mxu1 %v10759_v3  ;;  %5751 = vmatpush2.msra.mxu0 %v10729_v4  ;;  %v10810_v3 = vld [vmem:[%s19931_s11 + $0x1c8] sm:$0xff] }
 0xa06   :  { %5811 = vmatprep.subr.mxu1 %v10758_v29  ;;  %5752 = vmatprep.subr.mxu0 %v10728_v61 }
 0xa07   :  { %5812 = vmatpush1.msra.mxu1 %v10757_v19  ;;  %5753 = vmatpush2.msra.mxu0 %v10727_v43 }
 0xa08   :  { %5510 = vmatmul.mubr.f32.gmra.mxu1 %v16926_v55  ;;  %5813 = vmatprep.subr.mxu1 %v10756_v15 }
 0xa09   :  { %5515 = vmatprep.mubr.f32.mxu1 %v16946_v62  ;;  %5754 = vmatprep.subr.mxu0 %v10726_v1 }
 0xa0a   :  { %5814 = vmatpush1.msra.mxu1 %v10755_v17  ;;  %5755 = vmatpush2.msra.mxu0 %v10725_v52 }
 0xa0b   :  { %5815 = vmatprep.subr.mxu1 %v10754_v50  ;;  %5756 = vmatprep.subr.mxu0 %v10724_v21 }
 0xa0c   :  { %5816 = vmatpush1.msra.mxu1 %v10753_v12  ;;  %5757 = vmatpush2.msra.mxu0 %v10723_v56 }
 0xa0d   :  { %5516 = vmatmul.mubr.f32.gmra.mxu1 %v16963_v42  ;;  %5817 = vmatprep.subr.mxu1 %v10752_v23 }
 0xa0e   :  { %5758 = vmatprep.subr.mxu0 %v10722_v27  ;;  %5818 = vmatpush1.msra.mxu1 %v10751_v24 }
 0xa0f   :  { %5759 = vmatpush2.msra.mxu0 %v10721_v8  ;;  %5819 = vmatprep.subr.mxu1 %v10750_v37 }
 0xa10   :  { %5760 = vmatprep.subr.mxu0 %v10720_v22  ;;  %5820 = vmatpush1.msra.mxu1 %v10749_v35 }
 0xa11   :  { %5761 = vmatpush2.msra.mxu0 %v10719_v60  ;;  %5821 = vmatprep.subr.mxu1 %v10748_v59 }
 0xa12   :  { %5762 = vmatprep.subr.mxu0 %v10718_v13  ;;  %5822 = vmatpush1.msra.mxu1 %v10747_v11 }
 0xa13   :  { %5763 = vmatpush2.msra.mxu0 %v10717_v32  ;;  %5823 = vmatprep.subr.mxu1 %v10746_v16 }
 0xa14   :  { %5764 = vmatprep.subr.mxu0 %v10716_v49  ;;  %5824 = vmatpush1.msra.mxu1 %v10745_v34 }
 0xa15   :  { %5765 = vmatpush2.msra.mxu0 %v10715_v58  ;;  %5825 = vmatprep.subr.mxu1 %v10744_v5 }
 0xa16   :  { %5766 = vmatprep.subr.mxu0 %v10714_v2  ;;  %5826 = vmatpush1.msra.mxu1 %v10743_v6 }
 0xa17   :  { %5767 = vmatpush2.msra.mxu0 %v10713_v57  ;;  %5827 = vmatprep.subr.mxu1 %v10742_v39 }
 0xa18   :  { %5768 = vmatprep.subr.mxu0 %v10712_v44  ;;  %5828 = vmatpush1.msra.mxu1 %v10741_v38 }
 0xa19   :  { %5769 = vmatpush2.msra.mxu0 %v10711_v20  ;;  %5829 = vmatprep.subr.mxu1 %v10740_v28 }
 0xa1a   :  { %5770 = vmatprep.subr.mxu0 %v10710_v63  ;;  %5830 = vmatpush1.msra.mxu1 %v10739_v54 }
 0xa1b   :  { %5863 = vmatprep.mubr.f32.mxu1 %v20058_v10  ;;  %5771 = vmatpush2.msra.mxu0 %v10709_v14 }
 0xa1c   :  { %10765 = vmatmul.mubr.msk.f32.vlgmr.msra.gmra.mxu1 %vm5151_vm4, %v16823_v40  ;;  %5772 = vmatprep.subr.mxu0 %v10708_v33  ;;  %v10826_v40 = vld [vmem:[%s19931_s11 + $0x248] sm:$0xff] }
 0xa1d   :  { %5773 = vmatpush2.msra.mxu0 %v10707_v18  ;;  %5869 = vmatprep.mubr.f32.mxu1 %v20058_v10 }
 0xa1e   :  { %5775 = vmatmul.mubr.f32.vlgmr.msra.gmra.mxu0 %v16842_v47  ;;  %v10825_v47 = vld [vmem:[%s19931_s11 + $0x240] sm:$0xff]  ;;  %6437 = vmatprep.subr.mxu0 %v10826_v40 }
 0xa1f   :  { %5780 = vmatprep.mubr.f32.mxu0 %v16868_v9  ;;  %v10823_v9 = vld [vmem:[%s19931_s11 + $0x230] sm:$0xff]  ;;  %6438 = vmatpush1.msra.mxu0 %v10825_v47 }
 0xa20   :  { %10766 = vmatmul.mubr.msk.f32.gmra.mxu1 %vm5151_vm4, %v16859_v30  ;;  %v10824_v30 = vld [vmem:[%s19931_s11 + $0x238] sm:$0xff] }
 0xa21   :  { %5875 = vmatprep.mubr.f32.mxu1 %v20058_v10  ;;  %6439 = vmatprep.subr.mxu0 %v10824_v30 }
 0xa22   :  { %5781 = vmatmul.mubr.f32.gmra.mxu0 %v16885_v48  ;;  %v10822_v48 = vld [vmem:[%s19931_s11 + $0x228] sm:$0xff] }
 0xa23   :  { %5786 = vmatprep.mubr.f32.mxu0 %v16902_v53  ;;  %6440 = vmatpush1.msra.mxu0 %v10823_v9  ;;  %v10820_v53 = vld [vmem:[%s19931_s11 + $0x218] sm:$0xff] }
 0xa24   :  { %10767 = vmatmul.mubr.msk.f32.gmra.mxu1 %vm5151_vm4, %v16887_v41  ;;  %v10821_v41 = vld [vmem:[%s19931_s11 + $0x220] sm:$0xff]  ;;  %6441 = vmatprep.subr.mxu0 %v10822_v48 }
 0xa25   :  { %5881 = vmatprep.mubr.f32.mxu1 %v20058_v10  ;;  %6442 = vmatpush1.msra.mxu0 %v10821_v41 }
 0xa26   :  { %5787 = vmatmul.mubr.f32.gmra.mxu0 %v16926_v55  ;;  %v10819_v55 = vld [vmem:[%s19931_s11 + $0x210] sm:$0xff]  ;;  %6443 = vmatprep.subr.mxu0 %v10820_v53 }
 0xa27   :  { %5792 = vmatprep.mubr.f32.mxu0 %v16946_v62  ;;  %v10817_v62 = vld [vmem:[%s19931_s11 + $0x200] sm:$0xff]  ;;  %6444 = vmatpush1.msra.mxu0 %v10819_v55 }
 0xa28   :  { %10768 = vmatmul.mubr.msk.f32.gmra.mxu1 %vm5151_vm4, %v16928_v36  ;;  %v10818_v36 = vld [vmem:[%s19931_s11 + $0x208] sm:$0xff] }
 0xa29   :  { %5974 = vmatprep.mubr.f32.mxu1 %v20058_v10  ;;  %6445 = vmatprep.subr.mxu0 %v10818_v36 }
 0xa2a   :  { %5793 = vmatmul.mubr.f32.gmra.mxu0 %v16963_v42  ;;  %v10816_v42 = vld [vmem:[%s19931_s11 + $0x1f8] sm:$0xff] }
 0xa2b   :  { %6446 = vmatpush1.msra.mxu0 %v10817_v62 }
 0xa2c   :  { %6447 = vmatprep.subr.mxu0 %v10816_v42 }
 0xa2d   :  { %6448 = vmatpush1.msra.mxu0 %v10815_v51 }
 0xa2e   :  { %6449 = vmatprep.subr.mxu0 %v10814_v7 }
 0xa2f   :  { %6450 = vmatpush1.msra.mxu0 %v10813_v25 }
 0xa30   :  { %6451 = vmatprep.subr.mxu0 %v10812_v0 }
 0xa31   :  { %6452 = vmatpush1.msra.mxu0 %v10811_v31 }
 0xa32   :  { %6453 = vmatprep.subr.mxu0 %v10810_v3 }
 0xa73   :  { %v17511_v4 = vpop.f32.mrf.mxu1 }
 0xa74   :  { %20066 = vst [vmem:[#allocation3_spill] sm:$0xff] %v17511_v4 }
 0xa75   :  { %v17515_v61 = vpop.f32.mrf.mxu1 }
 0xa76   :  { %v17513_v29 = vpop.f32.mrf.mxu0 }
 0xa78   :  { %v17517_v19 = vpop.f32.mrf.mxu0  ;;  %v5325_v43 = vpop.f32.mrf.mxu1 }
 0xa7a   :  { %v5327_v1 = vpop.f32.mrf.mxu1 }
 0xa7c   :  { %v5236_v15 = vpop.f32.mrf.mxu0 }
 0xa7d   :  { %v5326_v41 = vadd.f32 %v5325_v43, %v5236_v15 }
 0xa7e   :  { %v5238_v17 = vpop.f32.mrf.mxu0  ;;  %v5331_v52 = vpop.f32.mrf.mxu1 }
 0xa7f   :  { %v5328_v53 = vadd.f32 %v5327_v1, %v5238_v17 }
 0xa80   :  { %v5333_v21 = vpop.f32.mrf.mxu1 }
 0xa82   :  { %v5242_v50 = vpop.f32.mrf.mxu0 }
 0xa83   :  { %v5332_v46 = vadd.f32 %v5331_v52, %v5242_v50  ;;  %v20067_v52 = vld [vmem:[#allocation3_spill] sm:$0xff] }
 0xa84   :  { %v5244_v12 = vpop.f32.mrf.mxu0  ;;  %v5337_v56 = vpop.f32.mrf.mxu1  ;;  %v5320_v50 = vadd.f32 %v20067_v52, %v17513_v29  ;;  %v5897_v29 = vld [vmem:[%s19932_s10 + $0x8] sm:$0x3f] }
 0xa85   :  { %v5334_v62 = vadd.f32 %v5333_v21, %v5244_v12  ;;  %v6168_v52 = vld [vmem:[%s19933_s12 + $0x8] sm:$0x3f] }
 0xa86   :  { %v5339_v27 = vpop.f32.mrf.mxu1 }
 0xa88   :  { %v5248_v23 = vpop.f32.mrf.mxu0 }
 0xa89   :  { %v5338_v42 = vadd.f32 %v5337_v56, %v5248_v23  ;;  %v5322_v56 = vadd.f32 %v17515_v61, %v17517_v19 }
 0xa8a   :  { %v5250_v24 = vpop.f32.mrf.mxu0 }
 0xa8b   :  { %v5340_v55 = vadd.f32 %v5339_v27, %v5250_v24 }
 0xa97   :  { %v5588_v37 = vpop.f32.mrf.mxu0 }
 0xa99   :  { %v5590_v35 = vpop.f32.mrf.mxu0 }
 0xa9c   :  { %v5594_v59 = vpop.f32.mrf.mxu0 }
 0xa9e   :  { %v5596_v11 = vpop.f32.mrf.mxu0 }
 0xaa1   :  { %v5600_v16 = vpop.f32.mrf.mxu0 }
 0xaa3   :  { %v5602_v34 = vpop.f32.mrf.mxu0 }
 0xaa6   :  { %v5606_v5 = vpop.f32.mrf.mxu0 }
 0xaa8   :  { %v5608_v6 = vpop.f32.mrf.mxu0 }
 0xabd   :  { %v5499_v8 = vpop.f32.mrf.mxu1 }
 0xabe   :  { %v5589_v1 = vadd.f32 %v5588_v37, %v5499_v8  ;;  %v10773_v37 = vld [vmem:[%s19932_s10 + $0x10] sm:$0xff] }
 0xabf   :  { %v5501_v22 = vpop.f32.mrf.mxu1 }
 0xac3   :  { %v5505_v60 = vpop.f32.mrf.mxu1 }
 0xac4   :  { %v5595_v10 = vadd.f32 %v5594_v59, %v5505_v60  ;;  %v10774_v59 = vld [vmem:[%s19932_s10 + $0x18] sm:$0x3f] }
 0xac5   :  { %v5507_v13 = vpop.f32.mrf.mxu1 }
 0xac6   :  { %v5597_v31 = vadd.f32 %v5596_v11, %v5507_v13  ;;  %v5613_v60 = vmax.f32 %v5326_v41, %v5595_v10  ;;  %v20068_v10 = vmov 0.0   ;;  %v10779_v13 = vld [vmem:[%s19932_s10 + $0x20] sm:$0xff]  ;;  %v10780_v11 = vld [vmem:[%s19932_s10 + $0x28] sm:$0x3f] }
 0xac7   :  { %v10830_v41 = vld [vmem:[%s19931_s11 + $0x268] sm:$0xff] }
 0xac8   :  { %v5511_v32 = vpop.f32.mrf.mxu1  ;;  %v5614_v23 = vmax.f32 %v5328_v53, %v5597_v31  ;;  %v10829_v53 = vld [vmem:[%s19931_s11 + $0x260] sm:$0xff] }
 0xac9   :  { %v5601_v51 = vadd.f32 %v5600_v16, %v5511_v32  ;;  %v10809_v32 = vld [vmem:[%s19931_s11 + $0x1c0] sm:$0xff]  ;;  %v10808_v16 = vld [vmem:[%s19931_s11 + $0x1b8] sm:$0xff] }
 0xaca   :  { %v5513_v49 = vpop.f32.mrf.mxu1  ;;  %6454 = vmatpush1.msra.mxu0 %v10809_v32  ;;  %v6276_v32 = vld [vmem:[%s19931_s11 + $0x88] sm:$0xff] }
 0xacb   :  { %v5603_v36 = vadd.f32 %v5602_v34, %v5513_v49  ;;  %v5615_v17 = vmax.f32 %v5332_v46, %v5601_v51  ;;  %6455 = vmatprep.subr.mxu0 %v10808_v16  ;;  %v10807_v49 = vld [vmem:[%s19931_s11 + $0x1b0] sm:$0xff]  ;;  %v10806_v34 = vld [vmem:[%s19931_s11 + $0x1a8] sm:$0xff]  ;;  %v6275_v16 = vld [vmem:[%s19931_s11 + $0x80] sm:$0xff] }
 0xacc   :  { %6456 = vmatpush1.msra.mxu0 %v10807_v49  ;;  %v6274_v49 = vld [vmem:[%s19931_s11 + $0x78] sm:$0xff] }
 0xacd   :  { %v5517_v58 = vpop.f32.mrf.mxu1  ;;  %6457 = vmatprep.subr.mxu0 %v10806_v34  ;;  %v6273_v34 = vld [vmem:[%s19931_s11 + $0x70] sm:$0xff] }
 0xace   :  { %v5607_v9 = vadd.f32 %v5606_v5, %v5517_v58  ;;  %v5591_v58 = vadd.f32 %v5590_v35, %v5501_v22  ;;  %v5616_v5 = vmax.f32 %v5334_v62, %v5603_v36  ;;  %v10827_v36 = vld [vmem:[%s19931_s11 + $0x250] sm:$0xff] }
 0xacf   :  { %v5519_v2 = vpop.f32.mrf.mxu1 }
 0xad0   :  { %v5609_v30 = vadd.f32 %v5608_v6, %v5519_v2  ;;  %v5617_v4 = vmax.f32 %v5338_v42, %v5607_v9  ;;  %v10805_v6 = vld [vmem:[%s19931_s11 + $0x1a0] sm:$0xff]  ;;  %v10832_v9 = vld [vmem:[%s19931_s11 + $0x278] sm:$0xff] }
 0xad1   :  { %6458 = vmatpush1.msra.mxu0 %v10805_v6  ;;  %v6272_v6 = vld [vmem:[%s19931_s11 + $0x68] sm:$0xff] }
 0xad2   :  { %v5618_v3 = vmax.f32 %v5340_v55, %v5609_v30  ;;  %v10833_v30 = vld [vmem:[%s19931_s11 + $0x280] sm:$0xff]  ;;  %v10828_v55 = vld [vmem:[%s19931_s11 + $0x258] sm:$0xff] }
 0xadc   :  { %v5865_v57 = vpop.f32.mrf.mxu1 }
 0xade   :  { %v5867_v39 = vpop.f32.mrf.mxu1  ;;  %v5776_v44 = vpop.f32.mrf.mxu0 }
 0xadf   :  { %v5866_v22 = vadd.f32 %v5865_v57, %v5776_v44  ;;  %v10804_v57 = vld [vmem:[%s19931_s11 + $0x198] sm:$0xff]  ;;  %v10802_v44 = vld [vmem:[%s19931_s11 + $0x188] sm:$0xff] }
 0xae0   :  { %v5871_v38 = vpop.f32.mrf.mxu1  ;;  %v5778_v20 = vpop.f32.mrf.mxu0  ;;  %6459 = vmatprep.subr.mxu0 %v10804_v57  ;;  %v6271_v57 = vld [vmem:[%s19931_s11 + $0x60] sm:$0xff] }
 0xae1   :  { %v5868_v27 = vadd.f32 %v5867_v39, %v5778_v20  ;;  %v10803_v39 = vld [vmem:[%s19931_s11 + $0x190] sm:$0xff]  ;;  %v10800_v20 = vld [vmem:[%s19931_s11 + $0x178] sm:$0xff] }
 0xae2   :  { %v5873_v28 = vpop.f32.mrf.mxu1  ;;  %v5782_v63 = vpop.f32.mrf.mxu0  ;;  %6460 = vmatpush1.msra.mxu0 %v10803_v39  ;;  %v6270_v39 = vld [vmem:[%s19931_s11 + $0x58] sm:$0xff] }
 0xae3   :  { %v5872_v21 = vadd.f32 %v5871_v38, %v5782_v63  ;;  %6461 = vmatprep.subr.mxu0 %v10802_v44  ;;  %v10801_v38 = vld [vmem:[%s19931_s11 + $0x180] sm:$0xff]  ;;  %v10798_v63 = vld [vmem:[%s19931_s11 + $0x168] sm:$0xff]  ;;  %v6269_v44 = vld [vmem:[%s19931_s11 + $0x50] sm:$0xff] }
 0xae4   :  { %v5877_v54 = vpop.f32.mrf.mxu1  ;;  %v5784_v14 = vpop.f32.mrf.mxu0  ;;  %6462 = vmatpush1.msra.mxu0 %v10801_v38  ;;  %v6268_v38 = vld [vmem:[%s19931_s11 + $0x48] sm:$0xff] }
 0xae5   :  { %v5874_v43 = vadd.f32 %v5873_v28, %v5784_v14  ;;  %v5890_v8 = vmax.f32 %v5613_v60, %v5872_v21  ;;  %6463 = vmatprep.subr.mxu0 %v10800_v20  ;;  %v10799_v28 = vld [vmem:[%s19931_s11 + $0x170] sm:$0xff]  ;;  %v10796_v14 = vld [vmem:[%s19931_s11 + $0x158] sm:$0xff]  ;;  %v6267_v20 = vld [vmem:[%s19931_s11 + $0x40] sm:$0xff] }
 0xae6   :  { %v5879_v33 = vpop.f32.mrf.mxu1  ;;  %v5788_v18 = vpop.f32.mrf.mxu0  ;;  %6464 = vmatpush1.msra.mxu0 %v10799_v28  ;;  %v10789_v60 = vld [vmem:[%s19933_s12 + $0x10] sm:$0xff]  ;;  %v6266_v28 = vld [vmem:[%s19931_s11 + $0x38] sm:$0xff] }
 0xae7   :  { %v5878_v2 = vadd.f32 %v5877_v54, %v5788_v18  ;;  %v5891_v46 = vmax.f32 %v5614_v23, %v5874_v43  ;;  %6465 = vmatprep.subr.mxu0 %v10798_v63  ;;  %v10797_v54 = vld [vmem:[%s19931_s11 + $0x160] sm:$0xff]  ;;  %v10836_v18 = vld [vmem:[%s19931_s11 + $0x298] sm:$0xff]  ;;  %v6265_v63 = vld [vmem:[%s19931_s11 + $0x30] sm:$0xff] }
 0xae8   :  { %v5883_v40 = vpop.f32.mrf.mxu1  ;;  %v5790_v47 = vpop.f32.mrf.mxu0  ;;  %6466 = vmatpush1.msra.mxu0 %v10797_v54  ;;  %v6264_v54 = vld [vmem:[%s19931_s11 + $0x28] sm:$0xff] }
 0xae9   :  { %v5880_v45 = vadd.f32 %v5879_v33, %v5790_v47  ;;  %v5892_v35 = vmax.f32 %v5615_v17, %v5878_v2  ;;  %6467 = vmatprep.subr.mxu0 %v10796_v14  ;;  %v10795_v33 = vld [vmem:[%s19931_s11 + $0x150] sm:$0xff]  ;;  %v10834_v47 = vld [vmem:[%s19931_s11 + $0x288] sm:$0xff]  ;;  %v6263_v14 = vld [vmem:[%s19931_s11 + $0x20] sm:$0xff] }
 0xaea   :  { %v5794_v48 = vpop.f32.mrf.mxu0  ;;  %v5885_v7 = vpop.f32.mrf.mxu1  ;;  %6468 = vmatpush1.msra.mxu0 %v10795_v33  ;;  %v6262_v33 = vld [vmem:[%s19931_s11 + $0x18] sm:$0xff] }
 0xaeb   :  { %v5884_v25 = vadd.f32 %v5883_v40, %v5794_v48  ;;  %v5893_v24 = vmax.f32 %v5616_v5, %v5880_v45  ;;  %v5896_v45 = vld [vmem:[%s19932_s10] sm:$0xff]  ;;  %6491 = vmatprep.subr.mxu0 %v10836_v18  ;;  %v10835_v40 = vld [vmem:[%s19931_s11 + $0x290] sm:$0xff] }
 0xaec   :  { %v5796_v0 = vpop.f32.mrf.mxu0  ;;  %6492 = vmatpush2.msra.mxu0 %v10835_v40  ;;  %v10831_v48 = vld [vmem:[%s19931_s11 + $0x270] sm:$0xff]  ;;  %v6260_v40 = vld [vmem:[%s19931_s11 + $0x8] sm:$0xff] }
 0xaed   :  { %v5886_v26 = vadd.f32 %v5885_v7, %v5796_v0  ;;  %v5894_v12 = vmax.f32 %v5617_v4, %v5884_v25  ;;  %v5611_v4 = vmax.f32 %v5320_v50, %v5589_v1  ;;  %6493 = vmatprep.subr.mxu0 %v10834_v47  ;;  %v6290_v50 = vld [vmem:[%s19931_s11 + $0xf8] sm:$0xff]  ;;  %v6261_v18 = vld [vmem:[%s19931_s11 + $0x10] sm:$0xff]  ;;  %v6259_v47 = vld [vmem:[%s19931_s11] sm:$0xff] }
 0xaee   :  { %6494 = vmatpush2.msra.mxu0 %v10833_v30  ;;  %v6300_v30 = vld [vmem:[%s19931_s11 + $0x148] sm:$0xff] }
 0xaef   :  { %v5895_v15 = vmax.f32 %v5618_v3, %v5886_v26  ;;  %v5612_v26 = vmax.f32 %v5322_v56, %v5591_v58  ;;  %v5888_v19 = vmax.f32 %v5611_v4, %v5866_v22  ;;  %6495 = vmatprep.subr.mxu0 %v10832_v9  ;;  %v6289_v22 = vld [vmem:[%s19931_s11 + $0xf0] sm:$0xff]  ;;  %v6286_v4 = vld [vmem:[%s19931_s11 + $0xd8] sm:$0xff]  ;;  %v6299_v9 = vld [vmem:[%s19931_s11 + $0x140] sm:$0xff] }
 0xaf0   :  { %6496 = vmatpush2.msra.mxu0 %v10831_v48  ;;  %v6298_v48 = vld [vmem:[%s19931_s11 + $0x138] sm:$0xff] }
 0xaf1   :  { %10769 = vmatprep.subr.msk.mxu1 %vm3079_vm1, %v5895_v15  ;;  %v5889_v61 = vmax.f32 %v5612_v26, %v5868_v27  ;;  %6497 = vmatprep.subr.mxu0 %v10830_v41  ;;  %v6287_v26 = vld [vmem:[%s19931_s11 + $0xe0] sm:$0xff]  ;;  %v6297_v41 = vld [vmem:[%s19931_s11 + $0x130] sm:$0xff] }
 0xaf2   :  { %10770 = vmatpush1.msk.msra.mxu1 %vm3079_vm1, %v5894_v12  ;;  %6498 = vmatpush2.msra.mxu0 %v10829_v53  ;;  %v6296_v53 = vld [vmem:[%s19931_s11 + $0x128] sm:$0xff] }
 0xaf3   :  { %5936 = vmatprep.subr.mxu1 %v5893_v24  ;;  %6499 = vmatprep.subr.mxu0 %v10828_v55  ;;  %v6295_v55 = vld [vmem:[%s19931_s11 + $0x120] sm:$0xff] }
 0xaf4   :  { %5937 = vmatpush1.msra.mxu1 %v5892_v35  ;;  %6500 = vmatpush2.msra.mxu0 %v10827_v36  ;;  %v6294_v36 = vld [vmem:[%s19931_s11 + $0x118] sm:$0xff] }
 0xaf5   :  { %5938 = vmatprep.subr.mxu1 %v5891_v46 }
 0xaf6   :  { %5939 = vmatpush1.msra.mxu1 %v5890_v8 }
 0xaf7   :  { %5940 = vmatprep.subr.mxu1 %v5889_v61 }
 0xaf8   :  { %5941 = vmatpush1.msra.mxu1 %v5888_v19 }
 0xaf9   :  { %10771 = vmatmul.mubr.msk.f32.vlgmr.msra.gmra.mxu1 %vm3066_vm2, %v5896_v45  ;;  %10775 = vmatprep.subr.msk.mxu1 %vm3079_vm1, %v5895_v15  ;;  %v6282_v45 = vld [vmem:[%s19931_s11 + $0xb8] sm:$0xff] }
 0xafa   :  { %10776 = vmatpush1.msk.msra.mxu1 %vm3079_vm1, %v5894_v12  ;;  %5980 = vmatprep.mubr.f32.mxu1 %v20068_v10 }
 0xafb   :  { %6022 = vmatprep.subr.mxu1 %v5893_v24 }
 0xafc   :  { %6023 = vmatpush1.msra.mxu1 %v5892_v35 }
 0xafd   :  { %10772 = vmatmul.mubr.msk.f32.gmra.mxu1 %vm3066_vm2, %v5897_v29  ;;  %6024 = vmatprep.subr.mxu1 %v5891_v46  ;;  %v6281_v29 = vld [vmem:[%s19931_s11 + $0xb0] sm:$0xff] }
 0xafe   :  { %6025 = vmatpush1.msra.mxu1 %v5890_v8  ;;  %6060 = vmatprep.mubr.f32.mxu1 %v20068_v10 }
 0xaff   :  { %6026 = vmatprep.subr.mxu1 %v5889_v61 }
 0xb00   :  { %6027 = vmatpush1.msra.mxu1 %v5888_v19 }
 0xb01   :  { %10777 = vmatmul.mubr.msk.f32.vlgmr.msra.gmra.mxu1 %vm3066_vm2, %v10773_v37  ;;  %10781 = vmatprep.subr.msk.mxu1 %vm3079_vm1, %v5895_v15  ;;  %v6280_v37 = vld [vmem:[%s19931_s11 + $0xa8] sm:$0xff] }
 0xb02   :  { %10782 = vmatpush1.msk.msra.mxu1 %vm3079_vm1, %v5894_v12  ;;  %6066 = vmatprep.mubr.f32.mxu1 %v20068_v10 }
 0xb03   :  { %6112 = vmatprep.subr.mxu1 %v5893_v24  ;;  %v6167_v24 = vld [vmem:[%s19933_s12] sm:$0xff] }
 0xb04   :  { %6113 = vmatpush1.msra.mxu1 %v5892_v35  ;;  %v6288_v35 = vld [vmem:[%s19931_s11 + $0xe8] sm:$0xff] }
 0xb05   :  { %10778 = vmatmul.mubr.msk.f32.gmra.mxu1 %vm3066_vm2, %v10774_v59  ;;  %6114 = vmatprep.subr.mxu1 %v5891_v46  ;;  %v10790_v46 = vld [vmem:[%s19933_s12 + $0x18] sm:$0x3f]  ;;  %v6279_v59 = vld [vmem:[%s19931_s11 + $0xa0] sm:$0xff] }
 0xb06   :  { %6115 = vmatpush1.msra.mxu1 %v5890_v8  ;;  %6150 = vmatprep.mubr.f32.mxu1 %v20068_v10  ;;  %v6285_v8 = vld [vmem:[%s19931_s11 + $0xd0] sm:$0xff] }
 0xb07   :  { %6116 = vmatprep.subr.mxu1 %v5889_v61  ;;  %v6284_v61 = vld [vmem:[%s19931_s11 + $0xc8] sm:$0xff] }
 0xb08   :  { %6117 = vmatpush1.msra.mxu1 %v5888_v19  ;;  %v6283_v19 = vld [vmem:[%s19931_s11 + $0xc0] sm:$0xff] }
 0xb09   :  { %10783 = vmatmul.mubr.msk.f32.vlgmr.msra.gmra.mxu1 %vm3066_vm2, %v10779_v13  ;;  %v6278_v13 = vld [vmem:[%s19931_s11 + $0x98] sm:$0xff] }
 0xb0a   :  { %6156 = vmatprep.mubr.f32.mxu1 %v20068_v10 }
 0xb0d   :  { %10784 = vmatmul.mubr.msk.f32.gmra.mxu1 %vm3066_vm2, %v10780_v11  ;;  %v6277_v11 = vld [vmem:[%s19931_s11 + $0x90] sm:$0xff] }
 0xb0e   :  { %6246 = vmatprep.mubr.f32.mxu1 %v20068_v10 }
 0xbb9   :  { %v5976_v62 = vpop.f32.mrf.mxu1 }
 0xbbb   :  { %v5978_v42 = vpop.f32.mrf.mxu1 }
 0xbbd   :  { %v5982_v51 = vpop.f32.mrf.mxu1 }
 0xbbf   :  { %v5984_v7 = vpop.f32.mrf.mxu1 }
 0xbc1   :  { %v6062_v25 = vpop.f32.mrf.mxu1 }
 0xbc2   :  { %v6073_v12 = vmax.f32 %v5976_v62, %v6062_v25  ;;  %v6293_v62 = vld [vmem:[%s19931_s11 + $0x110] sm:$0xff] }
 0xbc3   :  { %v6064_v0 = vpop.f32.mrf.mxu1 }
 0xbc4   :  { %v6074_v17 = vmax.f32 %v5978_v42, %v6064_v0  ;;  %v6292_v42 = vld [vmem:[%s19931_s11 + $0x108] sm:$0xff] }
 0xbc5   :  { %v6068_v31 = vpop.f32.mrf.mxu1 }
 0xbc6   :  { %v6075_v15 = vmax.f32 %v5982_v51, %v6068_v31  ;;  %v6291_v51 = vld [vmem:[%s19931_s11 + $0x100] sm:$0xff] }
 0xbc7   :  { %v6070_v3 = vpop.f32.mrf.mxu1 }
 0xbc8   :  { %v6076_v43 = vmax.f32 %v5984_v7, %v6070_v3 }
 0xbc9   :  { %v6152_v2 = vpop.f32.mrf.mxu1 }
 0xbca   :  { %v17640_v27 = vmax.f32 %v6073_v12, %v6152_v2  ;;  %v10842_v12 = vld [vmem:[%s19933_s12 + $0x28] sm:$0x3f] }
 0xbcb   :  { %v6154_v58 = vpop.f32.mrf.mxu1 }
 0xbcc   :  { %v17636_v23 = vmax.f32 %v6074_v17, %v6154_v58  ;;  %v10876_v17 = vld [vmem:[%s19931_s11 + $0x388] sm:$0xff] }
 0xbcd   :  { %v6158_v5 = vpop.f32.mrf.mxu1 }
 0xbce   :  { %v17634_v56 = vmax.f32 %v6075_v15, %v6158_v5  ;;  %v10878_v5 = vld [vmem:[%s19931_s11 + $0x398] sm:$0xff]  ;;  %v10841_v15 = vld [vmem:[%s19933_s12 + $0x20] sm:$0xff] }
 0xbcf   :  { %v6160_v1 = vpop.f32.mrf.mxu1 }
 0xbd0   :  { %v6166_v21 = vmax.f32 %v6076_v43, %v6160_v1  ;;  %v10877_v1 = vld [vmem:[%s19931_s11 + $0x390] sm:$0xff] }
 0xbd2   :  { %10785 = vmatprep.subr.msk.mxu1 %vm3079_vm1, %v6166_v21  ;;  %10843 = vmatprep.subr.msk.mxu0 %vm3079_vm1, %v6166_v21 }
 0xbd3   :  { %10786 = vmatpush1.msk.msra.mxu1 %vm3079_vm1, %v17634_v56 }
 0xbd4   :  { %6212 = vmatprep.subr.mxu1 %v17636_v23 }
 0xbd5   :  { %6213 = vmatpush1.msra.mxu1 %v17640_v27 }
 0xbd6   :  { %10787 = vmatmul.mubr.msk.f32.vlgmr.msra.gmra.mxu1 %vm6169_vm5, %v6167_v24  ;;  %10791 = vmatprep.subr.msk.mxu1 %vm3079_vm1, %v6166_v21  ;;  %v10875_v21 = vld [vmem:[%s19931_s11 + $0x380] sm:$0xff] }
 0xbd7   :  { %10792 = vmatpush1.msk.msra.mxu1 %vm3079_vm1, %v17634_v56  ;;  %6252 = vmatprep.mubr.f32.mxu1 %v20068_v10  ;;  %v10871_v24 = vld [vmem:[%s19931_s11 + $0x360] sm:$0xff] }
 0xbd8   :  { %6340 = vmatprep.subr.mxu1 %v17636_v23 }
 0xbd9   :  { %6341 = vmatpush1.msra.mxu1 %v17640_v27 }
 0xbda   :  { %10788 = vmatmul.mubr.msk.f32.gmra.mxu1 %vm6169_vm5, %v6168_v52  ;;  %6520 = vmatprep.subr.mxu1 %v6290_v50  ;;  %v10870_v52 = vld [vmem:[%s19931_s11 + $0x358] sm:$0xff]  ;;  %v10869_v50 = vld [vmem:[%s19931_s11 + $0x350] sm:$0xff] }
 0xbdb   :  { %6374 = vmatprep.mubr.f32.mxu1 %v20068_v10 }
 0xbde   :  { %10793 = vmatmul.mubr.msk.f32.vlgmr.msra.gmra.mxu1 %vm6169_vm5, %v10789_v60  ;;  %v10868_v60 = vld [vmem:[%s19931_s11 + $0x348] sm:$0xff] }
 0xbdf   :  { %6380 = vmatprep.mubr.f32.mxu1 %v20068_v10  ;;  %6521 = vmatpush1.msra.mxu1 %v6289_v22  ;;  %v10867_v22 = vld [vmem:[%s19931_s11 + $0x340] sm:$0xff] }
 0xbe0   :  { %6522 = vmatprep.subr.mxu1 %v6288_v35  ;;  %v10866_v35 = vld [vmem:[%s19931_s11 + $0x338] sm:$0xff] }
 0xbe1   :  { %6523 = vmatpush1.msra.mxu1 %v6287_v26  ;;  %v10865_v26 = vld [vmem:[%s19931_s11 + $0x330] sm:$0xff] }
 0xbe2   :  { %10794 = vmatmul.mubr.msk.f32.gmra.mxu1 %vm6169_vm5, %v10790_v46  ;;  %6524 = vmatprep.subr.mxu1 %v6286_v4  ;;  %v10864_v46 = vld [vmem:[%s19931_s11 + $0x328] sm:$0xff]  ;;  %v10863_v4 = vld [vmem:[%s19931_s11 + $0x320] sm:$0xff] }
 0xbe3   :  { %6525 = vmatpush1.msra.mxu1 %v6285_v8  ;;  %v10862_v8 = vld [vmem:[%s19931_s11 + $0x318] sm:$0xff] }
 0xbe4   :  { %6526 = vmatprep.subr.mxu1 %v6284_v61  ;;  %v10861_v61 = vld [vmem:[%s19931_s11 + $0x310] sm:$0xff] }
 0xbe5   :  { %6527 = vmatpush1.msra.mxu1 %v6283_v19  ;;  %v10860_v19 = vld [vmem:[%s19931_s11 + $0x308] sm:$0xff] }
 0xbe6   :  { %6528 = vmatprep.subr.mxu1 %v6282_v45  ;;  %v10859_v45 = vld [vmem:[%s19931_s11 + $0x300] sm:$0xff] }
 0xbe7   :  { %6529 = vmatpush1.msra.mxu1 %v6281_v29  ;;  %v10858_v29 = vld [vmem:[%s19931_s11 + $0x2f8] sm:$0xff] }
 0xbe8   :  { %6530 = vmatprep.subr.mxu1 %v6280_v37  ;;  %v10857_v37 = vld [vmem:[%s19931_s11 + $0x2f0] sm:$0xff] }
 0xbe9   :  { %6531 = vmatpush1.msra.mxu1 %v6279_v59  ;;  %v10856_v59 = vld [vmem:[%s19931_s11 + $0x2e8] sm:$0xff] }
 0xbea   :  { %6532 = vmatprep.subr.mxu1 %v6278_v13  ;;  %v10855_v13 = vld [vmem:[%s19931_s11 + $0x2e0] sm:$0xff] }
 0xbeb   :  { %6533 = vmatpush1.msra.mxu1 %v6277_v11  ;;  %v10854_v11 = vld [vmem:[%s19931_s11 + $0x2d8] sm:$0xff] }
 0xbec   :  { %6534 = vmatprep.subr.mxu1 %v6276_v32  ;;  %v10853_v32 = vld [vmem:[%s19931_s11 + $0x2d0] sm:$0xff] }
 0xbed   :  { %6535 = vmatpush1.msra.mxu1 %v6275_v16  ;;  %v10852_v16 = vld [vmem:[%s19931_s11 + $0x2c8] sm:$0xff] }
 0xbee   :  { %6536 = vmatprep.subr.mxu1 %v6274_v49  ;;  %v10851_v49 = vld [vmem:[%s19931_s11 + $0x2c0] sm:$0xff] }
 0xbef   :  { %6537 = vmatpush1.msra.mxu1 %v6273_v34  ;;  %v10850_v34 = vld [vmem:[%s19931_s11 + $0x2b8] sm:$0xff] }
 0xbf0   :  { %6538 = vmatprep.subr.mxu1 %v6272_v6  ;;  %v10849_v6 = vld [vmem:[%s19931_s11 + $0x2b0] sm:$0xff] }
 0xbf1   :  { %6539 = vmatpush1.msra.mxu1 %v6271_v57  ;;  %v10848_v57 = vld [vmem:[%s19931_s11 + $0x2a8] sm:$0xff] }
 0xbf2   :  { %6540 = vmatprep.subr.mxu1 %v6270_v39  ;;  %v10847_v39 = vld [vmem:[%s19931_s11 + $0x2a0] sm:$0xff] }
 0xbf3   :  { %6541 = vmatpush1.msra.mxu1 %v6269_v44  ;;  %v10888_v44 = vld [vmem:[%s19931_s11 + $0x3e8] sm:$0xff] }
 0xbf4   :  { %6542 = vmatprep.subr.mxu1 %v6268_v38  ;;  %v10887_v38 = vld [vmem:[%s19931_s11 + $0x3e0] sm:$0xff] }
 0xbf5   :  { %6543 = vmatpush1.msra.mxu1 %v6267_v20  ;;  %v10886_v20 = vld [vmem:[%s19931_s11 + $0x3d8] sm:$0xff] }
 0xbf6   :  { %6544 = vmatprep.subr.mxu1 %v6266_v28  ;;  %v10885_v28 = vld [vmem:[%s19931_s11 + $0x3d0] sm:$0xff] }
 0xbf7   :  { %6545 = vmatpush1.msra.mxu1 %v6265_v63  ;;  %v10884_v63 = vld [vmem:[%s19931_s11 + $0x3c8] sm:$0xff] }
 0xbf8   :  { %6546 = vmatprep.subr.mxu1 %v6264_v54  ;;  %v10883_v54 = vld [vmem:[%s19931_s11 + $0x3c0] sm:$0xff] }
 0xbf9   :  { %6547 = vmatpush1.msra.mxu1 %v6263_v14  ;;  %v10882_v14 = vld [vmem:[%s19931_s11 + $0x3b8] sm:$0xff] }
 0xbfa   :  { %6548 = vmatprep.subr.mxu1 %v6262_v33  ;;  %v10881_v33 = vld [vmem:[%s19931_s11 + $0x3b0] sm:$0xff] }
 0xbfb   :  { %6549 = vmatpush1.msra.mxu1 %v6261_v18  ;;  %v10880_v18 = vld [vmem:[%s19931_s11 + $0x3a8] sm:$0xff] }
 0xbfc   :  { %6550 = vmatprep.subr.mxu1 %v6260_v40  ;;  %v10879_v40 = vld [vmem:[%s19931_s11 + $0x3a0] sm:$0xff] }
 0xbfd   :  { %6551 = vmatpush1.msra.mxu1 %v6259_v47 }
 0xbfe   :  { %6574 = vmatprep.subr.mxu1 %v6300_v30 }
 0xbff   :  { %6575 = vmatpush2.msra.mxu1 %v6299_v9 }
 0xc00   :  { %6576 = vmatprep.subr.mxu1 %v6298_v48 }
 0xc01   :  { %6577 = vmatpush2.msra.mxu1 %v6297_v41 }
 0xc02   :  { %6578 = vmatprep.subr.mxu1 %v6296_v53 }
 0xc03   :  { %6579 = vmatpush2.msra.mxu1 %v6295_v55 }
 0xc04   :  { %6580 = vmatprep.subr.mxu1 %v6294_v36 }
 0xc05   :  { %6581 = vmatpush2.msra.mxu1 %v6293_v62  ;;  %v6955_v62 = vld [vmem:[%s19934_s14 + $0xf8] sm:$0xff] }
 0xc06   :  { %6582 = vmatprep.subr.mxu1 %v6292_v42  ;;  %v6954_v42 = vld [vmem:[%s19934_s14 + $0xf0] sm:$0xff] }
 0xc07   :  { %6583 = vmatpush2.msra.mxu1 %v6291_v51  ;;  %v6953_v51 = vld [vmem:[%s19934_s14 + $0xe8] sm:$0xff] }
 0xc96   :  { %v6248_v7 = vpop.f32.mrf.mxu1 }
 0xc98   :  { %v6250_v25 = vpop.f32.mrf.mxu1 }
 0xc99   :  { %10839 = vmatprep.mubr.msk.f32.mxu1 %vm6430_vm6, %v6250_v25  ;;  %v6951_v25 = vld [vmem:[%s19934_s14 + $0xd8] sm:$0xff] }
 0xc9a   :  { %v6254_v0 = vpop.f32.mrf.mxu1  ;;  %6585 = vmatmul.mubr.f32.vlgmr.msra.gmra.mxu1 %v6248_v7  ;;  %v6952_v7 = vld [vmem:[%s19934_s14 + $0xe0] sm:$0xff] }
 0xc9c   :  { %v6256_v31 = vpop.f32.mrf.mxu1 }
 0xc9d   :  { %10840 = vmatprep.mubr.msk.f32.mxu1 %vm6430_vm6, %v6256_v31  ;;  %v6949_v31 = vld [vmem:[%s19934_s14 + $0xc8] sm:$0xff] }
 0xc9e   :  { %v6376_v3 = vpop.f32.mrf.mxu1  ;;  %6591 = vmatmul.mubr.f32.gmra.mxu1 %v6254_v0  ;;  %v6950_v0 = vld [vmem:[%s19934_s14 + $0xd0] sm:$0xff] }
 0xc9f   :  { %6911 = vmatprep.mubr.f32.mxu1 %v20068_v10 }
 0xca0   :  { %v6378_v2 = vpop.f32.mrf.mxu1 }
 0xca1   :  { %10837 = vmatprep.mubr.msk.f32.mxu0 %vm6430_vm6, %v6378_v2  ;;  %v6947_v2 = vld [vmem:[%s19934_s14 + $0xb8] sm:$0xff] }
 0xca2   :  { %v6382_v58 = vpop.f32.mrf.mxu1  ;;  %6502 = vmatmul.mubr.f32.vlgmr.msra.gmra.mxu0 %v6376_v3  ;;  %v6948_v3 = vld [vmem:[%s19934_s14 + $0xc0] sm:$0xff] }
 0xca3   :  { %10844 = vmatpush1.msk.msra.mxu0 %vm3079_vm1, %v17634_v56  ;;  %v10874_v56 = vld [vmem:[%s19931_s11 + $0x378] sm:$0xff] }
 0xca4   :  { %6636 = vmatprep.subr.mxu0 %v17636_v23  ;;  %v6384_v43 = vpop.f32.mrf.mxu1  ;;  %v10873_v23 = vld [vmem:[%s19931_s11 + $0x370] sm:$0xff] }
 0xca5   :  { %6637 = vmatpush1.msra.mxu0 %v17640_v27  ;;  %10838 = vmatprep.mubr.msk.f32.mxu0 %vm6430_vm6, %v6384_v43  ;;  %v10872_v27 = vld [vmem:[%s19931_s11 + $0x368] sm:$0xff]  ;;  %v6944_v43 = vld [vmem:[%s19934_s14 + $0xa0] sm:$0xff] }
 0xca6   :  { %6508 = vmatmul.mubr.f32.gmra.mxu0 %v6382_v58  ;;  %6732 = vmatprep.subr.mxu0 %v10878_v5  ;;  %v6946_v58 = vld [vmem:[%s19934_s14 + $0xb0] sm:$0xff]  ;;  %v6945_v5 = vld [vmem:[%s19934_s14 + $0xa8] sm:$0xff] }
 0xca7   :  { %6670 = vmatprep.mubr.f32.mxu0 %v20068_v10 }
 0xcaa   :  { %10845 = vmatmul.mubr.msk.f32.vlgmr.msra.gmra.mxu0 %vm6169_vm5, %v10841_v15  ;;  %v6943_v15 = vld [vmem:[%s19934_s14 + $0x98] sm:$0xff] }
 0xcab   :  { %6676 = vmatprep.mubr.f32.mxu0 %v20068_v10  ;;  %6733 = vmatpush1.msra.mxu0 %v10877_v1  ;;  %v6942_v1 = vld [vmem:[%s19934_s14 + $0x90] sm:$0xff] }
 0xcac   :  { %6734 = vmatprep.subr.mxu0 %v10876_v17  ;;  %v6941_v17 = vld [vmem:[%s19934_s14 + $0x88] sm:$0xff] }
 0xcad   :  { %6735 = vmatpush1.msra.mxu0 %v10875_v21  ;;  %v6940_v21 = vld [vmem:[%s19934_s14 + $0x80] sm:$0xff] }
 0xcae   :  { %10846 = vmatmul.mubr.msk.f32.gmra.mxu0 %vm6169_vm5, %v10842_v12  ;;  %6736 = vmatprep.subr.mxu0 %v10874_v56  ;;  %v6939_v12 = vld [vmem:[%s19934_s14 + $0x78] sm:$0xff]  ;;  %v6938_v56 = vld [vmem:[%s19934_s14 + $0x70] sm:$0xff] }
 0xcaf   :  { %6737 = vmatpush1.msra.mxu0 %v10873_v23  ;;  %v6937_v23 = vld [vmem:[%s19934_s14 + $0x68] sm:$0xff] }
 0xcb0   :  { %6738 = vmatprep.subr.mxu0 %v10872_v27  ;;  %v6936_v27 = vld [vmem:[%s19934_s14 + $0x60] sm:$0xff] }
 0xcb1   :  { %6739 = vmatpush1.msra.mxu0 %v10871_v24  ;;  %v6935_v24 = vld [vmem:[%s19934_s14 + $0x58] sm:$0xff] }
 0xcb2   :  { %6740 = vmatprep.subr.mxu0 %v10870_v52  ;;  %v6934_v52 = vld [vmem:[%s19934_s14 + $0x50] sm:$0xff] }
 0xcb3   :  { %6741 = vmatpush1.msra.mxu0 %v10869_v50  ;;  %v6933_v50 = vld [vmem:[%s19934_s14 + $0x48] sm:$0xff] }
 0xcb4   :  { %6742 = vmatprep.subr.mxu0 %v10868_v60  ;;  %v6932_v60 = vld [vmem:[%s19934_s14 + $0x40] sm:$0xff] }
 0xcb5   :  { %6743 = vmatpush1.msra.mxu0 %v10867_v22  ;;  %v6931_v22 = vld [vmem:[%s19934_s14 + $0x38] sm:$0xff] }
 0xcb6   :  { %6744 = vmatprep.subr.mxu0 %v10866_v35  ;;  %v6930_v35 = vld [vmem:[%s19934_s14 + $0x30] sm:$0xff] }
 0xcb7   :  { %6745 = vmatpush1.msra.mxu0 %v10865_v26  ;;  %v6929_v26 = vld [vmem:[%s19934_s14 + $0x28] sm:$0xff] }
 0xcb8   :  { %6746 = vmatprep.subr.mxu0 %v10864_v46  ;;  %v6928_v46 = vld [vmem:[%s19934_s14 + $0x20] sm:$0xff] }
 0xcb9   :  { %6747 = vmatpush1.msra.mxu0 %v10863_v4  ;;  %v6927_v4 = vld [vmem:[%s19934_s14 + $0x18] sm:$0xff] }
 0xcba   :  { %6748 = vmatprep.subr.mxu0 %v10862_v8  ;;  %v6926_v8 = vld [vmem:[%s19934_s14 + $0x10] sm:$0xff] }
 0xcbb   :  { %6749 = vmatpush1.msra.mxu0 %v10861_v61  ;;  %v6925_v61 = vld [vmem:[%s19934_s14 + $0x8] sm:$0xff] }
 0xcbc   :  { %6750 = vmatprep.subr.mxu0 %v10860_v19  ;;  %v6924_v19 = vld [vmem:[%s19934_s14] sm:$0xff] }
 0xcbd   :  { %6751 = vmatpush1.msra.mxu0 %v10859_v45  ;;  %v6979_v45 = vld [vmem:[%s19934_s14 + $0x1b8] sm:$0xff] }
 0xcbe   :  { %6752 = vmatprep.subr.mxu0 %v10858_v29  ;;  %v6978_v29 = vld [vmem:[%s19934_s14 + $0x1b0] sm:$0xff] }
 0xcbf   :  { %6753 = vmatpush1.msra.mxu0 %v10857_v37  ;;  %v6977_v37 = vld [vmem:[%s19934_s14 + $0x1a8] sm:$0xff] }
 0xcc0   :  { %6754 = vmatprep.subr.mxu0 %v10856_v59  ;;  %v6976_v59 = vld [vmem:[%s19934_s14 + $0x1a0] sm:$0xff] }
 0xcc1   :  { %6755 = vmatpush1.msra.mxu0 %v10855_v13  ;;  %v6975_v13 = vld [vmem:[%s19934_s14 + $0x198] sm:$0xff] }
 0xcc2   :  { %6756 = vmatprep.subr.mxu0 %v10854_v11  ;;  %v6974_v11 = vld [vmem:[%s19934_s14 + $0x190] sm:$0xff] }
 0xcc3   :  { %6757 = vmatpush1.msra.mxu0 %v10853_v32  ;;  %v6973_v32 = vld [vmem:[%s19934_s14 + $0x188] sm:$0xff] }
 0xcc4   :  { %6758 = vmatprep.subr.mxu0 %v10852_v16  ;;  %v6972_v16 = vld [vmem:[%s19934_s14 + $0x180] sm:$0xff] }
 0xcc5   :  { %6759 = vmatpush1.msra.mxu0 %v10851_v49  ;;  %v6971_v49 = vld [vmem:[%s19934_s14 + $0x178] sm:$0xff] }
 0xcc6   :  { %6760 = vmatprep.subr.mxu0 %v10850_v34 }
 0xcc7   :  { %6761 = vmatpush1.msra.mxu0 %v10849_v6  ;;  %v6970_v6 = vld [vmem:[%s19934_s14 + $0x170] sm:$0xff] }
 0xcc8   :  { %6762 = vmatprep.subr.mxu0 %v10848_v57  ;;  %v6969_v57 = vld [vmem:[%s19934_s14 + $0x168] sm:$0xff] }
 0xcc9   :  { %6763 = vmatpush1.msra.mxu0 %v10847_v39  ;;  %v6968_v39 = vld [vmem:[%s19934_s14 + $0x160] sm:$0xff] }
 0xcca   :  { %6786 = vmatprep.subr.mxu0 %v10888_v44  ;;  %v6967_v44 = vld [vmem:[%s19934_s14 + $0x158] sm:$0xff] }
 0xccb   :  { %6787 = vmatpush2.msra.mxu0 %v10887_v38 }
 0xccc   :  { %6788 = vmatprep.subr.mxu0 %v10886_v20 }
 0xccd   :  { %6789 = vmatpush2.msra.mxu0 %v10885_v28 }
 0xcce   :  { %6790 = vmatprep.subr.mxu0 %v10884_v63 }
 0xccf   :  { %6791 = vmatpush2.msra.mxu0 %v10883_v54 }
 0xcd0   :  { %6792 = vmatprep.subr.mxu0 %v10882_v14 }
 0xcd1   :  { %6793 = vmatpush2.msra.mxu0 %v10881_v33  ;;  %v6813_v33 = vld [vmem:[%s19935_s13] sm:$0x3] }
 0xcd2   :  { %6794 = vmatprep.subr.mxu0 %v10880_v18 }
 0xcd3   :  { %6795 = vmatpush2.msra.mxu0 %v10879_v40 }
 0xcd4   :  { %7213 = vmatprep.subr.mxu0 %v6955_v62 }
 0xd5a   :  { %v6586_v34 = vpop.f32.mrf.mxu1 }
 0xd5c   :  { %v6588_v38 = vpop.f32.mrf.mxu1 }
 0xd5e   :  { %v6592_v20 = vpop.f32.mrf.mxu1 }
 0xd60   :  { %v6594_v40 = vpop.f32.mrf.mxu1 }
 0xd62   :  { %v17941_v47 = vpop.f32.mrf.mxu0 }
 0xd63   :  { %v6587_v18 = vadd.f32 %v6586_v34, %v17941_v47  ;;  %v10906_v34 = vld [vmem:[%s19934_s14 + $0x1e8] sm:$0xff] }
 0xd64   :  { %v17943_v30 = vpop.f32.mrf.mxu0 }
 0xd65   :  { %v6589_v54 = vadd.f32 %v6588_v38, %v17943_v30  ;;  %v10901_v38 = vld [vmem:[%s19934_s14 + $0x1c0] sm:$0xff] }
 0xd66   :  { %v17945_v9 = vpop.f32.mrf.mxu0 }
 0xd67   :  { %v6593_v14 = vadd.f32 %v6592_v20, %v17945_v9  ;;  %v10956_v20 = vld [vmem:[%s19934_s14 + $0x378] sm:$0xff] }
 0xd68   :  { %v17947_v48 = vpop.f32.mrf.mxu0 }
 0xd6a   :  { %v6672_v41 = vpop.f32.mrf.mxu0 }
 0xd6c   :  { %v6674_v53 = vpop.f32.mrf.mxu0 }
 0xd6d   :  { %10889 = vmatprep.mubr.msk.f32.mxu0 %vm6430_vm6, %v6674_v53  ;;  %v6595_v53 = vadd.f32 %v6594_v40, %v17947_v48  ;;  %v10949_v40 = vld [vmem:[%s19934_s14 + $0x340] sm:$0xff] }
 0xd6e   :  { %v6678_v55 = vpop.f32.mrf.mxu0  ;;  %6797 = vmatmul.mubr.f32.vlgmr.msra.gmra.mxu0 %v6672_v41 }
 0xd6f   :  { %7214 = vmatpush1.msra.mxu0 %v6954_v42 }
 0xd70   :  { %v6680_v36 = vpop.f32.mrf.mxu0  ;;  %7215 = vmatprep.subr.mxu0 %v6953_v51 }
 0xd71   :  { %10890 = vmatprep.mubr.msk.f32.mxu0 %vm6430_vm6, %v6680_v36  ;;  %7216 = vmatpush1.msra.mxu0 %v6952_v7  ;;  %v20069_v36 = vld [vmem:[#allocation13_spill] sm:$0xff]  ;;  %v20070_v7 = vld [vmem:[#allocation12_spill] sm:$0xff] }
 0xd72   :  { %6803 = vmatmul.mubr.f32.gmra.mxu0 %v6678_v55  ;;  %7217 = vmatprep.subr.mxu0 %v6951_v25  ;;  %v6822_v62 = vrot.slane %v6813_v33, %v20069_v36  ;;  %v6818_v25 = vrot.slane %v6813_v33, %v20070_v7  ;;  %v10951_v33 = vld [vmem:[%s19934_s14 + $0x350] sm:$0xff] }
 0xd73   :  { %7218 = vmatpush1.msra.mxu0 %v6950_v0 }
 0xd74   :  { %7219 = vmatprep.subr.mxu0 %v6949_v31 }
 0xd75   :  { %7220 = vmatpush1.msra.mxu0 %v6948_v3 }
 0xd76   :  { %7221 = vmatprep.subr.mxu0 %v6947_v2 }
 0xd77   :  { %7222 = vmatpush1.msra.mxu0 %v6946_v58 }
 0xd78   :  { %7223 = vmatprep.subr.mxu0 %v6945_v5 }
 0xd79   :  { %7224 = vmatpush1.msra.mxu0 %v6944_v43  ;;  %v6833_v43 = vld [vmem:[%s19936_s15] sm:$0xff] }
 0xd7a   :  { %7225 = vmatprep.subr.mxu0 %v6943_v15  ;;  %v6834_v15 = vld [vmem:[%s19936_s15 + $0x8] sm:$0x3f] }
 0xd7b   :  { %7226 = vmatpush1.msra.mxu0 %v6942_v1  ;;  %v10932_v1 = vld [vmem:[%s19934_s14 + $0x2b8] sm:$0xff] }
 0xd7c   :  { %7227 = vmatprep.subr.mxu0 %v6941_v17  ;;  %v10895_v17 = vld [vmem:[%s19936_s15 + $0x10] sm:$0xff] }
 0xd7d   :  { %7228 = vmatpush1.msra.mxu0 %v6940_v21  ;;  %v10931_v21 = vld [vmem:[%s19934_s14 + $0x2b0] sm:$0xff] }
 0xd7e   :  { %7229 = vmatprep.subr.mxu0 %v6939_v12  ;;  %v10930_v12 = vld [vmem:[%s19934_s14 + $0x2a8] sm:$0xff] }
 0xd7f   :  { %7230 = vmatpush1.msra.mxu0 %v6938_v56  ;;  %v10929_v56 = vld [vmem:[%s19934_s14 + $0x2a0] sm:$0xff] }
 0xd80   :  { %7231 = vmatprep.subr.mxu0 %v6937_v23  ;;  %v10928_v23 = vld [vmem:[%s19934_s14 + $0x298] sm:$0xff] }
 0xd81   :  { %7232 = vmatpush1.msra.mxu0 %v6936_v27  ;;  %v10896_v27 = vld [vmem:[%s19936_s15 + $0x18] sm:$0x3f] }
 0xd82   :  { %7233 = vmatprep.subr.mxu0 %v6935_v24  ;;  %v10927_v24 = vld [vmem:[%s19934_s14 + $0x290] sm:$0xff] }
 0xd83   :  { %7234 = vmatpush1.msra.mxu0 %v6934_v52  ;;  %v10926_v52 = vld [vmem:[%s19934_s14 + $0x288] sm:$0xff] }
 0xd84   :  { %7235 = vmatprep.subr.mxu0 %v6933_v50  ;;  %v10925_v50 = vld [vmem:[%s19934_s14 + $0x280] sm:$0xff] }
 0xd85   :  { %7236 = vmatpush1.msra.mxu0 %v6932_v60  ;;  %v10924_v60 = vld [vmem:[%s19934_s14 + $0x278] sm:$0xff] }
 0xd86   :  { %7237 = vmatprep.subr.mxu0 %v6931_v22  ;;  %v10923_v22 = vld [vmem:[%s19934_s14 + $0x270] sm:$0xff] }
 0xd87   :  { %7238 = vmatpush1.msra.mxu0 %v6930_v35  ;;  %v10922_v35 = vld [vmem:[%s19934_s14 + $0x268] sm:$0xff] }
 0xd88   :  { %7239 = vmatprep.subr.mxu0 %v6929_v26  ;;  %v10921_v26 = vld [vmem:[%s19934_s14 + $0x260] sm:$0xff] }
 0xd89   :  { %7240 = vmatpush1.msra.mxu0 %v6928_v46  ;;  %v10920_v46 = vld [vmem:[%s19934_s14 + $0x258] sm:$0xff] }
 0xd8a   :  { %7241 = vmatprep.subr.mxu0 %v6927_v4  ;;  %v10919_v4 = vld [vmem:[%s19934_s14 + $0x250] sm:$0xff] }
 0xd8b   :  { %7242 = vmatpush1.msra.mxu0 %v6926_v8  ;;  %v10918_v8 = vld [vmem:[%s19934_s14 + $0x248] sm:$0xff] }
 0xd8c   :  { %7243 = vmatprep.subr.mxu0 %v6925_v61  ;;  %v10917_v61 = vld [vmem:[%s19934_s14 + $0x240] sm:$0xff] }
 0xd8d   :  { %7244 = vmatpush1.msra.mxu0 %v6924_v19  ;;  %v10916_v19 = vld [vmem:[%s19934_s14 + $0x238] sm:$0xff] }
 0xd8e   :  { %7253 = vmatprep.subr.mxu0 %v6979_v45  ;;  %v10915_v45 = vld [vmem:[%s19934_s14 + $0x230] sm:$0xff] }
 0xd8f   :  { %7254 = vmatpush2.msra.mxu0 %v6978_v29  ;;  %v10914_v29 = vld [vmem:[%s19934_s14 + $0x228] sm:$0xff] }
 0xd90   :  { %7255 = vmatprep.subr.mxu0 %v6977_v37  ;;  %v10913_v37 = vld [vmem:[%s19934_s14 + $0x220] sm:$0xff] }
 0xd91   :  { %7256 = vmatpush2.msra.mxu0 %v6976_v59  ;;  %v10912_v59 = vld [vmem:[%s19934_s14 + $0x218] sm:$0xff] }
 0xd92   :  { %7257 = vmatprep.subr.mxu0 %v6975_v13  ;;  %v10911_v13 = vld [vmem:[%s19934_s14 + $0x210] sm:$0xff] }
 0xd93   :  { %7258 = vmatpush2.msra.mxu0 %v6974_v11  ;;  %v10910_v11 = vld [vmem:[%s19934_s14 + $0x208] sm:$0xff] }
 0xd94   :  { %7259 = vmatprep.subr.mxu0 %v6973_v32  ;;  %v10909_v32 = vld [vmem:[%s19934_s14 + $0x200] sm:$0xff] }
 0xd95   :  { %7260 = vmatpush2.msra.mxu0 %v6972_v16  ;;  %v10908_v16 = vld [vmem:[%s19934_s14 + $0x1f8] sm:$0xff] }
 0xd96   :  { %7261 = vmatprep.subr.mxu0 %v6971_v49  ;;  %v10907_v49 = vld [vmem:[%s19934_s14 + $0x1f0] sm:$0xff] }
 0xd97   :  { %7262 = vmatpush2.msra.mxu0 %v6970_v6  ;;  %v10905_v6 = vld [vmem:[%s19934_s14 + $0x1e0] sm:$0xff] }
 0xd98   :  { %7263 = vmatprep.subr.mxu0 %v6969_v57  ;;  %v10904_v57 = vld [vmem:[%s19934_s14 + $0x1d8] sm:$0xff] }
 0xd99   :  { %7264 = vmatpush2.msra.mxu0 %v6968_v39  ;;  %v10903_v39 = vld [vmem:[%s19934_s14 + $0x1d0] sm:$0xff] }
 0xd9a   :  { %7265 = vmatprep.subr.mxu0 %v6967_v44  ;;  %v10902_v44 = vld [vmem:[%s19934_s14 + $0x1c8] sm:$0xff] }
 0xe2e   :  { %v6798_v28 = vpop.f32.mrf.mxu0 }
 0xe2f   :  { %v6809_v51 = vadd.f32 %v6798_v28, %v6587_v18  ;;  %v10955_v28 = vld [vmem:[%s19934_s14 + $0x370] sm:$0xff]  ;;  %v10950_v18 = vld [vmem:[%s19934_s14 + $0x348] sm:$0xff] }
 0xe30   :  { %v6800_v63 = vpop.f32.mrf.mxu0 }
 0xe31   :  { %v6810_v55 = vadd.f32 %v6800_v63, %v6589_v54  ;;  %v6825_v2 = vadd.f32 %v6818_v25, %v6809_v51  ;;  %v10954_v63 = vld [vmem:[%s19934_s14 + $0x368] sm:$0xff]  ;;  %v10953_v54 = vld [vmem:[%s19934_s14 + $0x360] sm:$0xff]  ;;  %v10943_v51 = vld [vmem:[%s19934_s14 + $0x310] sm:$0xff] }
 0xe32   :  { %v6804_v41 = vpop.f32.mrf.mxu0 }
 0xe33   :  { %v6811_v42 = vadd.f32 %v6804_v41, %v6593_v14  ;;  %v6826_v31 = vadd.f32 %v6822_v62, %v6810_v55  ;;  %v18103_v48 = vmax.f32 %v6825_v2, 0.0  ;;  %v10952_v14 = vld [vmem:[%s19934_s14 + $0x358] sm:$0xff]  ;;  %v10946_v55 = vld [vmem:[%s19934_s14 + $0x328] sm:$0xff] }
 0xe34   :  { %v6806_v30 = vpop.f32.mrf.mxu0  ;;  %v10948_v41 = vld [vmem:[%s19934_s14 + $0x338] sm:$0xff] }
 0xe35   :  { %v6812_v0 = vadd.f32 %v6806_v30, %v6595_v53  ;;  %v6827_v9 = vadd.f32 %v6818_v25, %v6811_v42  ;;  %v18099_v5 = vmax.f32 %v6826_v31, 0.0  ;;  %v10947_v53 = vld [vmem:[%s19934_s14 + $0x330] sm:$0xff]  ;;  %v10944_v42 = vld [vmem:[%s19934_s14 + $0x318] sm:$0xff]  ;;  %v10942_v25 = vld [vmem:[%s19934_s14 + $0x308] sm:$0xff] }
 0xe36   :  { %v10941_v30 = vld [vmem:[%s19934_s14 + $0x300] sm:$0xff]  ;;  %v10938_v31 = vld [vmem:[%s19934_s14 + $0x2e8] sm:$0xff]  ;;  %v10936_v2 = vld [vmem:[%s19934_s14 + $0x2d8] sm:$0xff] }
 0xe37   :  { %v6828_v3 = vadd.f32 %v6822_v62, %v6812_v0  ;;  %v18097_v47 = vmax.f32 %v6827_v9, 0.0  ;;  %v10945_v62 = vld [vmem:[%s19934_s14 + $0x320] sm:$0xff]  ;;  %v10940_v0 = vld [vmem:[%s19934_s14 + $0x2f8] sm:$0xff]  ;;  %v10939_v9 = vld [vmem:[%s19934_s14 + $0x2f0] sm:$0xff] }
 0xe39   :  { %v18095_v58 = vmax.f32 %v6828_v3, 0.0  ;;  %v10937_v3 = vld [vmem:[%s19934_s14 + $0x2e0] sm:$0xff] }
 0xe3b   :  { %10891 = vmatprep.subr.msk.mxu1 %vm3079_vm1, %v18095_v58 }
 0xe3c   :  { %10892 = vmatpush1.msk.msra.mxu1 %vm3079_vm1, %v18097_v47 }
 0xe3d   :  { %6877 = vmatprep.subr.mxu1 %v18099_v5 }
 0xe3e   :  { %6878 = vmatpush1.msra.mxu1 %v18103_v48 }
 0xe3f   :  { %10893 = vmatmul.mubr.msk.f32.vlgmr.msra.gmra.mxu1 %vm6169_vm5, %v6833_v43  ;;  %10897 = vmatprep.subr.msk.mxu1 %vm3079_vm1, %v18095_v58  ;;  %v6966_v43 = vld [vmem:[%s19934_s14 + $0x150] sm:$0xff] }
 0xe40   :  { %10898 = vmatpush1.msk.msra.mxu1 %vm3079_vm1, %v18097_v47  ;;  %6917 = vmatprep.mubr.f32.mxu1 %v20068_v10 }
 0xe41   :  { %7019 = vmatprep.subr.mxu1 %v18099_v5  ;;  %7266 = vmatpush2.msra.mxu0 %v6966_v43  ;;  %v11017_v43 = vld [vmem:[%s19934_s14 + $0x510] sm:$0xff] }
 0xe42   :  { %7020 = vmatpush1.msra.mxu1 %v18103_v48 }
 0xe43   :  { %10894 = vmatmul.mubr.msk.f32.gmra.mxu1 %vm6169_vm5, %v6834_v15  ;;  %7130 = vmatprep.subr.mxu1 %v10932_v1  ;;  %v10935_v15 = vld [vmem:[%s19934_s14 + $0x2d0] sm:$0xff]  ;;  %v6965_v1 = vld [vmem:[%s19934_s14 + $0x148] sm:$0xff] }
 0xe44   :  { %7053 = vmatprep.mubr.f32.mxu1 %v20068_v10  ;;  %7267 = vmatprep.subr.mxu0 %v6965_v1  ;;  %v11015_v1 = vld [vmem:[%s19934_s14 + $0x500] sm:$0xff] }
 0xe47   :  { %10899 = vmatmul.mubr.msk.f32.vlgmr.msra.gmra.mxu1 %vm6169_vm5, %v10895_v17  ;;  %v10934_v17 = vld [vmem:[%s19934_s14 + $0x2c8] sm:$0xff] }
 0xe48   :  { %7131 = vmatpush1.msra.mxu1 %v10931_v21  ;;  %7059 = vmatprep.mubr.f32.mxu1 %v20068_v10  ;;  %v6964_v21 = vld [vmem:[%s19934_s14 + $0x140] sm:$0xff] }
 0xe49   :  { %7132 = vmatprep.subr.mxu1 %v10930_v12  ;;  %v10933_v12 = vld [vmem:[%s19934_s14 + $0x2c0] sm:$0xff]  ;;  %7268 = vmatpush2.msra.mxu0 %v6964_v21  ;;  %v11013_v21 = vld [vmem:[%s19934_s14 + $0x4f0] sm:$0xff] }
 0xe4a   :  { %7133 = vmatpush1.msra.mxu1 %v10929_v56  ;;  %v6963_v56 = vld [vmem:[%s19934_s14 + $0x138] sm:$0xff] }
 0xe4b   :  { %7134 = vmatprep.subr.mxu1 %v10928_v23  ;;  %10900 = vmatmul.mubr.msk.f32.gmra.mxu1 %vm6169_vm5, %v10896_v27  ;;  %v6962_v23 = vld [vmem:[%s19934_s14 + $0x130] sm:$0xff]  ;;  %v6961_v27 = vld [vmem:[%s19934_s14 + $0x128] sm:$0xff] }
 0xe4c   :  { %7135 = vmatpush1.msra.mxu1 %v10927_v24  ;;  %7269 = vmatprep.subr.mxu0 %v6963_v56  ;;  %v6960_v24 = vld [vmem:[%s19934_s14 + $0x120] sm:$0xff] }
 0xe4d   :  { %7136 = vmatprep.subr.mxu1 %v10926_v52  ;;  %7270 = vmatpush2.msra.mxu0 %v6962_v23  ;;  %v6959_v52 = vld [vmem:[%s19934_s14 + $0x118] sm:$0xff]  ;;  %v11011_v56 = vld [vmem:[%s19934_s14 + $0x4e0] sm:$0xff] }
 0xe4e   :  { %7137 = vmatpush1.msra.mxu1 %v10925_v50  ;;  %7271 = vmatprep.subr.mxu0 %v6961_v27  ;;  %v6958_v50 = vld [vmem:[%s19934_s14 + $0x110] sm:$0xff]  ;;  %v11010_v23 = vld [vmem:[%s19934_s14 + $0x4d8] sm:$0xff] }
 0xe4f   :  { %7138 = vmatprep.subr.mxu1 %v10924_v60  ;;  %7272 = vmatpush2.msra.mxu0 %v6960_v24  ;;  %v6957_v60 = vld [vmem:[%s19934_s14 + $0x108] sm:$0xff]  ;;  %v11009_v27 = vld [vmem:[%s19934_s14 + $0x4d0] sm:$0xff] }
 0xe50   :  { %7139 = vmatpush1.msra.mxu1 %v10923_v22  ;;  %7273 = vmatprep.subr.mxu0 %v6959_v52  ;;  %v11008_v24 = vld [vmem:[%s19934_s14 + $0x4c8] sm:$0xff]  ;;  %v11007_v52 = vld [vmem:[%s19934_s14 + $0x4c0] sm:$0xff] }
 0xe51   :  { %7140 = vmatprep.subr.mxu1 %v10922_v35  ;;  %7274 = vmatpush2.msra.mxu0 %v6958_v50  ;;  %v11006_v50 = vld [vmem:[%s19934_s14 + $0x4b8] sm:$0xff] }
 0xe52   :  { %7141 = vmatpush1.msra.mxu1 %v10921_v26  ;;  %7275 = vmatprep.subr.mxu0 %v6957_v60  ;;  %v11005_v60 = vld [vmem:[%s19934_s14 + $0x4b0] sm:$0xff] }
 0xe53   :  { %7142 = vmatprep.subr.mxu1 %v10920_v46 }
 0xe54   :  { %7143 = vmatpush1.msra.mxu1 %v10919_v4 }
 0xe55   :  { %7144 = vmatprep.subr.mxu1 %v10918_v8 }
 0xe56   :  { %7145 = vmatpush1.msra.mxu1 %v10917_v61 }
 0xe57   :  { %7146 = vmatprep.subr.mxu1 %v10916_v19  ;;  %v10998_v19 = vld [vmem:[%s19934_s14 + $0x478] sm:$0xff] }
 0xe58   :  { %7147 = vmatpush1.msra.mxu1 %v10915_v45 }
 0xe59   :  { %7148 = vmatprep.subr.mxu1 %v10914_v29  ;;  %v10961_v29 = vld [vmem:[%s19936_s15 + $0x20] sm:$0xff] }
 0xe5a   :  { %7149 = vmatpush1.msra.mxu1 %v10913_v37  ;;  %v10962_v37 = vld [vmem:[%s19936_s15 + $0x28] sm:$0x3f] }
 0xe5b   :  { %7150 = vmatprep.subr.mxu1 %v10912_v59  ;;  %v10994_v59 = vld [vmem:[%s19934_s14 + $0x458] sm:$0xff] }
 0xe5c   :  { %7151 = vmatpush1.msra.mxu1 %v10911_v13  ;;  %v10993_v13 = vld [vmem:[%s19934_s14 + $0x450] sm:$0xff] }
 0xe5d   :  { %7152 = vmatprep.subr.mxu1 %v10910_v11  ;;  %v10992_v11 = vld [vmem:[%s19934_s14 + $0x448] sm:$0xff] }
 0xe5e   :  { %7153 = vmatpush1.msra.mxu1 %v10909_v32  ;;  %v10991_v32 = vld [vmem:[%s19934_s14 + $0x440] sm:$0xff] }
 0xe5f   :  { %7154 = vmatprep.subr.mxu1 %v10908_v16  ;;  %v10990_v16 = vld [vmem:[%s19934_s14 + $0x438] sm:$0xff] }
 0xe60   :  { %7155 = vmatpush1.msra.mxu1 %v10907_v49  ;;  %v10989_v49 = vld [vmem:[%s19934_s14 + $0x430] sm:$0xff] }
 0xe61   :  { %7156 = vmatprep.subr.mxu1 %v10906_v34  ;;  %v10988_v34 = vld [vmem:[%s19934_s14 + $0x428] sm:$0xff] }
 0xe62   :  { %7157 = vmatpush1.msra.mxu1 %v10905_v6  ;;  %v10987_v6 = vld [vmem:[%s19934_s14 + $0x420] sm:$0xff] }
 0xe63   :  { %7158 = vmatprep.subr.mxu1 %v10904_v57  ;;  %v10986_v57 = vld [vmem:[%s19934_s14 + $0x418] sm:$0xff] }
 0xe64   :  { %7159 = vmatpush1.msra.mxu1 %v10903_v39  ;;  %v10985_v39 = vld [vmem:[%s19934_s14 + $0x410] sm:$0xff] }
 0xe65   :  { %7160 = vmatprep.subr.mxu1 %v10902_v44  ;;  %v10984_v44 = vld [vmem:[%s19934_s14 + $0x408] sm:$0xff] }
 0xe66   :  { %7161 = vmatpush1.msra.mxu1 %v10901_v38  ;;  %v10983_v38 = vld [vmem:[%s19934_s14 + $0x400] sm:$0xff] }
 0xe67   :  { %7170 = vmatprep.subr.mxu1 %v10956_v20  ;;  %v10982_v20 = vld [vmem:[%s19934_s14 + $0x3f8] sm:$0xff] }
 0xe68   :  { %7171 = vmatpush2.msra.mxu1 %v10955_v28  ;;  %v10981_v28 = vld [vmem:[%s19934_s14 + $0x3f0] sm:$0xff] }
 0xe69   :  { %7172 = vmatprep.subr.mxu1 %v10954_v63  ;;  %v10980_v63 = vld [vmem:[%s19934_s14 + $0x3e8] sm:$0xff] }
 0xe6a   :  { %7173 = vmatpush2.msra.mxu1 %v10953_v54  ;;  %v10979_v54 = vld [vmem:[%s19934_s14 + $0x3e0] sm:$0xff] }
 0xe6b   :  { %7174 = vmatprep.subr.mxu1 %v10952_v14  ;;  %v10978_v14 = vld [vmem:[%s19934_s14 + $0x3d8] sm:$0xff] }
 0xe6c   :  { %7175 = vmatpush2.msra.mxu1 %v10951_v33  ;;  %v10977_v33 = vld [vmem:[%s19934_s14 + $0x3d0] sm:$0xff] }
 0xe6d   :  { %7176 = vmatprep.subr.mxu1 %v10950_v18  ;;  %v10976_v18 = vld [vmem:[%s19934_s14 + $0x3c8] sm:$0xff] }
 0xe6e   :  { %7177 = vmatpush2.msra.mxu1 %v10949_v40  ;;  %v10975_v40 = vld [vmem:[%s19934_s14 + $0x3c0] sm:$0xff] }
 0xe6f   :  { %7178 = vmatprep.subr.mxu1 %v10948_v41  ;;  %v10974_v41 = vld [vmem:[%s19934_s14 + $0x3b8] sm:$0xff] }
 0xe70   :  { %7179 = vmatpush2.msra.mxu1 %v10947_v53  ;;  %v10973_v53 = vld [vmem:[%s19934_s14 + $0x3b0] sm:$0xff] }
 0xe71   :  { %7180 = vmatprep.subr.mxu1 %v10946_v55  ;;  %v10972_v55 = vld [vmem:[%s19934_s14 + $0x3a8] sm:$0xff] }
 0xe72   :  { %7181 = vmatpush2.msra.mxu1 %v10945_v62  ;;  %v10971_v62 = vld [vmem:[%s19934_s14 + $0x3a0] sm:$0xff] }
 0xe73   :  { %7182 = vmatprep.subr.mxu1 %v10944_v42  ;;  %v10970_v42 = vld [vmem:[%s19934_s14 + $0x398] sm:$0xff] }
 0xe74   :  { %7183 = vmatpush2.msra.mxu1 %v10943_v51  ;;  %v10969_v51 = vld [vmem:[%s19934_s14 + $0x390] sm:$0xff] }
 0xe75   :  { %7184 = vmatprep.subr.mxu1 %v10942_v25  ;;  %v10968_v25 = vld [vmem:[%s19934_s14 + $0x388] sm:$0xff] }
 0xe76   :  { %7185 = vmatpush2.msra.mxu1 %v10941_v30  ;;  %v10967_v30 = vld [vmem:[%s19934_s14 + $0x380] sm:$0xff] }
 0xe77   :  { %7186 = vmatprep.subr.mxu1 %v10940_v0  ;;  %v11022_v0 = vld [vmem:[%s19934_s14 + $0x538] sm:$0xff] }
 0xe78   :  { %7187 = vmatpush2.msra.mxu1 %v10939_v9  ;;  %v11021_v9 = vld [vmem:[%s19934_s14 + $0x530] sm:$0xff] }
 0xe79   :  { %7188 = vmatprep.subr.mxu1 %v10938_v31  ;;  %v11020_v31 = vld [vmem:[%s19934_s14 + $0x528] sm:$0xff] }
 0xe7a   :  { %7189 = vmatpush2.msra.mxu1 %v10937_v3  ;;  %v11019_v3 = vld [vmem:[%s19934_s14 + $0x520] sm:$0xff] }
 0xe7b   :  { %7190 = vmatprep.subr.mxu1 %v10936_v2  ;;  %v11018_v2 = vld [vmem:[%s19934_s14 + $0x518] sm:$0xff] }
 0xe7c   :  { %7191 = vmatpush2.msra.mxu1 %v10935_v15  ;;  %v11016_v15 = vld [vmem:[%s19934_s14 + $0x508] sm:$0xff] }
 0xe7d   :  { %7192 = vmatprep.subr.mxu1 %v10934_v17  ;;  %v11014_v17 = vld [vmem:[%s19934_s14 + $0x4f8] sm:$0xff] }
 0xe7e   :  { %7193 = vmatpush2.msra.mxu1 %v10933_v12  ;;  %v11012_v12 = vld [vmem:[%s19934_s14 + $0x4e8] sm:$0xff] }
 0xe7f   :  { %10963 = vmatprep.subr.msk.mxu1 %vm3079_vm1, %v18095_v58  ;;  %v6956_v58 = vld [vmem:[%s19934_s14 + $0x100] sm:$0xff] }
 0xe80   :  { %7276 = vmatpush2.msra.mxu0 %v6956_v58  ;;  %v11004_v58 = vld [vmem:[%s19934_s14 + $0x4a8] sm:$0xff] }
 0xeff   :  { %v6913_v22 = vpop.f32.mrf.mxu1 }
 0xf01   :  { %v6915_v35 = vpop.f32.mrf.mxu1 }
 0xf02   :  { %10959 = vmatprep.mubr.msk.f32.mxu0 %vm7123_vm7, %v6915_v35  ;;  %v11002_v35 = vld [vmem:[%s19934_s14 + $0x498] sm:$0xff] }
 0xf03   :  { %v6919_v26 = vpop.f32.mrf.mxu1  ;;  %7278 = vmatmul.mubr.f32.vlgmr.msra.gmra.mxu0 %v6913_v22  ;;  %v11003_v22 = vld [vmem:[%s19934_s14 + $0x4a0] sm:$0xff] }
 0xf05   :  { %v6921_v46 = vpop.f32.mrf.mxu1 }
 0xf06   :  { %10960 = vmatprep.mubr.msk.f32.mxu0 %vm7123_vm7, %v6921_v46  ;;  %v11000_v46 = vld [vmem:[%s19934_s14 + $0x488] sm:$0xff] }
 0xf07   :  { %v7055_v4 = vpop.f32.mrf.mxu1  ;;  %7284 = vmatmul.mubr.f32.gmra.mxu0 %v6919_v26  ;;  %v11001_v26 = vld [vmem:[%s19934_s14 + $0x490] sm:$0xff] }
 0xf08   :  { %7618 = vmatprep.mubr.f32.mxu0 %v20068_v10 }
 0xf09   :  { %v7057_v8 = vpop.f32.mrf.mxu1 }
 0xf0a   :  { %10957 = vmatprep.mubr.msk.f32.mxu1 %vm7123_vm7, %v7057_v8 }
 0xf0b   :  { %v7061_v61 = vpop.f32.mrf.mxu1  ;;  %7195 = vmatmul.mubr.f32.vlgmr.msra.gmra.mxu1 %v7055_v4  ;;  %v10999_v4 = vld [vmem:[%s19934_s14 + $0x480] sm:$0xff] }
 0xf0c   :  { %10964 = vmatpush1.msk.msra.mxu1 %vm3079_vm1, %v18097_v47  ;;  %v10997_v47 = vld [vmem:[%s19934_s14 + $0x470] sm:$0xff] }
 0xf0d   :  { %7329 = vmatprep.subr.mxu1 %v18099_v5  ;;  %v7063_v45 = vpop.f32.mrf.mxu1  ;;  %v10996_v5 = vld [vmem:[%s19934_s14 + $0x468] sm:$0xff] }
 0xf0e   :  { %7330 = vmatpush1.msra.mxu1 %v18103_v48  ;;  %10958 = vmatprep.mubr.msk.f32.mxu1 %vm7123_vm7, %v7063_v45  ;;  %v10995_v48 = vld [vmem:[%s19934_s14 + $0x460] sm:$0xff] }
 0xf0f   :  { %7201 = vmatmul.mubr.f32.gmra.mxu1 %v7061_v61  ;;  %7439 = vmatprep.subr.mxu1 %v10998_v19 }
 0xf10   :  { %7363 = vmatprep.mubr.f32.mxu1 %v20068_v10 }
 0xf13   :  { %10965 = vmatmul.mubr.msk.f32.vlgmr.msra.gmra.mxu1 %vm6169_vm5, %v10961_v29 }
 0xf14   :  { %7369 = vmatprep.mubr.f32.mxu1 %v20068_v10  ;;  %7440 = vmatpush1.msra.mxu1 %v10997_v47 }
 0xf15   :  { %7441 = vmatprep.subr.mxu1 %v10996_v5 }
 0xf16   :  { %7442 = vmatpush1.msra.mxu1 %v10995_v48 }
 0xf17   :  { %10966 = vmatmul.mubr.msk.f32.gmra.mxu1 %vm6169_vm5, %v10962_v37  ;;  %7443 = vmatprep.subr.mxu1 %v10994_v59  ;;  %v7662_v37 = vld [vmem:[%s19937_s17 + $0xf8] sm:$0xff]  ;;  %v7661_v59 = vld [vmem:[%s19937_s17 + $0xf0] sm:$0xff] }
 0xf18   :  { %7444 = vmatpush1.msra.mxu1 %v10993_v13  ;;  %v7660_v13 = vld [vmem:[%s19937_s17 + $0xe8] sm:$0xff] }
 0xf19   :  { %7445 = vmatprep.subr.mxu1 %v10992_v11  ;;  %v7659_v11 = vld [vmem:[%s19937_s17 + $0xe0] sm:$0xff] }
 0xf1a   :  { %7446 = vmatpush1.msra.mxu1 %v10991_v32  ;;  %v7658_v32 = vld [vmem:[%s19937_s17 + $0xd8] sm:$0xff] }
 0xf1b   :  { %7447 = vmatprep.subr.mxu1 %v10990_v16  ;;  %v7657_v16 = vld [vmem:[%s19937_s17 + $0xd0] sm:$0xff] }
 0xf1c   :  { %7448 = vmatpush1.msra.mxu1 %v10989_v49  ;;  %v7656_v49 = vld [vmem:[%s19937_s17 + $0xc8] sm:$0xff] }
 0xf1d   :  { %7449 = vmatprep.subr.mxu1 %v10988_v34  ;;  %v7655_v34 = vld [vmem:[%s19937_s17 + $0xc0] sm:$0xff] }
 0xf1e   :  { %7450 = vmatpush1.msra.mxu1 %v10987_v6  ;;  %v7654_v6 = vld [vmem:[%s19937_s17 + $0xb8] sm:$0xff] }
 0xf1f   :  { %7451 = vmatprep.subr.mxu1 %v10986_v57  ;;  %v7653_v57 = vld [vmem:[%s19937_s17 + $0xb0] sm:$0xff] }
 0xf20   :  { %7452 = vmatpush1.msra.mxu1 %v10985_v39  ;;  %v7652_v39 = vld [vmem:[%s19937_s17 + $0xa8] sm:$0xff] }
 0xf21   :  { %7453 = vmatprep.subr.mxu1 %v10984_v44  ;;  %v7651_v44 = vld [vmem:[%s19937_s17 + $0xa0] sm:$0xff] }
 0xf22   :  { %7454 = vmatpush1.msra.mxu1 %v10983_v38  ;;  %v7650_v38 = vld [vmem:[%s19937_s17 + $0x98] sm:$0xff] }
 0xf23   :  { %7455 = vmatprep.subr.mxu1 %v10982_v20  ;;  %v7649_v20 = vld [vmem:[%s19937_s17 + $0x90] sm:$0xff] }
 0xf24   :  { %7456 = vmatpush1.msra.mxu1 %v10981_v28  ;;  %v7648_v28 = vld [vmem:[%s19937_s17 + $0x88] sm:$0xff] }
 0xf25   :  { %7457 = vmatprep.subr.mxu1 %v10980_v63  ;;  %v7647_v63 = vld [vmem:[%s19937_s17 + $0x80] sm:$0xff] }
 0xf26   :  { %7458 = vmatpush1.msra.mxu1 %v10979_v54  ;;  %v7646_v54 = vld [vmem:[%s19937_s17 + $0x78] sm:$0xff] }
 0xf27   :  { %7459 = vmatprep.subr.mxu1 %v10978_v14  ;;  %v7645_v14 = vld [vmem:[%s19937_s17 + $0x70] sm:$0xff] }
 0xf28   :  { %7460 = vmatpush1.msra.mxu1 %v10977_v33  ;;  %v7644_v33 = vld [vmem:[%s19937_s17 + $0x68] sm:$0xff] }
 0xf29   :  { %7461 = vmatprep.subr.mxu1 %v10976_v18  ;;  %v7643_v18 = vld [vmem:[%s19937_s17 + $0x60] sm:$0xff] }
 0xf2a   :  { %7462 = vmatpush1.msra.mxu1 %v10975_v40  ;;  %v7642_v40 = vld [vmem:[%s19937_s17 + $0x58] sm:$0xff] }
 0xf2b   :  { %7463 = vmatprep.subr.mxu1 %v10974_v41  ;;  %v7641_v41 = vld [vmem:[%s19937_s17 + $0x50] sm:$0xff] }
 0xf2c   :  { %7464 = vmatpush1.msra.mxu1 %v10973_v53  ;;  %v7640_v53 = vld [vmem:[%s19937_s17 + $0x48] sm:$0xff] }
 0xf2d   :  { %7465 = vmatprep.subr.mxu1 %v10972_v55  ;;  %v7639_v55 = vld [vmem:[%s19937_s17 + $0x40] sm:$0xff] }
 0xf2e   :  { %7466 = vmatpush1.msra.mxu1 %v10971_v62  ;;  %v7638_v62 = vld [vmem:[%s19937_s17 + $0x38] sm:$0xff] }
 0xf2f   :  { %7467 = vmatprep.subr.mxu1 %v10970_v42  ;;  %v7637_v42 = vld [vmem:[%s19937_s17 + $0x30] sm:$0xff] }
 0xf30   :  { %7468 = vmatpush1.msra.mxu1 %v10969_v51  ;;  %v7636_v51 = vld [vmem:[%s19937_s17 + $0x28] sm:$0xff] }
 0xf31   :  { %7469 = vmatprep.subr.mxu1 %v10968_v25  ;;  %v7635_v25 = vld [vmem:[%s19937_s17 + $0x20] sm:$0xff] }
 0xf32   :  { %7470 = vmatpush1.msra.mxu1 %v10967_v30  ;;  %v7634_v30 = vld [vmem:[%s19937_s17 + $0x18] sm:$0xff] }
 0xf33   :  { %7479 = vmatprep.subr.mxu1 %v11022_v0  ;;  %v7633_v0 = vld [vmem:[%s19937_s17 + $0x10] sm:$0xff] }
 0xf34   :  { %7480 = vmatpush2.msra.mxu1 %v11021_v9  ;;  %v7632_v9 = vld [vmem:[%s19937_s17 + $0x8] sm:$0xff] }
 0xf35   :  { %7481 = vmatprep.subr.mxu1 %v11020_v31  ;;  %v7631_v31 = vld [vmem:[%s19937_s17] sm:$0xff] }
 0xf36   :  { %7482 = vmatpush2.msra.mxu1 %v11019_v3  ;;  %v7686_v3 = vld [vmem:[%s19937_s17 + $0x1b8] sm:$0xff] }
 0xf37   :  { %7483 = vmatprep.subr.mxu1 %v11018_v2  ;;  %v7685_v2 = vld [vmem:[%s19937_s17 + $0x1b0] sm:$0xff] }
 0xf38   :  { %7484 = vmatpush2.msra.mxu1 %v11017_v43  ;;  %v7684_v43 = vld [vmem:[%s19937_s17 + $0x1a8] sm:$0xff] }
 0xf39   :  { %7485 = vmatprep.subr.mxu1 %v11016_v15  ;;  %v7683_v15 = vld [vmem:[%s19937_s17 + $0x1a0] sm:$0xff] }
 0xf3a   :  { %7486 = vmatpush2.msra.mxu1 %v11015_v1  ;;  %v7682_v1 = vld [vmem:[%s19937_s17 + $0x198] sm:$0xff] }
 0xf3b   :  { %7487 = vmatprep.subr.mxu1 %v11014_v17  ;;  %v7681_v17 = vld [vmem:[%s19937_s17 + $0x190] sm:$0xff] }
 0xf3c   :  { %7488 = vmatpush2.msra.mxu1 %v11013_v21  ;;  %v7680_v21 = vld [vmem:[%s19937_s17 + $0x188] sm:$0xff] }
 0xf3d   :  { %7489 = vmatprep.subr.mxu1 %v11012_v12  ;;  %v7679_v12 = vld [vmem:[%s19937_s17 + $0x180] sm:$0xff] }
 0xf3e   :  { %7490 = vmatpush2.msra.mxu1 %v11011_v56  ;;  %v7678_v56 = vld [vmem:[%s19937_s17 + $0x178] sm:$0xff] }
 0xf3f   :  { %7491 = vmatprep.subr.mxu1 %v11010_v23 }
 0xf40   :  { %7492 = vmatpush2.msra.mxu1 %v11009_v27  ;;  %v7677_v27 = vld [vmem:[%s19937_s17 + $0x170] sm:$0xff] }
 0xf41   :  { %7493 = vmatprep.subr.mxu1 %v11008_v24  ;;  %v7676_v24 = vld [vmem:[%s19937_s17 + $0x168] sm:$0xff] }
 0xf42   :  { %7494 = vmatpush2.msra.mxu1 %v11007_v52  ;;  %v7675_v52 = vld [vmem:[%s19937_s17 + $0x160] sm:$0xff] }
 0xf43   :  { %7495 = vmatprep.subr.mxu1 %v11006_v50  ;;  %v7674_v50 = vld [vmem:[%s19937_s17 + $0x158] sm:$0xff] }
 0xf44   :  { %7496 = vmatpush2.msra.mxu1 %v11005_v60 }
 0xf45   :  { %7497 = vmatprep.subr.mxu1 %v11004_v58 }
 0xf46   :  { %7498 = vmatpush2.msra.mxu1 %v11003_v22 }
 0xf47   :  { %7499 = vmatprep.subr.mxu1 %v11002_v35 }
 0xf48   :  { %7500 = vmatpush2.msra.mxu1 %v11001_v26 }
 0xf49   :  { %7501 = vmatprep.subr.mxu1 %v11000_v46 }
 0xf4a   :  { %7502 = vmatpush2.msra.mxu1 %v10999_v4  ;;  %v7520_v4 = vld [vmem:[%s19938_s16] sm:$0x3] }
 0xf4b   :  { %7919 = vmatprep.subr.mxu1 %v7662_v37 }
 0xfc3   :  { %v7279_v23 = vpop.f32.mrf.mxu0 }
 0xfc5   :  { %v7281_v60 = vpop.f32.mrf.mxu0 }
 0xfc7   :  { %v7285_v58 = vpop.f32.mrf.mxu0 }
 0xfcb   :  { %v18524_v8 = vpop.f32.mrf.mxu1 }
 0xfcd   :  { %v18526_v61 = vpop.f32.mrf.mxu1 }
 0xfce   :  { %v7282_v26 = vadd.f32 %v7281_v60, %v18526_v61  ;;  %v11035_v60 = vld [vmem:[%s19937_s17 + $0x1c0] sm:$0xff] }
 0xfcf   :  { %v18528_v19 = vpop.f32.mrf.mxu1 }
 0xfd0   :  { %v7286_v46 = vadd.f32 %v7285_v58, %v18528_v19  ;;  %v11090_v58 = vld [vmem:[%s19937_s17 + $0x378] sm:$0xff] }
 0xfd1   :  { %v18530_v45 = vpop.f32.mrf.mxu1 }
 0xfd3   :  { %v7365_v29 = vpop.f32.mrf.mxu1 }
 0xfd5   :  { %v7367_v47 = vpop.f32.mrf.mxu1 }
 0xfd6   :  { %11023 = vmatprep.mubr.msk.f32.mxu1 %vm7123_vm7, %v7367_v47  ;;  %v7287_v47 = vpop.f32.mrf.mxu0 }
 0xfd7   :  { %v7371_v5 = vpop.f32.mrf.mxu1  ;;  %7504 = vmatmul.mubr.f32.vlgmr.msra.gmra.mxu1 %v7365_v29  ;;  %v7280_v29 = vadd.f32 %v7279_v23, %v18524_v8  ;;  %v11040_v23 = vld [vmem:[%s19937_s17 + $0x1e8] sm:$0xff] }
 0xfd8   :  { %7920 = vmatpush1.msra.mxu1 %v7661_v59  ;;  %v7529_v59 = vrot.slane %v7520_v4, %v20069_v36 }
 0xfd9   :  { %v7373_v48 = vpop.f32.mrf.mxu1  ;;  %7921 = vmatprep.subr.mxu1 %v7660_v13 }
 0xfda   :  { %11024 = vmatprep.mubr.msk.f32.mxu1 %vm7123_vm7, %v7373_v48  ;;  %7922 = vmatpush1.msra.mxu1 %v7659_v11  ;;  %v7288_v48 = vadd.f32 %v7287_v47, %v18530_v45  ;;  %v11083_v47 = vld [vmem:[%s19937_s17 + $0x340] sm:$0xff] }
 0xfdb   :  { %7510 = vmatmul.mubr.f32.gmra.mxu1 %v7371_v5  ;;  %7923 = vmatprep.subr.mxu1 %v7658_v32  ;;  %v7525_v32 = vrot.slane %v7520_v4, %v20070_v7  ;;  %v11085_v4 = vld [vmem:[%s19937_s17 + $0x350] sm:$0xff] }
 0xfdc   :  { %7924 = vmatpush1.msra.mxu1 %v7657_v16 }
 0xfdd   :  { %7925 = vmatprep.subr.mxu1 %v7656_v49 }
 0xfde   :  { %7926 = vmatpush1.msra.mxu1 %v7655_v34 }
 0xfdf   :  { %7927 = vmatprep.subr.mxu1 %v7654_v6 }
 0xfe0   :  { %7928 = vmatpush1.msra.mxu1 %v7653_v57 }
 0xfe1   :  { %7929 = vmatprep.subr.mxu1 %v7652_v39 }
 0xfe2   :  { %7930 = vmatpush1.msra.mxu1 %v7651_v44  ;;  %v7540_v44 = vld [vmem:[%s19939_s18] sm:$0xff] }
 0xfe3   :  { %7931 = vmatprep.subr.mxu1 %v7650_v38  ;;  %v7541_v38 = vld [vmem:[%s19939_s18 + $0x8] sm:$0x3f] }
 0xfe4   :  { %7932 = vmatpush1.msra.mxu1 %v7649_v20  ;;  %v11066_v20 = vld [vmem:[%s19937_s17 + $0x2b8] sm:$0xff] }
 0xfe5   :  { %7933 = vmatprep.subr.mxu1 %v7648_v28  ;;  %v11029_v28 = vld [vmem:[%s19939_s18 + $0x10] sm:$0xff] }
 0xfe6   :  { %7934 = vmatpush1.msra.mxu1 %v7647_v63  ;;  %v11065_v63 = vld [vmem:[%s19937_s17 + $0x2b0] sm:$0xff] }
 0xfe7   :  { %7935 = vmatprep.subr.mxu1 %v7646_v54  ;;  %v11064_v54 = vld [vmem:[%s19937_s17 + $0x2a8] sm:$0xff] }
 0xfe8   :  { %7936 = vmatpush1.msra.mxu1 %v7645_v14  ;;  %v11063_v14 = vld [vmem:[%s19937_s17 + $0x2a0] sm:$0xff] }
 0xfe9   :  { %7937 = vmatprep.subr.mxu1 %v7644_v33  ;;  %v11062_v33 = vld [vmem:[%s19937_s17 + $0x298] sm:$0xff] }
 0xfea   :  { %7938 = vmatpush1.msra.mxu1 %v7643_v18  ;;  %v11030_v18 = vld [vmem:[%s19939_s18 + $0x18] sm:$0x3f] }
 0xfeb   :  { %7939 = vmatprep.subr.mxu1 %v7642_v40  ;;  %v11061_v40 = vld [vmem:[%s19937_s17 + $0x290] sm:$0xff] }
 0xfec   :  { %7940 = vmatpush1.msra.mxu1 %v7641_v41  ;;  %v11060_v41 = vld [vmem:[%s19937_s17 + $0x288] sm:$0xff] }
 0xfed   :  { %7941 = vmatprep.subr.mxu1 %v7640_v53  ;;  %v11059_v53 = vld [vmem:[%s19937_s17 + $0x280] sm:$0xff] }
 0xfee   :  { %7942 = vmatpush1.msra.mxu1 %v7639_v55  ;;  %v11058_v55 = vld [vmem:[%s19937_s17 + $0x278] sm:$0xff] }
 0xfef   :  { %7943 = vmatprep.subr.mxu1 %v7638_v62  ;;  %v11057_v62 = vld [vmem:[%s19937_s17 + $0x270] sm:$0xff] }
 0xff0   :  { %7944 = vmatpush1.msra.mxu1 %v7637_v42  ;;  %v11056_v42 = vld [vmem:[%s19937_s17 + $0x268] sm:$0xff] }
 0xff1   :  { %7945 = vmatprep.subr.mxu1 %v7636_v51  ;;  %v11055_v51 = vld [vmem:[%s19937_s17 + $0x260] sm:$0xff] }
 0xff2   :  { %7946 = vmatpush1.msra.mxu1 %v7635_v25  ;;  %v11054_v25 = vld [vmem:[%s19937_s17 + $0x258] sm:$0xff] }
 0xff3   :  { %7947 = vmatprep.subr.mxu1 %v7634_v30  ;;  %v11053_v30 = vld [vmem:[%s19937_s17 + $0x250] sm:$0xff] }
 0xff4   :  { %7948 = vmatpush1.msra.mxu1 %v7633_v0  ;;  %v11052_v0 = vld [vmem:[%s19937_s17 + $0x248] sm:$0xff] }
 0xff5   :  { %7949 = vmatprep.subr.mxu1 %v7632_v9  ;;  %v11051_v9 = vld [vmem:[%s19937_s17 + $0x240] sm:$0xff] }
 0xff6   :  { %7950 = vmatpush1.msra.mxu1 %v7631_v31  ;;  %v11050_v31 = vld [vmem:[%s19937_s17 + $0x238] sm:$0xff] }
 0xff7   :  { %7959 = vmatprep.subr.mxu1 %v7686_v3  ;;  %v11049_v3 = vld [vmem:[%s19937_s17 + $0x230] sm:$0xff] }
 0xff8   :  { %7960 = vmatpush2.msra.mxu1 %v7685_v2  ;;  %v11048_v2 = vld [vmem:[%s19937_s17 + $0x228] sm:$0xff] }
 0xff9   :  { %7961 = vmatprep.subr.mxu1 %v7684_v43  ;;  %v11047_v43 = vld [vmem:[%s19937_s17 + $0x220] sm:$0xff] }
 0xffa   :  { %7962 = vmatpush2.msra.mxu1 %v7683_v15  ;;  %v11046_v15 = vld [vmem:[%s19937_s17 + $0x218] sm:$0xff] }
 0xffb   :  { %7963 = vmatprep.subr.mxu1 %v7682_v1  ;;  %v11045_v1 = vld [vmem:[%s19937_s17 + $0x210] sm:$0xff] }
 0xffc   :  { %7964 = vmatpush2.msra.mxu1 %v7681_v17  ;;  %v11044_v17 = vld [vmem:[%s19937_s17 + $0x208] sm:$0xff] }
 0xffd   :  { %7965 = vmatprep.subr.mxu1 %v7680_v21  ;;  %v11043_v21 = vld [vmem:[%s19937_s17 + $0x200] sm:$0xff] }
 0xffe   :  { %7966 = vmatpush2.msra.mxu1 %v7679_v12  ;;  %v11042_v12 = vld [vmem:[%s19937_s17 + $0x1f8] sm:$0xff] }
 0xfff   :  { %7967 = vmatprep.subr.mxu1 %v7678_v56  ;;  %v11041_v56 = vld [vmem:[%s19937_s17 + $0x1f0] sm:$0xff] }
0x1000   :  { %7968 = vmatpush2.msra.mxu1 %v7677_v27  ;;  %v11039_v27 = vld [vmem:[%s19937_s17 + $0x1e0] sm:$0xff] }
0x1001   :  { %7969 = vmatprep.subr.mxu1 %v7676_v24  ;;  %v11038_v24 = vld [vmem:[%s19937_s17 + $0x1d8] sm:$0xff] }
0x1002   :  { %7970 = vmatpush2.msra.mxu1 %v7675_v52  ;;  %v11037_v52 = vld [vmem:[%s19937_s17 + $0x1d0] sm:$0xff] }
0x1003   :  { %7971 = vmatprep.subr.mxu1 %v7674_v50  ;;  %v11036_v50 = vld [vmem:[%s19937_s17 + $0x1c8] sm:$0xff] }
0x1097   :  { %v7505_v22 = vpop.f32.mrf.mxu1 }
0x1098   :  { %v7516_v11 = vadd.f32 %v7505_v22, %v7280_v29  ;;  %v11089_v22 = vld [vmem:[%s19937_s17 + $0x370] sm:$0xff]  ;;  %v11084_v29 = vld [vmem:[%s19937_s17 + $0x348] sm:$0xff] }
0x1099   :  { %v7507_v35 = vpop.f32.mrf.mxu1 }
0x109a   :  { %v7517_v37 = vadd.f32 %v7507_v35, %v7282_v26  ;;  %v7532_v6 = vadd.f32 %v7525_v32, %v7516_v11  ;;  %v11088_v35 = vld [vmem:[%s19937_s17 + $0x368] sm:$0xff]  ;;  %v11087_v26 = vld [vmem:[%s19937_s17 + $0x360] sm:$0xff]  ;;  %v11077_v11 = vld [vmem:[%s19937_s17 + $0x310] sm:$0xff] }
0x109b   :  { %v7511_v5 = vpop.f32.mrf.mxu1 }
0x109c   :  { %v7518_v13 = vadd.f32 %v7511_v5, %v7286_v46  ;;  %v7533_v49 = vadd.f32 %v7529_v59, %v7517_v37  ;;  %v18686_v45 = vmax.f32 %v7532_v6, 0.0  ;;  %v11086_v46 = vld [vmem:[%s19937_s17 + $0x358] sm:$0xff]  ;;  %v11080_v37 = vld [vmem:[%s19937_s17 + $0x328] sm:$0xff] }
0x109d   :  { %v7513_v61 = vpop.f32.mrf.mxu1  ;;  %v11082_v5 = vld [vmem:[%s19937_s17 + $0x338] sm:$0xff] }
0x109e   :  { %v7519_v16 = vadd.f32 %v7513_v61, %v7288_v48  ;;  %v7534_v19 = vadd.f32 %v7525_v32, %v7518_v13  ;;  %v18682_v39 = vmax.f32 %v7533_v49, 0.0  ;;  %v11081_v48 = vld [vmem:[%s19937_s17 + $0x330] sm:$0xff]  ;;  %v11078_v13 = vld [vmem:[%s19937_s17 + $0x318] sm:$0xff]  ;;  %v11076_v32 = vld [vmem:[%s19937_s17 + $0x308] sm:$0xff] }
0x109f   :  { %v11075_v61 = vld [vmem:[%s19937_s17 + $0x300] sm:$0xff]  ;;  %v11072_v49 = vld [vmem:[%s19937_s17 + $0x2e8] sm:$0xff]  ;;  %v11070_v6 = vld [vmem:[%s19937_s17 + $0x2d8] sm:$0xff] }
0x10a0   :  { %v7535_v34 = vadd.f32 %v7529_v59, %v7519_v16  ;;  %v18680_v8 = vmax.f32 %v7534_v19, 0.0  ;;  %v11079_v59 = vld [vmem:[%s19937_s17 + $0x320] sm:$0xff]  ;;  %v11074_v16 = vld [vmem:[%s19937_s17 + $0x2f8] sm:$0xff]  ;;  %v11073_v19 = vld [vmem:[%s19937_s17 + $0x2f0] sm:$0xff] }
0x10a2   :  { %v18678_v57 = vmax.f32 %v7535_v34, 0.0  ;;  %v11071_v34 = vld [vmem:[%s19937_s17 + $0x2e0] sm:$0xff] }
0x10a4   :  { %11025 = vmatprep.subr.msk.mxu0 %vm3079_vm1, %v18678_v57 }
0x10a5   :  { %11026 = vmatpush1.msk.msra.mxu0 %vm3079_vm1, %v18680_v8 }
0x10a6   :  { %7584 = vmatprep.subr.mxu0 %v18682_v39 }
0x10a7   :  { %7585 = vmatpush1.msra.mxu0 %v18686_v45 }
0x10a8   :  { %11027 = vmatmul.mubr.msk.f32.vlgmr.msra.gmra.mxu0 %vm6169_vm5, %v7540_v44  ;;  %11031 = vmatprep.subr.msk.mxu0 %vm3079_vm1, %v18678_v57  ;;  %v7673_v44 = vld [vmem:[%s19937_s17 + $0x150] sm:$0xff] }
0x10a9   :  { %11032 = vmatpush1.msk.msra.mxu0 %vm3079_vm1, %v18680_v8  ;;  %7624 = vmatprep.mubr.f32.mxu0 %v20068_v10 }
0x10aa   :  { %7726 = vmatprep.subr.mxu0 %v18682_v39  ;;  %7972 = vmatpush2.msra.mxu1 %v7673_v44  ;;  %v11151_v44 = vld [vmem:[%s19937_s17 + $0x510] sm:$0xff] }
0x10ab   :  { %7727 = vmatpush1.msra.mxu0 %v18686_v45 }
0x10ac   :  { %11028 = vmatmul.mubr.msk.f32.gmra.mxu0 %vm6169_vm5, %v7541_v38  ;;  %7836 = vmatprep.subr.mxu0 %v11066_v20  ;;  %v11069_v38 = vld [vmem:[%s19937_s17 + $0x2d0] sm:$0xff]  ;;  %v7672_v20 = vld [vmem:[%s19937_s17 + $0x148] sm:$0xff] }
0x10ad   :  { %7760 = vmatprep.mubr.f32.mxu0 %v20068_v10  ;;  %7973 = vmatprep.subr.mxu1 %v7672_v20  ;;  %v11149_v20 = vld [vmem:[%s19937_s17 + $0x500] sm:$0xff] }
0x10b0   :  { %11033 = vmatmul.mubr.msk.f32.vlgmr.msra.gmra.mxu0 %vm6169_vm5, %v11029_v28  ;;  %v11068_v28 = vld [vmem:[%s19937_s17 + $0x2c8] sm:$0xff] }
0x10b1   :  { %7837 = vmatpush1.msra.mxu0 %v11065_v63  ;;  %7766 = vmatprep.mubr.f32.mxu0 %v20068_v10  ;;  %v7671_v63 = vld [vmem:[%s19937_s17 + $0x140] sm:$0xff] }
0x10b2   :  { %7838 = vmatprep.subr.mxu0 %v11064_v54  ;;  %v11067_v54 = vld [vmem:[%s19937_s17 + $0x2c0] sm:$0xff]  ;;  %7974 = vmatpush2.msra.mxu1 %v7671_v63  ;;  %v11147_v63 = vld [vmem:[%s19937_s17 + $0x4f0] sm:$0xff] }
0x10b3   :  { %7839 = vmatpush1.msra.mxu0 %v11063_v14  ;;  %v7670_v14 = vld [vmem:[%s19937_s17 + $0x138] sm:$0xff] }
0x10b4   :  { %7840 = vmatprep.subr.mxu0 %v11062_v33  ;;  %11034 = vmatmul.mubr.msk.f32.gmra.mxu0 %vm6169_vm5, %v11030_v18  ;;  %v7669_v33 = vld [vmem:[%s19937_s17 + $0x130] sm:$0xff]  ;;  %v7668_v18 = vld [vmem:[%s19937_s17 + $0x128] sm:$0xff] }
0x10b5   :  { %7841 = vmatpush1.msra.mxu0 %v11061_v40  ;;  %7975 = vmatprep.subr.mxu1 %v7670_v14  ;;  %v7667_v40 = vld [vmem:[%s19937_s17 + $0x120] sm:$0xff] }
0x10b6   :  { %7842 = vmatprep.subr.mxu0 %v11060_v41  ;;  %7976 = vmatpush2.msra.mxu1 %v7669_v33  ;;  %v7666_v41 = vld [vmem:[%s19937_s17 + $0x118] sm:$0xff]  ;;  %v11145_v14 = vld [vmem:[%s19937_s17 + $0x4e0] sm:$0xff] }
0x10b7   :  { %7843 = vmatpush1.msra.mxu0 %v11059_v53  ;;  %7977 = vmatprep.subr.mxu1 %v7668_v18  ;;  %v7665_v53 = vld [vmem:[%s19937_s17 + $0x110] sm:$0xff]  ;;  %v11144_v33 = vld [vmem:[%s19937_s17 + $0x4d8] sm:$0xff] }
0x10b8   :  { %7844 = vmatprep.subr.mxu0 %v11058_v55  ;;  %7978 = vmatpush2.msra.mxu1 %v7667_v40  ;;  %v7664_v55 = vld [vmem:[%s19937_s17 + $0x108] sm:$0xff]  ;;  %v11143_v18 = vld [vmem:[%s19937_s17 + $0x4d0] sm:$0xff] }
0x10b9   :  { %7845 = vmatpush1.msra.mxu0 %v11057_v62  ;;  %7979 = vmatprep.subr.mxu1 %v7666_v41  ;;  %v11142_v40 = vld [vmem:[%s19937_s17 + $0x4c8] sm:$0xff]  ;;  %v11141_v41 = vld [vmem:[%s19937_s17 + $0x4c0] sm:$0xff] }
0x10ba   :  { %7846 = vmatprep.subr.mxu0 %v11056_v42  ;;  %7980 = vmatpush2.msra.mxu1 %v7665_v53  ;;  %v11140_v53 = vld [vmem:[%s19937_s17 + $0x4b8] sm:$0xff] }
0x10bb   :  { %7847 = vmatpush1.msra.mxu0 %v11055_v51  ;;  %7981 = vmatprep.subr.mxu1 %v7664_v55  ;;  %v11139_v55 = vld [vmem:[%s19937_s17 + $0x4b0] sm:$0xff] }
0x10bc   :  { %7848 = vmatprep.subr.mxu0 %v11054_v25 }
0x10bd   :  { %7849 = vmatpush1.msra.mxu0 %v11053_v30 }
0x10be   :  { %7850 = vmatprep.subr.mxu0 %v11052_v0 }
0x10bf   :  { %7851 = vmatpush1.msra.mxu0 %v11051_v9 }
0x10c0   :  { %7852 = vmatprep.subr.mxu0 %v11050_v31  ;;  %v11132_v31 = vld [vmem:[%s19937_s17 + $0x478] sm:$0xff] }
0x10c1   :  { %7853 = vmatpush1.msra.mxu0 %v11049_v3 }
0x10c2   :  { %7854 = vmatprep.subr.mxu0 %v11048_v2  ;;  %v11095_v2 = vld [vmem:[%s19939_s18 + $0x20] sm:$0xff] }
0x10c3   :  { %7855 = vmatpush1.msra.mxu0 %v11047_v43  ;;  %v11096_v43 = vld [vmem:[%s19939_s18 + $0x28] sm:$0x3f] }
0x10c4   :  { %7856 = vmatprep.subr.mxu0 %v11046_v15  ;;  %v11128_v15 = vld [vmem:[%s19937_s17 + $0x458] sm:$0xff] }
0x10c5   :  { %7857 = vmatpush1.msra.mxu0 %v11045_v1  ;;  %v11127_v1 = vld [vmem:[%s19937_s17 + $0x450] sm:$0xff] }
0x10c6   :  { %7858 = vmatprep.subr.mxu0 %v11044_v17  ;;  %v11126_v17 = vld [vmem:[%s19937_s17 + $0x448] sm:$0xff] }
0x10c7   :  { %7859 = vmatpush1.msra.mxu0 %v11043_v21  ;;  %v11125_v21 = vld [vmem:[%s19937_s17 + $0x440] sm:$0xff] }
0x10c8   :  { %7860 = vmatprep.subr.mxu0 %v11042_v12  ;;  %v11124_v12 = vld [vmem:[%s19937_s17 + $0x438] sm:$0xff] }
0x10c9   :  { %7861 = vmatpush1.msra.mxu0 %v11041_v56  ;;  %v11123_v56 = vld [vmem:[%s19937_s17 + $0x430] sm:$0xff] }
0x10ca   :  { %7862 = vmatprep.subr.mxu0 %v11040_v23  ;;  %v11122_v23 = vld [vmem:[%s19937_s17 + $0x428] sm:$0xff] }
0x10cb   :  { %7863 = vmatpush1.msra.mxu0 %v11039_v27  ;;  %v11121_v27 = vld [vmem:[%s19937_s17 + $0x420] sm:$0xff] }
0x10cc   :  { %7864 = vmatprep.subr.mxu0 %v11038_v24  ;;  %v11120_v24 = vld [vmem:[%s19937_s17 + $0x418] sm:$0xff] }
0x10cd   :  { %7865 = vmatpush1.msra.mxu0 %v11037_v52  ;;  %v11119_v52 = vld [vmem:[%s19937_s17 + $0x410] sm:$0xff] }
0x10ce   :  { %7866 = vmatprep.subr.mxu0 %v11036_v50  ;;  %v11118_v50 = vld [vmem:[%s19937_s17 + $0x408] sm:$0xff] }
0x10cf   :  { %7867 = vmatpush1.msra.mxu0 %v11035_v60  ;;  %v11117_v60 = vld [vmem:[%s19937_s17 + $0x400] sm:$0xff] }
0x10d0   :  { %7876 = vmatprep.subr.mxu0 %v11090_v58  ;;  %v11116_v58 = vld [vmem:[%s19937_s17 + $0x3f8] sm:$0xff] }
0x10d1   :  { %7877 = vmatpush2.msra.mxu0 %v11089_v22  ;;  %v11115_v22 = vld [vmem:[%s19937_s17 + $0x3f0] sm:$0xff] }
0x10d2   :  { %7878 = vmatprep.subr.mxu0 %v11088_v35  ;;  %v11114_v35 = vld [vmem:[%s19937_s17 + $0x3e8] sm:$0xff] }
0x10d3   :  { %7879 = vmatpush2.msra.mxu0 %v11087_v26  ;;  %v11113_v26 = vld [vmem:[%s19937_s17 + $0x3e0] sm:$0xff] }
0x10d4   :  { %7880 = vmatprep.subr.mxu0 %v11086_v46  ;;  %v11112_v46 = vld [vmem:[%s19937_s17 + $0x3d8] sm:$0xff] }
0x10d5   :  { %7881 = vmatpush2.msra.mxu0 %v11085_v4  ;;  %v11111_v4 = vld [vmem:[%s19937_s17 + $0x3d0] sm:$0xff] }
0x10d6   :  { %7882 = vmatprep.subr.mxu0 %v11084_v29  ;;  %v11110_v29 = vld [vmem:[%s19937_s17 + $0x3c8] sm:$0xff] }
0x10d7   :  { %7883 = vmatpush2.msra.mxu0 %v11083_v47  ;;  %v11109_v47 = vld [vmem:[%s19937_s17 + $0x3c0] sm:$0xff] }
0x10d8   :  { %7884 = vmatprep.subr.mxu0 %v11082_v5  ;;  %v11108_v5 = vld [vmem:[%s19937_s17 + $0x3b8] sm:$0xff] }
0x10d9   :  { %7885 = vmatpush2.msra.mxu0 %v11081_v48  ;;  %v11107_v48 = vld [vmem:[%s19937_s17 + $0x3b0] sm:$0xff] }
0x10da   :  { %7886 = vmatprep.subr.mxu0 %v11080_v37  ;;  %v11106_v37 = vld [vmem:[%s19937_s17 + $0x3a8] sm:$0xff] }
0x10db   :  { %7887 = vmatpush2.msra.mxu0 %v11079_v59  ;;  %v11105_v59 = vld [vmem:[%s19937_s17 + $0x3a0] sm:$0xff] }
0x10dc   :  { %7888 = vmatprep.subr.mxu0 %v11078_v13  ;;  %v11104_v13 = vld [vmem:[%s19937_s17 + $0x398] sm:$0xff] }
0x10dd   :  { %7889 = vmatpush2.msra.mxu0 %v11077_v11  ;;  %v11103_v11 = vld [vmem:[%s19937_s17 + $0x390] sm:$0xff] }
0x10de   :  { %7890 = vmatprep.subr.mxu0 %v11076_v32  ;;  %v11102_v32 = vld [vmem:[%s19937_s17 + $0x388] sm:$0xff] }
0x10df   :  { %7891 = vmatpush2.msra.mxu0 %v11075_v61  ;;  %v11101_v61 = vld [vmem:[%s19937_s17 + $0x380] sm:$0xff] }
0x10e0   :  { %7892 = vmatprep.subr.mxu0 %v11074_v16  ;;  %v11156_v16 = vld [vmem:[%s19937_s17 + $0x538] sm:$0xff] }
0x10e1   :  { %7893 = vmatpush2.msra.mxu0 %v11073_v19  ;;  %v11155_v19 = vld [vmem:[%s19937_s17 + $0x530] sm:$0xff] }
0x10e2   :  { %7894 = vmatprep.subr.mxu0 %v11072_v49  ;;  %v11154_v49 = vld [vmem:[%s19937_s17 + $0x528] sm:$0xff] }
0x10e3   :  { %7895 = vmatpush2.msra.mxu0 %v11071_v34  ;;  %v11153_v34 = vld [vmem:[%s19937_s17 + $0x520] sm:$0xff] }
0x10e4   :  { %7896 = vmatprep.subr.mxu0 %v11070_v6  ;;  %v11152_v6 = vld [vmem:[%s19937_s17 + $0x518] sm:$0xff] }
0x10e5   :  { %7897 = vmatpush2.msra.mxu0 %v11069_v38  ;;  %v11150_v38 = vld [vmem:[%s19937_s17 + $0x508] sm:$0xff] }
0x10e6   :  { %7898 = vmatprep.subr.mxu0 %v11068_v28  ;;  %v11148_v28 = vld [vmem:[%s19937_s17 + $0x4f8] sm:$0xff] }
0x10e7   :  { %7899 = vmatpush2.msra.mxu0 %v11067_v54  ;;  %v11146_v54 = vld [vmem:[%s19937_s17 + $0x4e8] sm:$0xff] }
0x10e8   :  { %11097 = vmatprep.subr.msk.mxu0 %vm3079_vm1, %v18678_v57  ;;  %v7663_v57 = vld [vmem:[%s19937_s17 + $0x100] sm:$0xff] }
0x10e9   :  { %7982 = vmatpush2.msra.mxu1 %v7663_v57  ;;  %v11138_v57 = vld [vmem:[%s19937_s17 + $0x4a8] sm:$0xff] }
0x10ea   :  { %8280 = vmatprep.subr.mxu1 %v20068_v10 }
0x1168   :  { %v7620_v62 = vpop.f32.mrf.mxu0 }
0x116a   :  { %v7622_v42 = vpop.f32.mrf.mxu0 }
0x116b   :  { %11093 = vmatprep.mubr.msk.f32.mxu1 %vm7123_vm7, %v7622_v42  ;;  %v11136_v42 = vld [vmem:[%s19937_s17 + $0x498] sm:$0xff] }
0x116c   :  { %v7626_v51 = vpop.f32.mrf.mxu0  ;;  %7984 = vmatmul.mubr.f32.vlgmr.msra.gmra.mxu1 %v7620_v62  ;;  %v11137_v62 = vld [vmem:[%s19937_s17 + $0x4a0] sm:$0xff] }
0x116e   :  { %v7628_v25 = vpop.f32.mrf.mxu0 }
0x116f   :  { %11094 = vmatprep.mubr.msk.f32.mxu1 %vm7123_vm7, %v7628_v25  ;;  %v11134_v25 = vld [vmem:[%s19937_s17 + $0x488] sm:$0xff] }
0x1170   :  { %v7762_v30 = vpop.f32.mrf.mxu0  ;;  %7990 = vmatmul.mubr.f32.gmra.mxu1 %v7626_v51  ;;  %v11135_v51 = vld [vmem:[%s19937_s17 + $0x490] sm:$0xff] }
0x1172   :  { %v7764_v0 = vpop.f32.mrf.mxu0 }
0x1173   :  { %11091 = vmatprep.mubr.msk.f32.mxu0 %vm7123_vm7, %v7764_v0  ;;  %v8261_v0 = vld [vmem:[%s19940_s20 + $0x78] sm:$0xff] }
0x1174   :  { %v7768_v9 = vpop.f32.mrf.mxu0  ;;  %7901 = vmatmul.mubr.f32.vlgmr.msra.gmra.mxu0 %v7762_v30  ;;  %v11133_v30 = vld [vmem:[%s19937_s17 + $0x480] sm:$0xff]  ;;  %8281 = vmatpush1.msra.mxu1 %v8261_v0  ;;  %v11178_v0 = vld [vmem:[%s19940_s20 + $0x168] sm:$0xff] }
0x1175   :  { %11098 = vmatpush1.msk.msra.mxu0 %vm3079_vm1, %v18680_v8  ;;  %v11131_v8 = vld [vmem:[%s19937_s17 + $0x470] sm:$0xff]  ;;  %8282 = vmatprep.subr.mxu1 %v20068_v10 }
0x1176   :  { %8035 = vmatprep.subr.mxu0 %v18682_v39  ;;  %v7770_v3 = vpop.f32.mrf.mxu0  ;;  %v11130_v39 = vld [vmem:[%s19937_s17 + $0x468] sm:$0xff] }
0x1177   :  { %8036 = vmatpush1.msra.mxu0 %v18686_v45  ;;  %11092 = vmatprep.mubr.msk.f32.mxu0 %vm7123_vm7, %v7770_v3  ;;  %v11129_v45 = vld [vmem:[%s19937_s17 + $0x460] sm:$0xff] }
0x1178   :  { %7907 = vmatmul.mubr.f32.gmra.mxu0 %v7768_v9  ;;  %8145 = vmatprep.subr.mxu0 %v11132_v31  ;;  %v8260_v9 = vld [vmem:[%s19940_s20 + $0x70] sm:$0xff]  ;;  %v8259_v31 = vld [vmem:[%s19940_s20 + $0x68] sm:$0xff]  ;;  %v8258_v3 = vld [vmem:[%s19940_s20 + $0x60] sm:$0xff] }
0x1179   :  { %8069 = vmatprep.mubr.f32.mxu0 %v20068_v10  ;;  %8283 = vmatpush1.msra.mxu1 %v8260_v9  ;;  %v8262_v9 = vld [vmem:[%s19940_s20 + $0x80] sm:$0xff] }
0x117a   :  { %8284 = vmatprep.subr.mxu1 %v20068_v10 }
0x117b   :  { %8285 = vmatpush1.msra.mxu1 %v8259_v31  ;;  %v11177_v31 = vld [vmem:[%s19940_s20 + $0x160] sm:$0xff] }
0x117c   :  { %11099 = vmatmul.mubr.msk.f32.vlgmr.msra.gmra.mxu0 %vm6169_vm5, %v11095_v2  ;;  %8286 = vmatprep.subr.mxu1 %v20068_v10  ;;  %v8257_v2 = vld [vmem:[%s19940_s20 + $0x58] sm:$0xff] }
0x117d   :  { %8075 = vmatprep.mubr.f32.mxu0 %v20068_v10  ;;  %8146 = vmatpush1.msra.mxu0 %v11131_v8  ;;  %v8256_v8 = vld [vmem:[%s19940_s20 + $0x50] sm:$0xff] }
0x117e   :  { %8147 = vmatprep.subr.mxu0 %v11130_v39  ;;  %8287 = vmatpush1.msra.mxu1 %v8258_v3  ;;  %v8255_v39 = vld [vmem:[%s19940_s20 + $0x48] sm:$0xff] }
0x117f   :  { %8148 = vmatpush1.msra.mxu0 %v11129_v45  ;;  %8288 = vmatprep.subr.mxu1 %v20068_v10  ;;  %v8254_v45 = vld [vmem:[%s19940_s20 + $0x40] sm:$0xff] }
0x1180   :  { %11100 = vmatmul.mubr.msk.f32.gmra.mxu0 %vm6169_vm5, %v11096_v43  ;;  %8149 = vmatprep.subr.mxu0 %v11128_v15  ;;  %v8253_v43 = vld [vmem:[%s19940_s20 + $0x38] sm:$0xff]  ;;  %v8252_v15 = vld [vmem:[%s19940_s20 + $0x30] sm:$0xff] }
0x1181   :  { %8150 = vmatpush1.msra.mxu0 %v11127_v1  ;;  %8289 = vmatpush1.msra.mxu1 %v8257_v2  ;;  %v8251_v1 = vld [vmem:[%s19940_s20 + $0x28] sm:$0xff] }
0x1182   :  { %8151 = vmatprep.subr.mxu0 %v11126_v17  ;;  %8290 = vmatprep.subr.mxu1 %v20068_v10  ;;  %v8250_v17 = vld [vmem:[%s19940_s20 + $0x20] sm:$0xff] }
0x1183   :  { %8152 = vmatpush1.msra.mxu0 %v11125_v21  ;;  %8291 = vmatpush1.msra.mxu1 %v8256_v8  ;;  %v8249_v21 = vld [vmem:[%s19940_s20 + $0x18] sm:$0xff]  ;;  %v8226_v8 = vld [vmem:[%s19941_s19] sm:$0x3] }
0x1184   :  { %8153 = vmatprep.subr.mxu0 %v11124_v12  ;;  %8292 = vmatprep.subr.mxu1 %v20068_v10  ;;  %v8248_v12 = vld [vmem:[%s19940_s20 + $0x10] sm:$0xff] }
0x1185   :  { %8154 = vmatpush1.msra.mxu0 %v11123_v56  ;;  %8293 = vmatpush1.msra.mxu1 %v8255_v39  ;;  %v8247_v56 = vld [vmem:[%s19940_s20 + $0x8] sm:$0xff] }
0x1186   :  { %8155 = vmatprep.subr.mxu0 %v11122_v23  ;;  %8294 = vmatprep.subr.mxu1 %v20068_v10  ;;  %v8246_v23 = vld [vmem:[%s19940_s20] sm:$0xff] }
0x1187   :  { %8156 = vmatpush1.msra.mxu0 %v11121_v27  ;;  %8295 = vmatpush1.msra.mxu1 %v8254_v45  ;;  %v8273_v27 = vld [vmem:[%s19940_s20 + $0xd8] sm:$0xff] }
0x1188   :  { %8157 = vmatprep.subr.mxu0 %v11120_v24  ;;  %8296 = vmatprep.subr.mxu1 %v20068_v10  ;;  %v8272_v24 = vld [vmem:[%s19940_s20 + $0xd0] sm:$0xff] }
0x1189   :  { %8158 = vmatpush1.msra.mxu0 %v11119_v52  ;;  %8297 = vmatpush1.msra.mxu1 %v8253_v43  ;;  %v8271_v52 = vld [vmem:[%s19940_s20 + $0xc8] sm:$0xff] }
0x118a   :  { %8159 = vmatprep.subr.mxu0 %v11118_v50  ;;  %8298 = vmatprep.subr.mxu1 %v20068_v10  ;;  %v8270_v50 = vld [vmem:[%s19940_s20 + $0xc0] sm:$0xff] }
0x118b   :  { %8160 = vmatpush1.msra.mxu0 %v11117_v60  ;;  %8299 = vmatpush1.msra.mxu1 %v8252_v15  ;;  %v8269_v60 = vld [vmem:[%s19940_s20 + $0xb8] sm:$0xff]  ;;  %v8231_v15 = vrot.slane %v8226_v8, %v20070_v7 }
0x118c   :  { %8161 = vmatprep.subr.mxu0 %v11116_v58  ;;  %8300 = vmatprep.subr.mxu1 %v20068_v10  ;;  %v8268_v58 = vld [vmem:[%s19940_s20 + $0xb0] sm:$0xff] }
0x118d   :  { %8162 = vmatpush1.msra.mxu0 %v11115_v22  ;;  %8301 = vmatpush1.msra.mxu1 %v8251_v1  ;;  %v8267_v22 = vld [vmem:[%s19940_s20 + $0xa8] sm:$0xff] }
0x118e   :  { %8163 = vmatprep.subr.mxu0 %v11114_v35  ;;  %8302 = vmatprep.subr.mxu1 %v20068_v10 }
0x118f   :  { %8164 = vmatpush1.msra.mxu0 %v11113_v26  ;;  %8303 = vmatpush1.msra.mxu1 %v8250_v17 }
0x1190   :  { %8165 = vmatprep.subr.mxu0 %v11112_v46  ;;  %8304 = vmatprep.subr.mxu1 %v20068_v10 }
0x1191   :  { %8166 = vmatpush1.msra.mxu0 %v11111_v4  ;;  %8305 = vmatpush1.msra.mxu1 %v8249_v21  ;;  %v8235_v21 = vrot.slane %v8226_v8, %v20069_v36  ;;  %v11206_v36 = vld [vmem:[%s19940_s20 + $0x238] sm:$0xff] }
0x1192   :  { %8167 = vmatprep.subr.mxu0 %v11110_v29  ;;  %8306 = vmatprep.subr.mxu1 %v20068_v10 }
0x1193   :  { %8168 = vmatpush1.msra.mxu0 %v11109_v47  ;;  %8307 = vmatpush1.msra.mxu1 %v8248_v12 }
0x1194   :  { %8169 = vmatprep.subr.mxu0 %v11108_v5  ;;  %8308 = vmatprep.subr.mxu1 %v20068_v10  ;;  %v11176_v5 = vld [vmem:[%s19940_s20 + $0x158] sm:$0xff] }
0x1195   :  { %8170 = vmatpush1.msra.mxu0 %v11107_v48  ;;  %8309 = vmatpush1.msra.mxu1 %v8247_v56 }
0x1196   :  { %8171 = vmatprep.subr.mxu0 %v11106_v37  ;;  %8310 = vmatprep.subr.mxu1 %v20068_v10  ;;  %v11175_v37 = vld [vmem:[%s19940_s20 + $0x150] sm:$0xff] }
0x1197   :  { %8172 = vmatpush1.msra.mxu0 %v11105_v59  ;;  %8311 = vmatpush1.msra.mxu1 %v8246_v23 }
0x1198   :  { %8173 = vmatprep.subr.mxu0 %v11104_v13  ;;  %8320 = vmatprep.subr.mxu1 %v20068_v10  ;;  %v11174_v13 = vld [vmem:[%s19940_s20 + $0x148] sm:$0xff] }
0x1199   :  { %8174 = vmatpush1.msra.mxu0 %v11103_v11  ;;  %8321 = vmatpush2.msra.mxu1 %v8273_v27  ;;  %v11173_v11 = vld [vmem:[%s19940_s20 + $0x140] sm:$0xff] }
0x119a   :  { %8175 = vmatprep.subr.mxu0 %v11102_v32  ;;  %8322 = vmatprep.subr.mxu1 %v20068_v10  ;;  %v11172_v32 = vld [vmem:[%s19940_s20 + $0x138] sm:$0xff] }
0x119b   :  { %8176 = vmatpush1.msra.mxu0 %v11101_v61  ;;  %8323 = vmatpush2.msra.mxu1 %v8272_v24  ;;  %v11171_v61 = vld [vmem:[%s19940_s20 + $0x130] sm:$0xff] }
0x119c   :  { %8185 = vmatprep.subr.mxu0 %v11156_v16  ;;  %8324 = vmatprep.subr.mxu1 %v20068_v10  ;;  %v11170_v16 = vld [vmem:[%s19940_s20 + $0x128] sm:$0xff] }
0x119d   :  { %8186 = vmatpush2.msra.mxu0 %v11155_v19  ;;  %8325 = vmatpush2.msra.mxu1 %v8271_v52  ;;  %v11169_v19 = vld [vmem:[%s19940_s20 + $0x120] sm:$0xff] }
0x119e   :  { %8187 = vmatprep.subr.mxu0 %v11154_v49  ;;  %8326 = vmatprep.subr.mxu1 %v20068_v10  ;;  %v11168_v49 = vld [vmem:[%s19940_s20 + $0x118] sm:$0xff] }
0x119f   :  { %8188 = vmatpush2.msra.mxu0 %v11153_v34  ;;  %8327 = vmatpush2.msra.mxu1 %v8270_v50  ;;  %v11167_v34 = vld [vmem:[%s19940_s20 + $0x110] sm:$0xff] }
0x11a0   :  { %8189 = vmatprep.subr.mxu0 %v11152_v6  ;;  %8328 = vmatprep.subr.mxu1 %v20068_v10  ;;  %v11166_v6 = vld [vmem:[%s19940_s20 + $0x108] sm:$0xff] }
0x11a1   :  { %8190 = vmatpush2.msra.mxu0 %v11151_v44  ;;  %8329 = vmatpush2.msra.mxu1 %v8269_v60  ;;  %v11165_v44 = vld [vmem:[%s19940_s20 + $0x100] sm:$0xff] }
0x11a2   :  { %8191 = vmatprep.subr.mxu0 %v11150_v38  ;;  %8330 = vmatprep.subr.mxu1 %v20068_v10  ;;  %v11164_v38 = vld [vmem:[%s19940_s20 + $0xf8] sm:$0xff] }
0x11a3   :  { %8192 = vmatpush2.msra.mxu0 %v11149_v20  ;;  %8331 = vmatpush2.msra.mxu1 %v8268_v58  ;;  %v11163_v20 = vld [vmem:[%s19940_s20 + $0xf0] sm:$0xff] }
0x11a4   :  { %8193 = vmatprep.subr.mxu0 %v11148_v28  ;;  %8332 = vmatprep.subr.mxu1 %v20068_v10  ;;  %v11162_v28 = vld [vmem:[%s19940_s20 + $0xe8] sm:$0xff] }
0x11a5   :  { %8194 = vmatpush2.msra.mxu0 %v11147_v63  ;;  %8333 = vmatpush2.msra.mxu1 %v8267_v22  ;;  %v11161_v63 = vld [vmem:[%s19940_s20 + $0xe0] sm:$0xff] }
0x11a6   :  { %8195 = vmatprep.subr.mxu0 %v11146_v54  ;;  %8334 = vmatprep.subr.mxu1 %v20068_v10  ;;  %v11188_v54 = vld [vmem:[%s19940_s20 + $0x1b8] sm:$0xff] }
0x11a7   :  { %8196 = vmatpush2.msra.mxu0 %v11145_v14  ;;  %v11187_v14 = vld [vmem:[%s19940_s20 + $0x1b0] sm:$0xff] }
0x11a8   :  { %8197 = vmatprep.subr.mxu0 %v11144_v33  ;;  %v11186_v33 = vld [vmem:[%s19940_s20 + $0x1a8] sm:$0xff] }
0x11a9   :  { %8198 = vmatpush2.msra.mxu0 %v11143_v18  ;;  %v11185_v18 = vld [vmem:[%s19940_s20 + $0x1a0] sm:$0xff] }
0x11aa   :  { %8199 = vmatprep.subr.mxu0 %v11142_v40  ;;  %v11184_v40 = vld [vmem:[%s19940_s20 + $0x198] sm:$0xff] }
0x11ab   :  { %8200 = vmatpush2.msra.mxu0 %v11141_v41  ;;  %v11183_v41 = vld [vmem:[%s19940_s20 + $0x190] sm:$0xff] }
0x11ac   :  { %8201 = vmatprep.subr.mxu0 %v11140_v53  ;;  %v11182_v53 = vld [vmem:[%s19940_s20 + $0x188] sm:$0xff] }
0x11ad   :  { %8202 = vmatpush2.msra.mxu0 %v11139_v55  ;;  %v8266_v55 = vld [vmem:[%s19940_s20 + $0xa0] sm:$0xff] }
0x11ae   :  { %8203 = vmatprep.subr.mxu0 %v11138_v57  ;;  %8335 = vmatpush2.msra.mxu1 %v8266_v55  ;;  %v11181_v57 = vld [vmem:[%s19940_s20 + $0x180] sm:$0xff]  ;;  %v11208_v55 = vld [vmem:[%s19940_s20 + $0x248] sm:$0xff] }
0x11af   :  { %8204 = vmatpush2.msra.mxu0 %v11137_v62  ;;  %8336 = vmatprep.subr.mxu1 %v20068_v10  ;;  %v8265_v62 = vld [vmem:[%s19940_s20 + $0x98] sm:$0xff] }
0x11b0   :  { %8205 = vmatprep.subr.mxu0 %v11136_v42  ;;  %8337 = vmatpush2.msra.mxu1 %v8265_v62  ;;  %v11180_v42 = vld [vmem:[%s19940_s20 + $0x178] sm:$0xff] }
0x11b1   :  { %8206 = vmatpush2.msra.mxu0 %v11135_v51  ;;  %8338 = vmatprep.subr.mxu1 %v20068_v10  ;;  %v8264_v51 = vld [vmem:[%s19940_s20 + $0x90] sm:$0xff] }
0x11b2   :  { %8207 = vmatprep.subr.mxu0 %v11134_v25  ;;  %8339 = vmatpush2.msra.mxu1 %v8264_v51  ;;  %v11179_v25 = vld [vmem:[%s19940_s20 + $0x170] sm:$0xff] }
0x11b3   :  { %8208 = vmatpush2.msra.mxu0 %v11133_v30  ;;  %8340 = vmatprep.subr.mxu1 %v20068_v10  ;;  %v8263_v30 = vld [vmem:[%s19940_s20 + $0x88] sm:$0xff] }
0x11b4   :  { %8384 = vmatprep.subr.mxu0 %v20068_v10  ;;  %8341 = vmatpush2.msra.mxu1 %v8263_v30 }
0x11b5   :  { %8342 = vmatprep.subr.mxu1 %v20068_v10 }
0x11b6   :  { %8343 = vmatpush2.msra.mxu1 %v8262_v9 }
0x11b7   :  { %8490 = vmatprep.subr.mxu1 %v20068_v10 }
0x122c   :  { %v7985_v3 = vpop.f32.mrf.mxu1 }
0x122e   :  { %v7987_v2 = vpop.f32.mrf.mxu1 }
0x1230   :  { %v7991_v45 = vpop.f32.mrf.mxu1 }
0x1232   :  { %v7993_v27 = vpop.f32.mrf.mxu1 }
0x1234   :  { %v19200_v35 = vpop.f32.mrf.mxu0 }
0x1235   :  { %v7986_v39 = vadd.f32 %v7985_v3, %v19200_v35 }
0x1236   :  { %v19202_v26 = vpop.f32.mrf.mxu0 }
0x1237   :  { %v7988_v1 = vadd.f32 %v7987_v2, %v19202_v26 }
0x1238   :  { %v19204_v46 = vpop.f32.mrf.mxu0 }
0x1239   :  { %v7992_v56 = vadd.f32 %v7991_v45, %v19204_v46  ;;  %v11205_v46 = vld [vmem:[%s19940_s20 + $0x230] sm:$0xff] }
0x123a   :  { %v19206_v4 = vpop.f32.mrf.mxu0 }
0x123b   :  { %v7994_v50 = vadd.f32 %v7993_v27, %v19206_v4  ;;  %v11265_v27 = vld [vmem:[%s19943_s23 + $0x218] sm:$0xff] }
0x123c   :  { %v8071_v29 = vpop.f32.mrf.mxu0 }
0x123e   :  { %v8073_v47 = vpop.f32.mrf.mxu0 }
0x123f   :  { %11157 = vmatprep.mubr.msk.f32.mxu0 %vm7123_vm7, %v8073_v47 }
0x1240   :  { %v8077_v48 = vpop.f32.mrf.mxu0  ;;  %8210 = vmatmul.mubr.f32.vlgmr.msra.gmra.mxu0 %v8071_v29 }
0x1241   :  { %8385 = vmatpush1.msra.mxu0 %v11176_v5 }
0x1242   :  { %v8079_v59 = vpop.f32.mrf.mxu0  ;;  %8386 = vmatprep.subr.mxu0 %v20068_v10 }
0x1243   :  { %11158 = vmatprep.mubr.msk.f32.mxu0 %vm7123_vm7, %v8079_v59  ;;  %8387 = vmatpush1.msra.mxu0 %v11175_v37  ;;  %v11203_v37 = vld [vmem:[%s19940_s20 + $0x220] sm:$0xff]  ;;  %v11202_v59 = vld [vmem:[%s19940_s20 + $0x218] sm:$0xff] }
0x1244   :  { %8216 = vmatmul.mubr.f32.gmra.mxu0 %v8077_v48  ;;  %8388 = vmatprep.subr.mxu0 %v20068_v10  ;;  %v11204_v48 = vld [vmem:[%s19940_s20 + $0x228] sm:$0xff] }
0x1245   :  { %8389 = vmatpush1.msra.mxu0 %v11174_v13  ;;  %v11201_v13 = vld [vmem:[%s19940_s20 + $0x210] sm:$0xff] }
0x1246   :  { %8390 = vmatprep.subr.mxu0 %v20068_v10 }
0x1247   :  { %8391 = vmatpush1.msra.mxu0 %v11173_v11  ;;  %v11200_v11 = vld [vmem:[%s19940_s20 + $0x208] sm:$0xff] }
0x1248   :  { %8392 = vmatprep.subr.mxu0 %v20068_v10 }
0x1249   :  { %8393 = vmatpush1.msra.mxu0 %v11172_v32  ;;  %v11199_v32 = vld [vmem:[%s19940_s20 + $0x200] sm:$0xff] }
0x124a   :  { %8394 = vmatprep.subr.mxu0 %v20068_v10 }
0x124b   :  { %8395 = vmatpush1.msra.mxu0 %v11171_v61  ;;  %v11198_v61 = vld [vmem:[%s19940_s20 + $0x1f8] sm:$0xff] }
0x124c   :  { %8396 = vmatprep.subr.mxu0 %v20068_v10 }
0x124d   :  { %8397 = vmatpush1.msra.mxu0 %v11170_v16  ;;  %v11197_v16 = vld [vmem:[%s19940_s20 + $0x1f0] sm:$0xff] }
0x124e   :  { %8398 = vmatprep.subr.mxu0 %v20068_v10 }
0x124f   :  { %8399 = vmatpush1.msra.mxu0 %v11169_v19  ;;  %v11196_v19 = vld [vmem:[%s19940_s20 + $0x1e8] sm:$0xff] }
0x1250   :  { %8400 = vmatprep.subr.mxu0 %v20068_v10 }
0x1251   :  { %8401 = vmatpush1.msra.mxu0 %v11168_v49  ;;  %v11195_v49 = vld [vmem:[%s19940_s20 + $0x1e0] sm:$0xff] }
0x1252   :  { %8402 = vmatprep.subr.mxu0 %v20068_v10 }
0x1253   :  { %8403 = vmatpush1.msra.mxu0 %v11167_v34  ;;  %v11194_v34 = vld [vmem:[%s19940_s20 + $0x1d8] sm:$0xff] }
0x1254   :  { %8404 = vmatprep.subr.mxu0 %v20068_v10 }
0x1255   :  { %8405 = vmatpush1.msra.mxu0 %v11166_v6  ;;  %v11193_v6 = vld [vmem:[%s19940_s20 + $0x1d0] sm:$0xff] }
0x1256   :  { %8406 = vmatprep.subr.mxu0 %v20068_v10 }
0x1257   :  { %8407 = vmatpush1.msra.mxu0 %v11165_v44  ;;  %v11192_v44 = vld [vmem:[%s19940_s20 + $0x1c8] sm:$0xff] }
0x1258   :  { %8408 = vmatprep.subr.mxu0 %v20068_v10 }
0x1259   :  { %8409 = vmatpush1.msra.mxu0 %v11164_v38  ;;  %v11191_v38 = vld [vmem:[%s19940_s20 + $0x1c0] sm:$0xff] }
0x125a   :  { %8410 = vmatprep.subr.mxu0 %v20068_v10 }
0x125b   :  { %8411 = vmatpush1.msra.mxu0 %v11163_v20  ;;  %v11218_v20 = vld [vmem:[%s19940_s20 + $0x298] sm:$0xff] }
0x125c   :  { %8412 = vmatprep.subr.mxu0 %v20068_v10 }
0x125d   :  { %8413 = vmatpush1.msra.mxu0 %v11162_v28  ;;  %v11217_v28 = vld [vmem:[%s19940_s20 + $0x290] sm:$0xff] }
0x125e   :  { %8414 = vmatprep.subr.mxu0 %v20068_v10 }
0x125f   :  { %8415 = vmatpush1.msra.mxu0 %v11161_v63  ;;  %v11216_v63 = vld [vmem:[%s19940_s20 + $0x288] sm:$0xff] }
0x1260   :  { %8424 = vmatprep.subr.mxu0 %v20068_v10 }
0x1261   :  { %8425 = vmatpush2.msra.mxu0 %v11188_v54  ;;  %v11215_v54 = vld [vmem:[%s19940_s20 + $0x280] sm:$0xff] }
0x1262   :  { %8426 = vmatprep.subr.mxu0 %v20068_v10 }
0x1263   :  { %8427 = vmatpush2.msra.mxu0 %v11187_v14  ;;  %v11214_v14 = vld [vmem:[%s19940_s20 + $0x278] sm:$0xff] }
0x1264   :  { %8428 = vmatprep.subr.mxu0 %v20068_v10 }
0x1265   :  { %8429 = vmatpush2.msra.mxu0 %v11186_v33  ;;  %v11213_v33 = vld [vmem:[%s19940_s20 + $0x270] sm:$0xff] }
0x1266   :  { %8430 = vmatprep.subr.mxu0 %v20068_v10 }
0x1267   :  { %8431 = vmatpush2.msra.mxu0 %v11185_v18  ;;  %v11212_v18 = vld [vmem:[%s19940_s20 + $0x268] sm:$0xff] }
0x1268   :  { %8432 = vmatprep.subr.mxu0 %v20068_v10 }
0x1269   :  { %8433 = vmatpush2.msra.mxu0 %v11184_v40  ;;  %v11211_v40 = vld [vmem:[%s19940_s20 + $0x260] sm:$0xff] }
0x126a   :  { %8434 = vmatprep.subr.mxu0 %v20068_v10 }
0x126b   :  { %8435 = vmatpush2.msra.mxu0 %v11183_v41  ;;  %v11210_v41 = vld [vmem:[%s19940_s20 + $0x258] sm:$0xff] }
0x126c   :  { %8436 = vmatprep.subr.mxu0 %v20068_v10 }
0x126d   :  { %8437 = vmatpush2.msra.mxu0 %v11182_v53  ;;  %v11209_v53 = vld [vmem:[%s19940_s20 + $0x250] sm:$0xff] }
0x126e   :  { %8438 = vmatprep.subr.mxu0 %v20068_v10 }
0x126f   :  { %8439 = vmatpush2.msra.mxu0 %v11181_v57  ;;  %v11207_v57 = vld [vmem:[%s19940_s20 + $0x240] sm:$0xff] }
0x1270   :  { %8440 = vmatprep.subr.mxu0 %v20068_v10 }
0x1271   :  { %8441 = vmatpush2.msra.mxu0 %v11180_v42 }
0x1272   :  { %8442 = vmatprep.subr.mxu0 %v20068_v10 }
0x1273   :  { %8443 = vmatpush2.msra.mxu0 %v11179_v25 }
0x1274   :  { %8444 = vmatprep.subr.mxu0 %v20068_v10 }
0x1275   :  { %8445 = vmatpush2.msra.mxu0 %v11178_v0 }
0x1276   :  { %8446 = vmatprep.subr.mxu0 %v20068_v10 }
0x1277   :  { %8447 = vmatpush2.msra.mxu0 %v11177_v31 }
0x1278   :  { %11369 = vmatprep.subr.mxu0 %v20068_v10 }
0x1300   :  { %v8211_v43 = vpop.f32.mrf.mxu0 }
0x1301   :  { %v8222_v17 = vadd.f32 %v8211_v43, %v7986_v39 }
0x1302   :  { %v8213_v12 = vpop.f32.mrf.mxu0 }
0x1303   :  { %v8223_v23 = vadd.f32 %v8213_v12, %v7988_v1  ;;  %v8238_v24 = vadd.f32 %v8231_v15, %v8222_v17  ;;  %v8567_v17 = vld [vmem:[%s19942_s21] sm:$0x3f]  ;;  %v11226_v12 = vld [vmem:[%s19942_s21 + $0x10] sm:$0x3f] }
0x1304   :  { %v8217_v52 = vpop.f32.mrf.mxu0 }
0x1305   :  { %v8239_v60 = vadd.f32 %v8235_v21, %v8223_v23  ;;  %v8224_v58 = vadd.f32 %v8217_v52, %v7992_v56  ;;  %v19351_v7 = vmax.f32 %v8238_v24, 0.0  ;;  %v11268_v56 = vld [vmem:[%s19943_s23 + $0x230] sm:$0xff]  ;;  %v11267_v23 = vld [vmem:[%s19943_s23 + $0x228] sm:$0xff]  ;;  %v11262_v52 = vld [vmem:[%s19943_s23 + $0x200] sm:$0xff] }
0x1306   :  { %v8219_v22 = vpop.f32.mrf.mxu0  ;;  %v11264_v24 = vld [vmem:[%s19943_s23 + $0x210] sm:$0xff] }
0x1307   :  { %v8243_v35 = vmax.f32 %v8239_v60, 0.0  ;;  %v8225_v29 = vadd.f32 %v8219_v22, %v7994_v50  ;;  %v8240_v26 = vadd.f32 %v8231_v15, %v8224_v58  ;;  %v11261_v50 = vld [vmem:[%s19943_s23 + $0x1f8] sm:$0xff]  ;;  %v11259_v60 = vld [vmem:[%s19943_s23 + $0x1e8] sm:$0xff]  ;;  %v11258_v58 = vld [vmem:[%s19943_s23 + $0x1e0] sm:$0xff] }
0x1308   :  { %v11256_v22 = vld [vmem:[%s19943_s23 + $0x1d0] sm:$0xff] }
0x1309   :  { %v8241_v47 = vadd.f32 %v8235_v21, %v8225_v29  ;;  %11159 = vmatprep.mubr.msk.f32.mxu1 %vm7123_vm7, %v8243_v35  ;;  %11189 = vmatprep.mubr.msk.f32.mxu0 %vm7123_vm7, %v8243_v35  ;;  %v19366_v5 = vmax.f32 %v8240_v26, 0.0  ;;  %v11223_v21 = vld [vmem:[%s19942_s21 + $0x8] sm:$0x3f]  ;;  %v11253_v29 = vld [vmem:[%s19943_s23 + $0x1b8] sm:$0xff] }
0x130a   :  { %8345 = vmatmul.mubr.f32.vlgmr.msra.gmra.mxu1 %v19351_v7  ;;  %8449 = vmatmul.mubr.f32.vlgmr.msra.gmra.mxu0 %v19351_v7  ;;  %v11249_v26 = vld [vmem:[%s19943_s23 + $0x198] sm:$0xff] }
0x130b   :  { %v19363_v4 = vmax.f32 %v8241_v47, 0.0  ;;  %8491 = vmatpush1.msra.mxu1 %v11206_v36  ;;  %v11250_v36 = vld [vmem:[%s19943_s23 + $0x1a0] sm:$0xff]  ;;  %v11247_v47 = vld [vmem:[%s19943_s23 + $0x188] sm:$0xff] }
0x130c   :  { %8492 = vmatprep.subr.mxu1 %v20068_v10 }
0x130d   :  { %8493 = vmatpush1.msra.mxu1 %v11205_v46  ;;  %11160 = vmatprep.mubr.msk.f32.mxu1 %vm7123_vm7, %v19363_v4  ;;  %v11246_v46 = vld [vmem:[%s19943_s23 + $0x180] sm:$0xff] }
0x130e   :  { %11190 = vmatprep.mubr.msk.f32.mxu0 %vm7123_vm7, %v19363_v4  ;;  %8494 = vmatprep.subr.mxu1 %v20068_v10 }
0x130f   :  { %8350 = vmatmul.mubr.f32.gmra.mxu1 %v19366_v5  ;;  %8454 = vmatmul.mubr.f32.gmra.mxu0 %v19366_v5 }
0x1310   :  { %8495 = vmatpush1.msra.mxu1 %v11204_v48  ;;  %11219 = vmatprep.mubr.msk.f32.mxu1 %vm7123_vm7, %v8243_v35  ;;  %v11255_v35 = vld [vmem:[%s19943_s23 + $0x1c8] sm:$0xff]  ;;  %v11241_v48 = vld [vmem:[%s19943_s23 + $0x158] sm:$0xff] }
0x1311   :  { %8496 = vmatprep.subr.mxu1 %v20068_v10  ;;  %11373 = vmatprep.mubr.msk.f32.mxu0 %vm11522_vm8, %v20068_v10 }
0x1312   :  { %8497 = vmatpush1.msra.mxu1 %v11203_v37  ;;  %v11240_v37 = vld [vmem:[%s19943_s23 + $0x150] sm:$0xff] }
0x1313   :  { %8498 = vmatprep.subr.mxu1 %v20068_v10 }
0x1314   :  { %8499 = vmatpush1.msra.mxu1 %v11202_v59 }
0x1315   :  { %8500 = vmatprep.subr.mxu1 %v20068_v10 }
0x1316   :  { %8501 = vmatpush1.msra.mxu1 %v11201_v13 }
0x1317   :  { %8502 = vmatprep.subr.mxu1 %v20068_v10 }
0x1318   :  { %8503 = vmatpush1.msra.mxu1 %v11200_v11 }
0x1319   :  { %8504 = vmatprep.subr.mxu1 %v20068_v10 }
0x131a   :  { %8505 = vmatpush1.msra.mxu1 %v11199_v32 }
0x131b   :  { %8506 = vmatprep.subr.mxu1 %v20068_v10 }
0x131c   :  { %8507 = vmatpush1.msra.mxu1 %v11198_v61 }
0x131d   :  { %8508 = vmatprep.subr.mxu1 %v20068_v10 }
0x131e   :  { %8509 = vmatpush1.msra.mxu1 %v11197_v16 }
0x131f   :  { %8510 = vmatprep.subr.mxu1 %v20068_v10 }
0x1320   :  { %8511 = vmatpush1.msra.mxu1 %v11196_v19 }
0x1321   :  { %8512 = vmatprep.subr.mxu1 %v20068_v10 }
0x1322   :  { %8513 = vmatpush1.msra.mxu1 %v11195_v49  ;;  %v8796_v49 = vld [vmem:[%s19944_s22] sm:$0x3] }
0x1323   :  { %8514 = vmatprep.subr.mxu1 %v20068_v10 }
0x1324   :  { %8515 = vmatpush1.msra.mxu1 %v11194_v34 }
0x1325   :  { %8516 = vmatprep.subr.mxu1 %v20068_v10 }
0x1326   :  { %8517 = vmatpush1.msra.mxu1 %v11193_v6  ;;  %v11231_v6 = vld [vmem:[%s19944_s22 + $0x2] sm:$0x3] }
0x1327   :  { %8518 = vmatprep.subr.mxu1 %v20068_v10 }
0x1328   :  { %8519 = vmatpush1.msra.mxu1 %v11192_v44  ;;  %v11269_v44 = vld [vmem:[%s19943_s23 + $0x238] sm:$0xff] }
0x1329   :  { %8520 = vmatprep.subr.mxu1 %v20068_v10 }
0x132a   :  { %8521 = vmatpush1.msra.mxu1 %v11191_v38  ;;  %v11266_v38 = vld [vmem:[%s19943_s23 + $0x220] sm:$0xff] }
0x132b   :  { %8530 = vmatprep.subr.mxu1 %v20068_v10 }
0x132c   :  { %8531 = vmatpush2.msra.mxu1 %v11218_v20  ;;  %v11263_v20 = vld [vmem:[%s19943_s23 + $0x208] sm:$0xff] }
0x132d   :  { %8532 = vmatprep.subr.mxu1 %v20068_v10 }
0x132e   :  { %8533 = vmatpush2.msra.mxu1 %v11217_v28  ;;  %v11260_v28 = vld [vmem:[%s19943_s23 + $0x1f0] sm:$0xff] }
0x132f   :  { %8534 = vmatprep.subr.mxu1 %v20068_v10 }
0x1330   :  { %8535 = vmatpush2.msra.mxu1 %v11216_v63  ;;  %v11257_v63 = vld [vmem:[%s19943_s23 + $0x1d8] sm:$0xff] }
0x1331   :  { %8536 = vmatprep.subr.mxu1 %v20068_v10 }
0x1332   :  { %8537 = vmatpush2.msra.mxu1 %v11215_v54  ;;  %v11254_v54 = vld [vmem:[%s19943_s23 + $0x1c0] sm:$0xff] }
0x1333   :  { %8538 = vmatprep.subr.mxu1 %v20068_v10 }
0x1334   :  { %8539 = vmatpush2.msra.mxu1 %v11214_v14  ;;  %v11251_v14 = vld [vmem:[%s19943_s23 + $0x1a8] sm:$0xff] }
0x1335   :  { %8540 = vmatprep.subr.mxu1 %v20068_v10 }
0x1336   :  { %8541 = vmatpush2.msra.mxu1 %v11213_v33  ;;  %v11248_v33 = vld [vmem:[%s19943_s23 + $0x190] sm:$0xff] }
0x1337   :  { %8542 = vmatprep.subr.mxu1 %v20068_v10 }
0x1338   :  { %8543 = vmatpush2.msra.mxu1 %v11212_v18  ;;  %v11245_v18 = vld [vmem:[%s19943_s23 + $0x178] sm:$0xff] }
0x1339   :  { %8544 = vmatprep.subr.mxu1 %v20068_v10 }
0x133a   :  { %8545 = vmatpush2.msra.mxu1 %v11211_v40  ;;  %v11242_v40 = vld [vmem:[%s19943_s23 + $0x160] sm:$0xff] }
0x133b   :  { %8546 = vmatprep.subr.mxu1 %v20068_v10 }
0x133c   :  { %8547 = vmatpush2.msra.mxu1 %v11210_v41  ;;  %v11238_v41 = vld [vmem:[%s19943_s23 + $0x140] sm:$0xff] }
0x133d   :  { %8548 = vmatprep.subr.mxu1 %v20068_v10 }
0x133e   :  { %8549 = vmatpush2.msra.mxu1 %v11209_v53  ;;  %v11237_v53 = vld [vmem:[%s19943_s23 + $0x138] sm:$0xff] }
0x133f   :  { %8550 = vmatprep.subr.mxu1 %v20068_v10 }
0x1340   :  { %8551 = vmatpush2.msra.mxu1 %v11208_v55  ;;  %v11239_v55 = vld [vmem:[%s19943_s23 + $0x148] sm:$0xff] }
0x1341   :  { %8552 = vmatprep.subr.mxu1 %v20068_v10 }
0x1342   :  { %8553 = vmatpush2.msra.mxu1 %v11207_v57  ;;  %v11235_v57 = vld [vmem:[%s19943_s23 + $0x128] sm:$0xff] }
0x1343   :  { %8555 = vmatmul.mubr.f32.vlgmr.msra.gmra.mxu1 %v19351_v7  ;;  %9033 = vmatprep.subr.mxu1 %v11268_v56  ;;  %v11252_v7 = vld [vmem:[%s19943_s23 + $0x1b0] sm:$0xff]  ;;  %v8895_v56 = vld [vmem:[%s19943_s23 + $0xa8] sm:$0xff] }
0x1344   :  { %11220 = vmatprep.mubr.msk.f32.mxu1 %vm7123_vm7, %v19363_v4  ;;  %9034 = vmatpush1.msra.mxu1 %v11267_v23  ;;  %v11244_v4 = vld [vmem:[%s19943_s23 + $0x170] sm:$0xff]  ;;  %v8897_v23 = vld [vmem:[%s19943_s23 + $0xb8] sm:$0xff] }
0x1345   :  { %9035 = vmatprep.subr.mxu1 %v11265_v27  ;;  %v8893_v27 = vld [vmem:[%s19943_s23 + $0x98] sm:$0xff] }
0x1346   :  { %9036 = vmatpush1.msra.mxu1 %v11264_v24  ;;  %v8892_v24 = vld [vmem:[%s19943_s23 + $0x90] sm:$0xff] }
0x1347   :  { %8560 = vmatmul.mubr.f32.gmra.mxu1 %v19366_v5  ;;  %9037 = vmatprep.subr.mxu1 %v11262_v52  ;;  %v11243_v5 = vld [vmem:[%s19943_s23 + $0x168] sm:$0xff]  ;;  %v8894_v52 = vld [vmem:[%s19943_s23 + $0xa0] sm:$0xff] }
0x1348   :  { %9089 = vmatprep.mubr.f32.mxu1 %v20068_v10  ;;  %9038 = vmatpush1.msra.mxu1 %v11261_v50  ;;  %v8890_v50 = vld [vmem:[%s19943_s23 + $0x80] sm:$0xff] }
0x1349   :  { %9039 = vmatprep.subr.mxu1 %v11259_v60  ;;  %v8889_v60 = vld [vmem:[%s19943_s23 + $0x78] sm:$0xff] }
0x134a   :  { %9040 = vmatpush1.msra.mxu1 %v11258_v58  ;;  %v8891_v58 = vld [vmem:[%s19943_s23 + $0x88] sm:$0xff] }
0x134b   :  { %9041 = vmatprep.subr.mxu1 %v11256_v22  ;;  %v8887_v22 = vld [vmem:[%s19943_s23 + $0x68] sm:$0xff] }
0x134c   :  { %9042 = vmatpush1.msra.mxu1 %v11255_v35  ;;  %v8886_v35 = vld [vmem:[%s19943_s23 + $0x60] sm:$0xff] }
0x134d   :  { %9043 = vmatprep.subr.mxu1 %v11253_v29  ;;  %v8888_v29 = vld [vmem:[%s19943_s23 + $0x70] sm:$0xff] }
0x134e   :  { %9044 = vmatpush1.msra.mxu1 %v11252_v7  ;;  %v8884_v7 = vld [vmem:[%s19943_s23 + $0x50] sm:$0xff] }
0x134f   :  { %9045 = vmatprep.subr.mxu1 %v11250_v36  ;;  %v8883_v36 = vld [vmem:[%s19943_s23 + $0x48] sm:$0xff] }
0x1350   :  { %9046 = vmatpush1.msra.mxu1 %v11249_v26  ;;  %v8885_v26 = vld [vmem:[%s19943_s23 + $0x58] sm:$0xff] }
0x1351   :  { %9047 = vmatprep.subr.mxu1 %v11247_v47  ;;  %v8881_v47 = vld [vmem:[%s19943_s23 + $0x38] sm:$0xff] }
0x1352   :  { %9048 = vmatpush1.msra.mxu1 %v11246_v46  ;;  %v8880_v46 = vld [vmem:[%s19943_s23 + $0x30] sm:$0xff] }
0x1353   :  { %9049 = vmatprep.subr.mxu1 %v11244_v4  ;;  %v8882_v4 = vld [vmem:[%s19943_s23 + $0x40] sm:$0xff] }
0x1354   :  { %9050 = vmatpush1.msra.mxu1 %v11243_v5  ;;  %v8878_v5 = vld [vmem:[%s19943_s23 + $0x20] sm:$0xff] }
0x1355   :  { %9051 = vmatprep.subr.mxu1 %v11241_v48  ;;  %v8877_v48 = vld [vmem:[%s19943_s23 + $0x18] sm:$0xff] }
0x1356   :  { %9052 = vmatpush1.msra.mxu1 %v11240_v37  ;;  %v8879_v37 = vld [vmem:[%s19943_s23 + $0x28] sm:$0xff] }
0x1357   :  { %9053 = vmatprep.subr.mxu1 %v11238_v41  ;;  %v11295_v41 = vld [vmem:[%s19943_s23 + $0x2d0] sm:$0xff] }
0x1358   :  { %9054 = vmatpush1.msra.mxu1 %v11237_v53  ;;  %v11297_v53 = vld [vmem:[%s19943_s23 + $0x2e0] sm:$0xff] }
0x1359   :  { %9055 = vmatprep.subr.mxu1 %v11235_v57  ;;  %v11292_v57 = vld [vmem:[%s19943_s23 + $0x2b8] sm:$0xff] }
0x13ca   :  { %v8346_v62 = vpop.f32.mrf.mxu1  ;;  %v8450_v42 = vpop.f32.mrf.mxu0 }
0x13cb   :  { %v8459_v45 = vmax.f32 %v8346_v62, %v8450_v42  ;;  %v11234_v62 = vld [vmem:[%s19943_s23 + $0x120] sm:$0xff]  ;;  %v11236_v42 = vld [vmem:[%s19943_s23 + $0x130] sm:$0xff] }
0x13cc   :  { %v8348_v51 = vpop.f32.mrf.mxu1  ;;  %v8452_v25 = vpop.f32.mrf.mxu0  ;;  %9056 = vmatpush1.msra.mxu1 %v11234_v62  ;;  %v11294_v62 = vld [vmem:[%s19943_s23 + $0x2c8] sm:$0xff] }
0x13cd   :  { %v8908_v51 = vld [vmem:[%s19943_s23 + $0x110] sm:$0xff] }
0x13ce   :  { %9177 = vmatprep.subr.mxu1 %v8908_v51  ;;  %v11289_v51 = vld [vmem:[%s19943_s23 + $0x2a0] sm:$0xff] }
0x13cf   :  { %v8351_v30 = vpop.f32.mrf.mxu1  ;;  %v8455_v0 = vpop.f32.mrf.mxu0 }
0x13d0   :  { %v8460_v8 = vmax.f32 %v8351_v30, %v8455_v0  ;;  %v8907_v0 = vld [vmem:[%s19943_s23 + $0x108] sm:$0xff] }
0x13d1   :  { %v8353_v9 = vpop.f32.mrf.mxu1  ;;  %v8457_v31 = vpop.f32.mrf.mxu0 }
0x13d2   :  { %v8909_v9 = vld [vmem:[%s19943_s23 + $0x118] sm:$0xff] }
0x1403   :  { %v8556_v3 = vpop.f32.mrf.mxu1 }
0x1404   :  { %v8565_v1 = vmax.f32 %v8459_v45, %v8556_v3  ;;  %v8905_v3 = vld [vmem:[%s19943_s23 + $0xf8] sm:$0xff] }
0x1405   :  { %v8558_v2 = vpop.f32.mrf.mxu1 }
0x1406   :  { %v8904_v2 = vld [vmem:[%s19943_s23 + $0xf0] sm:$0xff] }
0x1407   :  { %v8561_v39 = vpop.f32.mrf.mxu1 }
0x1408   :  { %v8566_v43 = vmax.f32 %v8460_v8, %v8561_v39  ;;  %v8906_v8 = vld [vmem:[%s19943_s23 + $0x100] sm:$0xff] }
0x1409   :  { %v8563_v15 = vpop.f32.mrf.mxu1  ;;  %v8902_v39 = vld [vmem:[%s19943_s23 + $0xe0] sm:$0xff] }
0x140a   :  { %11370 = vmatpush3.msk.msra.mxu0 %vm3079_vm1, %v8566_v43  ;;  %v8903_v15 = vld [vmem:[%s19943_s23 + $0xe8] sm:$0xff] }
0x140b   :  { %11371 = vmatprep.subr.mxu0 %v20068_v10 }
0x140c   :  { %11372 = vmatpush3.msra.mxu0 %v8565_v1 }
0x140d   :  { %11374 = vmatmul.mubr.msk.f32.vlgmr.msra.gmra.mxu0 %vm6169_vm5, %v8567_v17  ;;  %11376 = vmatprep.subr.mxu0 %v20068_v10  ;;  %v8898_v17 = vld [vmem:[%s19943_s23 + $0xc0] sm:$0xff] }
0x140e   :  { %11377 = vmatpush3.msk.msra.mxu0 %vm3079_vm1, %v8566_v43  ;;  %11380 = vmatprep.mubr.msk.f32.mxu0 %vm11522_vm8, %v20068_v10 }
0x140f   :  { %11378 = vmatprep.subr.mxu0 %v20068_v10 }
0x1410   :  { %11379 = vmatpush3.msra.mxu0 %v8565_v1 }
0x1411   :  { %11381 = vmatmul.mubr.msk.f32.vlgmr.msra.gmra.mxu0 %vm6169_vm5, %v11223_v21  ;;  %11383 = vmatprep.subr.mxu0 %v20068_v10  ;;  %v8900_v21 = vld [vmem:[%s19943_s23 + $0xd0] sm:$0xff] }
0x1412   :  { %11384 = vmatpush3.msk.msra.mxu0 %vm3079_vm1, %v8566_v43  ;;  %11387 = vmatprep.mubr.msk.f32.mxu0 %vm11522_vm8, %v20068_v10  ;;  %v8901_v43 = vld [vmem:[%s19943_s23 + $0xd8] sm:$0xff] }
0x1413   :  { %11385 = vmatprep.subr.mxu0 %v20068_v10 }
0x1414   :  { %11386 = vmatpush3.msra.mxu0 %v8565_v1  ;;  %v8899_v1 = vld [vmem:[%s19943_s23 + $0xc8] sm:$0xff] }
0x1415   :  { %11388 = vmatmul.mubr.msk.f32.vlgmr.msra.gmra.mxu0 %vm6169_vm5, %v11226_v12  ;;  %11390 = vmatprep.subr.mxu0 %v20068_v10  ;;  %v8896_v12 = vld [vmem:[%s19943_s23 + $0xb0] sm:$0xff] }
0x1416   :  { %11392 = vmatprep.mubr.msk.f32.mxu0 %vm11522_vm8, %v20068_v10 }
0x14cd   :  { %v8640_v59 = vpop.f32.mrf.mxu0 }
0x14cf   :  { %v11375_v13 = vpop.f32.mrf.mxu0 }
0x14d0   :  { %v8874_v13 = vld [vmem:[%s19943_s23] sm:$0xff] }
0x14d1   :  { %v8715_v11 = vpop.f32.mrf.mxu0 }
0x14d2   :  { %v8719_v61 = vmax.f32 %v8640_v59, %v8715_v11  ;;  %v8875_v59 = vld [vmem:[%s19943_s23 + $0x8] sm:$0xff]  ;;  %v8876_v11 = vld [vmem:[%s19943_s23 + $0x10] sm:$0xff] }
0x14d3   :  { %v11382_v32 = vpop.f32.mrf.mxu0 }
0x14d4   :  { %v11311_v32 = vld [vmem:[%s19943_s23 + $0x350] sm:$0xff] }
0x14d5   :  { %v8791_v16 = vpop.f32.mrf.mxu0 }
0x14d6   :  { %v19573_v19 = vmax.f32 %v8719_v61, %v8791_v16  ;;  %v11312_v61 = vld [vmem:[%s19943_s23 + $0x358] sm:$0xff]  ;;  %v11274_v16 = vld [vmem:[%s19944_s22 + $0x4] sm:$0x3] }
0x14d7   :  { %v11389_v34 = vpop.f32.mrf.mxu0 }
0x14d8   :  { %11391 = vmatpush3.msk.msra.mxu0 %vm3079_vm1, %v19573_v19  ;;  %v11309_v34 = vld [vmem:[%s19943_s23 + $0x340] sm:$0xff] }
0x14d9   :  { %11393 = vmatmul.mubr.msk.f32.vlgmr.msra.gmra.mxu0 %vm8797_vm9, %v8796_v49  ;;  %11395 = vmatprep.subr.mxu0 %v20068_v10  ;;  %v11310_v49 = vld [vmem:[%s19943_s23 + $0x348] sm:$0xff] }
0x14da   :  { %11396 = vmatpush3.msk.msra.mxu0 %vm3079_vm1, %v19573_v19  ;;  %11397 = vmatprep.mubr.msk.f32.mxu0 %vm11522_vm8, %v20068_v10 }
0x14db   :  { %11400 = vmatprep.subr.mxu0 %v20068_v10 }
0x14dd   :  { %11398 = vmatmul.mubr.msk.f32.vlgmr.msra.gmra.mxu0 %vm8797_vm9, %v11231_v6  ;;  %v11308_v6 = vld [vmem:[%s19943_s23 + $0x338] sm:$0xff] }
0x14de   :  { %11401 = vmatpush3.msra.mxu0 %v11269_v44  ;;  %11424 = vmatprep.mubr.msk.f32.mxu0 %vm11522_vm8, %v20068_v10  ;;  %v11306_v44 = vld [vmem:[%s19943_s23 + $0x328] sm:$0xff] }
0x14df   :  { %11402 = vmatprep.subr.mxu0 %v20068_v10 }
0x14e0   :  { %11403 = vmatpush3.msra.mxu0 %v11266_v38  ;;  %v11305_v38 = vld [vmem:[%s19943_s23 + $0x320] sm:$0xff] }
0x14e1   :  { %11404 = vmatprep.subr.mxu0 %v20068_v10 }
0x14e2   :  { %11405 = vmatpush3.msra.mxu0 %v11263_v20  ;;  %v11304_v20 = vld [vmem:[%s19943_s23 + $0x318] sm:$0xff] }
0x14e3   :  { %11406 = vmatprep.subr.mxu0 %v20068_v10 }
0x14e4   :  { %11407 = vmatpush3.msra.mxu0 %v11260_v28  ;;  %v11303_v28 = vld [vmem:[%s19943_s23 + $0x310] sm:$0xff] }
0x14e5   :  { %11408 = vmatprep.subr.mxu0 %v20068_v10 }
0x14e6   :  { %11409 = vmatpush3.msra.mxu0 %v11257_v63  ;;  %v11302_v63 = vld [vmem:[%s19943_s23 + $0x308] sm:$0xff] }
0x14e7   :  { %11410 = vmatprep.subr.mxu0 %v20068_v10 }
0x14e8   :  { %11411 = vmatpush3.msra.mxu0 %v11254_v54  ;;  %v11301_v54 = vld [vmem:[%s19943_s23 + $0x300] sm:$0xff] }
0x14e9   :  { %11412 = vmatprep.subr.mxu0 %v20068_v10 }
0x14ea   :  { %11413 = vmatpush3.msra.mxu0 %v11251_v14  ;;  %v11300_v14 = vld [vmem:[%s19943_s23 + $0x2f8] sm:$0xff] }
0x14eb   :  { %11414 = vmatprep.subr.mxu0 %v20068_v10 }
0x14ec   :  { %11415 = vmatpush3.msra.mxu0 %v11248_v33  ;;  %v11299_v33 = vld [vmem:[%s19943_s23 + $0x2f0] sm:$0xff] }
0x14ed   :  { %11416 = vmatprep.subr.mxu0 %v20068_v10 }
0x14ee   :  { %11417 = vmatpush3.msra.mxu0 %v11245_v18  ;;  %v11298_v18 = vld [vmem:[%s19943_s23 + $0x2e8] sm:$0xff] }
0x14ef   :  { %11418 = vmatprep.subr.mxu0 %v20068_v10 }
0x14f0   :  { %11419 = vmatpush3.msra.mxu0 %v11242_v40  ;;  %v11296_v40 = vld [vmem:[%s19943_s23 + $0x2d8] sm:$0xff] }
0x14f1   :  { %11420 = vmatprep.subr.mxu0 %v20068_v10 }
0x14f2   :  { %11421 = vmatpush3.msra.mxu0 %v11239_v55  ;;  %v11293_v55 = vld [vmem:[%s19943_s23 + $0x2c0] sm:$0xff] }
0x14f3   :  { %11422 = vmatprep.subr.mxu0 %v20068_v10 }
0x14f4   :  { %11423 = vmatpush3.msra.mxu0 %v11236_v42  ;;  %v11290_v42 = vld [vmem:[%s19943_s23 + $0x2a8] sm:$0xff] }
0x14f5   :  { %11427 = vmatprep.subr.mxu0 %v20068_v10 }
0x1599   :  { %v19656_v25 = vpop.f32.mrf.mxu0 }
0x159b   :  { %v11394_v30 = vpop.f32.mrf.mxu0 }
0x159c   :  { %v11287_v30 = vld [vmem:[%s19943_s23 + $0x290] sm:$0xff] }
0x159d   :  { %v8981_v31 = vpop.f32.mrf.mxu0 }
0x159e   :  { %11270 = vmatmul.mubr.msk.f32.vlgmr.msra.gmra.mxu1 %vm7123_vm7, %v8981_v31  ;;  %11425 = vmatmul.mubr.msk.f32.vlgmr.msra.gmra.mxu0 %vm7123_vm7, %v8981_v31  ;;  %v11284_v31 = vld [vmem:[%s19943_s23 + $0x278] sm:$0xff] }
0x159f   :  { %9178 = vmatpush1.msra.mxu1 %v8907_v0  ;;  %11428 = vmatpush3.msra.mxu0 %v8909_v9  ;;  %v11399_v45 = vpop.f32.mrf.mxu0  ;;  %v11288_v0 = vld [vmem:[%s19943_s23 + $0x298] sm:$0xff]  ;;  %v11286_v9 = vld [vmem:[%s19943_s23 + $0x288] sm:$0xff] }
0x15a0   :  { %9179 = vmatprep.subr.mxu1 %v8905_v3  ;;  %11429 = vmatprep.subr.mxu0 %v20068_v10  ;;  %v11283_v3 = vld [vmem:[%s19943_s23 + $0x270] sm:$0xff]  ;;  %v11282_v45 = vld [vmem:[%s19943_s23 + $0x268] sm:$0xff] }
0x15a1   :  { %9180 = vmatpush1.msra.mxu1 %v8904_v2  ;;  %11430 = vmatpush3.msra.mxu0 %v8906_v8  ;;  %v11285_v2 = vld [vmem:[%s19943_s23 + $0x280] sm:$0xff] }
0x15a2   :  { %9181 = vmatprep.subr.mxu1 %v8902_v39  ;;  %11431 = vmatprep.subr.mxu0 %v20068_v10  ;;  %v11281_v8 = vld [vmem:[%s19943_s23 + $0x260] sm:$0xff]  ;;  %v11280_v39 = vld [vmem:[%s19943_s23 + $0x258] sm:$0xff] }
0x15a3   :  { %9182 = vmatpush1.msra.mxu1 %v8901_v43  ;;  %11432 = vmatpush3.msra.mxu0 %v8903_v15  ;;  %v11278_v43 = vld [vmem:[%s19943_s23 + $0x248] sm:$0xff]  ;;  %v11277_v15 = vld [vmem:[%s19943_s23 + $0x240] sm:$0xff] }
0x15a4   :  { %9183 = vmatprep.subr.mxu1 %v8899_v1  ;;  %11433 = vmatprep.subr.mxu0 %v20068_v10  ;;  %v11279_v1 = vld [vmem:[%s19943_s23 + $0x250] sm:$0xff] }
0x15a5   :  { %9184 = vmatpush1.msra.mxu1 %v8898_v17  ;;  %11434 = vmatpush3.msra.mxu0 %v8900_v21 }
0x15a6   :  { %9185 = vmatprep.subr.mxu1 %v8896_v12  ;;  %11435 = vmatprep.subr.mxu0 %v20068_v10 }
0x15a7   :  { %9186 = vmatpush1.msra.mxu1 %v8895_v56  ;;  %11436 = vmatpush3.msra.mxu0 %v8897_v23 }
0x15a8   :  { %9187 = vmatprep.subr.mxu1 %v8893_v27  ;;  %11437 = vmatprep.subr.mxu0 %v20068_v10 }
0x15a9   :  { %9188 = vmatpush1.msra.mxu1 %v8892_v24  ;;  %11438 = vmatpush3.msra.mxu0 %v8894_v52 }
0x15aa   :  { %9189 = vmatprep.subr.mxu1 %v8890_v50  ;;  %11439 = vmatprep.subr.mxu0 %v20068_v10 }
0x15ab   :  { %9190 = vmatpush1.msra.mxu1 %v8889_v60  ;;  %11440 = vmatpush3.msra.mxu0 %v8891_v58 }
0x15ac   :  { %9191 = vmatprep.subr.mxu1 %v8887_v22  ;;  %11441 = vmatprep.subr.mxu0 %v20068_v10 }
0x15ad   :  { %9192 = vmatpush1.msra.mxu1 %v8886_v35  ;;  %11442 = vmatpush3.msra.mxu0 %v8888_v29  ;;  %v11523_v35 = vmov 1983009808  }
0x15ae   :  { %9193 = vmatprep.subr.mxu1 %v8884_v7  ;;  %11443 = vmatprep.subr.mxu0 %v20068_v10  ;;  %v9574_v29 = vunpack.c.l.s4 %v11523_v35 }
0x15af   :  { %9194 = vmatpush1.msra.mxu1 %v8883_v36  ;;  %11444 = vmatpush3.msra.mxu0 %v8885_v26 }
0x15b0   :  { %9195 = vmatprep.subr.mxu1 %v8881_v47  ;;  %11445 = vmatprep.subr.mxu0 %v20068_v10  ;;  %v9575_v7 = vunpack.c.0.s8 %v9574_v29 }
0x15b1   :  { %9196 = vmatpush1.msra.mxu1 %v8880_v46  ;;  %11446 = vmatpush3.msra.mxu0 %v8882_v4 }
0x15b2   :  { %9197 = vmatprep.subr.mxu1 %v8878_v5  ;;  %11447 = vmatprep.subr.mxu0 %v20068_v10 }
0x15b3   :  { %9198 = vmatpush1.msra.mxu1 %v8877_v48  ;;  %11448 = vmatpush3.msra.mxu0 %v8879_v37  ;;  %v20071_v48 = vld [vmem:[#allocation10_spill] sm:$0xff] }
0x15b4   :  { %9199 = vmatprep.subr.mxu1 %v8875_v59  ;;  %11449 = vmatprep.subr.mxu0 %v20068_v10  ;;  %v9578_v37 = vsub.s32 %v9575_v7, %v20071_v48 }
0x15b5   :  { %9200 = vmatpush1.msra.mxu1 %v8874_v13  ;;  %9233 = vmatprep.mubr.f32.mxu1 %v20068_v10 }
0x15b6   :  { %11450 = vmatpush3.msra.mxu0 %v8876_v11  ;;  %11451 = vmatprep.mubr.msk.f32.mxu0 %vm11522_vm8, %v20068_v10 }
0x15b7   :  { %11272 = vmatmul.mubr.msk.f32.vlgmr.msra.gmra.mxu1 %vm7123_vm7, %v19656_v25  ;;  %11452 = vmatmul.mubr.msk.f32.vlgmr.msra.gmra.mxu0 %vm7123_vm7, %v19656_v25  ;;  %v11291_v25 = vld [vmem:[%s19943_s23 + $0x2b0] sm:$0xff] }
0x15b8   :  { %11454 = vmatprep.subr.mxu1 %v20068_v10  ;;  %11456 = vmatprep.mubr.msk.f32.mxu1 %vm11522_vm8, %v20068_v10 }
0x15b9   :  { %11455 = vmatpush3.msk.msra.mxu1 %vm3079_vm1, %v19573_v19  ;;  %11459 = vmatprep.subr.mxu0 %v20068_v10  ;;  %v11307_v19 = vld [vmem:[%s19943_s23 + $0x330] sm:$0xff] }
0x15ba   :  { %9433 = vmatprep.subr.mxu1 %v11311_v32  ;;  %11460 = vmatpush3.msra.mxu0 %v11312_v61 }
0x15bb   :  { %11457 = vmatmul.mubr.msk.f32.vlgmr.msra.gmra.mxu1 %vm8797_vm9, %v11274_v16  ;;  %11461 = vmatprep.subr.mxu0 %v20068_v10 }
0x15bc   :  { %9434 = vmatpush1.msra.mxu1 %v11310_v49  ;;  %11462 = vmatpush3.msra.mxu0 %v11309_v34 }
0x15bd   :  { %9435 = vmatprep.subr.mxu1 %v11308_v6  ;;  %11463 = vmatprep.subr.mxu0 %v20068_v10 }
0x15be   :  { %9436 = vmatpush1.msra.mxu1 %v11307_v19  ;;  %11464 = vmatpush3.msra.mxu0 %v11306_v44 }
0x15bf   :  { %9437 = vmatprep.subr.mxu1 %v11305_v38  ;;  %11465 = vmatprep.subr.mxu0 %v20068_v10 }
0x15c0   :  { %9438 = vmatpush1.msra.mxu1 %v11304_v20  ;;  %11466 = vmatpush3.msra.mxu0 %v11303_v28 }
0x15c1   :  { %9439 = vmatprep.subr.mxu1 %v11302_v63  ;;  %11467 = vmatprep.subr.mxu0 %v20068_v10 }
0x15c2   :  { %9440 = vmatpush1.msra.mxu1 %v11301_v54  ;;  %11468 = vmatpush3.msra.mxu0 %v11300_v14 }
0x15c3   :  { %9441 = vmatprep.subr.mxu1 %v11299_v33  ;;  %11469 = vmatprep.subr.mxu0 %v20068_v10 }
0x15c4   :  { %9442 = vmatpush1.msra.mxu1 %v11298_v18  ;;  %9489 = vmatprep.mubr.f32.mxu1 %v20068_v10 }
0x15c5   :  { %11483 = vmatprep.mubr.msk.f32.mxu0 %vm11522_vm8, %v20068_v10  ;;  %9443 = vmatprep.subr.mxu1 %v11296_v40 }
0x15c6   :  { %11470 = vmatpush3.msra.mxu0 %v11297_v53  ;;  %9444 = vmatpush1.msra.mxu1 %v11295_v41 }
0x15c7   :  { %11471 = vmatprep.subr.mxu0 %v20068_v10  ;;  %9445 = vmatprep.subr.mxu1 %v11293_v55 }
0x15c8   :  { %11472 = vmatpush3.msra.mxu0 %v11294_v62  ;;  %9446 = vmatpush1.msra.mxu1 %v11292_v57 }
0x15c9   :  { %11473 = vmatprep.subr.mxu0 %v20068_v10  ;;  %9447 = vmatprep.subr.mxu1 %v11290_v42 }
0x15ca   :  { %11474 = vmatpush3.msra.mxu0 %v11291_v25  ;;  %9448 = vmatpush1.msra.mxu1 %v11289_v51 }
0x15cb   :  { %11475 = vmatprep.subr.mxu0 %v20068_v10  ;;  %9449 = vmatprep.subr.mxu1 %v11287_v30 }
0x15cc   :  { %11476 = vmatpush3.msra.mxu0 %v11288_v0  ;;  %9450 = vmatpush1.msra.mxu1 %v11286_v9 }
0x15cd   :  { %11477 = vmatprep.subr.mxu0 %v20068_v10  ;;  %9451 = vmatprep.subr.mxu1 %v11284_v31 }
0x15ce   :  { %9452 = vmatpush1.msra.mxu1 %v11283_v3  ;;  %11478 = vmatpush3.msra.mxu0 %v11285_v2 }
0x15cf   :  { %9453 = vmatprep.subr.mxu1 %v11281_v8  ;;  %11479 = vmatprep.subr.mxu0 %v20068_v10 }
0x15d0   :  { %9454 = vmatpush1.msra.mxu1 %v11280_v39  ;;  %11480 = vmatpush3.msra.mxu0 %v11282_v45 }
0x15d1   :  { %9455 = vmatprep.subr.mxu1 %v11278_v43  ;;  %11481 = vmatprep.subr.mxu0 %v20068_v10 }
0x15d2   :  { %9456 = vmatpush1.msra.mxu1 %v11277_v15  ;;  %11482 = vmatpush3.msra.mxu0 %v11279_v1 }
0x165e   :  { %v9162_v17 = vpop.f32.mrf.mxu0  ;;  %v9091_v12 = vpop.f32.mrf.mxu1 }
0x1660   :  { %v11426_v21 = vpop.f32.mrf.mxu0  ;;  %v9093_v56 = vpop.f32.mrf.mxu1 }
0x1677   :  { %v9235_v23 = vpop.f32.mrf.mxu1  ;;  %v9306_v27 = vpop.f32.mrf.mxu0 }
0x1678   :  { %v9236_v24 = vadd.f32 %v9235_v23, %v9091_v12  ;;  %v9307_v52 = vadd.f32 %v9306_v27, %v9162_v17 }
0x1679   :  { %v9237_v50 = vpop.f32.mrf.mxu1  ;;  %v11453_v10 = vpop.f32.mrf.mxu0 }
0x167a   :  { %v9238_v60 = vadd.f32 %v9237_v50, %v9093_v56 }
0x167b   :  { %v9381_v58 = vpop.f32.mrf.mxu1 }
0x167c   :  { %11313 = vmatmul.mubr.msk.f32.vlgmr.msra.gmra.mxu1 %vm7123_vm7, %v9381_v58  ;;  %11484 = vmatmul.mubr.msk.f32.vlgmr.msra.gmra.mxu0 %vm7123_vm7, %v9381_v58 }
0x167d   :  { %v11458_v22 = vpop.f32.mrf.mxu1 }
0x173c   :  { %v9491_v36 = vpop.f32.mrf.mxu1  ;;  %v9562_v26 = vpop.f32.mrf.mxu0 }
0x173d   :  { %v9566_v4 = vadd.f32 %v9491_v36, %v9236_v24  ;;  %v9568_v5 = vadd.f32 %v9562_v26, %v9307_v52 }
0x173e   :  { %v9493_v47 = vpop.f32.mrf.mxu1  ;;  %v11485_v46 = vpop.f32.mrf.mxu0 }
0x173f   :  { %v9567_v59 = vadd.f32 %v9493_v47, %v9238_v60  ;;  %v9586_v11 = vrot.slane %v9568_v5, %v9578_v37 }
0x1741   :  { %v9572_v13 = vcombine.low %v9566_v4, %v9567_v59 }
0x1743   :  { %v9579_v32 = vrot.slane %v9572_v13, %v9578_v37 }
0x1745   :  { %v9587_v61 = vcombine.low %v9579_v32, %v9586_v11 }
0x1747   :  { %9594 = vst.msk [vmem:[%s19945_s24] sm:$0x3f] %vm9593_vm14, %v9587_v61 }

</bundles_post_ra>
